<compile_context>
chip_gen: v5e
topology: v5e:2x2
jax: 0.10.0
libtpu: 0.0.40
codegen_flags: <defaults>
</compile_context>

<pallas_src>
import functools

import jax
import jax.numpy as jnp
from jax.experimental import pallas as pl
from jax.experimental.pallas import tpu as pltpu


_ACT_DTYPE = jnp.bfloat16
_BN_EPS = 1e-5
_FC_PAD = 128                      # pad the tiny FC output to a full lane tile
_VMEM_LIMIT = 32 * 1024 * 1024


# ---------------------------------------------------------------------------
# Pallas kernels
# ---------------------------------------------------------------------------

def _conv_bn_kernel(x_ref, w_ref, s_ref, b_ref, *rest, relu, has_res):
    """One batch element x one Cout tile: Conv1d + BN (+ residual) (+ ReLU).

    x_ref : (Lh, stride*Cin)    zero-padded, phase-reshaped input (bf16)
    w_ref : (KP, stride*Cin, T) phase-packed conv weights (bf16)
    s_ref, b_ref : (1, T)       folded BatchNorm scale / bias (f32)
    rest  : [res_ref (Lout, T)], o_ref (Lout, T)
    """
    if has_res:
        r_ref, o_ref = rest
    else:
        (o_ref,) = rest

    lout, tcout = o_ref.shape
    kp = w_ref.shape[0]

    acc = jnp.zeros((lout, tcout), jnp.float32)
    for o in range(kp):                      # KP <= 4, unrolled at trace time
        xt = x_ref[pl.ds(o, lout), :]        # contiguous row-offset slice
        acc = acc + jnp.dot(xt, w_ref[o], preferred_element_type=jnp.float32)

    y = acc * s_ref[...] + b_ref[...]
    if has_res:
        y = y + r_ref[...].astype(jnp.float32)
    if relu:
        y = jnp.maximum(y, 0.0)
    o_ref[...] = y.astype(o_ref.dtype)


def _maxpool3_kernel(x0_ref, x1_ref, o_ref):
    # MaxPool1d(k=3, s=2, p=1): out[j] = max(pad[2j], pad[2j+1], pad[2j+2])
    lout = o_ref.shape[0]
    t0 = x0_ref[pl.ds(0, lout), :]
    t1 = x1_ref[pl.ds(0, lout), :]
    t2 = x0_ref[pl.ds(1, lout), :]
    o_ref[...] = jnp.maximum(jnp.maximum(t0, t1), t2)


def _pool_fc_kernel(x_ref, w_ref, b_ref, logits_ref, h_ref, *, inv_l):
    # AdaptiveAvgPool1d(1) + flatten + Linear (logits padded to 128 lanes).
    h = jnp.sum(x_ref[...].astype(jnp.float32), axis=1) * inv_l      # (N, 512)
    h_ref[...] = h
    logits_ref[...] = (
        jnp.dot(h, w_ref[...], preferred_element_type=jnp.float32) + b_ref[...]
    )


# ---------------------------------------------------------------------------
# JAX wrappers
# ---------------------------------------------------------------------------

def _pad_phase_reshape(x, k, stride, padding):
    """Zero-pad the length axis and fold the stride phase into channels.

    Returns xph (N, Lh, stride*Cin), Lout, Lh with
    xph[n, r, p*Cin + c] == padded_x[n, r*stride + p, c].
    """
    n, l, c = x.shape
    lout = (l + 2 * padding - k) // stride + 1
    lh = lout + (k - 1) // stride
    lpad = lh * stride
    rpad = lpad - l - padding
    assert lout >= 1 and rpad >= 0, (l, k, stride, padding)
    xp = jnp.pad(x, ((0, 0), (padding, rpad), (0, 0)))
    return xp.reshape(n, lh, stride * c), lout, lh


def conv_bn(x, w, scale, bias, *, k, stride, padding, relu, residual=None):
    """Conv1d (no bias) + folded BatchNorm (+ residual add) (+ ReLU).

    x: (N, L, Cin) bf16 channels-last; w: phase-packed (KP, stride*Cin, Cout) bf16.
    """
    n, l, cin = x.shape
    cout = w.shape[-1]
    xph, lout, lh = _pad_phase_reshape(x, k, stride, padding)

    tcout = min(cout, 128)
    grid = (n, cout // tcout)

    in_specs = [
        pl.BlockSpec((None, lh, stride * cin), lambda i, j: (i, 0, 0)),
        pl.BlockSpec((w.shape[0], stride * cin, tcout), lambda i, j: (0, 0, j)),
        pl.BlockSpec((1, tcout), lambda i, j: (0, j)),
        pl.BlockSpec((1, tcout), lambda i, j: (0, j)),
    ]
    args = [xph, w, scale, bias]
    if residual is not None:
        in_specs.append(pl.BlockSpec((None, lout, tcout), lambda i, j: (i, 0, j)))
        args.append(residual)

    kernel = functools.partial(_conv_bn_kernel, relu=relu,
                               has_res=residual is not None)

    return pl.pallas_call(
        kernel,
        out_shape=jax.ShapeDtypeStruct((n, lout, cout), _ACT_DTYPE),
        grid=grid,
        in_specs=in_specs,
        out_specs=pl.BlockSpec((None, lout, tcout), lambda i, j: (i, 0, j)),
        compiler_params=pltpu.CompilerParams(
            dimension_semantics=("parallel", "parallel"),
            vmem_limit_bytes=_VMEM_LIMIT),
    )(*args)


def maxpool3_s2(x):
    """MaxPool1d(kernel_size=3, stride=2, padding=1) on (N, L, C)."""
    n, l, c = x.shape
    lout = (l + 2 - 3) // 2 + 1
    lh = lout + 1
    rpad = 2 * lh - (l + 1)
    assert rpad >= 0
    xp = jnp.pad(x, ((0, 0), (1, rpad), (0, 0)), constant_values=-jnp.inf)
    x0 = xp[:, 0::2, :]        # even padded positions, (n, lh, c)
    x1 = xp[:, 1::2, :]        # odd padded positions,  (n, lh, c)
    return pl.pallas_call(
        _maxpool3_kernel,
        out_shape=jax.ShapeDtypeStruct((n, lout, c), x.dtype),
        grid=(n,),
        in_specs=[pl.BlockSpec((None, lh, c), lambda i: (i, 0, 0)),
                  pl.BlockSpec((None, lh, c), lambda i: (i, 0, 0))],
        out_specs=pl.BlockSpec((None, lout, c), lambda i: (i, 0, 0)),
        compiler_params=pltpu.CompilerParams(
            dimension_semantics=("parallel",),
            vmem_limit_bytes=_VMEM_LIMIT),
    )(x0, x1)


def pool_and_fc(x, fc_w, fc_b):
    """AdaptiveAvgPool1d(1) + flatten + Linear, fused.  x: (N, L, 512) bf16."""
    n, l, c = x.shape
    vmem = pl.BlockSpec(memory_space=pltpu.MemorySpace.VMEM)
    logits_pad, h = pl.pallas_call(
        functools.partial(_pool_fc_kernel, inv_l=1.0 / l),
        out_shape=(jax.ShapeDtypeStruct((n, fc_w.shape[-1]), jnp.float32),
                   jax.ShapeDtypeStruct((n, c), jnp.float32)),
        in_specs=[vmem, vmem, vmem],
        out_specs=(vmem, vmem),
        compiler_params=pltpu.CompilerParams(vmem_limit_bytes=_VMEM_LIMIT),
    )(x, fc_w, fc_b)
    return logits_pad, h


# ---------------------------------------------------------------------------
# Parameter construction (deterministic synthetic weights, pre-packed at init)
# ---------------------------------------------------------------------------

def _pack_conv(w_ock, stride):
    """PyTorch (Cout, Cin, K) -> phase-packed (KP, stride*Cin, Cout) bf16."""
    cout, cin, k = w_ock.shape
    kp = (k - 1) // stride + 1
    wp = jnp.zeros((kp, stride * cin, cout), jnp.float32)
    for t in range(k):
        off, ph = divmod(t, stride)
        wp = wp.at[off, ph * cin:(ph + 1) * cin, :].set(w_ock[:, :, t].T)
    return wp.astype(_ACT_DTYPE)


def _conv_weight(key, cout, cin, k, stride):
    fan_in = cin * k
    std = (2.0 / fan_in) ** 0.5
    w = jax.random.normal(key, (cout, cin, k), jnp.float32) * std
    return _pack_conv(w, stride)


def _bn_params(key, c):
    k1, k2, k3, k4 = jax.random.split(key, 4)
    gamma = 1.0 + 0.1 * jax.random.normal(k1, (c,), jnp.float32)
    beta = 0.1 * jax.random.normal(k2, (c,), jnp.float32)
    mean = 0.1 * jax.random.normal(k3, (c,), jnp.float32)
    var = jnp.abs(1.0 + 0.1 * jax.random.normal(k4, (c,), jnp.float32))
    scale = gamma / jnp.sqrt(var + _BN_EPS)
    bias = beta - mean * scale
    return scale.reshape(1, c), bias.reshape(1, c)


def _block_configs():
    cfgs = []
    inplanes = 64
    for planes, nblocks, stride in [(64, 3, 1), (128, 4, 2), (256, 6, 2), (512, 3, 2)]:
        for i in range(nblocks):
            s = stride if i == 0 else 1
            downsample = (s != 1) or (inplanes != planes)
            cfgs.append((inplanes, planes, s, downsample))
            inplanes = planes
    return tuple(cfgs)


_BLOCK_CONFIGS = _block_configs()   # static python config (kept out of the pytree)


def init_params(key, num_classes, in_c=12):
    assert num_classes <= _FC_PAD
    keys = iter(jax.random.split(key, 256))
    params = {}
    params["stem_w"] = _conv_weight(next(keys), 64, in_c, 7, stride=2)
    params["stem_s"], params["stem_b"] = _bn_params(next(keys), 64)

    blocks = []
    for (inpl, planes, stride, down) in _BLOCK_CONFIGS:
        blk = {}
        blk["w1"] = _conv_weight(next(keys), planes, inpl, 3, stride=stride)
        blk["s1"], blk["b1"] = _bn_params(next(keys), planes)
        blk["w2"] = _conv_weight(next(keys), planes, planes, 3, stride=1)
        blk["s2"], blk["b2"] = _bn_params(next(keys), planes)
        if down:
            blk["dw"] = _conv_weight(next(keys), planes, inpl, 1, stride=stride)
            blk["ds"], blk["db"] = _bn_params(next(keys), planes)
        blocks.append(blk)
    params["blocks"] = blocks

    fc_w = (jax.random.normal(next(keys), (num_classes, 512), jnp.float32)
            * (1.0 / 512.0) ** 0.5)
    fc_b = 0.01 * jax.random.normal(next(keys), (num_classes,), jnp.float32)
    params["fc_w"] = jnp.zeros((512, _FC_PAD), jnp.float32).at[:, :num_classes].set(fc_w.T)
    params["fc_b"] = jnp.zeros((1, _FC_PAD), jnp.float32).at[0, :num_classes].set(fc_b)
    return params


# ---------------------------------------------------------------------------
# Forward pass (matches ResNet1D34.forward: returns (logits, pooled features))
# ---------------------------------------------------------------------------

def forward(params, x_ncl, *, num_classes):
    # PyTorch input is (N, C, L); convert once to channels-last bf16.
    x = jnp.transpose(x_ncl, (0, 2, 1)).astype(_ACT_DTYPE)

    # stem: conv7/s2 + bn + relu, then maxpool3/s2
    x = conv_bn(x, params["stem_w"], params["stem_s"], params["stem_b"],
                k=7, stride=2, padding=3, relu=True)
    x = maxpool3_s2(x)

    # residual stages (3, 4, 6, 3 BasicBlock1D)
    for (inpl, planes, stride, down), blk in zip(_BLOCK_CONFIGS, params["blocks"]):
        identity = x
        out = conv_bn(x, blk["w1"], blk["s1"], blk["b1"],
                      k=3, stride=stride, padding=1, relu=True)
        if down:
            identity = conv_bn(x, blk["dw"], blk["ds"], blk["db"],
                               k=1, stride=stride, padding=0, relu=False)
        # conv2 + bn2 + residual add + relu fused into one kernel
        x = conv_bn(out, blk["w2"], blk["s2"], blk["b2"],
                    k=3, stride=1, padding=1, relu=False, residual=identity)

    # AdaptiveAvgPool1d(1) + flatten + fc (fused, 128-lane-padded logits)
    logits_pad, h = pool_and_fc(x, params["fc_w"], params["fc_b"])
    return logits_pad[:, :num_classes], h


# ---------------------------------------------------------------------------
# Main
# ---------------------------------------------------------------------------

if __name__ == "__main__":
    NUM_CLASSES = 5
    IN_C = 12
    BATCH = 2
    LENGTH = 64   # small sequence length; shrinks to 2 before the avg pool

    key = jax.random.PRNGKey(0)
    kx, kp = jax.random.split(key)
    x = jax.random.normal(kx, (BATCH, IN_C, LENGTH), jnp.float32)   # NCL, as PyTorch
    params = init_params(kp, num_classes=NUM_CLASSES, in_c=IN_C)

    fwd = jax.jit(functools.partial(forward, num_classes=NUM_CLASSES))
    logits, h = fwd(params, x)
    jax.block_until_ready((logits, h))

    assert logits.shape == (BATCH, NUM_CLASSES), logits.shape
    assert h.shape == (BATCH, 512), h.shape
    assert bool(jnp.all(jnp.isfinite(logits))) and bool(jnp.all(jnp.isfinite(h)))
    print("KERNEL_OK")
</pallas_src>

<mosaic_0001>
module attributes {stable_mosaic.version = 11 : i64} {
  func.func @_maxpool3_kernel(%arg0: i32, %arg1: memref<1x17x64xbf16, #tpu.memory_space<vmem>>, %arg2: memref<1x17x64xbf16, #tpu.memory_space<vmem>>, %arg3: memref<1x16x64xbf16, #tpu.memory_space<vmem>>) attributes {dimension_semantics = [#tpu.dimension_semantics<parallel>], iteration_bounds = array<i64: 2>, scalar_prefetch = 0 : i64, scratch_operands = 0 : i64, tpu.core_type = #tpu.core_type<tc>, window_params = [{transform_indices = @transform_0, window_bounds = array<i64: 1, 17, 64>}, {transform_indices = @transform_1, window_bounds = array<i64: 1, 17, 64>}, {transform_indices = @transform_2, window_bounds = array<i64: 1, 16, 64>}]} {
    %c0 = arith.constant 0 : index
    %c0_0 = arith.constant 0 : index
    %c0_1 = arith.constant 0 : index
    %0 = vector.load %arg1[%c0, %c0_0, %c0_1] : memref<1x17x64xbf16, #tpu.memory_space<vmem>>, vector<1x16x64xbf16>
    %1 = vector.shape_cast %0 : vector<1x16x64xbf16> to vector<16x64xbf16>
    %c0_2 = arith.constant 0 : index
    %c0_3 = arith.constant 0 : index
    %c0_4 = arith.constant 0 : index
    %2 = vector.load %arg2[%c0_2, %c0_3, %c0_4] : memref<1x17x64xbf16, #tpu.memory_space<vmem>>, vector<1x16x64xbf16>
    %3 = vector.shape_cast %2 : vector<1x16x64xbf16> to vector<16x64xbf16>
    %c0_5 = arith.constant 0 : index
    %c1 = arith.constant 1 : index
    %c0_6 = arith.constant 0 : index
    %4 = vector.load %arg1[%c0_5, %c1, %c0_6] : memref<1x17x64xbf16, #tpu.memory_space<vmem>>, vector<1x16x64xbf16>
    %5 = vector.shape_cast %4 : vector<1x16x64xbf16> to vector<16x64xbf16>
    %6 = arith.maximumf %1, %3 : vector<16x64xbf16>
    %7 = arith.maximumf %6, %5 : vector<16x64xbf16>
    %c0_7 = arith.constant 0 : index
    %c0_8 = arith.constant 0 : index
    %c0_9 = arith.constant 0 : index
    %8 = vector.load %arg3[%c0_7, %c0_8, %c0_9] : memref<1x16x64xbf16, #tpu.memory_space<vmem>>, vector<1x16x64xbf16>
    %9 = vector.shape_cast %8 : vector<1x16x64xbf16> to vector<16x64xbf16>
    %10 = vector.shape_cast %7 : vector<16x64xbf16> to vector<1x16x64xbf16>
    tpu.vector_store %arg3[%c0_7, %c0_8, %c0_9], %10 {strides = array<i32>} : memref<1x16x64xbf16, #tpu.memory_space<vmem>>, vector<1x16x64xbf16>,
    return
  }
  func.func @transform_0(%arg0: i32) -> (i32, i32, i32) {
    %c0_i32 = arith.constant 0 : i32
    %c0_i32_0 = arith.constant 0 : i32
    %c0_i32_1 = arith.constant 0 : i32
    return %arg0, %c0_i32, %c0_i32_0 : i32, i32, i32
  }
  func.func @transform_1(%arg0: i32) -> (i32, i32, i32) {
    %c0_i32 = arith.constant 0 : i32
    %c0_i32_0 = arith.constant 0 : i32
    %c0_i32_1 = arith.constant 0 : i32
    return %arg0, %c0_i32, %c0_i32_0 : i32, i32, i32
  }
  func.func @transform_2(%arg0: i32) -> (i32, i32, i32) {
    %c0_i32 = arith.constant 0 : i32
    %c0_i32_0 = arith.constant 0 : i32
    %c0_i32_1 = arith.constant 0 : i32
    return %arg0, %c0_i32, %c0_i32_0 : i32, i32, i32
  }
}

module attributes {stable_mosaic.version = 11 : i64} {
  func.func @_conv_bn_kernel(%arg0: i32, %arg1: i32, %arg2: memref<1x18x64xbf16, #tpu.memory_space<vmem>>, %arg3: memref<3x64x64xbf16, #tpu.memory_space<vmem>>, %arg4: memref<1x64xf32, #tpu.memory_space<vmem>>, %arg5: memref<1x64xf32, #tpu.memory_space<vmem>>, %arg6: memref<1x16x64xbf16, #tpu.memory_space<vmem>>, %arg7: memref<1x16x64xbf16, #tpu.memory_space<vmem>>) attributes {dimension_semantics = [#tpu.dimension_semantics<parallel>, #tpu.dimension_semantics<parallel>], iteration_bounds = array<i64: 2, 1>, scalar_prefetch = 0 : i64, scratch_operands = 0 : i64, tpu.core_type = #tpu.core_type<tc>, window_params = [{transform_indices = @transform_0, window_bounds = array<i64: 1, 18, 64>}, {transform_indices = @transform_1, window_bounds = array<i64: 3, 64, 64>}, {transform_indices = @transform_2, window_bounds = array<i64: 1, 64>}, {transform_indices = @transform_3, window_bounds = array<i64: 1, 64>}, {transform_indices = @transform_4, window_bounds = array<i64: 1, 16, 64>}, {transform_indices = @transform_5, window_bounds = array<i64: 1, 16, 64>}]} {
    %cst = arith.constant 0.000000e+00 : f32
    %0 = vector.broadcast %cst : f32 to vector<16x64xf32>
    %c0 = arith.constant 0 : index
    %c0_0 = arith.constant 0 : index
    %c0_1 = arith.constant 0 : index
    %1 = vector.load %arg2[%c0, %c0_0, %c0_1] : memref<1x18x64xbf16, #tpu.memory_space<vmem>>, vector<1x16x64xbf16>
    %2 = vector.shape_cast %1 : vector<1x16x64xbf16> to vector<16x64xbf16>
    %c0_2 = arith.constant 0 : index
    %c0_3 = arith.constant 0 : index
    %c0_4 = arith.constant 0 : index
    %3 = vector.load %arg3[%c0_2, %c0_3, %c0_4] : memref<3x64x64xbf16, #tpu.memory_space<vmem>>, vector<1x64x64xbf16>
    %4 = vector.shape_cast %3 : vector<1x64x64xbf16> to vector<64x64xbf16>
    %cst_5 = arith.constant dense<0.000000e+00> : vector<16x64xf32>
    %5 = tpu.matmul %2, %4, %cst_5 {dimension_numbers = #tpu.dot_dimension_numbers<[1], [0], [0], [1], [0, 0, 1, 1], [], []>} : vector<16x64xbf16>, vector<64x64xbf16>, vector<16x64xf32> -> vector<16x64xf32>
    %6 = arith.addf %0, %5 : vector<16x64xf32>
    %c0_6 = arith.constant 0 : index
    %c1 = arith.constant 1 : index
    %c0_7 = arith.constant 0 : index
    %7 = vector.load %arg2[%c0_6, %c1, %c0_7] : memref<1x18x64xbf16, #tpu.memory_space<vmem>>, vector<1x16x64xbf16>
    %8 = vector.shape_cast %7 : vector<1x16x64xbf16> to vector<16x64xbf16>
    %c1_8 = arith.constant 1 : index
    %c0_9 = arith.constant 0 : index
    %c0_10 = arith.constant 0 : index
    %9 = vector.load %arg3[%c1_8, %c0_9, %c0_10] : memref<3x64x64xbf16, #tpu.memory_space<vmem>>, vector<1x64x64xbf16>
    %10 = vector.shape_cast %9 : vector<1x64x64xbf16> to vector<64x64xbf16>
    %cst_11 = arith.constant dense<0.000000e+00> : vector<16x64xf32>
    %11 = tpu.matmul %8, %10, %cst_11 {dimension_numbers = #tpu.dot_dimension_numbers<[1], [0], [0], [1], [0, 0, 1, 1], [], []>} : vector<16x64xbf16>, vector<64x64xbf16>, vector<16x64xf32> -> vector<16x64xf32>
    %12 = arith.addf %6, %11 : vector<16x64xf32>
    %c0_12 = arith.constant 0 : index
    %c2 = arith.constant 2 : index
    %c0_13 = arith.constant 0 : index
    %13 = vector.load %arg2[%c0_12, %c2, %c0_13] : memref<1x18x64xbf16, #tpu.memory_space<vmem>>, vector<1x16x64xbf16>
    %14 = vector.shape_cast %13 : vector<1x16x64xbf16> to vector<16x64xbf16>
    %c2_14 = arith.constant 2 : index
    %c0_15 = arith.constant 0 : index
    %c0_16 = arith.constant 0 : index
    %15 = vector.load %arg3[%c2_14, %c0_15, %c0_16] : memref<3x64x64xbf16, #tpu.memory_space<vmem>>, vector<1x64x64xbf16>
    %16 = vector.shape_cast %15 : vector<1x64x64xbf16> to vector<64x64xbf16>
    %cst_17 = arith.constant dense<0.000000e+00> : vector<16x64xf32>
    %17 = tpu.matmul %14, %16, %cst_17 {dimension_numbers = #tpu.dot_dimension_numbers<[1], [0], [0], [1], [0, 0, 1, 1], [], []>} : vector<16x64xbf16>, vector<64x64xbf16>, vector<16x64xf32> -> vector<16x64xf32>
    %18 = arith.addf %12, %17 : vector<16x64xf32>
    %c0_18 = arith.constant 0 : index
    %c0_19 = arith.constant 0 : index
    %19 = vector.load %arg4[%c0_18, %c0_19] : memref<1x64xf32, #tpu.memory_space<vmem>>, vector<1x64xf32>
    %20 = vector.broadcast %19 : vector<1x64xf32> to vector<16x64xf32>
    %21 = arith.mulf %18, %20 : vector<16x64xf32>
    %c0_20 = arith.constant 0 : index
    %c0_21 = arith.constant 0 : index
    %22 = vector.load %arg5[%c0_20, %c0_21] : memref<1x64xf32, #tpu.memory_space<vmem>>, vector<1x64xf32>
    %23 = vector.broadcast %22 : vector<1x64xf32> to vector<16x64xf32>
    %24 = arith.addf %21, %23 : vector<16x64xf32>
    %c0_22 = arith.constant 0 : index
    %c0_23 = arith.constant 0 : index
    %c0_24 = arith.constant 0 : index
    %25 = vector.load %arg6[%c0_22, %c0_23, %c0_24] : memref<1x16x64xbf16, #tpu.memory_space<vmem>>, vector<1x16x64xbf16>
    %26 = vector.shape_cast %25 : vector<1x16x64xbf16> to vector<16x64xbf16>
    %27 = arith.extf %26 : vector<16x64xbf16> to vector<16x64xf32>
    %28 = arith.addf %24, %27 : vector<16x64xf32>
    %29 = arith.truncf %28 : vector<16x64xf32> to vector<16x64xbf16>
    %c0_25 = arith.constant 0 : index
    %c0_26 = arith.constant 0 : index
    %c0_27 = arith.constant 0 : index
    %30 = vector.load %arg7[%c0_25, %c0_26, %c0_27] : memref<1x16x64xbf16, #tpu.memory_space<vmem>>, vector<1x16x64xbf16>
    %31 = vector.shape_cast %30 : vector<1x16x64xbf16> to vector<16x64xbf16>
    %32 = vector.shape_cast %29 : vector<16x64xbf16> to vector<1x16x64xbf16>
    tpu.vector_store %arg7[%c0_25, %c0_26, %c0_27], %32 {strides = array<i32>} : memref<1x16x64xbf16, #tpu.memory_space<vmem>>, vector<1x16x64xbf16>,
    return
  }
  func.func @transform_0(%arg0: i32, %arg1: i32) -> (i32, i32, i32) {
    %c0_i32 = arith.constant 0 : i32
    %c0_i32_0 = arith.constant 0 : i32
    %c0_i32_1 = arith.constant 0 : i32
    return %arg0, %c0_i32, %c0_i32_0 : i32, i32, i32
  }
  func.func @transform_1(%arg0: i32, %arg1: i32) -> (i32, i32, i32) {
    %c0_i32 = arith.constant 0 : i32
    %c0_i32_0 = arith.constant 0 : i32
    %c0_i32_1 = arith.constant 0 : i32
    return %c0_i32, %c0_i32_0, %arg1 : i32, i32, i32
  }
  func.func @transform_2(%arg0: i32, %arg1: i32) -> (i32, i32) {
    %c0_i32 = arith.constant 0 : i32
    %c0_i32_0 = arith.constant 0 : i32
    return %c0_i32, %arg1 : i32, i32
  }
  func.func @transform_3(%arg0: i32, %arg1: i32) -> (i32, i32) {
    %c0_i32 = arith.constant 0 : i32
    %c0_i32_0 = arith.constant 0 : i32
    return %c0_i32, %arg1 : i32, i32
  }
  func.func @transform_4(%arg0: i32, %arg1: i32) -> (i32, i32, i32) {
    %c0_i32 = arith.constant 0 : i32
    %c0_i32_0 = arith.constant 0 : i32
    return %arg0, %c0_i32, %arg1 : i32, i32, i32
  }
  func.func @transform_5(%arg0: i32, %arg1: i32) -> (i32, i32, i32) {
    %c0_i32 = arith.constant 0 : i32
    %c0_i32_0 = arith.constant 0 : i32
    return %arg0, %c0_i32, %arg1 : i32, i32, i32
  }
}

module attributes {stable_mosaic.version = 11 : i64} {
  func.func @_conv_bn_kernel(%arg0: i32, %arg1: i32, %arg2: memref<1x35x24xbf16, #tpu.memory_space<vmem>>, %arg3: memref<4x24x64xbf16, #tpu.memory_space<vmem>>, %arg4: memref<1x64xf32, #tpu.memory_space<vmem>>, %arg5: memref<1x64xf32, #tpu.memory_space<vmem>>, %arg6: memref<1x32x64xbf16, #tpu.memory_space<vmem>>) attributes {dimension_semantics = [#tpu.dimension_semantics<parallel>, #tpu.dimension_semantics<parallel>], iteration_bounds = array<i64: 2, 1>, scalar_prefetch = 0 : i64, scratch_operands = 0 : i64, tpu.core_type = #tpu.core_type<tc>, window_params = [{transform_indices = @transform_0, window_bounds = array<i64: 1, 35, 24>}, {transform_indices = @transform_1, window_bounds = array<i64: 4, 24, 64>}, {transform_indices = @transform_2, window_bounds = array<i64: 1, 64>}, {transform_indices = @transform_3, window_bounds = array<i64: 1, 64>}, {transform_indices = @transform_4, window_bounds = array<i64: 1, 32, 64>}]} {
    %cst = arith.constant 0.000000e+00 : f32
    %0 = vector.broadcast %cst : f32 to vector<32x64xf32>
    %c0 = arith.constant 0 : index
    %c0_0 = arith.constant 0 : index
    %c0_1 = arith.constant 0 : index
    %1 = vector.load %arg2[%c0, %c0_0, %c0_1] : memref<1x35x24xbf16, #tpu.memory_space<vmem>>, vector<1x32x24xbf16>
    %2 = vector.shape_cast %1 : vector<1x32x24xbf16> to vector<32x24xbf16>
    %c0_2 = arith.constant 0 : index
    %c0_3 = arith.constant 0 : index
    %c0_4 = arith.constant 0 : index
    %3 = vector.load %arg3[%c0_2, %c0_3, %c0_4] : memref<4x24x64xbf16, #tpu.memory_space<vmem>>, vector<1x24x64xbf16>
    %4 = vector.shape_cast %3 : vector<1x24x64xbf16> to vector<24x64xbf16>
    %cst_5 = arith.constant dense<0.000000e+00> : vector<32x64xf32>
    %5 = tpu.matmul %2, %4, %cst_5 {dimension_numbers = #tpu.dot_dimension_numbers<[1], [0], [0], [1], [0, 0, 1, 1], [], []>} : vector<32x24xbf16>, vector<24x64xbf16>, vector<32x64xf32> -> vector<32x64xf32>
    %6 = arith.addf %0, %5 : vector<32x64xf32>
    %c0_6 = arith.constant 0 : index
    %c1 = arith.constant 1 : index
    %c0_7 = arith.constant 0 : index
    %7 = vector.load %arg2[%c0_6, %c1, %c0_7] : memref<1x35x24xbf16, #tpu.memory_space<vmem>>, vector<1x32x24xbf16>
    %8 = vector.shape_cast %7 : vector<1x32x24xbf16> to vector<32x24xbf16>
    %c1_8 = arith.constant 1 : index
    %c0_9 = arith.constant 0 : index
    %c0_10 = arith.constant 0 : index
    %9 = vector.load %arg3[%c1_8, %c0_9, %c0_10] : memref<4x24x64xbf16, #tpu.memory_space<vmem>>, vector<1x24x64xbf16>
    %10 = vector.shape_cast %9 : vector<1x24x64xbf16> to vector<24x64xbf16>
    %cst_11 = arith.constant dense<0.000000e+00> : vector<32x64xf32>
    %11 = tpu.matmul %8, %10, %cst_11 {dimension_numbers = #tpu.dot_dimension_numbers<[1], [0], [0], [1], [0, 0, 1, 1], [], []>} : vector<32x24xbf16>, vector<24x64xbf16>, vector<32x64xf32> -> vector<32x64xf32>
    %12 = arith.addf %6, %11 : vector<32x64xf32>
    %c0_12 = arith.constant 0 : index
    %c2 = arith.constant 2 : index
    %c0_13 = arith.constant 0 : index
    %13 = vector.load %arg2[%c0_12, %c2, %c0_13] : memref<1x35x24xbf16, #tpu.memory_space<vmem>>, vector<1x32x24xbf16>
    %14 = vector.shape_cast %13 : vector<1x32x24xbf16> to vector<32x24xbf16>
    %c2_14 = arith.constant 2 : index
    %c0_15 = arith.constant 0 : index
    %c0_16 = arith.constant 0 : index
    %15 = vector.load %arg3[%c2_14, %c0_15, %c0_16] : memref<4x24x64xbf16, #tpu.memory_space<vmem>>, vector<1x24x64xbf16>
    %16 = vector.shape_cast %15 : vector<1x24x64xbf16> to vector<24x64xbf16>
    %cst_17 = arith.constant dense<0.000000e+00> : vector<32x64xf32>
    %17 = tpu.matmul %14, %16, %cst_17 {dimension_numbers = #tpu.dot_dimension_numbers<[1], [0], [0], [1], [0, 0, 1, 1], [], []>} : vector<32x24xbf16>, vector<24x64xbf16>, vector<32x64xf32> -> vector<32x64xf32>
    %18 = arith.addf %12, %17 : vector<32x64xf32>
    %c0_18 = arith.constant 0 : index
    %c3 = arith.constant 3 : index
    %c0_19 = arith.constant 0 : index
    %19 = vector.load %arg2[%c0_18, %c3, %c0_19] : memref<1x35x24xbf16, #tpu.memory_space<vmem>>, vector<1x32x24xbf16>
    %20 = vector.shape_cast %19 : vector<1x32x24xbf16> to vector<32x24xbf16>
    %c3_20 = arith.constant 3 : index
    %c0_21 = arith.constant 0 : index
    %c0_22 = arith.constant 0 : index
    %21 = vector.load %arg3[%c3_20, %c0_21, %c0_22] : memref<4x24x64xbf16, #tpu.memory_space<vmem>>, vector<1x24x64xbf16>
    %22 = vector.shape_cast %21 : vector<1x24x64xbf16> to vector<24x64xbf16>
    %cst_23 = arith.constant dense<0.000000e+00> : vector<32x64xf32>
    %23 = tpu.matmul %20, %22, %cst_23 {dimension_numbers = #tpu.dot_dimension_numbers<[1], [0], [0], [1], [0, 0, 1, 1], [], []>} : vector<32x24xbf16>, vector<24x64xbf16>, vector<32x64xf32> -> vector<32x64xf32>
    %24 = arith.addf %18, %23 : vector<32x64xf32>
    %c0_24 = arith.constant 0 : index
    %c0_25 = arith.constant 0 : index
    %25 = vector.load %arg4[%c0_24, %c0_25] : memref<1x64xf32, #tpu.memory_space<vmem>>, vector<1x64xf32>
    %26 = vector.broadcast %25 : vector<1x64xf32> to vector<32x64xf32>
    %27 = arith.mulf %24, %26 : vector<32x64xf32>
    %c0_26 = arith.constant 0 : index
    %c0_27 = arith.constant 0 : index
    %28 = vector.load %arg5[%c0_26, %c0_27] : memref<1x64xf32, #tpu.memory_space<vmem>>, vector<1x64xf32>
    %29 = vector.broadcast %28 : vector<1x64xf32> to vector<32x64xf32>
    %30 = arith.addf %27, %29 : vector<32x64xf32>
    %cst_28 = arith.constant 0.000000e+00 : f32
    %31 = vector.broadcast %cst_28 : f32 to vector<32x64xf32>
    %32 = arith.maximumf %30, %31 : vector<32x64xf32>
    %33 = arith.truncf %32 : vector<32x64xf32> to vector<32x64xbf16>
    %c0_29 = arith.constant 0 : index
    %c0_30 = arith.constant 0 : index
    %c0_31 = arith.constant 0 : index
    %34 = vector.load %arg6[%c0_29, %c0_30, %c0_31] : memref<1x32x64xbf16, #tpu.memory_space<vmem>>, vector<1x32x64xbf16>
    %35 = vector.shape_cast %34 : vector<1x32x64xbf16> to vector<32x64xbf16>
    %36 = vector.shape_cast %33 : vector<32x64xbf16> to vector<1x32x64xbf16>
    tpu.vector_store %arg6[%c0_29, %c0_30, %c0_31], %36 {strides = array<i32>} : memref<1x32x64xbf16, #tpu.memory_space<vmem>>, vector<1x32x64xbf16>,
    return
  }
  func.func @transform_0(%arg0: i32, %arg1: i32) -> (i32, i32, i32) {
    %c0_i32 = arith.constant 0 : i32
    %c0_i32_0 = arith.constant 0 : i32
    %c0_i32_1 = arith.constant 0 : i32
    return %arg0, %c0_i32, %c0_i32_0 : i32, i32, i32
  }
  func.func @transform_1(%arg0: i32, %arg1: i32) -> (i32, i32, i32) {
    %c0_i32 = arith.constant 0 : i32
    %c0_i32_0 = arith.constant 0 : i32
    %c0_i32_1 = arith.constant 0 : i32
    return %c0_i32, %c0_i32_0, %arg1 : i32, i32, i32
  }
  func.func @transform_2(%arg0: i32, %arg1: i32) -> (i32, i32) {
    %c0_i32 = arith.constant 0 : i32
    %c0_i32_0 = arith.constant 0 : i32
    return %c0_i32, %arg1 : i32, i32
  }
  func.func @transform_3(%arg0: i32, %arg1: i32) -> (i32, i32) {
    %c0_i32 = arith.constant 0 : i32
    %c0_i32_0 = arith.constant 0 : i32
    return %c0_i32, %arg1 : i32, i32
  }
  func.func @transform_4(%arg0: i32, %arg1: i32) -> (i32, i32, i32) {
    %c0_i32 = arith.constant 0 : i32
    %c0_i32_0 = arith.constant 0 : i32
    return %arg0, %c0_i32, %arg1 : i32, i32, i32
  }
}

module attributes {stable_mosaic.version = 11 : i64} {
  func.func @_conv_bn_kernel(%arg0: i32, %arg1: i32, %arg2: memref<1x18x64xbf16, #tpu.memory_space<vmem>>, %arg3: memref<3x64x64xbf16, #tpu.memory_space<vmem>>, %arg4: memref<1x64xf32, #tpu.memory_space<vmem>>, %arg5: memref<1x64xf32, #tpu.memory_space<vmem>>, %arg6: memref<1x16x64xbf16, #tpu.memory_space<vmem>>) attributes {dimension_semantics = [#tpu.dimension_semantics<parallel>, #tpu.dimension_semantics<parallel>], iteration_bounds = array<i64: 2, 1>, scalar_prefetch = 0 : i64, scratch_operands = 0 : i64, tpu.core_type = #tpu.core_type<tc>, window_params = [{transform_indices = @transform_0, window_bounds = array<i64: 1, 18, 64>}, {transform_indices = @transform_1, window_bounds = array<i64: 3, 64, 64>}, {transform_indices = @transform_2, window_bounds = array<i64: 1, 64>}, {transform_indices = @transform_3, window_bounds = array<i64: 1, 64>}, {transform_indices = @transform_4, window_bounds = array<i64: 1, 16, 64>}]} {
    %cst = arith.constant 0.000000e+00 : f32
    %0 = vector.broadcast %cst : f32 to vector<16x64xf32>
    %c0 = arith.constant 0 : index
    %c0_0 = arith.constant 0 : index
    %c0_1 = arith.constant 0 : index
    %1 = vector.load %arg2[%c0, %c0_0, %c0_1] : memref<1x18x64xbf16, #tpu.memory_space<vmem>>, vector<1x16x64xbf16>
    %2 = vector.shape_cast %1 : vector<1x16x64xbf16> to vector<16x64xbf16>
    %c0_2 = arith.constant 0 : index
    %c0_3 = arith.constant 0 : index
    %c0_4 = arith.constant 0 : index
    %3 = vector.load %arg3[%c0_2, %c0_3, %c0_4] : memref<3x64x64xbf16, #tpu.memory_space<vmem>>, vector<1x64x64xbf16>
    %4 = vector.shape_cast %3 : vector<1x64x64xbf16> to vector<64x64xbf16>
    %cst_5 = arith.constant dense<0.000000e+00> : vector<16x64xf32>
    %5 = tpu.matmul %2, %4, %cst_5 {dimension_numbers = #tpu.dot_dimension_numbers<[1], [0], [0], [1], [0, 0, 1, 1], [], []>} : vector<16x64xbf16>, vector<64x64xbf16>, vector<16x64xf32> -> vector<16x64xf32>
    %6 = arith.addf %0, %5 : vector<16x64xf32>
    %c0_6 = arith.constant 0 : index
    %c1 = arith.constant 1 : index
    %c0_7 = arith.constant 0 : index
    %7 = vector.load %arg2[%c0_6, %c1, %c0_7] : memref<1x18x64xbf16, #tpu.memory_space<vmem>>, vector<1x16x64xbf16>
    %8 = vector.shape_cast %7 : vector<1x16x64xbf16> to vector<16x64xbf16>
    %c1_8 = arith.constant 1 : index
    %c0_9 = arith.constant 0 : index
    %c0_10 = arith.constant 0 : index
    %9 = vector.load %arg3[%c1_8, %c0_9, %c0_10] : memref<3x64x64xbf16, #tpu.memory_space<vmem>>, vector<1x64x64xbf16>
    %10 = vector.shape_cast %9 : vector<1x64x64xbf16> to vector<64x64xbf16>
    %cst_11 = arith.constant dense<0.000000e+00> : vector<16x64xf32>
    %11 = tpu.matmul %8, %10, %cst_11 {dimension_numbers = #tpu.dot_dimension_numbers<[1], [0], [0], [1], [0, 0, 1, 1], [], []>} : vector<16x64xbf16>, vector<64x64xbf16>, vector<16x64xf32> -> vector<16x64xf32>
    %12 = arith.addf %6, %11 : vector<16x64xf32>
    %c0_12 = arith.constant 0 : index
    %c2 = arith.constant 2 : index
    %c0_13 = arith.constant 0 : index
    %13 = vector.load %arg2[%c0_12, %c2, %c0_13] : memref<1x18x64xbf16, #tpu.memory_space<vmem>>, vector<1x16x64xbf16>
    %14 = vector.shape_cast %13 : vector<1x16x64xbf16> to vector<16x64xbf16>
    %c2_14 = arith.constant 2 : index
    %c0_15 = arith.constant 0 : index
    %c0_16 = arith.constant 0 : index
    %15 = vector.load %arg3[%c2_14, %c0_15, %c0_16] : memref<3x64x64xbf16, #tpu.memory_space<vmem>>, vector<1x64x64xbf16>
    %16 = vector.shape_cast %15 : vector<1x64x64xbf16> to vector<64x64xbf16>
    %cst_17 = arith.constant dense<0.000000e+00> : vector<16x64xf32>
    %17 = tpu.matmul %14, %16, %cst_17 {dimension_numbers = #tpu.dot_dimension_numbers<[1], [0], [0], [1], [0, 0, 1, 1], [], []>} : vector<16x64xbf16>, vector<64x64xbf16>, vector<16x64xf32> -> vector<16x64xf32>
    %18 = arith.addf %12, %17 : vector<16x64xf32>
    %c0_18 = arith.constant 0 : index
    %c0_19 = arith.constant 0 : index
    %19 = vector.load %arg4[%c0_18, %c0_19] : memref<1x64xf32, #tpu.memory_space<vmem>>, vector<1x64xf32>
    %20 = vector.broadcast %19 : vector<1x64xf32> to vector<16x64xf32>
    %21 = arith.mulf %18, %20 : vector<16x64xf32>
    %c0_20 = arith.constant 0 : index
    %c0_21 = arith.constant 0 : index
    %22 = vector.load %arg5[%c0_20, %c0_21] : memref<1x64xf32, #tpu.memory_space<vmem>>, vector<1x64xf32>
    %23 = vector.broadcast %22 : vector<1x64xf32> to vector<16x64xf32>
    %24 = arith.addf %21, %23 : vector<16x64xf32>
    %cst_22 = arith.constant 0.000000e+00 : f32
    %25 = vector.broadcast %cst_22 : f32 to vector<16x64xf32>
    %26 = arith.maximumf %24, %25 : vector<16x64xf32>
    %27 = arith.truncf %26 : vector<16x64xf32> to vector<16x64xbf16>
    %c0_23 = arith.constant 0 : index
    %c0_24 = arith.constant 0 : index
    %c0_25 = arith.constant 0 : index
    %28 = vector.load %arg6[%c0_23, %c0_24, %c0_25] : memref<1x16x64xbf16, #tpu.memory_space<vmem>>, vector<1x16x64xbf16>
    %29 = vector.shape_cast %28 : vector<1x16x64xbf16> to vector<16x64xbf16>
    %30 = vector.shape_cast %27 : vector<16x64xbf16> to vector<1x16x64xbf16>
    tpu.vector_store %arg6[%c0_23, %c0_24, %c0_25], %30 {strides = array<i32>} : memref<1x16x64xbf16, #tpu.memory_space<vmem>>, vector<1x16x64xbf16>,
    return
  }
  func.func @transform_0(%arg0: i32, %arg1: i32) -> (i32, i32, i32) {
    %c0_i32 = arith.constant 0 : i32
    %c0_i32_0 = arith.constant 0 : i32
    %c0_i32_1 = arith.constant 0 : i32
    return %arg0, %c0_i32, %c0_i32_0 : i32, i32, i32
  }
  func.func @transform_1(%arg0: i32, %arg1: i32) -> (i32, i32, i32) {
    %c0_i32 = arith.constant 0 : i32
    %c0_i32_0 = arith.constant 0 : i32
    %c0_i32_1 = arith.constant 0 : i32
    return %c0_i32, %c0_i32_0, %arg1 : i32, i32, i32
  }
  func.func @transform_2(%arg0: i32, %arg1: i32) -> (i32, i32) {
    %c0_i32 = arith.constant 0 : i32
    %c0_i32_0 = arith.constant 0 : i32
    return %c0_i32, %arg1 : i32, i32
  }
  func.func @transform_3(%arg0: i32, %arg1: i32) -> (i32, i32) {
    %c0_i32 = arith.constant 0 : i32
    %c0_i32_0 = arith.constant 0 : i32
    return %c0_i32, %arg1 : i32, i32
  }
  func.func @transform_4(%arg0: i32, %arg1: i32) -> (i32, i32, i32) {
    %c0_i32 = arith.constant 0 : i32
    %c0_i32_0 = arith.constant 0 : i32
    return %arg0, %c0_i32, %arg1 : i32, i32, i32
  }
}

module attributes {stable_mosaic.version = 11 : i64} {
  func.func @_conv_bn_kernel(%arg0: i32, %arg1: i32, %arg2: memref<1x8x128xbf16, #tpu.memory_space<vmem>>, %arg3: memref<1x128x128xbf16, #tpu.memory_space<vmem>>, %arg4: memref<1x128xf32, #tpu.memory_space<vmem>>, %arg5: memref<1x128xf32, #tpu.memory_space<vmem>>, %arg6: memref<1x8x128xbf16, #tpu.memory_space<vmem>>) attributes {dimension_semantics = [#tpu.dimension_semantics<parallel>, #tpu.dimension_semantics<parallel>], iteration_bounds = array<i64: 2, 1>, scalar_prefetch = 0 : i64, scratch_operands = 0 : i64, tpu.core_type = #tpu.core_type<tc>, window_params = [{transform_indices = @transform_0, window_bounds = array<i64: 1, 8, 128>}, {transform_indices = @transform_1, window_bounds = array<i64: 1, 128, 128>}, {transform_indices = @transform_2, window_bounds = array<i64: 1, 128>}, {transform_indices = @transform_3, window_bounds = array<i64: 1, 128>}, {transform_indices = @transform_4, window_bounds = array<i64: 1, 8, 128>}]} {
    %cst = arith.constant 0.000000e+00 : f32
    %0 = vector.broadcast %cst : f32 to vector<8x128xf32>
    %c0 = arith.constant 0 : index
    %c0_0 = arith.constant 0 : index
    %c0_1 = arith.constant 0 : index
    %1 = vector.load %arg2[%c0, %c0_0, %c0_1] : memref<1x8x128xbf16, #tpu.memory_space<vmem>>, vector<1x8x128xbf16>
    %2 = vector.shape_cast %1 : vector<1x8x128xbf16> to vector<8x128xbf16>
    %c0_2 = arith.constant 0 : index
    %c0_3 = arith.constant 0 : index
    %c0_4 = arith.constant 0 : index
    %3 = vector.load %arg3[%c0_2, %c0_3, %c0_4] : memref<1x128x128xbf16, #tpu.memory_space<vmem>>, vector<1x128x128xbf16>
    %4 = vector.shape_cast %3 : vector<1x128x128xbf16> to vector<128x128xbf16>
    %cst_5 = arith.constant dense<0.000000e+00> : vector<8x128xf32>
    %5 = tpu.matmul %2, %4, %cst_5 {dimension_numbers = #tpu.dot_dimension_numbers<[1], [0], [0], [1], [0, 0, 1, 1], [], []>} : vector<8x128xbf16>, vector<128x128xbf16>, vector<8x128xf32> -> vector<8x128xf32>
    %6 = arith.addf %0, %5 : vector<8x128xf32>
    %c0_6 = arith.constant 0 : index
    %c0_7 = arith.constant 0 : index
    %7 = vector.load %arg4[%c0_6, %c0_7] : memref<1x128xf32, #tpu.memory_space<vmem>>, vector<1x128xf32>
    %8 = vector.broadcast %7 : vector<1x128xf32> to vector<8x128xf32>
    %9 = arith.mulf %6, %8 : vector<8x128xf32>
    %c0_8 = arith.constant 0 : index
    %c0_9 = arith.constant 0 : index
    %10 = vector.load %arg5[%c0_8, %c0_9] : memref<1x128xf32, #tpu.memory_space<vmem>>, vector<1x128xf32>
    %11 = vector.broadcast %10 : vector<1x128xf32> to vector<8x128xf32>
    %12 = arith.addf %9, %11 : vector<8x128xf32>
    %13 = arith.truncf %12 : vector<8x128xf32> to vector<8x128xbf16>
    %c0_10 = arith.constant 0 : index
    %c0_11 = arith.constant 0 : index
    %c0_12 = arith.constant 0 : index
    %14 = vector.load %arg6[%c0_10, %c0_11, %c0_12] : memref<1x8x128xbf16, #tpu.memory_space<vmem>>, vector<1x8x128xbf16>
    %15 = vector.shape_cast %14 : vector<1x8x128xbf16> to vector<8x128xbf16>
    %16 = vector.shape_cast %13 : vector<8x128xbf16> to vector<1x8x128xbf16>
    tpu.vector_store %arg6[%c0_10, %c0_11, %c0_12], %16 {strides = array<i32>} : memref<1x8x128xbf16, #tpu.memory_space<vmem>>, vector<1x8x128xbf16>,
    return
  }
  func.func @transform_0(%arg0: i32, %arg1: i32) -> (i32, i32, i32) {
    %c0_i32 = arith.constant 0 : i32
    %c0_i32_0 = arith.constant 0 : i32
    %c0_i32_1 = arith.constant 0 : i32
    return %arg0, %c0_i32, %c0_i32_0 : i32, i32, i32
  }
  func.func @transform_1(%arg0: i32, %arg1: i32) -> (i32, i32, i32) {
    %c0_i32 = arith.constant 0 : i32
    %c0_i32_0 = arith.constant 0 : i32
    %c0_i32_1 = arith.constant 0 : i32
    return %c0_i32, %c0_i32_0, %arg1 : i32, i32, i32
  }
  func.func @transform_2(%arg0: i32, %arg1: i32) -> (i32, i32) {
    %c0_i32 = arith.constant 0 : i32
    %c0_i32_0 = arith.constant 0 : i32
    return %c0_i32, %arg1 : i32, i32
  }
  func.func @transform_3(%arg0: i32, %arg1: i32) -> (i32, i32) {
    %c0_i32 = arith.constant 0 : i32
    %c0_i32_0 = arith.constant 0 : i32
    return %c0_i32, %arg1 : i32, i32
  }
  func.func @transform_4(%arg0: i32, %arg1: i32) -> (i32, i32, i32) {
    %c0_i32 = arith.constant 0 : i32
    %c0_i32_0 = arith.constant 0 : i32
    return %arg0, %c0_i32, %arg1 : i32, i32, i32
  }
}

module attributes {stable_mosaic.version = 11 : i64} {
  func.func @_conv_bn_kernel(%arg0: i32, %arg1: i32, %arg2: memref<1x9x128xbf16, #tpu.memory_space<vmem>>, %arg3: memref<2x128x128xbf16, #tpu.memory_space<vmem>>, %arg4: memref<1x128xf32, #tpu.memory_space<vmem>>, %arg5: memref<1x128xf32, #tpu.memory_space<vmem>>, %arg6: memref<1x8x128xbf16, #tpu.memory_space<vmem>>) attributes {dimension_semantics = [#tpu.dimension_semantics<parallel>, #tpu.dimension_semantics<parallel>], iteration_bounds = array<i64: 2, 1>, scalar_prefetch = 0 : i64, scratch_operands = 0 : i64, tpu.core_type = #tpu.core_type<tc>, window_params = [{transform_indices = @transform_0, window_bounds = array<i64: 1, 9, 128>}, {transform_indices = @transform_1, window_bounds = array<i64: 2, 128, 128>}, {transform_indices = @transform_2, window_bounds = array<i64: 1, 128>}, {transform_indices = @transform_3, window_bounds = array<i64: 1, 128>}, {transform_indices = @transform_4, window_bounds = array<i64: 1, 8, 128>}]} {
    %cst = arith.constant 0.000000e+00 : f32
    %0 = vector.broadcast %cst : f32 to vector<8x128xf32>
    %c0 = arith.constant 0 : index
    %c0_0 = arith.constant 0 : index
    %c0_1 = arith.constant 0 : index
    %1 = vector.load %arg2[%c0, %c0_0, %c0_1] : memref<1x9x128xbf16, #tpu.memory_space<vmem>>, vector<1x8x128xbf16>
    %2 = vector.shape_cast %1 : vector<1x8x128xbf16> to vector<8x128xbf16>
    %c0_2 = arith.constant 0 : index
    %c0_3 = arith.constant 0 : index
    %c0_4 = arith.constant 0 : index
    %3 = vector.load %arg3[%c0_2, %c0_3, %c0_4] : memref<2x128x128xbf16, #tpu.memory_space<vmem>>, vector<1x128x128xbf16>
    %4 = vector.shape_cast %3 : vector<1x128x128xbf16> to vector<128x128xbf16>
    %cst_5 = arith.constant dense<0.000000e+00> : vector<8x128xf32>
    %5 = tpu.matmul %2, %4, %cst_5 {dimension_numbers = #tpu.dot_dimension_numbers<[1], [0], [0], [1], [0, 0, 1, 1], [], []>} : vector<8x128xbf16>, vector<128x128xbf16>, vector<8x128xf32> -> vector<8x128xf32>
    %6 = arith.addf %0, %5 : vector<8x128xf32>
    %c0_6 = arith.constant 0 : index
    %c1 = arith.constant 1 : index
    %c0_7 = arith.constant 0 : index
    %7 = vector.load %arg2[%c0_6, %c1, %c0_7] : memref<1x9x128xbf16, #tpu.memory_space<vmem>>, vector<1x8x128xbf16>
    %8 = vector.shape_cast %7 : vector<1x8x128xbf16> to vector<8x128xbf16>
    %c1_8 = arith.constant 1 : index
    %c0_9 = arith.constant 0 : index
    %c0_10 = arith.constant 0 : index
    %9 = vector.load %arg3[%c1_8, %c0_9, %c0_10] : memref<2x128x128xbf16, #tpu.memory_space<vmem>>, vector<1x128x128xbf16>
    %10 = vector.shape_cast %9 : vector<1x128x128xbf16> to vector<128x128xbf16>
    %cst_11 = arith.constant dense<0.000000e+00> : vector<8x128xf32>
    %11 = tpu.matmul %8, %10, %cst_11 {dimension_numbers = #tpu.dot_dimension_numbers<[1], [0], [0], [1], [0, 0, 1, 1], [], []>} : vector<8x128xbf16>, vector<128x128xbf16>, vector<8x128xf32> -> vector<8x128xf32>
    %12 = arith.addf %6, %11 : vector<8x128xf32>
    %c0_12 = arith.constant 0 : index
    %c0_13 = arith.constant 0 : index
    %13 = vector.load %arg4[%c0_12, %c0_13] : memref<1x128xf32, #tpu.memory_space<vmem>>, vector<1x128xf32>
    %14 = vector.broadcast %13 : vector<1x128xf32> to vector<8x128xf32>
    %15 = arith.mulf %12, %14 : vector<8x128xf32>
    %c0_14 = arith.constant 0 : index
    %c0_15 = arith.constant 0 : index
    %16 = vector.load %arg5[%c0_14, %c0_15] : memref<1x128xf32, #tpu.memory_space<vmem>>, vector<1x128xf32>
    %17 = vector.broadcast %16 : vector<1x128xf32> to vector<8x128xf32>
    %18 = arith.addf %15, %17 : vector<8x128xf32>
    %cst_16 = arith.constant 0.000000e+00 : f32
    %19 = vector.broadcast %cst_16 : f32 to vector<8x128xf32>
    %20 = arith.maximumf %18, %19 : vector<8x128xf32>
    %21 = arith.truncf %20 : vector<8x128xf32> to vector<8x128xbf16>
    %c0_17 = arith.constant 0 : index
    %c0_18 = arith.constant 0 : index
    %c0_19 = arith.constant 0 : index
    %22 = vector.load %arg6[%c0_17, %c0_18, %c0_19] : memref<1x8x128xbf16, #tpu.memory_space<vmem>>, vector<1x8x128xbf16>
    %23 = vector.shape_cast %22 : vector<1x8x128xbf16> to vector<8x128xbf16>
    %24 = vector.shape_cast %21 : vector<8x128xbf16> to vector<1x8x128xbf16>
    tpu.vector_store %arg6[%c0_17, %c0_18, %c0_19], %24 {strides = array<i32>} : memref<1x8x128xbf16, #tpu.memory_space<vmem>>, vector<1x8x128xbf16>,
    return
  }
  func.func @transform_0(%arg0: i32, %arg1: i32) -> (i32, i32, i32) {
    %c0_i32 = arith.constant 0 : i32
    %c0_i32_0 = arith.constant 0 : i32
    %c0_i32_1 = arith.constant 0 : i32
    return %arg0, %c0_i32, %c0_i32_0 : i32, i32, i32
  }
  func.func @transform_1(%arg0: i32, %arg1: i32) -> (i32, i32, i32) {
    %c0_i32 = arith.constant 0 : i32
    %c0_i32_0 = arith.constant 0 : i32
    %c0_i32_1 = arith.constant 0 : i32
    return %c0_i32, %c0_i32_0, %arg1 : i32, i32, i32
  }
  func.func @transform_2(%arg0: i32, %arg1: i32) -> (i32, i32) {
    %c0_i32 = arith.constant 0 : i32
    %c0_i32_0 = arith.constant 0 : i32
    return %c0_i32, %arg1 : i32, i32
  }
  func.func @transform_3(%arg0: i32, %arg1: i32) -> (i32, i32) {
    %c0_i32 = arith.constant 0 : i32
    %c0_i32_0 = arith.constant 0 : i32
    return %c0_i32, %arg1 : i32, i32
  }
  func.func @transform_4(%arg0: i32, %arg1: i32) -> (i32, i32, i32) {
    %c0_i32 = arith.constant 0 : i32
    %c0_i32_0 = arith.constant 0 : i32
    return %arg0, %c0_i32, %arg1 : i32, i32, i32
  }
}

module attributes {stable_mosaic.version = 11 : i64} {
  func.func @_conv_bn_kernel(%arg0: i32, %arg1: i32, %arg2: memref<1x4x256xbf16, #tpu.memory_space<vmem>>, %arg3: memref<1x256x128xbf16, #tpu.memory_space<vmem>>, %arg4: memref<1x128xf32, #tpu.memory_space<vmem>>, %arg5: memref<1x128xf32, #tpu.memory_space<vmem>>, %arg6: memref<1x4x128xbf16, #tpu.memory_space<vmem>>) attributes {dimension_semantics = [#tpu.dimension_semantics<parallel>, #tpu.dimension_semantics<parallel>], iteration_bounds = array<i64: 2, 2>, scalar_prefetch = 0 : i64, scratch_operands = 0 : i64, tpu.core_type = #tpu.core_type<tc>, window_params = [{transform_indices = @transform_0, window_bounds = array<i64: 1, 4, 256>}, {transform_indices = @transform_1, window_bounds = array<i64: 1, 256, 128>}, {transform_indices = @transform_2, window_bounds = array<i64: 1, 128>}, {transform_indices = @transform_3, window_bounds = array<i64: 1, 128>}, {transform_indices = @transform_4, window_bounds = array<i64: 1, 4, 128>}]} {
    %cst = arith.constant 0.000000e+00 : f32
    %0 = vector.broadcast %cst : f32 to vector<4x128xf32>
    %c0 = arith.constant 0 : index
    %c0_0 = arith.constant 0 : index
    %c0_1 = arith.constant 0 : index
    %1 = vector.load %arg2[%c0, %c0_0, %c0_1] : memref<1x4x256xbf16, #tpu.memory_space<vmem>>, vector<1x4x256xbf16>
    %2 = vector.shape_cast %1 : vector<1x4x256xbf16> to vector<4x256xbf16>
    %c0_2 = arith.constant 0 : index
    %c0_3 = arith.constant 0 : index
    %c0_4 = arith.constant 0 : index
    %3 = vector.load %arg3[%c0_2, %c0_3, %c0_4] : memref<1x256x128xbf16, #tpu.memory_space<vmem>>, vector<1x256x128xbf16>
    %4 = vector.shape_cast %3 : vector<1x256x128xbf16> to vector<256x128xbf16>
    %cst_5 = arith.constant dense<0.000000e+00> : vector<4x128xf32>
    %5 = tpu.matmul %2, %4, %cst_5 {dimension_numbers = #tpu.dot_dimension_numbers<[1], [0], [0], [1], [0, 0, 1, 1], [], []>} : vector<4x256xbf16>, vector<256x128xbf16>, vector<4x128xf32> -> vector<4x128xf32>
    %6 = arith.addf %0, %5 : vector<4x128xf32>
    %c0_6 = arith.constant 0 : index
    %c0_7 = arith.constant 0 : index
    %7 = vector.load %arg4[%c0_6, %c0_7] : memref<1x128xf32, #tpu.memory_space<vmem>>, vector<1x128xf32>
    %8 = vector.broadcast %7 : vector<1x128xf32> to vector<4x128xf32>
    %9 = arith.mulf %6, %8 : vector<4x128xf32>
    %c0_8 = arith.constant 0 : index
    %c0_9 = arith.constant 0 : index
    %10 = vector.load %arg5[%c0_8, %c0_9] : memref<1x128xf32, #tpu.memory_space<vmem>>, vector<1x128xf32>
    %11 = vector.broadcast %10 : vector<1x128xf32> to vector<4x128xf32>
    %12 = arith.addf %9, %11 : vector<4x128xf32>
    %13 = arith.truncf %12 : vector<4x128xf32> to vector<4x128xbf16>
    %c0_10 = arith.constant 0 : index
    %c0_11 = arith.constant 0 : index
    %c0_12 = arith.constant 0 : index
    %14 = vector.load %arg6[%c0_10, %c0_11, %c0_12] : memref<1x4x128xbf16, #tpu.memory_space<vmem>>, vector<1x4x128xbf16>
    %15 = vector.shape_cast %14 : vector<1x4x128xbf16> to vector<4x128xbf16>
    %16 = vector.shape_cast %13 : vector<4x128xbf16> to vector<1x4x128xbf16>
    tpu.vector_store %arg6[%c0_10, %c0_11, %c0_12], %16 {strides = array<i32>} : memref<1x4x128xbf16, #tpu.memory_space<vmem>>, vector<1x4x128xbf16>,
    return
  }
  func.func @transform_0(%arg0: i32, %arg1: i32) -> (i32, i32, i32) {
    %c0_i32 = arith.constant 0 : i32
    %c0_i32_0 = arith.constant 0 : i32
    %c0_i32_1 = arith.constant 0 : i32
    return %arg0, %c0_i32, %c0_i32_0 : i32, i32, i32
  }
  func.func @transform_1(%arg0: i32, %arg1: i32) -> (i32, i32, i32) {
    %c0_i32 = arith.constant 0 : i32
    %c0_i32_0 = arith.constant 0 : i32
    %c0_i32_1 = arith.constant 0 : i32
    return %c0_i32, %c0_i32_0, %arg1 : i32, i32, i32
  }
  func.func @transform_2(%arg0: i32, %arg1: i32) -> (i32, i32) {
    %c0_i32 = arith.constant 0 : i32
    %c0_i32_0 = arith.constant 0 : i32
    return %c0_i32, %arg1 : i32, i32
  }
  func.func @transform_3(%arg0: i32, %arg1: i32) -> (i32, i32) {
    %c0_i32 = arith.constant 0 : i32
    %c0_i32_0 = arith.constant 0 : i32
    return %c0_i32, %arg1 : i32, i32
  }
  func.func @transform_4(%arg0: i32, %arg1: i32) -> (i32, i32, i32) {
    %c0_i32 = arith.constant 0 : i32
    %c0_i32_0 = arith.constant 0 : i32
    return %arg0, %c0_i32, %arg1 : i32, i32, i32
  }
}

module attributes {stable_mosaic.version = 11 : i64} {
  func.func @_conv_bn_kernel(%arg0: i32, %arg1: i32, %arg2: memref<1x10x128xbf16, #tpu.memory_space<vmem>>, %arg3: memref<3x128x128xbf16, #tpu.memory_space<vmem>>, %arg4: memref<1x128xf32, #tpu.memory_space<vmem>>, %arg5: memref<1x128xf32, #tpu.memory_space<vmem>>, %arg6: memref<1x8x128xbf16, #tpu.memory_space<vmem>>) attributes {dimension_semantics = [#tpu.dimension_semantics<parallel>, #tpu.dimension_semantics<parallel>], iteration_bounds = array<i64: 2, 1>, scalar_prefetch = 0 : i64, scratch_operands = 0 : i64, tpu.core_type = #tpu.core_type<tc>, window_params = [{transform_indices = @transform_0, window_bounds = array<i64: 1, 10, 128>}, {transform_indices = @transform_1, window_bounds = array<i64: 3, 128, 128>}, {transform_indices = @transform_2, window_bounds = array<i64: 1, 128>}, {transform_indices = @transform_3, window_bounds = array<i64: 1, 128>}, {transform_indices = @transform_4, window_bounds = array<i64: 1, 8, 128>}]} {
    %cst = arith.constant 0.000000e+00 : f32
    %0 = vector.broadcast %cst : f32 to vector<8x128xf32>
    %c0 = arith.constant 0 : index
    %c0_0 = arith.constant 0 : index
    %c0_1 = arith.constant 0 : index
    %1 = vector.load %arg2[%c0, %c0_0, %c0_1] : memref<1x10x128xbf16, #tpu.memory_space<vmem>>, vector<1x8x128xbf16>
    %2 = vector.shape_cast %1 : vector<1x8x128xbf16> to vector<8x128xbf16>
    %c0_2 = arith.constant 0 : index
    %c0_3 = arith.constant 0 : index
    %c0_4 = arith.constant 0 : index
    %3 = vector.load %arg3[%c0_2, %c0_3, %c0_4] : memref<3x128x128xbf16, #tpu.memory_space<vmem>>, vector<1x128x128xbf16>
    %4 = vector.shape_cast %3 : vector<1x128x128xbf16> to vector<128x128xbf16>
    %cst_5 = arith.constant dense<0.000000e+00> : vector<8x128xf32>
    %5 = tpu.matmul %2, %4, %cst_5 {dimension_numbers = #tpu.dot_dimension_numbers<[1], [0], [0], [1], [0, 0, 1, 1], [], []>} : vector<8x128xbf16>, vector<128x128xbf16>, vector<8x128xf32> -> vector<8x128xf32>
    %6 = arith.addf %0, %5 : vector<8x128xf32>
    %c0_6 = arith.constant 0 : index
    %c1 = arith.constant 1 : index
    %c0_7 = arith.constant 0 : index
    %7 = vector.load %arg2[%c0_6, %c1, %c0_7] : memref<1x10x128xbf16, #tpu.memory_space<vmem>>, vector<1x8x128xbf16>
    %8 = vector.shape_cast %7 : vector<1x8x128xbf16> to vector<8x128xbf16>
    %c1_8 = arith.constant 1 : index
    %c0_9 = arith.constant 0 : index
    %c0_10 = arith.constant 0 : index
    %9 = vector.load %arg3[%c1_8, %c0_9, %c0_10] : memref<3x128x128xbf16, #tpu.memory_space<vmem>>, vector<1x128x128xbf16>
    %10 = vector.shape_cast %9 : vector<1x128x128xbf16> to vector<128x128xbf16>
    %cst_11 = arith.constant dense<0.000000e+00> : vector<8x128xf32>
    %11 = tpu.matmul %8, %10, %cst_11 {dimension_numbers = #tpu.dot_dimension_numbers<[1], [0], [0], [1], [0, 0, 1, 1], [], []>} : vector<8x128xbf16>, vector<128x128xbf16>, vector<8x128xf32> -> vector<8x128xf32>
    %12 = arith.addf %6, %11 : vector<8x128xf32>
    %c0_12 = arith.constant 0 : index
    %c2 = arith.constant 2 : index
    %c0_13 = arith.constant 0 : index
    %13 = vector.load %arg2[%c0_12, %c2, %c0_13] : memref<1x10x128xbf16, #tpu.memory_space<vmem>>, vector<1x8x128xbf16>
    %14 = vector.shape_cast %13 : vector<1x8x128xbf16> to vector<8x128xbf16>
    %c2_14 = arith.constant 2 : index
    %c0_15 = arith.constant 0 : index
    %c0_16 = arith.constant 0 : index
    %15 = vector.load %arg3[%c2_14, %c0_15, %c0_16] : memref<3x128x128xbf16, #tpu.memory_space<vmem>>, vector<1x128x128xbf16>
    %16 = vector.shape_cast %15 : vector<1x128x128xbf16> to vector<128x128xbf16>
    %cst_17 = arith.constant dense<0.000000e+00> : vector<8x128xf32>
    %17 = tpu.matmul %14, %16, %cst_17 {dimension_numbers = #tpu.dot_dimension_numbers<[1], [0], [0], [1], [0, 0, 1, 1], [], []>} : vector<8x128xbf16>, vector<128x128xbf16>, vector<8x128xf32> -> vector<8x128xf32>
    %18 = arith.addf %12, %17 : vector<8x128xf32>
    %c0_18 = arith.constant 0 : index
    %c0_19 = arith.constant 0 : index
    %19 = vector.load %arg4[%c0_18, %c0_19] : memref<1x128xf32, #tpu.memory_space<vmem>>, vector<1x128xf32>
    %20 = vector.broadcast %19 : vector<1x128xf32> to vector<8x128xf32>
    %21 = arith.mulf %18, %20 : vector<8x128xf32>
    %c0_20 = arith.constant 0 : index
    %c0_21 = arith.constant 0 : index
    %22 = vector.load %arg5[%c0_20, %c0_21] : memref<1x128xf32, #tpu.memory_space<vmem>>, vector<1x128xf32>
    %23 = vector.broadcast %22 : vector<1x128xf32> to vector<8x128xf32>
    %24 = arith.addf %21, %23 : vector<8x128xf32>
    %cst_22 = arith.constant 0.000000e+00 : f32
    %25 = vector.broadcast %cst_22 : f32 to vector<8x128xf32>
    %26 = arith.maximumf %24, %25 : vector<8x128xf32>
    %27 = arith.truncf %26 : vector<8x128xf32> to vector<8x128xbf16>
    %c0_23 = arith.constant 0 : index
    %c0_24 = arith.constant 0 : index
    %c0_25 = arith.constant 0 : index
    %28 = vector.load %arg6[%c0_23, %c0_24, %c0_25] : memref<1x8x128xbf16, #tpu.memory_space<vmem>>, vector<1x8x128xbf16>
    %29 = vector.shape_cast %28 : vector<1x8x128xbf16> to vector<8x128xbf16>
    %30 = vector.shape_cast %27 : vector<8x128xbf16> to vector<1x8x128xbf16>
    tpu.vector_store %arg6[%c0_23, %c0_24, %c0_25], %30 {strides = array<i32>} : memref<1x8x128xbf16, #tpu.memory_space<vmem>>, vector<1x8x128xbf16>,
    return
  }
  func.func @transform_0(%arg0: i32, %arg1: i32) -> (i32, i32, i32) {
    %c0_i32 = arith.constant 0 : i32
    %c0_i32_0 = arith.constant 0 : i32
    %c0_i32_1 = arith.constant 0 : i32
    return %arg0, %c0_i32, %c0_i32_0 : i32, i32, i32
  }
  func.func @transform_1(%arg0: i32, %arg1: i32) -> (i32, i32, i32) {
    %c0_i32 = arith.constant 0 : i32
    %c0_i32_0 = arith.constant 0 : i32
    %c0_i32_1 = arith.constant 0 : i32
    return %c0_i32, %c0_i32_0, %arg1 : i32, i32, i32
  }
  func.func @transform_2(%arg0: i32, %arg1: i32) -> (i32, i32) {
    %c0_i32 = arith.constant 0 : i32
    %c0_i32_0 = arith.constant 0 : i32
    return %c0_i32, %arg1 : i32, i32
  }
  func.func @transform_3(%arg0: i32, %arg1: i32) -> (i32, i32) {
    %c0_i32 = arith.constant 0 : i32
    %c0_i32_0 = arith.constant 0 : i32
    return %c0_i32, %arg1 : i32, i32
  }
  func.func @transform_4(%arg0: i32, %arg1: i32) -> (i32, i32, i32) {
    %c0_i32 = arith.constant 0 : i32
    %c0_i32_0 = arith.constant 0 : i32
    return %arg0, %c0_i32, %arg1 : i32, i32, i32
  }
}

module attributes {stable_mosaic.version = 11 : i64} {
  func.func @_conv_bn_kernel(%arg0: i32, %arg1: i32, %arg2: memref<1x5x256xbf16, #tpu.memory_space<vmem>>, %arg3: memref<2x256x128xbf16, #tpu.memory_space<vmem>>, %arg4: memref<1x128xf32, #tpu.memory_space<vmem>>, %arg5: memref<1x128xf32, #tpu.memory_space<vmem>>, %arg6: memref<1x4x128xbf16, #tpu.memory_space<vmem>>) attributes {dimension_semantics = [#tpu.dimension_semantics<parallel>, #tpu.dimension_semantics<parallel>], iteration_bounds = array<i64: 2, 2>, scalar_prefetch = 0 : i64, scratch_operands = 0 : i64, tpu.core_type = #tpu.core_type<tc>, window_params = [{transform_indices = @transform_0, window_bounds = array<i64: 1, 5, 256>}, {transform_indices = @transform_1, window_bounds = array<i64: 2, 256, 128>}, {transform_indices = @transform_2, window_bounds = array<i64: 1, 128>}, {transform_indices = @transform_3, window_bounds = array<i64: 1, 128>}, {transform_indices = @transform_4, window_bounds = array<i64: 1, 4, 128>}]} {
    %cst = arith.constant 0.000000e+00 : f32
    %0 = vector.broadcast %cst : f32 to vector<4x128xf32>
    %c0 = arith.constant 0 : index
    %c0_0 = arith.constant 0 : index
    %c0_1 = arith.constant 0 : index
    %1 = vector.load %arg2[%c0, %c0_0, %c0_1] : memref<1x5x256xbf16, #tpu.memory_space<vmem>>, vector<1x4x256xbf16>
    %2 = vector.shape_cast %1 : vector<1x4x256xbf16> to vector<4x256xbf16>
    %c0_2 = arith.constant 0 : index
    %c0_3 = arith.constant 0 : index
    %c0_4 = arith.constant 0 : index
    %3 = vector.load %arg3[%c0_2, %c0_3, %c0_4] : memref<2x256x128xbf16, #tpu.memory_space<vmem>>, vector<1x256x128xbf16>
    %4 = vector.shape_cast %3 : vector<1x256x128xbf16> to vector<256x128xbf16>
    %cst_5 = arith.constant dense<0.000000e+00> : vector<4x128xf32>
    %5 = tpu.matmul %2, %4, %cst_5 {dimension_numbers = #tpu.dot_dimension_numbers<[1], [0], [0], [1], [0, 0, 1, 1], [], []>} : vector<4x256xbf16>, vector<256x128xbf16>, vector<4x128xf32> -> vector<4x128xf32>
    %6 = arith.addf %0, %5 : vector<4x128xf32>
    %c0_6 = arith.constant 0 : index
    %c1 = arith.constant 1 : index
    %c0_7 = arith.constant 0 : index
    %7 = vector.load %arg2[%c0_6, %c1, %c0_7] : memref<1x5x256xbf16, #tpu.memory_space<vmem>>, vector<1x4x256xbf16>
    %8 = vector.shape_cast %7 : vector<1x4x256xbf16> to vector<4x256xbf16>
    %c1_8 = arith.constant 1 : index
    %c0_9 = arith.constant 0 : index
    %c0_10 = arith.constant 0 : index
    %9 = vector.load %arg3[%c1_8, %c0_9, %c0_10] : memref<2x256x128xbf16, #tpu.memory_space<vmem>>, vector<1x256x128xbf16>
    %10 = vector.shape_cast %9 : vector<1x256x128xbf16> to vector<256x128xbf16>
    %cst_11 = arith.constant dense<0.000000e+00> : vector<4x128xf32>
    %11 = tpu.matmul %8, %10, %cst_11 {dimension_numbers = #tpu.dot_dimension_numbers<[1], [0], [0], [1], [0, 0, 1, 1], [], []>} : vector<4x256xbf16>, vector<256x128xbf16>, vector<4x128xf32> -> vector<4x128xf32>
    %12 = arith.addf %6, %11 : vector<4x128xf32>
    %c0_12 = arith.constant 0 : index
    %c0_13 = arith.constant 0 : index
    %13 = vector.load %arg4[%c0_12, %c0_13] : memref<1x128xf32, #tpu.memory_space<vmem>>, vector<1x128xf32>
    %14 = vector.broadcast %13 : vector<1x128xf32> to vector<4x128xf32>
    %15 = arith.mulf %12, %14 : vector<4x128xf32>
    %c0_14 = arith.constant 0 : index
    %c0_15 = arith.constant 0 : index
    %16 = vector.load %arg5[%c0_14, %c0_15] : memref<1x128xf32, #tpu.memory_space<vmem>>, vector<1x128xf32>
    %17 = vector.broadcast %16 : vector<1x128xf32> to vector<4x128xf32>
    %18 = arith.addf %15, %17 : vector<4x128xf32>
    %cst_16 = arith.constant 0.000000e+00 : f32
    %19 = vector.broadcast %cst_16 : f32 to vector<4x128xf32>
    %20 = arith.maximumf %18, %19 : vector<4x128xf32>
    %21 = arith.truncf %20 : vector<4x128xf32> to vector<4x128xbf16>
    %c0_17 = arith.constant 0 : index
    %c0_18 = arith.constant 0 : index
    %c0_19 = arith.constant 0 : index
    %22 = vector.load %arg6[%c0_17, %c0_18, %c0_19] : memref<1x4x128xbf16, #tpu.memory_space<vmem>>, vector<1x4x128xbf16>
    %23 = vector.shape_cast %22 : vector<1x4x128xbf16> to vector<4x128xbf16>
    %24 = vector.shape_cast %21 : vector<4x128xbf16> to vector<1x4x128xbf16>
    tpu.vector_store %arg6[%c0_17, %c0_18, %c0_19], %24 {strides = array<i32>} : memref<1x4x128xbf16, #tpu.memory_space<vmem>>, vector<1x4x128xbf16>,
    return
  }
  func.func @transform_0(%arg0: i32, %arg1: i32) -> (i32, i32, i32) {
    %c0_i32 = arith.constant 0 : i32
    %c0_i32_0 = arith.constant 0 : i32
    %c0_i32_1 = arith.constant 0 : i32
    return %arg0, %c0_i32, %c0_i32_0 : i32, i32, i32
  }
  func.func @transform_1(%arg0: i32, %arg1: i32) -> (i32, i32, i32) {
    %c0_i32 = arith.constant 0 : i32
    %c0_i32_0 = arith.constant 0 : i32
    %c0_i32_1 = arith.constant 0 : i32
    return %c0_i32, %c0_i32_0, %arg1 : i32, i32, i32
  }
  func.func @transform_2(%arg0: i32, %arg1: i32) -> (i32, i32) {
    %c0_i32 = arith.constant 0 : i32
    %c0_i32_0 = arith.constant 0 : i32
    return %c0_i32, %arg1 : i32, i32
  }
  func.func @transform_3(%arg0: i32, %arg1: i32) -> (i32, i32) {
    %c0_i32 = arith.constant 0 : i32
    %c0_i32_0 = arith.constant 0 : i32
    return %c0_i32, %arg1 : i32, i32
  }
  func.func @transform_4(%arg0: i32, %arg1: i32) -> (i32, i32, i32) {
    %c0_i32 = arith.constant 0 : i32
    %c0_i32_0 = arith.constant 0 : i32
    return %arg0, %c0_i32, %arg1 : i32, i32, i32
  }
}

module attributes {stable_mosaic.version = 11 : i64} {
  func.func @_conv_bn_kernel(%arg0: i32, %arg1: i32, %arg2: memref<1x10x128xbf16, #tpu.memory_space<vmem>>, %arg3: memref<3x128x128xbf16, #tpu.memory_space<vmem>>, %arg4: memref<1x128xf32, #tpu.memory_space<vmem>>, %arg5: memref<1x128xf32, #tpu.memory_space<vmem>>, %arg6: memref<1x8x128xbf16, #tpu.memory_space<vmem>>, %arg7: memref<1x8x128xbf16, #tpu.memory_space<vmem>>) attributes {dimension_semantics = [#tpu.dimension_semantics<parallel>, #tpu.dimension_semantics<parallel>], iteration_bounds = array<i64: 2, 1>, scalar_prefetch = 0 : i64, scratch_operands = 0 : i64, tpu.core_type = #tpu.core_type<tc>, window_params = [{transform_indices = @transform_0, window_bounds = array<i64: 1, 10, 128>}, {transform_indices = @transform_1, window_bounds = array<i64: 3, 128, 128>}, {transform_indices = @transform_2, window_bounds = array<i64: 1, 128>}, {transform_indices = @transform_3, window_bounds = array<i64: 1, 128>}, {transform_indices = @transform_4, window_bounds = array<i64: 1, 8, 128>}, {transform_indices = @transform_5, window_bounds = array<i64: 1, 8, 128>}]} {
    %cst = arith.constant 0.000000e+00 : f32
    %0 = vector.broadcast %cst : f32 to vector<8x128xf32>
    %c0 = arith.constant 0 : index
    %c0_0 = arith.constant 0 : index
    %c0_1 = arith.constant 0 : index
    %1 = vector.load %arg2[%c0, %c0_0, %c0_1] : memref<1x10x128xbf16, #tpu.memory_space<vmem>>, vector<1x8x128xbf16>
    %2 = vector.shape_cast %1 : vector<1x8x128xbf16> to vector<8x128xbf16>
    %c0_2 = arith.constant 0 : index
    %c0_3 = arith.constant 0 : index
    %c0_4 = arith.constant 0 : index
    %3 = vector.load %arg3[%c0_2, %c0_3, %c0_4] : memref<3x128x128xbf16, #tpu.memory_space<vmem>>, vector<1x128x128xbf16>
    %4 = vector.shape_cast %3 : vector<1x128x128xbf16> to vector<128x128xbf16>
    %cst_5 = arith.constant dense<0.000000e+00> : vector<8x128xf32>
    %5 = tpu.matmul %2, %4, %cst_5 {dimension_numbers = #tpu.dot_dimension_numbers<[1], [0], [0], [1], [0, 0, 1, 1], [], []>} : vector<8x128xbf16>, vector<128x128xbf16>, vector<8x128xf32> -> vector<8x128xf32>
    %6 = arith.addf %0, %5 : vector<8x128xf32>
    %c0_6 = arith.constant 0 : index
    %c1 = arith.constant 1 : index
    %c0_7 = arith.constant 0 : index
    %7 = vector.load %arg2[%c0_6, %c1, %c0_7] : memref<1x10x128xbf16, #tpu.memory_space<vmem>>, vector<1x8x128xbf16>
    %8 = vector.shape_cast %7 : vector<1x8x128xbf16> to vector<8x128xbf16>
    %c1_8 = arith.constant 1 : index
    %c0_9 = arith.constant 0 : index
    %c0_10 = arith.constant 0 : index
    %9 = vector.load %arg3[%c1_8, %c0_9, %c0_10] : memref<3x128x128xbf16, #tpu.memory_space<vmem>>, vector<1x128x128xbf16>
    %10 = vector.shape_cast %9 : vector<1x128x128xbf16> to vector<128x128xbf16>
    %cst_11 = arith.constant dense<0.000000e+00> : vector<8x128xf32>
    %11 = tpu.matmul %8, %10, %cst_11 {dimension_numbers = #tpu.dot_dimension_numbers<[1], [0], [0], [1], [0, 0, 1, 1], [], []>} : vector<8x128xbf16>, vector<128x128xbf16>, vector<8x128xf32> -> vector<8x128xf32>
    %12 = arith.addf %6, %11 : vector<8x128xf32>
    %c0_12 = arith.constant 0 : index
    %c2 = arith.constant 2 : index
    %c0_13 = arith.constant 0 : index
    %13 = vector.load %arg2[%c0_12, %c2, %c0_13] : memref<1x10x128xbf16, #tpu.memory_space<vmem>>, vector<1x8x128xbf16>
    %14 = vector.shape_cast %13 : vector<1x8x128xbf16> to vector<8x128xbf16>
    %c2_14 = arith.constant 2 : index
    %c0_15 = arith.constant 0 : index
    %c0_16 = arith.constant 0 : index
    %15 = vector.load %arg3[%c2_14, %c0_15, %c0_16] : memref<3x128x128xbf16, #tpu.memory_space<vmem>>, vector<1x128x128xbf16>
    %16 = vector.shape_cast %15 : vector<1x128x128xbf16> to vector<128x128xbf16>
    %cst_17 = arith.constant dense<0.000000e+00> : vector<8x128xf32>
    %17 = tpu.matmul %14, %16, %cst_17 {dimension_numbers = #tpu.dot_dimension_numbers<[1], [0], [0], [1], [0, 0, 1, 1], [], []>} : vector<8x128xbf16>, vector<128x128xbf16>, vector<8x128xf32> -> vector<8x128xf32>
    %18 = arith.addf %12, %17 : vector<8x128xf32>
    %c0_18 = arith.constant 0 : index
    %c0_19 = arith.constant 0 : index
    %19 = vector.load %arg4[%c0_18, %c0_19] : memref<1x128xf32, #tpu.memory_space<vmem>>, vector<1x128xf32>
    %20 = vector.broadcast %19 : vector<1x128xf32> to vector<8x128xf32>
    %21 = arith.mulf %18, %20 : vector<8x128xf32>
    %c0_20 = arith.constant 0 : index
    %c0_21 = arith.constant 0 : index
    %22 = vector.load %arg5[%c0_20, %c0_21] : memref<1x128xf32, #tpu.memory_space<vmem>>, vector<1x128xf32>
    %23 = vector.broadcast %22 : vector<1x128xf32> to vector<8x128xf32>
    %24 = arith.addf %21, %23 : vector<8x128xf32>
    %c0_22 = arith.constant 0 : index
    %c0_23 = arith.constant 0 : index
    %c0_24 = arith.constant 0 : index
    %25 = vector.load %arg6[%c0_22, %c0_23, %c0_24] : memref<1x8x128xbf16, #tpu.memory_space<vmem>>, vector<1x8x128xbf16>
    %26 = vector.shape_cast %25 : vector<1x8x128xbf16> to vector<8x128xbf16>
    %27 = arith.extf %26 : vector<8x128xbf16> to vector<8x128xf32>
    %28 = arith.addf %24, %27 : vector<8x128xf32>
    %29 = arith.truncf %28 : vector<8x128xf32> to vector<8x128xbf16>
    %c0_25 = arith.constant 0 : index
    %c0_26 = arith.constant 0 : index
    %c0_27 = arith.constant 0 : index
    %30 = vector.load %arg7[%c0_25, %c0_26, %c0_27] : memref<1x8x128xbf16, #tpu.memory_space<vmem>>, vector<1x8x128xbf16>
    %31 = vector.shape_cast %30 : vector<1x8x128xbf16> to vector<8x128xbf16>
    %32 = vector.shape_cast %29 : vector<8x128xbf16> to vector<1x8x128xbf16>
    tpu.vector_store %arg7[%c0_25, %c0_26, %c0_27], %32 {strides = array<i32>} : memref<1x8x128xbf16, #tpu.memory_space<vmem>>, vector<1x8x128xbf16>,
    return
  }
  func.func @transform_0(%arg0: i32, %arg1: i32) -> (i32, i32, i32) {
    %c0_i32 = arith.constant 0 : i32
    %c0_i32_0 = arith.constant 0 : i32
    %c0_i32_1 = arith.constant 0 : i32
    return %arg0, %c0_i32, %c0_i32_0 : i32, i32, i32
  }
  func.func @transform_1(%arg0: i32, %arg1: i32) -> (i32, i32, i32) {
    %c0_i32 = arith.constant 0 : i32
    %c0_i32_0 = arith.constant 0 : i32
    %c0_i32_1 = arith.constant 0 : i32
    return %c0_i32, %c0_i32_0, %arg1 : i32, i32, i32
  }
  func.func @transform_2(%arg0: i32, %arg1: i32) -> (i32, i32) {
    %c0_i32 = arith.constant 0 : i32
    %c0_i32_0 = arith.constant 0 : i32
    return %c0_i32, %arg1 : i32, i32
  }
  func.func @transform_3(%arg0: i32, %arg1: i32) -> (i32, i32) {
    %c0_i32 = arith.constant 0 : i32
    %c0_i32_0 = arith.constant 0 : i32
    return %c0_i32, %arg1 : i32, i32
  }
  func.func @transform_4(%arg0: i32, %arg1: i32) -> (i32, i32, i32) {
    %c0_i32 = arith.constant 0 : i32
    %c0_i32_0 = arith.constant 0 : i32
    return %arg0, %c0_i32, %arg1 : i32, i32, i32
  }
  func.func @transform_5(%arg0: i32, %arg1: i32) -> (i32, i32, i32) {
    %c0_i32 = arith.constant 0 : i32
    %c0_i32_0 = arith.constant 0 : i32
    return %arg0, %c0_i32, %arg1 : i32, i32, i32
  }
}

module attributes {stable_mosaic.version = 11 : i64} {
  func.func @_conv_bn_kernel(%arg0: i32, %arg1: i32, %arg2: memref<1x6x256xbf16, #tpu.memory_space<vmem>>, %arg3: memref<3x256x128xbf16, #tpu.memory_space<vmem>>, %arg4: memref<1x128xf32, #tpu.memory_space<vmem>>, %arg5: memref<1x128xf32, #tpu.memory_space<vmem>>, %arg6: memref<1x4x128xbf16, #tpu.memory_space<vmem>>, %arg7: memref<1x4x128xbf16, #tpu.memory_space<vmem>>) attributes {dimension_semantics = [#tpu.dimension_semantics<parallel>, #tpu.dimension_semantics<parallel>], iteration_bounds = array<i64: 2, 2>, scalar_prefetch = 0 : i64, scratch_operands = 0 : i64, tpu.core_type = #tpu.core_type<tc>, window_params = [{transform_indices = @transform_0, window_bounds = array<i64: 1, 6, 256>}, {transform_indices = @transform_1, window_bounds = array<i64: 3, 256, 128>}, {transform_indices = @transform_2, window_bounds = array<i64: 1, 128>}, {transform_indices = @transform_3, window_bounds = array<i64: 1, 128>}, {transform_indices = @transform_4, window_bounds = array<i64: 1, 4, 128>}, {transform_indices = @transform_5, window_bounds = array<i64: 1, 4, 128>}]} {
    %cst = arith.constant 0.000000e+00 : f32
    %0 = vector.broadcast %cst : f32 to vector<4x128xf32>
    %c0 = arith.constant 0 : index
    %c0_0 = arith.constant 0 : index
    %c0_1 = arith.constant 0 : index
    %1 = vector.load %arg2[%c0, %c0_0, %c0_1] : memref<1x6x256xbf16, #tpu.memory_space<vmem>>, vector<1x4x256xbf16>
    %2 = vector.shape_cast %1 : vector<1x4x256xbf16> to vector<4x256xbf16>
    %c0_2 = arith.constant 0 : index
    %c0_3 = arith.constant 0 : index
    %c0_4 = arith.constant 0 : index
    %3 = vector.load %arg3[%c0_2, %c0_3, %c0_4] : memref<3x256x128xbf16, #tpu.memory_space<vmem>>, vector<1x256x128xbf16>
    %4 = vector.shape_cast %3 : vector<1x256x128xbf16> to vector<256x128xbf16>
    %cst_5 = arith.constant dense<0.000000e+00> : vector<4x128xf32>
    %5 = tpu.matmul %2, %4, %cst_5 {dimension_numbers = #tpu.dot_dimension_numbers<[1], [0], [0], [1], [0, 0, 1, 1], [], []>} : vector<4x256xbf16>, vector<256x128xbf16>, vector<4x128xf32> -> vector<4x128xf32>
    %6 = arith.addf %0, %5 : vector<4x128xf32>
    %c0_6 = arith.constant 0 : index
    %c1 = arith.constant 1 : index
    %c0_7 = arith.constant 0 : index
    %7 = vector.load %arg2[%c0_6, %c1, %c0_7] : memref<1x6x256xbf16, #tpu.memory_space<vmem>>, vector<1x4x256xbf16>
    %8 = vector.shape_cast %7 : vector<1x4x256xbf16> to vector<4x256xbf16>
    %c1_8 = arith.constant 1 : index
    %c0_9 = arith.constant 0 : index
    %c0_10 = arith.constant 0 : index
    %9 = vector.load %arg3[%c1_8, %c0_9, %c0_10] : memref<3x256x128xbf16, #tpu.memory_space<vmem>>, vector<1x256x128xbf16>
    %10 = vector.shape_cast %9 : vector<1x256x128xbf16> to vector<256x128xbf16>
    %cst_11 = arith.constant dense<0.000000e+00> : vector<4x128xf32>
    %11 = tpu.matmul %8, %10, %cst_11 {dimension_numbers = #tpu.dot_dimension_numbers<[1], [0], [0], [1], [0, 0, 1, 1], [], []>} : vector<4x256xbf16>, vector<256x128xbf16>, vector<4x128xf32> -> vector<4x128xf32>
    %12 = arith.addf %6, %11 : vector<4x128xf32>
    %c0_12 = arith.constant 0 : index
    %c2 = arith.constant 2 : index
    %c0_13 = arith.constant 0 : index
    %13 = vector.load %arg2[%c0_12, %c2, %c0_13] : memref<1x6x256xbf16, #tpu.memory_space<vmem>>, vector<1x4x256xbf16>
    %14 = vector.shape_cast %13 : vector<1x4x256xbf16> to vector<4x256xbf16>
    %c2_14 = arith.constant 2 : index
    %c0_15 = arith.constant 0 : index
    %c0_16 = arith.constant 0 : index
    %15 = vector.load %arg3[%c2_14, %c0_15, %c0_16] : memref<3x256x128xbf16, #tpu.memory_space<vmem>>, vector<1x256x128xbf16>
    %16 = vector.shape_cast %15 : vector<1x256x128xbf16> to vector<256x128xbf16>
    %cst_17 = arith.constant dense<0.000000e+00> : vector<4x128xf32>
    %17 = tpu.matmul %14, %16, %cst_17 {dimension_numbers = #tpu.dot_dimension_numbers<[1], [0], [0], [1], [0, 0, 1, 1], [], []>} : vector<4x256xbf16>, vector<256x128xbf16>, vector<4x128xf32> -> vector<4x128xf32>
    %18 = arith.addf %12, %17 : vector<4x128xf32>
    %c0_18 = arith.constant 0 : index
    %c0_19 = arith.constant 0 : index
    %19 = vector.load %arg4[%c0_18, %c0_19] : memref<1x128xf32, #tpu.memory_space<vmem>>, vector<1x128xf32>
    %20 = vector.broadcast %19 : vector<1x128xf32> to vector<4x128xf32>
    %21 = arith.mulf %18, %20 : vector<4x128xf32>
    %c0_20 = arith.constant 0 : index
    %c0_21 = arith.constant 0 : index
    %22 = vector.load %arg5[%c0_20, %c0_21] : memref<1x128xf32, #tpu.memory_space<vmem>>, vector<1x128xf32>
    %23 = vector.broadcast %22 : vector<1x128xf32> to vector<4x128xf32>
    %24 = arith.addf %21, %23 : vector<4x128xf32>
    %c0_22 = arith.constant 0 : index
    %c0_23 = arith.constant 0 : index
    %c0_24 = arith.constant 0 : index
    %25 = vector.load %arg6[%c0_22, %c0_23, %c0_24] : memref<1x4x128xbf16, #tpu.memory_space<vmem>>, vector<1x4x128xbf16>
    %26 = vector.shape_cast %25 : vector<1x4x128xbf16> to vector<4x128xbf16>
    %27 = arith.extf %26 : vector<4x128xbf16> to vector<4x128xf32>
    %28 = arith.addf %24, %27 : vector<4x128xf32>
    %29 = arith.truncf %28 : vector<4x128xf32> to vector<4x128xbf16>
    %c0_25 = arith.constant 0 : index
    %c0_26 = arith.constant 0 : index
    %c0_27 = arith.constant 0 : index
    %30 = vector.load %arg7[%c0_25, %c0_26, %c0_27] : memref<1x4x128xbf16, #tpu.memory_space<vmem>>, vector<1x4x128xbf16>
    %31 = vector.shape_cast %30 : vector<1x4x128xbf16> to vector<4x128xbf16>
    %32 = vector.shape_cast %29 : vector<4x128xbf16> to vector<1x4x128xbf16>
    tpu.vector_store %arg7[%c0_25, %c0_26, %c0_27], %32 {strides = array<i32>} : memref<1x4x128xbf16, #tpu.memory_space<vmem>>, vector<1x4x128xbf16>,
    return
  }
  func.func @transform_0(%arg0: i32, %arg1: i32) -> (i32, i32, i32) {
    %c0_i32 = arith.constant 0 : i32
    %c0_i32_0 = arith.constant 0 : i32
    %c0_i32_1 = arith.constant 0 : i32
    return %arg0, %c0_i32, %c0_i32_0 : i32, i32, i32
  }
  func.func @transform_1(%arg0: i32, %arg1: i32) -> (i32, i32, i32) {
    %c0_i32 = arith.constant 0 : i32
    %c0_i32_0 = arith.constant 0 : i32
    %c0_i32_1 = arith.constant 0 : i32
    return %c0_i32, %c0_i32_0, %arg1 : i32, i32, i32
  }
  func.func @transform_2(%arg0: i32, %arg1: i32) -> (i32, i32) {
    %c0_i32 = arith.constant 0 : i32
    %c0_i32_0 = arith.constant 0 : i32
    return %c0_i32, %arg1 : i32, i32
  }
  func.func @transform_3(%arg0: i32, %arg1: i32) -> (i32, i32) {
    %c0_i32 = arith.constant 0 : i32
    %c0_i32_0 = arith.constant 0 : i32
    return %c0_i32, %arg1 : i32, i32
  }
  func.func @transform_4(%arg0: i32, %arg1: i32) -> (i32, i32, i32) {
    %c0_i32 = arith.constant 0 : i32
    %c0_i32_0 = arith.constant 0 : i32
    return %arg0, %c0_i32, %arg1 : i32, i32, i32
  }
  func.func @transform_5(%arg0: i32, %arg1: i32) -> (i32, i32, i32) {
    %c0_i32 = arith.constant 0 : i32
    %c0_i32_0 = arith.constant 0 : i32
    return %arg0, %c0_i32, %arg1 : i32, i32, i32
  }
}

module attributes {stable_mosaic.version = 11 : i64} {
  func.func @_conv_bn_kernel(%arg0: i32, %arg1: i32, %arg2: memref<1x6x256xbf16, #tpu.memory_space<vmem>>, %arg3: memref<3x256x128xbf16, #tpu.memory_space<vmem>>, %arg4: memref<1x128xf32, #tpu.memory_space<vmem>>, %arg5: memref<1x128xf32, #tpu.memory_space<vmem>>, %arg6: memref<1x4x128xbf16, #tpu.memory_space<vmem>>) attributes {dimension_semantics = [#tpu.dimension_semantics<parallel>, #tpu.dimension_semantics<parallel>], iteration_bounds = array<i64: 2, 2>, scalar_prefetch = 0 : i64, scratch_operands = 0 : i64, tpu.core_type = #tpu.core_type<tc>, window_params = [{transform_indices = @transform_0, window_bounds = array<i64: 1, 6, 256>}, {transform_indices = @transform_1, window_bounds = array<i64: 3, 256, 128>}, {transform_indices = @transform_2, window_bounds = array<i64: 1, 128>}, {transform_indices = @transform_3, window_bounds = array<i64: 1, 128>}, {transform_indices = @transform_4, window_bounds = array<i64: 1, 4, 128>}]} {
    %cst = arith.constant 0.000000e+00 : f32
    %0 = vector.broadcast %cst : f32 to vector<4x128xf32>
    %c0 = arith.constant 0 : index
    %c0_0 = arith.constant 0 : index
    %c0_1 = arith.constant 0 : index
    %1 = vector.load %arg2[%c0, %c0_0, %c0_1] : memref<1x6x256xbf16, #tpu.memory_space<vmem>>, vector<1x4x256xbf16>
    %2 = vector.shape_cast %1 : vector<1x4x256xbf16> to vector<4x256xbf16>
    %c0_2 = arith.constant 0 : index
    %c0_3 = arith.constant 0 : index
    %c0_4 = arith.constant 0 : index
    %3 = vector.load %arg3[%c0_2, %c0_3, %c0_4] : memref<3x256x128xbf16, #tpu.memory_space<vmem>>, vector<1x256x128xbf16>
    %4 = vector.shape_cast %3 : vector<1x256x128xbf16> to vector<256x128xbf16>
    %cst_5 = arith.constant dense<0.000000e+00> : vector<4x128xf32>
    %5 = tpu.matmul %2, %4, %cst_5 {dimension_numbers = #tpu.dot_dimension_numbers<[1], [0], [0], [1], [0, 0, 1, 1], [], []>} : vector<4x256xbf16>, vector<256x128xbf16>, vector<4x128xf32> -> vector<4x128xf32>
    %6 = arith.addf %0, %5 : vector<4x128xf32>
    %c0_6 = arith.constant 0 : index
    %c1 = arith.constant 1 : index
    %c0_7 = arith.constant 0 : index
    %7 = vector.load %arg2[%c0_6, %c1, %c0_7] : memref<1x6x256xbf16, #tpu.memory_space<vmem>>, vector<1x4x256xbf16>
    %8 = vector.shape_cast %7 : vector<1x4x256xbf16> to vector<4x256xbf16>
    %c1_8 = arith.constant 1 : index
    %c0_9 = arith.constant 0 : index
    %c0_10 = arith.constant 0 : index
    %9 = vector.load %arg3[%c1_8, %c0_9, %c0_10] : memref<3x256x128xbf16, #tpu.memory_space<vmem>>, vector<1x256x128xbf16>
    %10 = vector.shape_cast %9 : vector<1x256x128xbf16> to vector<256x128xbf16>
    %cst_11 = arith.constant dense<0.000000e+00> : vector<4x128xf32>
    %11 = tpu.matmul %8, %10, %cst_11 {dimension_numbers = #tpu.dot_dimension_numbers<[1], [0], [0], [1], [0, 0, 1, 1], [], []>} : vector<4x256xbf16>, vector<256x128xbf16>, vector<4x128xf32> -> vector<4x128xf32>
    %12 = arith.addf %6, %11 : vector<4x128xf32>
    %c0_12 = arith.constant 0 : index
    %c2 = arith.constant 2 : index
    %c0_13 = arith.constant 0 : index
    %13 = vector.load %arg2[%c0_12, %c2, %c0_13] : memref<1x6x256xbf16, #tpu.memory_space<vmem>>, vector<1x4x256xbf16>
    %14 = vector.shape_cast %13 : vector<1x4x256xbf16> to vector<4x256xbf16>
    %c2_14 = arith.constant 2 : index
    %c0_15 = arith.constant 0 : index
    %c0_16 = arith.constant 0 : index
    %15 = vector.load %arg3[%c2_14, %c0_15, %c0_16] : memref<3x256x128xbf16, #tpu.memory_space<vmem>>, vector<1x256x128xbf16>
    %16 = vector.shape_cast %15 : vector<1x256x128xbf16> to vector<256x128xbf16>
    %cst_17 = arith.constant dense<0.000000e+00> : vector<4x128xf32>
    %17 = tpu.matmul %14, %16, %cst_17 {dimension_numbers = #tpu.dot_dimension_numbers<[1], [0], [0], [1], [0, 0, 1, 1], [], []>} : vector<4x256xbf16>, vector<256x128xbf16>, vector<4x128xf32> -> vector<4x128xf32>
    %18 = arith.addf %12, %17 : vector<4x128xf32>
    %c0_18 = arith.constant 0 : index
    %c0_19 = arith.constant 0 : index
    %19 = vector.load %arg4[%c0_18, %c0_19] : memref<1x128xf32, #tpu.memory_space<vmem>>, vector<1x128xf32>
    %20 = vector.broadcast %19 : vector<1x128xf32> to vector<4x128xf32>
    %21 = arith.mulf %18, %20 : vector<4x128xf32>
    %c0_20 = arith.constant 0 : index
    %c0_21 = arith.constant 0 : index
    %22 = vector.load %arg5[%c0_20, %c0_21] : memref<1x128xf32, #tpu.memory_space<vmem>>, vector<1x128xf32>
    %23 = vector.broadcast %22 : vector<1x128xf32> to vector<4x128xf32>
    %24 = arith.addf %21, %23 : vector<4x128xf32>
    %cst_22 = arith.constant 0.000000e+00 : f32
    %25 = vector.broadcast %cst_22 : f32 to vector<4x128xf32>
    %26 = arith.maximumf %24, %25 : vector<4x128xf32>
    %27 = arith.truncf %26 : vector<4x128xf32> to vector<4x128xbf16>
    %c0_23 = arith.constant 0 : index
    %c0_24 = arith.constant 0 : index
    %c0_25 = arith.constant 0 : index
    %28 = vector.load %arg6[%c0_23, %c0_24, %c0_25] : memref<1x4x128xbf16, #tpu.memory_space<vmem>>, vector<1x4x128xbf16>
    %29 = vector.shape_cast %28 : vector<1x4x128xbf16> to vector<4x128xbf16>
    %30 = vector.shape_cast %27 : vector<4x128xbf16> to vector<1x4x128xbf16>
    tpu.vector_store %arg6[%c0_23, %c0_24, %c0_25], %30 {strides = array<i32>} : memref<1x4x128xbf16, #tpu.memory_space<vmem>>, vector<1x4x128xbf16>,
    return
  }
  func.func @transform_0(%arg0: i32, %arg1: i32) -> (i32, i32, i32) {
    %c0_i32 = arith.constant 0 : i32
    %c0_i32_0 = arith.constant 0 : i32
    %c0_i32_1 = arith.constant 0 : i32
    return %arg0, %c0_i32, %c0_i32_0 : i32, i32, i32
  }
  func.func @transform_1(%arg0: i32, %arg1: i32) -> (i32, i32, i32) {
    %c0_i32 = arith.constant 0 : i32
    %c0_i32_0 = arith.constant 0 : i32
    %c0_i32_1 = arith.constant 0 : i32
    return %c0_i32, %c0_i32_0, %arg1 : i32, i32, i32
  }
  func.func @transform_2(%arg0: i32, %arg1: i32) -> (i32, i32) {
    %c0_i32 = arith.constant 0 : i32
    %c0_i32_0 = arith.constant 0 : i32
    return %c0_i32, %arg1 : i32, i32
  }
  func.func @transform_3(%arg0: i32, %arg1: i32) -> (i32, i32) {
    %c0_i32 = arith.constant 0 : i32
    %c0_i32_0 = arith.constant 0 : i32
    return %c0_i32, %arg1 : i32, i32
  }
  func.func @transform_4(%arg0: i32, %arg1: i32) -> (i32, i32, i32) {
    %c0_i32 = arith.constant 0 : i32
    %c0_i32_0 = arith.constant 0 : i32
    return %arg0, %c0_i32, %arg1 : i32, i32, i32
  }
}

module attributes {stable_mosaic.version = 11 : i64} {
  func.func @_conv_bn_kernel(%arg0: i32, %arg1: i32, %arg2: memref<1x2x512xbf16, #tpu.memory_space<vmem>>, %arg3: memref<1x512x128xbf16, #tpu.memory_space<vmem>>, %arg4: memref<1x128xf32, #tpu.memory_space<vmem>>, %arg5: memref<1x128xf32, #tpu.memory_space<vmem>>, %arg6: memref<1x2x128xbf16, #tpu.memory_space<vmem>>) attributes {dimension_semantics = [#tpu.dimension_semantics<parallel>, #tpu.dimension_semantics<parallel>], iteration_bounds = array<i64: 2, 4>, scalar_prefetch = 0 : i64, scratch_operands = 0 : i64, tpu.core_type = #tpu.core_type<tc>, window_params = [{transform_indices = @transform_0, window_bounds = array<i64: 1, 2, 512>}, {transform_indices = @transform_1, window_bounds = array<i64: 1, 512, 128>}, {transform_indices = @transform_2, window_bounds = array<i64: 1, 128>}, {transform_indices = @transform_3, window_bounds = array<i64: 1, 128>}, {transform_indices = @transform_4, window_bounds = array<i64: 1, 2, 128>}]} {
    %cst = arith.constant 0.000000e+00 : f32
    %0 = vector.broadcast %cst : f32 to vector<2x128xf32>
    %c0 = arith.constant 0 : index
    %c0_0 = arith.constant 0 : index
    %c0_1 = arith.constant 0 : index
    %1 = vector.load %arg2[%c0, %c0_0, %c0_1] : memref<1x2x512xbf16, #tpu.memory_space<vmem>>, vector<1x2x512xbf16>
    %2 = vector.shape_cast %1 : vector<1x2x512xbf16> to vector<2x512xbf16>
    %c0_2 = arith.constant 0 : index
    %c0_3 = arith.constant 0 : index
    %c0_4 = arith.constant 0 : index
    %3 = vector.load %arg3[%c0_2, %c0_3, %c0_4] : memref<1x512x128xbf16, #tpu.memory_space<vmem>>, vector<1x512x128xbf16>
    %4 = vector.shape_cast %3 : vector<1x512x128xbf16> to vector<512x128xbf16>
    %cst_5 = arith.constant dense<0.000000e+00> : vector<2x128xf32>
    %5 = tpu.matmul %2, %4, %cst_5 {dimension_numbers = #tpu.dot_dimension_numbers<[1], [0], [0], [1], [0, 0, 1, 1], [], []>} : vector<2x512xbf16>, vector<512x128xbf16>, vector<2x128xf32> -> vector<2x128xf32>
    %6 = arith.addf %0, %5 : vector<2x128xf32>
    %c0_6 = arith.constant 0 : index
    %c0_7 = arith.constant 0 : index
    %7 = vector.load %arg4[%c0_6, %c0_7] : memref<1x128xf32, #tpu.memory_space<vmem>>, vector<1x128xf32>
    %8 = vector.broadcast %7 : vector<1x128xf32> to vector<2x128xf32>
    %9 = arith.mulf %6, %8 : vector<2x128xf32>
    %c0_8 = arith.constant 0 : index
    %c0_9 = arith.constant 0 : index
    %10 = vector.load %arg5[%c0_8, %c0_9] : memref<1x128xf32, #tpu.memory_space<vmem>>, vector<1x128xf32>
    %11 = vector.broadcast %10 : vector<1x128xf32> to vector<2x128xf32>
    %12 = arith.addf %9, %11 : vector<2x128xf32>
    %13 = arith.truncf %12 : vector<2x128xf32> to vector<2x128xbf16>
    %c0_10 = arith.constant 0 : index
    %c0_11 = arith.constant 0 : index
    %c0_12 = arith.constant 0 : index
    %14 = vector.load %arg6[%c0_10, %c0_11, %c0_12] : memref<1x2x128xbf16, #tpu.memory_space<vmem>>, vector<1x2x128xbf16>
    %15 = vector.shape_cast %14 : vector<1x2x128xbf16> to vector<2x128xbf16>
    %16 = vector.shape_cast %13 : vector<2x128xbf16> to vector<1x2x128xbf16>
    tpu.vector_store %arg6[%c0_10, %c0_11, %c0_12], %16 {strides = array<i32>} : memref<1x2x128xbf16, #tpu.memory_space<vmem>>, vector<1x2x128xbf16>,
    return
  }
  func.func @transform_0(%arg0: i32, %arg1: i32) -> (i32, i32, i32) {
    %c0_i32 = arith.constant 0 : i32
    %c0_i32_0 = arith.constant 0 : i32
    %c0_i32_1 = arith.constant 0 : i32
    return %arg0, %c0_i32, %c0_i32_0 : i32, i32, i32
  }
  func.func @transform_1(%arg0: i32, %arg1: i32) -> (i32, i32, i32) {
    %c0_i32 = arith.constant 0 : i32
    %c0_i32_0 = arith.constant 0 : i32
    %c0_i32_1 = arith.constant 0 : i32
    return %c0_i32, %c0_i32_0, %arg1 : i32, i32, i32
  }
  func.func @transform_2(%arg0: i32, %arg1: i32) -> (i32, i32) {
    %c0_i32 = arith.constant 0 : i32
    %c0_i32_0 = arith.constant 0 : i32
    return %c0_i32, %arg1 : i32, i32
  }
  func.func @transform_3(%arg0: i32, %arg1: i32) -> (i32, i32) {
    %c0_i32 = arith.constant 0 : i32
    %c0_i32_0 = arith.constant 0 : i32
    return %c0_i32, %arg1 : i32, i32
  }
  func.func @transform_4(%arg0: i32, %arg1: i32) -> (i32, i32, i32) {
    %c0_i32 = arith.constant 0 : i32
    %c0_i32_0 = arith.constant 0 : i32
    return %arg0, %c0_i32, %arg1 : i32, i32, i32
  }
}

module attributes {stable_mosaic.version = 11 : i64} {
  func.func @_conv_bn_kernel(%arg0: i32, %arg1: i32, %arg2: memref<1x3x512xbf16, #tpu.memory_space<vmem>>, %arg3: memref<2x512x128xbf16, #tpu.memory_space<vmem>>, %arg4: memref<1x128xf32, #tpu.memory_space<vmem>>, %arg5: memref<1x128xf32, #tpu.memory_space<vmem>>, %arg6: memref<1x2x128xbf16, #tpu.memory_space<vmem>>) attributes {dimension_semantics = [#tpu.dimension_semantics<parallel>, #tpu.dimension_semantics<parallel>], iteration_bounds = array<i64: 2, 4>, scalar_prefetch = 0 : i64, scratch_operands = 0 : i64, tpu.core_type = #tpu.core_type<tc>, window_params = [{transform_indices = @transform_0, window_bounds = array<i64: 1, 3, 512>}, {transform_indices = @transform_1, window_bounds = array<i64: 2, 512, 128>}, {transform_indices = @transform_2, window_bounds = array<i64: 1, 128>}, {transform_indices = @transform_3, window_bounds = array<i64: 1, 128>}, {transform_indices = @transform_4, window_bounds = array<i64: 1, 2, 128>}]} {
    %cst = arith.constant 0.000000e+00 : f32
    %0 = vector.broadcast %cst : f32 to vector<2x128xf32>
    %c0 = arith.constant 0 : index
    %c0_0 = arith.constant 0 : index
    %c0_1 = arith.constant 0 : index
    %1 = vector.load %arg2[%c0, %c0_0, %c0_1] : memref<1x3x512xbf16, #tpu.memory_space<vmem>>, vector<1x2x512xbf16>
    %2 = vector.shape_cast %1 : vector<1x2x512xbf16> to vector<2x512xbf16>
    %c0_2 = arith.constant 0 : index
    %c0_3 = arith.constant 0 : index
    %c0_4 = arith.constant 0 : index
    %3 = vector.load %arg3[%c0_2, %c0_3, %c0_4] : memref<2x512x128xbf16, #tpu.memory_space<vmem>>, vector<1x512x128xbf16>
    %4 = vector.shape_cast %3 : vector<1x512x128xbf16> to vector<512x128xbf16>
    %cst_5 = arith.constant dense<0.000000e+00> : vector<2x128xf32>
    %5 = tpu.matmul %2, %4, %cst_5 {dimension_numbers = #tpu.dot_dimension_numbers<[1], [0], [0], [1], [0, 0, 1, 1], [], []>} : vector<2x512xbf16>, vector<512x128xbf16>, vector<2x128xf32> -> vector<2x128xf32>
    %6 = arith.addf %0, %5 : vector<2x128xf32>
    %c0_6 = arith.constant 0 : index
    %c1 = arith.constant 1 : index
    %c0_7 = arith.constant 0 : index
    %7 = vector.load %arg2[%c0_6, %c1, %c0_7] : memref<1x3x512xbf16, #tpu.memory_space<vmem>>, vector<1x2x512xbf16>
    %8 = vector.shape_cast %7 : vector<1x2x512xbf16> to vector<2x512xbf16>
    %c1_8 = arith.constant 1 : index
    %c0_9 = arith.constant 0 : index
    %c0_10 = arith.constant 0 : index
    %9 = vector.load %arg3[%c1_8, %c0_9, %c0_10] : memref<2x512x128xbf16, #tpu.memory_space<vmem>>, vector<1x512x128xbf16>
    %10 = vector.shape_cast %9 : vector<1x512x128xbf16> to vector<512x128xbf16>
    %cst_11 = arith.constant dense<0.000000e+00> : vector<2x128xf32>
    %11 = tpu.matmul %8, %10, %cst_11 {dimension_numbers = #tpu.dot_dimension_numbers<[1], [0], [0], [1], [0, 0, 1, 1], [], []>} : vector<2x512xbf16>, vector<512x128xbf16>, vector<2x128xf32> -> vector<2x128xf32>
    %12 = arith.addf %6, %11 : vector<2x128xf32>
    %c0_12 = arith.constant 0 : index
    %c0_13 = arith.constant 0 : index
    %13 = vector.load %arg4[%c0_12, %c0_13] : memref<1x128xf32, #tpu.memory_space<vmem>>, vector<1x128xf32>
    %14 = vector.broadcast %13 : vector<1x128xf32> to vector<2x128xf32>
    %15 = arith.mulf %12, %14 : vector<2x128xf32>
    %c0_14 = arith.constant 0 : index
    %c0_15 = arith.constant 0 : index
    %16 = vector.load %arg5[%c0_14, %c0_15] : memref<1x128xf32, #tpu.memory_space<vmem>>, vector<1x128xf32>
    %17 = vector.broadcast %16 : vector<1x128xf32> to vector<2x128xf32>
    %18 = arith.addf %15, %17 : vector<2x128xf32>
    %cst_16 = arith.constant 0.000000e+00 : f32
    %19 = vector.broadcast %cst_16 : f32 to vector<2x128xf32>
    %20 = arith.maximumf %18, %19 : vector<2x128xf32>
    %21 = arith.truncf %20 : vector<2x128xf32> to vector<2x128xbf16>
    %c0_17 = arith.constant 0 : index
    %c0_18 = arith.constant 0 : index
    %c0_19 = arith.constant 0 : index
    %22 = vector.load %arg6[%c0_17, %c0_18, %c0_19] : memref<1x2x128xbf16, #tpu.memory_space<vmem>>, vector<1x2x128xbf16>
    %23 = vector.shape_cast %22 : vector<1x2x128xbf16> to vector<2x128xbf16>
    %24 = vector.shape_cast %21 : vector<2x128xbf16> to vector<1x2x128xbf16>
    tpu.vector_store %arg6[%c0_17, %c0_18, %c0_19], %24 {strides = array<i32>} : memref<1x2x128xbf16, #tpu.memory_space<vmem>>, vector<1x2x128xbf16>,
    return
  }
  func.func @transform_0(%arg0: i32, %arg1: i32) -> (i32, i32, i32) {
    %c0_i32 = arith.constant 0 : i32
    %c0_i32_0 = arith.constant 0 : i32
    %c0_i32_1 = arith.constant 0 : i32
    return %arg0, %c0_i32, %c0_i32_0 : i32, i32, i32
  }
  func.func @transform_1(%arg0: i32, %arg1: i32) -> (i32, i32, i32) {
    %c0_i32 = arith.constant 0 : i32
    %c0_i32_0 = arith.constant 0 : i32
    %c0_i32_1 = arith.constant 0 : i32
    return %c0_i32, %c0_i32_0, %arg1 : i32, i32, i32
  }
  func.func @transform_2(%arg0: i32, %arg1: i32) -> (i32, i32) {
    %c0_i32 = arith.constant 0 : i32
    %c0_i32_0 = arith.constant 0 : i32
    return %c0_i32, %arg1 : i32, i32
  }
  func.func @transform_3(%arg0: i32, %arg1: i32) -> (i32, i32) {
    %c0_i32 = arith.constant 0 : i32
    %c0_i32_0 = arith.constant 0 : i32
    return %c0_i32, %arg1 : i32, i32
  }
  func.func @transform_4(%arg0: i32, %arg1: i32) -> (i32, i32, i32) {
    %c0_i32 = arith.constant 0 : i32
    %c0_i32_0 = arith.constant 0 : i32
    return %arg0, %c0_i32, %arg1 : i32, i32, i32
  }
}

module attributes {stable_mosaic.version = 11 : i64} {
  func.func @_conv_bn_kernel(%arg0: i32, %arg1: i32, %arg2: memref<1x4x512xbf16, #tpu.memory_space<vmem>>, %arg3: memref<3x512x128xbf16, #tpu.memory_space<vmem>>, %arg4: memref<1x128xf32, #tpu.memory_space<vmem>>, %arg5: memref<1x128xf32, #tpu.memory_space<vmem>>, %arg6: memref<1x2x128xbf16, #tpu.memory_space<vmem>>, %arg7: memref<1x2x128xbf16, #tpu.memory_space<vmem>>) attributes {dimension_semantics = [#tpu.dimension_semantics<parallel>, #tpu.dimension_semantics<parallel>], iteration_bounds = array<i64: 2, 4>, scalar_prefetch = 0 : i64, scratch_operands = 0 : i64, tpu.core_type = #tpu.core_type<tc>, window_params = [{transform_indices = @transform_0, window_bounds = array<i64: 1, 4, 512>}, {transform_indices = @transform_1, window_bounds = array<i64: 3, 512, 128>}, {transform_indices = @transform_2, window_bounds = array<i64: 1, 128>}, {transform_indices = @transform_3, window_bounds = array<i64: 1, 128>}, {transform_indices = @transform_4, window_bounds = array<i64: 1, 2, 128>}, {transform_indices = @transform_5, window_bounds = array<i64: 1, 2, 128>}]} {
    %cst = arith.constant 0.000000e+00 : f32
    %0 = vector.broadcast %cst : f32 to vector<2x128xf32>
    %c0 = arith.constant 0 : index
    %c0_0 = arith.constant 0 : index
    %c0_1 = arith.constant 0 : index
    %1 = vector.load %arg2[%c0, %c0_0, %c0_1] : memref<1x4x512xbf16, #tpu.memory_space<vmem>>, vector<1x2x512xbf16>
    %2 = vector.shape_cast %1 : vector<1x2x512xbf16> to vector<2x512xbf16>
    %c0_2 = arith.constant 0 : index
    %c0_3 = arith.constant 0 : index
    %c0_4 = arith.constant 0 : index
    %3 = vector.load %arg3[%c0_2, %c0_3, %c0_4] : memref<3x512x128xbf16, #tpu.memory_space<vmem>>, vector<1x512x128xbf16>
    %4 = vector.shape_cast %3 : vector<1x512x128xbf16> to vector<512x128xbf16>
    %cst_5 = arith.constant dense<0.000000e+00> : vector<2x128xf32>
    %5 = tpu.matmul %2, %4, %cst_5 {dimension_numbers = #tpu.dot_dimension_numbers<[1], [0], [0], [1], [0, 0, 1, 1], [], []>} : vector<2x512xbf16>, vector<512x128xbf16>, vector<2x128xf32> -> vector<2x128xf32>
    %6 = arith.addf %0, %5 : vector<2x128xf32>
    %c0_6 = arith.constant 0 : index
    %c1 = arith.constant 1 : index
    %c0_7 = arith.constant 0 : index
    %7 = vector.load %arg2[%c0_6, %c1, %c0_7] : memref<1x4x512xbf16, #tpu.memory_space<vmem>>, vector<1x2x512xbf16>
    %8 = vector.shape_cast %7 : vector<1x2x512xbf16> to vector<2x512xbf16>
    %c1_8 = arith.constant 1 : index
    %c0_9 = arith.constant 0 : index
    %c0_10 = arith.constant 0 : index
    %9 = vector.load %arg3[%c1_8, %c0_9, %c0_10] : memref<3x512x128xbf16, #tpu.memory_space<vmem>>, vector<1x512x128xbf16>
    %10 = vector.shape_cast %9 : vector<1x512x128xbf16> to vector<512x128xbf16>
    %cst_11 = arith.constant dense<0.000000e+00> : vector<2x128xf32>
    %11 = tpu.matmul %8, %10, %cst_11 {dimension_numbers = #tpu.dot_dimension_numbers<[1], [0], [0], [1], [0, 0, 1, 1], [], []>} : vector<2x512xbf16>, vector<512x128xbf16>, vector<2x128xf32> -> vector<2x128xf32>
    %12 = arith.addf %6, %11 : vector<2x128xf32>
    %c0_12 = arith.constant 0 : index
    %c2 = arith.constant 2 : index
    %c0_13 = arith.constant 0 : index
    %13 = vector.load %arg2[%c0_12, %c2, %c0_13] : memref<1x4x512xbf16, #tpu.memory_space<vmem>>, vector<1x2x512xbf16>
    %14 = vector.shape_cast %13 : vector<1x2x512xbf16> to vector<2x512xbf16>
    %c2_14 = arith.constant 2 : index
    %c0_15 = arith.constant 0 : index
    %c0_16 = arith.constant 0 : index
    %15 = vector.load %arg3[%c2_14, %c0_15, %c0_16] : memref<3x512x128xbf16, #tpu.memory_space<vmem>>, vector<1x512x128xbf16>
    %16 = vector.shape_cast %15 : vector<1x512x128xbf16> to vector<512x128xbf16>
    %cst_17 = arith.constant dense<0.000000e+00> : vector<2x128xf32>
    %17 = tpu.matmul %14, %16, %cst_17 {dimension_numbers = #tpu.dot_dimension_numbers<[1], [0], [0], [1], [0, 0, 1, 1], [], []>} : vector<2x512xbf16>, vector<512x128xbf16>, vector<2x128xf32> -> vector<2x128xf32>
    %18 = arith.addf %12, %17 : vector<2x128xf32>
    %c0_18 = arith.constant 0 : index
    %c0_19 = arith.constant 0 : index
    %19 = vector.load %arg4[%c0_18, %c0_19] : memref<1x128xf32, #tpu.memory_space<vmem>>, vector<1x128xf32>
    %20 = vector.broadcast %19 : vector<1x128xf32> to vector<2x128xf32>
    %21 = arith.mulf %18, %20 : vector<2x128xf32>
    %c0_20 = arith.constant 0 : index
    %c0_21 = arith.constant 0 : index
    %22 = vector.load %arg5[%c0_20, %c0_21] : memref<1x128xf32, #tpu.memory_space<vmem>>, vector<1x128xf32>
    %23 = vector.broadcast %22 : vector<1x128xf32> to vector<2x128xf32>
    %24 = arith.addf %21, %23 : vector<2x128xf32>
    %c0_22 = arith.constant 0 : index
    %c0_23 = arith.constant 0 : index
    %c0_24 = arith.constant 0 : index
    %25 = vector.load %arg6[%c0_22, %c0_23, %c0_24] : memref<1x2x128xbf16, #tpu.memory_space<vmem>>, vector<1x2x128xbf16>
    %26 = vector.shape_cast %25 : vector<1x2x128xbf16> to vector<2x128xbf16>
    %27 = arith.extf %26 : vector<2x128xbf16> to vector<2x128xf32>
    %28 = arith.addf %24, %27 : vector<2x128xf32>
    %29 = arith.truncf %28 : vector<2x128xf32> to vector<2x128xbf16>
    %c0_25 = arith.constant 0 : index
    %c0_26 = arith.constant 0 : index
    %c0_27 = arith.constant 0 : index
    %30 = vector.load %arg7[%c0_25, %c0_26, %c0_27] : memref<1x2x128xbf16, #tpu.memory_space<vmem>>, vector<1x2x128xbf16>
    %31 = vector.shape_cast %30 : vector<1x2x128xbf16> to vector<2x128xbf16>
    %32 = vector.shape_cast %29 : vector<2x128xbf16> to vector<1x2x128xbf16>
    tpu.vector_store %arg7[%c0_25, %c0_26, %c0_27], %32 {strides = array<i32>} : memref<1x2x128xbf16, #tpu.memory_space<vmem>>, vector<1x2x128xbf16>,
    return
  }
  func.func @transform_0(%arg0: i32, %arg1: i32) -> (i32, i32, i32) {
    %c0_i32 = arith.constant 0 : i32
    %c0_i32_0 = arith.constant 0 : i32
    %c0_i32_1 = arith.constant 0 : i32
    return %arg0, %c0_i32, %c0_i32_0 : i32, i32, i32
  }
  func.func @transform_1(%arg0: i32, %arg1: i32) -> (i32, i32, i32) {
    %c0_i32 = arith.constant 0 : i32
    %c0_i32_0 = arith.constant 0 : i32
    %c0_i32_1 = arith.constant 0 : i32
    return %c0_i32, %c0_i32_0, %arg1 : i32, i32, i32
  }
  func.func @transform_2(%arg0: i32, %arg1: i32) -> (i32, i32) {
    %c0_i32 = arith.constant 0 : i32
    %c0_i32_0 = arith.constant 0 : i32
    return %c0_i32, %arg1 : i32, i32
  }
  func.func @transform_3(%arg0: i32, %arg1: i32) -> (i32, i32) {
    %c0_i32 = arith.constant 0 : i32
    %c0_i32_0 = arith.constant 0 : i32
    return %c0_i32, %arg1 : i32, i32
  }
  func.func @transform_4(%arg0: i32, %arg1: i32) -> (i32, i32, i32) {
    %c0_i32 = arith.constant 0 : i32
    %c0_i32_0 = arith.constant 0 : i32
    return %arg0, %c0_i32, %arg1 : i32, i32, i32
  }
  func.func @transform_5(%arg0: i32, %arg1: i32) -> (i32, i32, i32) {
    %c0_i32 = arith.constant 0 : i32
    %c0_i32_0 = arith.constant 0 : i32
    return %arg0, %c0_i32, %arg1 : i32, i32, i32
  }
}

module attributes {stable_mosaic.version = 11 : i64} {
  func.func @_conv_bn_kernel(%arg0: i32, %arg1: i32, %arg2: memref<1x4x512xbf16, #tpu.memory_space<vmem>>, %arg3: memref<3x512x128xbf16, #tpu.memory_space<vmem>>, %arg4: memref<1x128xf32, #tpu.memory_space<vmem>>, %arg5: memref<1x128xf32, #tpu.memory_space<vmem>>, %arg6: memref<1x2x128xbf16, #tpu.memory_space<vmem>>) attributes {dimension_semantics = [#tpu.dimension_semantics<parallel>, #tpu.dimension_semantics<parallel>], iteration_bounds = array<i64: 2, 4>, scalar_prefetch = 0 : i64, scratch_operands = 0 : i64, tpu.core_type = #tpu.core_type<tc>, window_params = [{transform_indices = @transform_0, window_bounds = array<i64: 1, 4, 512>}, {transform_indices = @transform_1, window_bounds = array<i64: 3, 512, 128>}, {transform_indices = @transform_2, window_bounds = array<i64: 1, 128>}, {transform_indices = @transform_3, window_bounds = array<i64: 1, 128>}, {transform_indices = @transform_4, window_bounds = array<i64: 1, 2, 128>}]} {
    %cst = arith.constant 0.000000e+00 : f32
    %0 = vector.broadcast %cst : f32 to vector<2x128xf32>
    %c0 = arith.constant 0 : index
    %c0_0 = arith.constant 0 : index
    %c0_1 = arith.constant 0 : index
    %1 = vector.load %arg2[%c0, %c0_0, %c0_1] : memref<1x4x512xbf16, #tpu.memory_space<vmem>>, vector<1x2x512xbf16>
    %2 = vector.shape_cast %1 : vector<1x2x512xbf16> to vector<2x512xbf16>
    %c0_2 = arith.constant 0 : index
    %c0_3 = arith.constant 0 : index
    %c0_4 = arith.constant 0 : index
    %3 = vector.load %arg3[%c0_2, %c0_3, %c0_4] : memref<3x512x128xbf16, #tpu.memory_space<vmem>>, vector<1x512x128xbf16>
    %4 = vector.shape_cast %3 : vector<1x512x128xbf16> to vector<512x128xbf16>
    %cst_5 = arith.constant dense<0.000000e+00> : vector<2x128xf32>
    %5 = tpu.matmul %2, %4, %cst_5 {dimension_numbers = #tpu.dot_dimension_numbers<[1], [0], [0], [1], [0, 0, 1, 1], [], []>} : vector<2x512xbf16>, vector<512x128xbf16>, vector<2x128xf32> -> vector<2x128xf32>
    %6 = arith.addf %0, %5 : vector<2x128xf32>
    %c0_6 = arith.constant 0 : index
    %c1 = arith.constant 1 : index
    %c0_7 = arith.constant 0 : index
    %7 = vector.load %arg2[%c0_6, %c1, %c0_7] : memref<1x4x512xbf16, #tpu.memory_space<vmem>>, vector<1x2x512xbf16>
    %8 = vector.shape_cast %7 : vector<1x2x512xbf16> to vector<2x512xbf16>
    %c1_8 = arith.constant 1 : index
    %c0_9 = arith.constant 0 : index
    %c0_10 = arith.constant 0 : index
    %9 = vector.load %arg3[%c1_8, %c0_9, %c0_10] : memref<3x512x128xbf16, #tpu.memory_space<vmem>>, vector<1x512x128xbf16>
    %10 = vector.shape_cast %9 : vector<1x512x128xbf16> to vector<512x128xbf16>
    %cst_11 = arith.constant dense<0.000000e+00> : vector<2x128xf32>
    %11 = tpu.matmul %8, %10, %cst_11 {dimension_numbers = #tpu.dot_dimension_numbers<[1], [0], [0], [1], [0, 0, 1, 1], [], []>} : vector<2x512xbf16>, vector<512x128xbf16>, vector<2x128xf32> -> vector<2x128xf32>
    %12 = arith.addf %6, %11 : vector<2x128xf32>
    %c0_12 = arith.constant 0 : index
    %c2 = arith.constant 2 : index
    %c0_13 = arith.constant 0 : index
    %13 = vector.load %arg2[%c0_12, %c2, %c0_13] : memref<1x4x512xbf16, #tpu.memory_space<vmem>>, vector<1x2x512xbf16>
    %14 = vector.shape_cast %13 : vector<1x2x512xbf16> to vector<2x512xbf16>
    %c2_14 = arith.constant 2 : index
    %c0_15 = arith.constant 0 : index
    %c0_16 = arith.constant 0 : index
    %15 = vector.load %arg3[%c2_14, %c0_15, %c0_16] : memref<3x512x128xbf16, #tpu.memory_space<vmem>>, vector<1x512x128xbf16>
    %16 = vector.shape_cast %15 : vector<1x512x128xbf16> to vector<512x128xbf16>
    %cst_17 = arith.constant dense<0.000000e+00> : vector<2x128xf32>
    %17 = tpu.matmul %14, %16, %cst_17 {dimension_numbers = #tpu.dot_dimension_numbers<[1], [0], [0], [1], [0, 0, 1, 1], [], []>} : vector<2x512xbf16>, vector<512x128xbf16>, vector<2x128xf32> -> vector<2x128xf32>
    %18 = arith.addf %12, %17 : vector<2x128xf32>
    %c0_18 = arith.constant 0 : index
    %c0_19 = arith.constant 0 : index
    %19 = vector.load %arg4[%c0_18, %c0_19] : memref<1x128xf32, #tpu.memory_space<vmem>>, vector<1x128xf32>
    %20 = vector.broadcast %19 : vector<1x128xf32> to vector<2x128xf32>
    %21 = arith.mulf %18, %20 : vector<2x128xf32>
    %c0_20 = arith.constant 0 : index
    %c0_21 = arith.constant 0 : index
    %22 = vector.load %arg5[%c0_20, %c0_21] : memref<1x128xf32, #tpu.memory_space<vmem>>, vector<1x128xf32>
    %23 = vector.broadcast %22 : vector<1x128xf32> to vector<2x128xf32>
    %24 = arith.addf %21, %23 : vector<2x128xf32>
    %cst_22 = arith.constant 0.000000e+00 : f32
    %25 = vector.broadcast %cst_22 : f32 to vector<2x128xf32>
    %26 = arith.maximumf %24, %25 : vector<2x128xf32>
    %27 = arith.truncf %26 : vector<2x128xf32> to vector<2x128xbf16>
    %c0_23 = arith.constant 0 : index
    %c0_24 = arith.constant 0 : index
    %c0_25 = arith.constant 0 : index
    %28 = vector.load %arg6[%c0_23, %c0_24, %c0_25] : memref<1x2x128xbf16, #tpu.memory_space<vmem>>, vector<1x2x128xbf16>
    %29 = vector.shape_cast %28 : vector<1x2x128xbf16> to vector<2x128xbf16>
    %30 = vector.shape_cast %27 : vector<2x128xbf16> to vector<1x2x128xbf16>
    tpu.vector_store %arg6[%c0_23, %c0_24, %c0_25], %30 {strides = array<i32>} : memref<1x2x128xbf16, #tpu.memory_space<vmem>>, vector<1x2x128xbf16>,
    return
  }
  func.func @transform_0(%arg0: i32, %arg1: i32) -> (i32, i32, i32) {
    %c0_i32 = arith.constant 0 : i32
    %c0_i32_0 = arith.constant 0 : i32
    %c0_i32_1 = arith.constant 0 : i32
    return %arg0, %c0_i32, %c0_i32_0 : i32, i32, i32
  }
  func.func @transform_1(%arg0: i32, %arg1: i32) -> (i32, i32, i32) {
    %c0_i32 = arith.constant 0 : i32
    %c0_i32_0 = arith.constant 0 : i32
    %c0_i32_1 = arith.constant 0 : i32
    return %c0_i32, %c0_i32_0, %arg1 : i32, i32, i32
  }
  func.func @transform_2(%arg0: i32, %arg1: i32) -> (i32, i32) {
    %c0_i32 = arith.constant 0 : i32
    %c0_i32_0 = arith.constant 0 : i32
    return %c0_i32, %arg1 : i32, i32
  }
  func.func @transform_3(%arg0: i32, %arg1: i32) -> (i32, i32) {
    %c0_i32 = arith.constant 0 : i32
    %c0_i32_0 = arith.constant 0 : i32
    return %c0_i32, %arg1 : i32, i32
  }
  func.func @transform_4(%arg0: i32, %arg1: i32) -> (i32, i32, i32) {
    %c0_i32 = arith.constant 0 : i32
    %c0_i32_0 = arith.constant 0 : i32
    return %arg0, %c0_i32, %arg1 : i32, i32, i32
  }
}

module attributes {stable_mosaic.version = 11 : i64} {
  func.func @_pool_fc_kernel(%arg0: memref<2x2x512xbf16, #tpu.memory_space<vmem>>, %arg1: memref<512x128xf32, #tpu.memory_space<vmem>>, %arg2: memref<1x128xf32, #tpu.memory_space<vmem>>, %arg3: memref<2x128xf32, #tpu.memory_space<vmem>>, %arg4: memref<2x512xf32, #tpu.memory_space<vmem>>) attributes {dimension_semantics = [], scalar_prefetch = 0 : i64, scratch_operands = 0 : i64, tpu.core_type = #tpu.core_type<tc>} {
    %c0 = arith.constant 0 : index
    %c0_0 = arith.constant 0 : index
    %c0_1 = arith.constant 0 : index
    %0 = vector.load %arg0[%c0, %c0_0, %c0_1] : memref<2x2x512xbf16, #tpu.memory_space<vmem>>, vector<2x2x512xbf16>
    %1 = arith.extf %0 : vector<2x2x512xbf16> to vector<2x2x512xf32>
    %cst = arith.constant dense<0.000000e+00> : vector<2x512xf32>
    %2 = vector.multi_reduction <add>, %1, %cst [1] : vector<2x2x512xf32> to vector<2x512xf32>
    %cst_2 = arith.constant 5.000000e-01 : f32
    %3 = vector.broadcast %cst_2 : f32 to vector<2x512xf32>
    %4 = arith.mulf %2, %3 : vector<2x512xf32>
    %c0_3 = arith.constant 0 : index
    %c0_4 = arith.constant 0 : index
    %5 = vector.load %arg4[%c0_3, %c0_4] : memref<2x512xf32, #tpu.memory_space<vmem>>, vector<2x512xf32>
    tpu.vector_store %arg4[%c0_3, %c0_4], %4 {strides = array<i32>} : memref<2x512xf32, #tpu.memory_space<vmem>>, vector<2x512xf32>,
    %c0_5 = arith.constant 0 : index
    %c0_6 = arith.constant 0 : index
    %6 = vector.load %arg1[%c0_5, %c0_6] : memref<512x128xf32, #tpu.memory_space<vmem>>, vector<512x128xf32>
    %cst_7 = arith.constant dense<0.000000e+00> : vector<2x128xf32>
    %7 = tpu.matmul %4, %6, %cst_7 {dimension_numbers = #tpu.dot_dimension_numbers<[1], [0], [0], [1], [0, 0, 1, 1], [], []>} : vector<2x512xf32>, vector<512x128xf32>, vector<2x128xf32> -> vector<2x128xf32>
    %c0_8 = arith.constant 0 : index
    %c0_9 = arith.constant 0 : index
    %8 = vector.load %arg2[%c0_8, %c0_9] : memref<1x128xf32, #tpu.memory_space<vmem>>, vector<1x128xf32>
    %9 = vector.broadcast %8 : vector<1x128xf32> to vector<2x128xf32>
    %10 = arith.addf %7, %9 : vector<2x128xf32>
    %c0_10 = arith.constant 0 : index
    %c0_11 = arith.constant 0 : index
    %11 = vector.load %arg3[%c0_10, %c0_11] : memref<2x128xf32, #tpu.memory_space<vmem>>, vector<2x128xf32>
    tpu.vector_store %arg3[%c0_10, %c0_11], %10 {strides = array<i32>} : memref<2x128xf32, #tpu.memory_space<vmem>>, vector<2x128xf32>,
    return
  }
}

</mosaic_0001>

<bundles_post_ra>
// kernel: forward.39
= control target key start
LH: loop header
LB: loop body
LE: loop exit
PB: predicated region body
PF: predicated region fallthrough
CT: control target
= control target key end

     0   :  { %s317_s9 = smov 0   ;;  %s337_s0 = inlined_call_operand.vmem [shape: bf16[2,17,64], index: 0, kind: input, shape index: {}]   ;;  %s338_s1 = inlined_call_operand.vmem [shape: bf16[2,17,64], index: 1, kind: input, shape index: {}]   ;;  %s339_s2 = inlined_call_operand.vmem [shape: bf16[2,16,64], index: 2, kind: output, shape index: {}]  }
   0x1 LB: > { %s265_s10 = sadd.s32 4294967295, %s300_s9   ;;  %p269_p0 = scmp.ge.s32.totalorder %s300_s9, 1  ;;  %s300_s9 = sphi %s317_s9, %s12_s9  }
   0x2   : > { %p122_p1 = scmp.lt.s32.totalorder %s300_s9, 3 }
   0x4   : > { %p123_p2 = pnand %p269_p0, %p122_p1 }
   0x5   : > { %p149_p3 = scmp.lt.s32.totalorder (!%p123_p2), %s265_s10, 1 }
   0x6   : > { %126 = sbr.rel (%p123_p2) target bundleno = 27 (0x1b), region = 28 }
   0xb   : > { %s341_s10 = smov (!%p149_p3, %s265_s10), 1  ;;  %vm183_vm0 = vcmask 1046528   ;;  %vm195_vm1 = vcmask 519168  }
   0xc   : > { %s285_s11 = smul.u32 12, %s341_s10  ;;  %s276_s18 = sshll.u32 %s341_s10, 3 }
   0xd   : > { %s163_s21 = scalar_lea.vmem %s339_s2, %s276_s18 }
   0xe   : > { %s153_s14 = scalar_lea.vmem %s337_s0, %s285_s11  ;;  %s158_s17 = scalar_lea.vmem %s338_s1, %s285_s11 }
   0xf   : > { %v278_v0 = vld [vmem:[%s153_s14] sm:$0xff]   ;;  %v168_v2 = vld [vmem:[%s153_s14 + $0x8] sm:$0x1] }
  0x10   : > { %v282_v1 = vld [vmem:[%s158_s17] sm:$0xff]   ;;  %v279_v3 = vunpack.c.l.bf16 %v278_v0  ;;  %v280_v4 = vunpack.c.h.bf16 %v278_v0  ;;  %v179_v6 = vunpack.c.l.bf16 %v168_v2 }
  0x11   : > { %v283_v5 = vunpack.c.l.bf16 %v282_v1  ;;  %v284_v7 = vunpack.c.h.bf16 %v282_v1 }
  0x12   : > { %v184_v9 = vrot.slane %v279_v3, 1  ;;  %v185_v10 = vrot.slane %v280_v4, 1  ;;  %v187_v11 = vrot.slane %v179_v6, 1 }
  0x13   : > { %v173_v8 = vmax.f32 %v279_v3, %v283_v5  ;;  %v174_v12 = vmax.f32 %v280_v4, %v284_v7 }
  0x14   : > { %v186_v13 = vsel %vm183_vm0, %v184_v9, %v185_v10  ;;  %v188_v14 = vsel %vm183_vm0, %v185_v10, %v187_v11 }
  0x15   : > { %v191_v15 = vmax.f32 %v173_v8, %v186_v13  ;;  %v192_v16 = vmax.f32 %v174_v12, %v188_v14 }
  0x17   : > { %v193_v17 = vpack.c.bf16 %v191_v15, %v191_v15  ;;  %v194_v18 = vpack.c.bf16 %v192_v16, %v192_v16 }
  0x19   : > { %196 = vst.msk [vmem:[%s163_s21] sm:$0xf] %vm195_vm1, %v193_v17 }
  0x1a   : > { %197 = vst.msk [vmem:[%s163_s21 + $0x4] sm:$0xf] %vm195_vm1, %v194_v18 }
  0x1b PF: > { %s12_s9 = sadd.s32 1, %s300_s9  }
  0x1c   : > { %p9_p4 = scmp.ge.s32.totalorder %s12_s9, 4  }
  0x1e   :  { %11 = sbr.rel (!%p9_p4) target bundleno = 1 (0x1), region = 61 }

// kernel: forward.41
= control target key start
LH: loop header
LB: loop body
LE: loop exit
PB: predicated region body
PF: predicated region fallthrough
CT: control target
= control target key end

     0   :  { %10 = vsyncpa [#allocation3], 0  ;;  %s1076_s0 = inlined_call_operand.vmem [shape: bf16[2,18,64], index: 0, kind: input, shape index: {}]   ;;  %s1077_s1 = inlined_call_operand.hbm [shape: bf16[3,64,64], index: 1, kind: input, shape index: {}]   ;;  %s1078_s2 = inlined_call_operand.hbm [shape: f32[1,64], index: 2, kind: input, shape index: {}]   ;;  %s1079_s3 = inlined_call_operand.hbm [shape: f32[1,64], index: 3, kind: input, shape index: {}]   ;;  %s1080_s4 = inlined_call_operand.vmem [shape: bf16[2,16,64], index: 4, kind: input, shape index: {}]   ;;  %s1081_s5 = inlined_call_operand.vmem [shape: bf16[2,16,64], index: 5, kind: output, shape index: {}]  }
   0x1   :  { %11 = vsyncpa [#allocation5], 0  ;;  %s990_s18 = smov 0   ;;  %s992_s19 = smov 0  }
   0x2   :  { %s994_s20 = smov 0  }
   0x3 LB: > { %s223_s23 = sshll.u32 %s1078_s2, 4  ;;  %s679_s24 = sadd.s32 4294967295, %s953_s20   ;;  %s953_s20 = sphi %s994_s20, %s17_s20   ;;  %s949_s19 = sphi %s992_s19, %s1086_s19   ;;  %s945_s18 = sphi %s990_s18, %s1085_s18   ;;  %s224_s23 = int_to_ptr.hbm [resolvable:$true] %s223_s23 }
   0x4   : > { %p681_p0 = scmp.ge.s32.totalorder %s953_s20, 1  ;;  %p194_p1 = scmp.lt.s32.totalorder %s953_s20, 3 }
   0x5   : > { %p1011_p2 = scmp.eq.s32.totalorder %s679_s24, 0  ;;  %s955_s27 = smov [#allocation4]  }
   0x6   : > { %p1015_p3 = pnand %p681_p0, %p194_p1  ;;  %s225_s28 = sshll.u32 %s955_s27, 4  ;;  %s226_s28 = int_to_ptr.vmem [resolvable:$true] %s225_s28 }
   0x7   : > { %s29_s30 = sadd.s32 1, %s949_s19  ;;  %s207_s8 = sshll.u32 %s1077_s1, 4  ;;  %s208_s8 = int_to_ptr.hbm [resolvable:$true] %s207_s8 }
   0x8   : > { %p786_p4 = pneg %p1015_p3  ;;  %p31_p6 = scmp.ge.s32.totalorder %s29_s30, 2 }
   0x9   : > { %s956_s9 = smov [#allocation2]   ;;  %s236_s13 = sshll.u32 %s1079_s3, 4  ;;  %s237_s13 = int_to_ptr.hbm [resolvable:$true] %s236_s13 }
   0xa   : > { %p1023_p5 = pnand %p1011_p2, %p786_p4  ;;  %s1088_s30 = smov (%p31_p6, %s29_s30), 0 }
   0xb   : > { %s209_s10 = sshll.u32 %s956_s9, 4  ;;  %s957_s14 = smov 64   ;;  %s210_s10 = int_to_ptr.vmem [resolvable:$true] %s209_s10 }
   0xc   : > { %792 = dma.hbm_to_vmem [thread:$0]  (!%p1023_p5), %s224_s23, 16, %s226_s28, [#allocation5]  }
   0xd   : > { %s958_s15 = smov 4   ;;  %s959_s16 = smov [#allocation6]  }
   0xe   : > { %789 = dma.hbm_to_vmem [thread:$0]  (!%p1023_p5), %s208_s8, 1536, %s210_s10, [#allocation3], %s957_s14, %s957_s14, %s958_s15  }
   0xf   : > { %s238_s17 = sshll.u32 %s959_s16, 4  ;;  %270 = sbr.rel (%p1015_p3) target bundleno = 192 (0xc0), region = 40  ;;  %s239_s17 = int_to_ptr.vmem [resolvable:$true] %s238_s17 }
  0x10   : > { %795 = dma.hbm_to_vmem [thread:$0]  (!%p1023_p5), %s237_s13, 16, %s239_s17, [#allocation5]  }
  0x14   : > { %936 = dma.done.wait (%p1011_p2), [#allocation3], 1536  }
  0x15   : > { %938 = vsyncadd (%p1011_p2), [#allocation3], 4294965760 }
  0x16   : > { %940 = dma.done.wait (%p1011_p2), [#allocation5], 32  }
  0x17   : > { %942 = vsyncadd (%p1011_p2), [#allocation5], 4294967264  ;;  %p320_p7 = scmp.lt.s32.totalorder %s945_s18, 1  ;;  %v757_v0 = vld [vmem:[#allocation2 + $0x38] sm:$0xff]  ;;  %v756_v3 = vld [vmem:[#allocation2 + $0x30] sm:$0xff]  ;;  %vm478_vm1 = vcmask 1046528  }
  0x18   : > { %v753_v1 = vld [vmem:[#allocation2 + $0x18] sm:$0xff]  ;;  %415 = vmatpush.bf16.msra.mxu0 %v757_v0  ;;  %v752_v4 = vld [vmem:[#allocation2 + $0x10] sm:$0xff]  ;;  %v755_v12 = vld [vmem:[#allocation2 + $0x28] sm:$0xff]  ;;  %vm370_vm0 = vsmask.f32 7424  ;;  %vm407_vm2 = vcmask 523264  }
  0x19   : > { %s1090_s18 = smov (!%p320_p7, %s945_s18), 1  ;;  %v761_v2 = vld [vmem:[#allocation2 + $0x58] sm:$0xff]  ;;  %455 = vmatpush.bf16.msra.mxu1 %v753_v1  ;;  %v760_v5 = vld [vmem:[#allocation2 + $0x50] sm:$0xff]  ;;  %v751_v13 = vld [vmem:[#allocation2 + $0x8] sm:$0xff]  ;;  %vm545_vm3 = vcmask 519168  }
  0x1a   : > { %s773_s21 = smul.u32 12, %s1090_s18  ;;  %513 = vmatpush.bf16.msra.mxu2 %v761_v2  ;;  %v759_v15 = vld [vmem:[#allocation2 + $0x48] sm:$0xff]  ;;  %v754_v20 = vld [vmem:[#allocation2 + $0x20] sm:$0xff]  ;;  %s748_s25 = sshll.u32 %s1090_s18, 3 }
  0x1b   : > { %v750_v21 = vld [vmem:[#allocation2] sm:$0xff]  ;;  %s332_s28 = scalar_lea.vmem %s1080_s4, %s748_s25  ;;  %s340_s18 = scalar_lea.vmem %s1081_s5, %s748_s25 }
  0x1c   : > { %s324_s24 = scalar_lea.vmem %s1076_s0, %s773_s21  ;;  %416 = vmatpush.bf16.msra.mxu0 %v756_v3  ;;  %v758_v23 = vld [vmem:[#allocation2 + $0x40] sm:$0xff] }
  0x1d   : > { %v763_v6 = vld [vmem:[%s324_s24] sm:$0xff]   ;;  %v352_v7 = vld [vmem:[%s324_s24 + $0x8] sm:$0x1]  ;;  %456 = vmatpush.bf16.msra.mxu1 %v752_v4 }
  0x1e   : > { %v770_v8 = vld [vmem:[%s324_s24] sm:$0xf0]  ;;  %v367_v9 = vunpack.c.l.b16 %v352_v7  ;;  %v374_v10 = vshll.u32 %v763_v6, 16  ;;  %v771_v11 = vld [vmem:[%s324_s24] sm:$0xe]  ;;  %v372_v14 = vshrl.u32 %v763_v6, 16  ;;  %514 = vmatpush.bf16.msra.mxu2 %v760_v5 }
  0x1f   : > { %v772_v18 = vor.u32 %v771_v11, %v770_v8  ;;  %v831_v32 = vld [vmem:[#allocation4] ss:$0 sm:$0xff]  ;;  %v832_v36 = vld [vmem:[#allocation6] ss:$0 sm:$0xff] }
  0x20   : > { %v369_v16 = vpack.c.b16 %v367_v9, %v367_v9  ;;  %v376_v17 = vrot.slane %v374_v10, 1  ;;  %417 = vmatpush.bf16.msra.mxu0 %v755_v12  ;;  %v767_v34 = vld [vmem:[%s332_s28] sm:$0xff]  }
  0x21   : > { %457 = vmatpush.bf16.msra.mxu1 %v751_v13  ;;  %v479_v25 = vrot.slane %v772_v18, 1  ;;  %v768_v38 = vunpack.c.l.bf16 %v767_v34  ;;  %v769_v48 = vunpack.c.h.bf16 %v767_v34 }
  0x22   : > { %v379_v19 = vshll.u32 %v369_v16, 16  ;;  %v377_v22 = vor.u32 %v376_v17, %v372_v14  ;;  %515 = vmatpush.bf16.msra.mxu2 %v759_v15  ;;  %v480_v26 = vrot.slane %v369_v16, 1 }
  0x24   : > { %v381_v24 = vrot.slane %v379_v19, 1  ;;  %418 = vmatpush.bf16.msra.mxu0 %v754_v20  ;;  %v481_v28 = vsel %vm478_vm1, %v479_v25, %v480_v26 }
  0x25   : > { %458 = vmatpush.bf16.msra.mxu1 %v750_v21 }
  0x26   : > { %v382_v27 = vsel %vm370_vm0, %v377_v22, %v381_v24  ;;  %516 = vmatpush.bf16.msra.mxu2 %v758_v23 }
  0x27   : > { %711 = vmatmul.msk.bf16.vlgmr.msra.gmra.mxu0 %vm407_vm2, %v382_v27 }
  0x28   : > { %728 = vmatmul.msk.bf16.vlgmr.msra.gmra.mxu1 %vm407_vm2, %v763_v6 }
  0x29   : > { %745 = vmatmul.msk.bf16.vlgmr.msra.gmra.mxu2 %vm407_vm2, %v481_v28 }
  0xa4   : > { %v420_v29 = vpop.f32.mrf.mxu0 }
  0xa5   : > { %v460_v30 = vpop.f32.mrf.mxu1 }
  0xa6   : > { %v461_v31 = vadd.f32 %v460_v30, %v420_v29 }
  0xac   : > { %v518_v33 = vpop.f32.mrf.mxu2  ;;  %v422_v39 = vpop.f32.mrf.mxu0 }
  0xad   : > { %v523_v35 = vadd.f32 %v518_v33, %v461_v31  ;;  %v462_v40 = vpop.f32.mrf.mxu1 }
  0xae   : > { %v463_v43 = vadd.f32 %v462_v40, %v422_v39 }
  0xaf   : > { %v529_v37 = vmul.f32 %v831_v32, %v523_v35 }
  0xb1   : > { %v535_v41 = vadd.f32 %v832_v36, %v529_v37 }
  0xb3   : > { %v541_v42 = vadd.f32 %v768_v38, %v535_v41 }
  0xb4   : > { %v520_v44 = vpop.f32.mrf.mxu2 }
  0xb5   : > { %v543_v45 = vpack.c.bf16 %v541_v42, %v541_v42  ;;  %v524_v46 = vadd.f32 %v520_v44, %v463_v43 }
  0xb7   : > { %546 = vst.msk [vmem:[%s340_s18] sm:$0xf] %vm545_vm3, %v543_v45  ;;  %v530_v47 = vmul.f32 %v831_v32, %v524_v46 }
  0xb9   : > { %v536_v49 = vadd.f32 %v832_v36, %v530_v47 }
  0xbb   : > { %v542_v50 = vadd.f32 %v769_v48, %v536_v49 }
  0xbd   : > { %v544_v51 = vpack.c.bf16 %v542_v50, %v542_v50 }
  0xbf   : > { %547 = vst.msk [vmem:[%s340_s18 + $0x4] sm:$0xf] %vm545_vm3, %v544_v51 }
  0xc0 PF: > { %s17_s20 = sadd.s32 1, %s953_s20   ;;  %s1085_s18 = smov %s949_s19 }
  0xc1   : > { %p14_p8 = scmp.ge.s32.totalorder %s17_s20, 4   ;;  %s1086_s19 = smov %s1088_s30 }
  0xc3   :  { %16 = sbr.rel (!%p14_p8) target bundleno = 3 (0x3), region = 91 }
  0xc8   :  { %575 = vsyncpa [#allocation3], 1 }
  0xc9   :  { %577 = vsyncpa [#allocation3 + $0x1], 1 }
  0xca   :  { %578 = vsyncpa [#allocation5], 1 }

// kernel: forward.38
= control target key start
LH: loop header
LB: loop body
LE: loop exit
PB: predicated region body
PF: predicated region fallthrough
CT: control target
= control target key end

     0   :  { %9 = vsyncpa [#allocation3], 0  ;;  %s1066_s0 = inlined_call_operand.vmem [shape: bf16[2,35,24], index: 0, kind: input, shape index: {}]   ;;  %s1067_s1 = inlined_call_operand.hbm [shape: bf16[4,24,64], index: 1, kind: input, shape index: {}]   ;;  %s1068_s2 = inlined_call_operand.hbm [shape: f32[1,64], index: 2, kind: input, shape index: {}]   ;;  %s1069_s3 = inlined_call_operand.hbm [shape: f32[1,64], index: 3, kind: input, shape index: {}]   ;;  %s1070_s4 = inlined_call_operand.vmem [shape: bf16[2,32,64], index: 4, kind: output, shape index: {}]  }
   0x1   :  { %10 = vsyncpa [#allocation5], 0  ;;  %s941_s15 = smov 0   ;;  %s943_s16 = smov 0  }
   0x2   :  { %s945_s17 = smov 0  }
   0x3 LB: > { %s194_s20 = sshll.u32 %s1068_s2, 4  ;;  %s672_s21 = sadd.s32 4294967295, %s909_s17   ;;  %s909_s17 = sphi %s945_s17, %s16_s17   ;;  %s905_s16 = sphi %s943_s16, %s1075_s16   ;;  %s901_s15 = sphi %s941_s15, %s1074_s15   ;;  %s195_s20 = int_to_ptr.hbm [resolvable:$true] %s194_s20 }
   0x4   : > { %p674_p0 = scmp.ge.s32.totalorder %s909_s17, 1  ;;  %p165_p1 = scmp.lt.s32.totalorder %s909_s17, 3 }
   0x5   : > { %p962_p2 = scmp.eq.s32.totalorder %s672_s21, 0  ;;  %s911_s24 = smov [#allocation4]  }
   0x6   : > { %p966_p3 = pnand %p674_p0, %p165_p1  ;;  %s196_s25 = sshll.u32 %s911_s24, 4  ;;  %s197_s25 = int_to_ptr.vmem [resolvable:$true] %s196_s25 }
   0x7   : > { %s28_s27 = sadd.s32 1, %s905_s16  ;;  %s178_s30 = sshll.u32 %s1067_s1, 4  ;;  %s179_s30 = int_to_ptr.hbm [resolvable:$true] %s178_s30 }
   0x8   : > { %p742_p4 = pneg %p966_p3  ;;  %p30_p6 = scmp.ge.s32.totalorder %s28_s27, 2 }
   0x9   : > { %s912_s5 = smov [#allocation2]   ;;  %s207_s9 = sshll.u32 %s1069_s3, 4  ;;  %s208_s9 = int_to_ptr.hbm [resolvable:$true] %s207_s9 }
   0xa   : > { %p974_p5 = pnand %p962_p2, %p742_p4  ;;  %s1077_s27 = smov (%p30_p6, %s28_s27), 0 }
   0xb   : > { %s180_s6 = sshll.u32 %s912_s5, 4  ;;  %s913_s10 = smov 64   ;;  %s181_s6 = int_to_ptr.vmem [resolvable:$true] %s180_s6 }
   0xc   : > { %748 = dma.hbm_to_vmem [thread:$0]  (!%p974_p5), %s195_s20, 16, %s197_s25, [#allocation5]  }
   0xd   : > { %s914_s11 = smov 4   ;;  %s915_s12 = smov [#allocation6]  }
   0xe   : > { %745 = dma.hbm_to_vmem [thread:$0]  (!%p974_p5), %s179_s30, 768, %s181_s6, [#allocation3], %s913_s10, %s913_s10, %s914_s11  }
   0xf   : > { %s209_s13 = sshll.u32 %s915_s12, 4  ;;  %230 = sbr.rel (%p966_p3) target bundleno = 207 (0xcf), region = 36  ;;  %s210_s13 = int_to_ptr.vmem [resolvable:$true] %s209_s13 }
  0x10   : > { %751 = dma.hbm_to_vmem [thread:$0]  (!%p974_p5), %s208_s9, 16, %s210_s13, [#allocation5]  }
  0x14   : > { %892 = dma.done.wait (%p962_p2), [#allocation3], 768  }
  0x15   : > { %894 = vsyncadd (%p962_p2), [#allocation3], 4294966528 }
  0x16   : > { %896 = dma.done.wait (%p962_p2), [#allocation5], 32  }
  0x17   : > { %898 = vsyncadd (%p962_p2), [#allocation5], 4294967264  ;;  %p270_p7 = scmp.lt.s32.totalorder %s901_s15, 1  ;;  %v295_v0 = vld [vmem:[#allocation2 + $0x14] sm:$0xf]  ;;  %vm346_vm0 = vcmask 1043456  }
  0x18   : > { %v290_v1 = vld [vmem:[#allocation2 + $0x8] sm:$0xf]  ;;  %v408_v2 = vld [vmem:[#allocation2 + $0x20] sm:$0xf]  ;;  %v335_v3 = vunpack.c.l.b16 %v295_v0  ;;  %v463_v6 = vld [vmem:[#allocation2 + $0x2c] sm:$0xf] }
  0x19   : > { %s1079_s15 = smov (!%p270_p7, %s901_s15), 1  ;;  %v374_v4 = vunpack.c.l.b16 %v290_v1  ;;  %v423_v5 = vunpack.c.l.b16 %v408_v2  ;;  %v494_v7 = vunpack.c.l.b16 %v463_v6  ;;  %vm309_vm1 = vsmask.f32 7424  ;;  %v719_v16 = vld [vmem:[#allocation2 + $0xc] sm:$0xff]  ;;  %v718_v17 = vld [vmem:[#allocation2] sm:$0xff]  ;;  %v720_v24 = vld [vmem:[#allocation2 + $0x18] sm:$0xff] }
  0x1a   : > { %s729_s14 = smul.u32 20, %s1079_s15  ;;  %v337_v9 = vpack.c.b16 %v335_v3, %v335_v3  ;;  %v721_v25 = vld [vmem:[#allocation2 + $0x24] sm:$0xff]  ;;  %vm412_vm2 = vcmask 1046528   ;;  %vm339_vm3 = vcmask 195584   ;;  %vm467_vm4 = vsmask.f32 6400 }
  0x1b   : > { %v376_v10 = vpack.c.b16 %v374_v4, %v374_v4  ;;  %v425_v11 = vpack.c.b16 %v423_v5, %v423_v5  ;;  %v496_v15 = vpack.c.b16 %v494_v7, %v494_v7  ;;  %v787_v5 = vld [vmem:[#allocation4] ss:$0 sm:$0xff]  ;;  %s716_s21 = sshll.u32 %s1079_s15, 4  ;;  %vm554_vm5 = vcmask 519168  }
  0x1c   : > { %s1011_s20 = scalar_lea.vmem %s1066_s0, %s729_s14  ;;  %v348_v21 = vsel %vm346_vm0, %v337_v9, 0  ;;  %v788_v9 = vld [vmem:[#allocation6] ss:$0 sm:$0xff]  ;;  %s1047_s24 = scalar_lea.vmem %s1070_s4, %s716_s21 }
  0x1d   : > { %v723_v8 = vld [vmem:[%s1011_s20] sm:$0xff]   ;;  %v1015_v12 = vld [vmem:[%s1011_s20 + $0x8] sm:$0xff]  ;;  %v383_v22 = vsel %vm346_vm0, %v376_v10, 0  ;;  %v434_v23 = vsel %vm346_vm0, %v425_v11, 0  ;;  %v291_v27 = vld [vmem:[%s1011_s20 + $0x10] sm:$0x1]  ;;  %356 = vmatpush.bf16.msra.mxu0 %v348_v21 }
  0x1e   : > { %v726_v13 = vld [vmem:[%s1011_s20] sm:$0xf0]  ;;  %v727_v14 = vld [vmem:[%s1011_s20] sm:$0xe]  ;;  %v311_v18 = vshrl.u32 %v723_v8, 16  ;;  %v313_v19 = vshll.u32 %v723_v8, 16  ;;  %391 = vmatpush.bf16.msra.mxu1 %v383_v22  ;;  %442 = vmatpush.bf16.msra.mxu2 %v434_v23  ;;  %v305_v43 = vunpack.c.l.b16 %v291_v27 }
  0x1f   : > { %v728_v20 = vor.u32 %v727_v14, %v726_v13  ;;  %v318_v26 = vshll.u32 %v1015_v12, 16  ;;  %v505_v28 = vsel %vm346_vm0, %v496_v15, 0  ;;  %v414_v31 = vrot.slane %v1015_v12, 1  ;;  %v459_v36 = vld [vmem:[%s1011_s20 + $0x10] sm:$0x3] }
  0x20   : > { %v315_v29 = vrot.slane %v313_v19, 1  ;;  %513 = vmatpush.bf16.msra.mxu3 %v505_v28  ;;  %v322_v33 = vshrl.u32 %v1015_v12, 16  ;;  %v465_v44 = vunpack.c.l.b16 %v459_v36  ;;  %v308_v50 = vpack.c.b16 %v305_v43, %v305_v43 }
  0x21   : > { %v413_v30 = vrot.slane %v728_v20, 1  ;;  %v320_v32 = vrot.slane %v318_v26, 1  ;;  %v469_v34 = vshrl.u32 %v728_v20, 16  ;;  %v472_v35 = vshll.u32 %v728_v20, 16  ;;  %357 = vmatpush.bf16.msra.mxu0 %v719_v16 }
  0x22   : > { %v316_v37 = vor.u32 %v315_v29, %v311_v18  ;;  %v477_v38 = vrot.slane %v318_v26, 2  ;;  %v476_v41 = vrot.slane %v322_v33, 1  ;;  %392 = vmatpush.bf16.msra.mxu1 %v718_v17  ;;  %443 = vmatpush.bf16.msra.mxu2 %v720_v24  ;;  %v466_v48 = vpack.c.b16 %v465_v44, %v465_v44 }
  0x23   : > { %v471_v39 = vrot.slane %v469_v34, 1  ;;  %v474_v40 = vrot.slane %v472_v35, 2  ;;  %v415_v45 = vsel %vm412_vm2, %v413_v30, %v414_v31  ;;  %v326_v53 = vshll.u32 %v308_v50, 16 }
  0x24   : > { %v321_v42 = vsel %vm309_vm1, %v316_v37, %v320_v32  ;;  %514 = vmatpush.bf16.msra.mxu3 %v721_v25  ;;  %v478_v47 = vor.u32 %v477_v38, %v476_v41  ;;  %v481_v51 = vshrl.u32 %v466_v48, 16  ;;  %v484_v52 = vshll.u32 %v466_v48, 16 }
  0x25   : > { %v475_v46 = vor.u32 %v474_v40, %v471_v39  ;;  %694 = vmatmul.msk.bf16.vlgmr.msra.gmra.mxu0 %vm339_vm3, %v321_v42  ;;  %700 = vmatmul.msk.bf16.vlgmr.msra.gmra.mxu1 %vm339_vm3, %v723_v8  ;;  %v324_v56 = vor.u32 %v322_v33, %v320_v32  ;;  %v328_v57 = vrot.slane %v326_v53, 1  ;;  %v416_v58 = vrot.slane %v308_v50, 1 }
  0x26   : > { %706 = vmatmul.msk.bf16.vlgmr.msra.gmra.mxu2 %vm339_vm3, %v415_v45  ;;  %v483_v54 = vrot.slane %v481_v51, 1  ;;  %v486_v55 = vrot.slane %v484_v52, 2 }
  0x27   : > { %v479_v49 = vsel %vm467_vm4, %v475_v46, %v478_v47  ;;  %v329_v60 = vsel %vm309_vm1, %v324_v56, %v328_v57  ;;  %v417_v61 = vsel %vm412_vm2, %v414_v31, %v416_v58 }
  0x28   : > { %712 = vmatmul.msk.bf16.vlgmr.msra.gmra.mxu3 %vm339_vm3, %v479_v49  ;;  %v487_v59 = vor.u32 %v486_v55, %v483_v54 }
  0x2a   : > { %v488_v62 = vsel %vm467_vm4, %v478_v47, %v487_v59 }
  0x35   : > { %695 = vmatmul.msk.bf16.gmra.mxu0 %vm339_vm3, %v329_v60  ;;  %701 = vmatmul.msk.bf16.gmra.mxu1 %vm339_vm3, %v1015_v12 }
  0x36   : > { %707 = vmatmul.msk.bf16.gmra.mxu2 %vm339_vm3, %v417_v61 }
  0x38   : > { %713 = vmatmul.msk.bf16.gmra.mxu3 %vm339_vm3, %v488_v62 }
  0xa2   : > { %v359_v63 = vpop.f32.mrf.mxu0  ;;  %v394_v0 = vpop.f32.mrf.mxu1 }
  0xa3   : > { %v395_v1 = vadd.f32 %v394_v0, %v359_v63 }
  0xa9   : > { %v445_v2 = vpop.f32.mrf.mxu2 }
  0xaa   : > { %v455_v4 = vadd.f32 %v445_v2, %v395_v1  ;;  %v361_v6 = vpop.f32.mrf.mxu0  ;;  %v396_v7 = vpop.f32.mrf.mxu1 }
  0xab   : > { %v516_v3 = vpop.f32.mrf.mxu3  ;;  %v397_v13 = vadd.f32 %v396_v7, %v361_v6 }
  0xac   : > { %v526_v8 = vadd.f32 %v516_v3, %v455_v4 }
  0xae   : > { %v534_v10 = vmul.f32 %v787_v5, %v526_v8 }
  0xb0   : > { %v542_v11 = vadd.f32 %v788_v9, %v534_v10 }
  0xb1   : > { %v447_v12 = vpop.f32.mrf.mxu2 }
  0xb2   : > { %v546_v15 = vmax.f32 %v542_v11, 0.0  ;;  %v456_v16 = vadd.f32 %v447_v12, %v397_v13  ;;  %v364_v17 = vpop.f32.mrf.mxu0  ;;  %v399_v18 = vpop.f32.mrf.mxu1 }
  0xb3   : > { %v518_v14 = vpop.f32.mrf.mxu3  ;;  %v400_v22 = vadd.f32 %v399_v18, %v364_v17 }
  0xb4   : > { %v550_v19 = vpack.c.bf16 %v546_v15, %v546_v15  ;;  %v527_v20 = vadd.f32 %v518_v14, %v456_v16 }
  0xb6   : > { %555 = vst.msk [vmem:[%s1047_s24] sm:$0xf] %vm554_vm5, %v550_v19  ;;  %v535_v21 = vmul.f32 %v787_v5, %v527_v20 }
  0xb8   : > { %v543_v23 = vadd.f32 %v788_v9, %v535_v21 }
  0xb9   : > { %v450_v24 = vpop.f32.mrf.mxu2 }
  0xba   : > { %v547_v26 = vmax.f32 %v543_v23, 0.0  ;;  %v457_v27 = vadd.f32 %v450_v24, %v400_v22  ;;  %v366_v30 = vpop.f32.mrf.mxu0  ;;  %v401_v31 = vpop.f32.mrf.mxu1 }
  0xbb   : > { %v521_v25 = vpop.f32.mrf.mxu3  ;;  %v402_v34 = vadd.f32 %v401_v31, %v366_v30 }
  0xbc   : > { %v551_v28 = vpack.c.bf16 %v547_v26, %v547_v26  ;;  %v528_v29 = vadd.f32 %v521_v25, %v457_v27 }
  0xbe   : > { %556 = vst.msk [vmem:[%s1047_s24 + $0x4] sm:$0xf] %vm554_vm5, %v551_v28  ;;  %v536_v32 = vmul.f32 %v787_v5, %v528_v29 }
  0xc0   : > { %v544_v33 = vadd.f32 %v788_v9, %v536_v32 }
  0xc1   : > { %v452_v35 = vpop.f32.mrf.mxu2 }
  0xc2   : > { %v548_v36 = vmax.f32 %v544_v33, 0.0  ;;  %v458_v37 = vadd.f32 %v452_v35, %v402_v34 }
  0xc3   : > { %v523_v38 = vpop.f32.mrf.mxu3 }
  0xc4   : > { %v552_v39 = vpack.c.bf16 %v548_v36, %v548_v36  ;;  %v529_v40 = vadd.f32 %v523_v38, %v458_v37 }
  0xc6   : > { %557 = vst.msk [vmem:[%s1047_s24 + $0x8] sm:$0xf] %vm554_vm5, %v552_v39  ;;  %v537_v41 = vmul.f32 %v787_v5, %v529_v40 }
  0xc8   : > { %v545_v42 = vadd.f32 %v788_v9, %v537_v41 }
  0xca   : > { %v549_v43 = vmax.f32 %v545_v42, 0.0 }
  0xcc   : > { %v553_v44 = vpack.c.bf16 %v549_v43, %v549_v43 }
  0xce   : > { %558 = vst.msk [vmem:[%s1047_s24 + $0xc] sm:$0xf] %vm554_vm5, %v553_v44 }
  0xcf PF: > { %s16_s17 = sadd.s32 1, %s909_s17   ;;  %s1074_s15 = smov %s905_s16 }
  0xd0   : > { %p13_p8 = scmp.ge.s32.totalorder %s16_s17, 4   ;;  %s1075_s16 = smov %s1077_s27 }
  0xd2   :  { %15 = sbr.rel (!%p13_p8) target bundleno = 3 (0x3), region = 85 }
  0xd7   :  { %586 = vsyncpa [#allocation3], 1 }
  0xd8   :  { %588 = vsyncpa [#allocation3 + $0x1], 1 }
  0xd9   :  { %589 = vsyncpa [#allocation5], 1 }

// kernel: forward.40
= control target key start
LH: loop header
LB: loop body
LE: loop exit
PB: predicated region body
PF: predicated region fallthrough
CT: control target
= control target key end

     0   :  { %9 = vsyncpa [#allocation3], 0  ;;  %s981_s0 = inlined_call_operand.vmem [shape: bf16[2,18,64], index: 0, kind: input, shape index: {}]   ;;  %s982_s1 = inlined_call_operand.hbm [shape: bf16[3,64,64], index: 1, kind: input, shape index: {}]   ;;  %s983_s2 = inlined_call_operand.hbm [shape: f32[1,64], index: 2, kind: input, shape index: {}]   ;;  %s984_s3 = inlined_call_operand.hbm [shape: f32[1,64], index: 3, kind: input, shape index: {}]   ;;  %s985_s4 = inlined_call_operand.vmem [shape: bf16[2,16,64], index: 4, kind: output, shape index: {}]  }
   0x1   :  { %10 = vsyncpa [#allocation5], 0  ;;  %s898_s15 = smov 0   ;;  %s900_s16 = smov 0  }
   0x2   :  { %s902_s17 = smov 0  }
   0x3 LB: > { %s194_s20 = sshll.u32 %s983_s2, 4  ;;  %s599_s21 = sadd.s32 4294967295, %s866_s17   ;;  %s866_s17 = sphi %s902_s17, %s16_s17   ;;  %s862_s16 = sphi %s900_s16, %s990_s16   ;;  %s858_s15 = sphi %s898_s15, %s989_s15   ;;  %s195_s20 = int_to_ptr.hbm [resolvable:$true] %s194_s20 }
   0x4   : > { %p601_p0 = scmp.ge.s32.totalorder %s866_s17, 1  ;;  %p165_p1 = scmp.lt.s32.totalorder %s866_s17, 3 }
   0x5   : > { %p919_p2 = scmp.eq.s32.totalorder %s599_s21, 0  ;;  %s868_s24 = smov [#allocation4]  }
   0x6   : > { %p923_p3 = pnand %p601_p0, %p165_p1  ;;  %s196_s25 = sshll.u32 %s868_s24, 4  ;;  %s197_s25 = int_to_ptr.vmem [resolvable:$true] %s196_s25 }
   0x7   : > { %s28_s27 = sadd.s32 1, %s862_s16  ;;  %s178_s30 = sshll.u32 %s982_s1, 4  ;;  %s179_s30 = int_to_ptr.hbm [resolvable:$true] %s178_s30 }
   0x8   : > { %p699_p4 = pneg %p923_p3  ;;  %p30_p6 = scmp.ge.s32.totalorder %s28_s27, 2 }
   0x9   : > { %s869_s5 = smov [#allocation2]   ;;  %s207_s9 = sshll.u32 %s984_s3, 4  ;;  %s208_s9 = int_to_ptr.hbm [resolvable:$true] %s207_s9 }
   0xa   : > { %p931_p5 = pnand %p919_p2, %p699_p4  ;;  %s992_s27 = smov (%p30_p6, %s28_s27), 0 }
   0xb   : > { %s180_s6 = sshll.u32 %s869_s5, 4  ;;  %s870_s10 = smov 64   ;;  %s181_s6 = int_to_ptr.vmem [resolvable:$true] %s180_s6 }
   0xc   : > { %705 = dma.hbm_to_vmem [thread:$0]  (!%p931_p5), %s195_s20, 16, %s197_s25, [#allocation5]  }
   0xd   : > { %s871_s11 = smov 4   ;;  %s872_s12 = smov [#allocation6]  }
   0xe   : > { %702 = dma.hbm_to_vmem [thread:$0]  (!%p931_p5), %s179_s30, 1536, %s181_s6, [#allocation3], %s870_s10, %s870_s10, %s871_s11  }
   0xf   : > { %s209_s13 = sshll.u32 %s872_s12, 4  ;;  %230 = sbr.rel (%p923_p3) target bundleno = 192 (0xc0), region = 36  ;;  %s210_s13 = int_to_ptr.vmem [resolvable:$true] %s209_s13 }
  0x10   : > { %708 = dma.hbm_to_vmem [thread:$0]  (!%p931_p5), %s208_s9, 16, %s210_s13, [#allocation5]  }
  0x14   : > { %849 = dma.done.wait (%p919_p2), [#allocation3], 1536  }
  0x15   : > { %851 = vsyncadd (%p919_p2), [#allocation3], 4294965760 }
  0x16   : > { %853 = dma.done.wait (%p919_p2), [#allocation5], 32  }
  0x17   : > { %855 = vsyncadd (%p919_p2), [#allocation5], 4294967264  ;;  %p270_p7 = scmp.lt.s32.totalorder %s858_s15, 1  ;;  %v674_v0 = vld [vmem:[#allocation2 + $0x38] sm:$0xff]  ;;  %v673_v3 = vld [vmem:[#allocation2 + $0x30] sm:$0xff]  ;;  %vm420_vm1 = vcmask 1046528  }
  0x18   : > { %v670_v1 = vld [vmem:[#allocation2 + $0x18] sm:$0xff]  ;;  %357 = vmatpush.bf16.msra.mxu0 %v674_v0  ;;  %v669_v4 = vld [vmem:[#allocation2 + $0x10] sm:$0xff]  ;;  %v672_v12 = vld [vmem:[#allocation2 + $0x28] sm:$0xff]  ;;  %vm312_vm0 = vsmask.f32 7424  ;;  %vm349_vm2 = vcmask 523264  }
  0x19   : > { %s994_s15 = smov (!%p270_p7, %s858_s15), 1  ;;  %v678_v2 = vld [vmem:[#allocation2 + $0x58] sm:$0xff]  ;;  %397 = vmatpush.bf16.msra.mxu1 %v670_v1  ;;  %v677_v5 = vld [vmem:[#allocation2 + $0x50] sm:$0xff]  ;;  %v668_v13 = vld [vmem:[#allocation2 + $0x8] sm:$0xff]  ;;  %vm483_vm3 = vcmask 519168  }
  0x1a   : > { %s686_s14 = smul.u32 12, %s994_s15  ;;  %455 = vmatpush.bf16.msra.mxu2 %v678_v2  ;;  %v676_v15 = vld [vmem:[#allocation2 + $0x48] sm:$0xff]  ;;  %v671_v20 = vld [vmem:[#allocation2 + $0x20] sm:$0xff]  ;;  %s666_s21 = sshll.u32 %s994_s15, 3 }
  0x1b   : > { %v667_v21 = vld [vmem:[#allocation2] sm:$0xff]  ;;  %s282_s24 = scalar_lea.vmem %s985_s4, %s666_s21 }
  0x1c   : > { %s274_s20 = scalar_lea.vmem %s981_s0, %s686_s14  ;;  %358 = vmatpush.bf16.msra.mxu0 %v673_v3  ;;  %v675_v23 = vld [vmem:[#allocation2 + $0x40] sm:$0xff] }
  0x1d   : > { %v680_v6 = vld [vmem:[%s274_s20] sm:$0xff]   ;;  %v294_v7 = vld [vmem:[%s274_s20 + $0x8] sm:$0x1]  ;;  %398 = vmatpush.bf16.msra.mxu1 %v669_v4 }
  0x1e   : > { %v683_v8 = vld [vmem:[%s274_s20] sm:$0xf0]  ;;  %v309_v9 = vunpack.c.l.b16 %v294_v7  ;;  %v316_v10 = vshll.u32 %v680_v6, 16  ;;  %v684_v11 = vld [vmem:[%s274_s20] sm:$0xe]  ;;  %v314_v14 = vshrl.u32 %v680_v6, 16  ;;  %456 = vmatpush.bf16.msra.mxu2 %v677_v5 }
  0x1f   : > { %v685_v18 = vor.u32 %v684_v11, %v683_v8  ;;  %v744_v32 = vld [vmem:[#allocation4] ss:$0 sm:$0xff]  ;;  %v745_v35 = vld [vmem:[#allocation6] ss:$0 sm:$0xff] }
  0x20   : > { %v311_v16 = vpack.c.b16 %v309_v9, %v309_v9  ;;  %v318_v17 = vrot.slane %v316_v10, 1  ;;  %359 = vmatpush.bf16.msra.mxu0 %v672_v12 }
  0x21   : > { %399 = vmatpush.bf16.msra.mxu1 %v668_v13  ;;  %v421_v25 = vrot.slane %v685_v18, 1 }
  0x22   : > { %v321_v19 = vshll.u32 %v311_v16, 16  ;;  %v319_v22 = vor.u32 %v318_v17, %v314_v14  ;;  %457 = vmatpush.bf16.msra.mxu2 %v676_v15  ;;  %v422_v26 = vrot.slane %v311_v16, 1 }
  0x24   : > { %v323_v24 = vrot.slane %v321_v19, 1  ;;  %360 = vmatpush.bf16.msra.mxu0 %v671_v20  ;;  %v423_v28 = vsel %vm420_vm1, %v421_v25, %v422_v26 }
  0x25   : > { %400 = vmatpush.bf16.msra.mxu1 %v667_v21 }
  0x26   : > { %v324_v27 = vsel %vm312_vm0, %v319_v22, %v323_v24  ;;  %458 = vmatpush.bf16.msra.mxu2 %v675_v23 }
  0x27   : > { %629 = vmatmul.msk.bf16.vlgmr.msra.gmra.mxu0 %vm349_vm2, %v324_v27 }
  0x28   : > { %646 = vmatmul.msk.bf16.vlgmr.msra.gmra.mxu1 %vm349_vm2, %v680_v6 }
  0x29   : > { %663 = vmatmul.msk.bf16.vlgmr.msra.gmra.mxu2 %vm349_vm2, %v423_v28 }
  0xa4   : > { %v362_v29 = vpop.f32.mrf.mxu0 }
  0xa5   : > { %v402_v30 = vpop.f32.mrf.mxu1 }
  0xa6   : > { %v403_v31 = vadd.f32 %v402_v30, %v362_v29 }
  0xac   : > { %v460_v33 = vpop.f32.mrf.mxu2  ;;  %v364_v37 = vpop.f32.mrf.mxu0 }
  0xad   : > { %v465_v34 = vadd.f32 %v460_v33, %v403_v31  ;;  %v404_v38 = vpop.f32.mrf.mxu1 }
  0xae   : > { %v405_v41 = vadd.f32 %v404_v38, %v364_v37 }
  0xaf   : > { %v471_v36 = vmul.f32 %v744_v32, %v465_v34 }
  0xb1   : > { %v477_v39 = vadd.f32 %v745_v35, %v471_v36 }
  0xb3   : > { %v479_v40 = vmax.f32 %v477_v39, 0.0 }
  0xb4   : > { %v462_v42 = vpop.f32.mrf.mxu2 }
  0xb5   : > { %v481_v43 = vpack.c.bf16 %v479_v40, %v479_v40  ;;  %v466_v44 = vadd.f32 %v462_v42, %v405_v41 }
  0xb7   : > { %484 = vst.msk [vmem:[%s282_s24] sm:$0xf] %vm483_vm3, %v481_v43  ;;  %v472_v45 = vmul.f32 %v744_v32, %v466_v44 }
  0xb9   : > { %v478_v46 = vadd.f32 %v745_v35, %v472_v45 }
  0xbb   : > { %v480_v47 = vmax.f32 %v478_v46, 0.0 }
  0xbd   : > { %v482_v48 = vpack.c.bf16 %v480_v47, %v480_v47 }
  0xbf   : > { %485 = vst.msk [vmem:[%s282_s24 + $0x4] sm:$0xf] %vm483_vm3, %v482_v48 }
  0xc0 PF: > { %s16_s17 = sadd.s32 1, %s866_s17   ;;  %s989_s15 = smov %s862_s16 }
  0xc1   : > { %p13_p8 = scmp.ge.s32.totalorder %s16_s17, 4   ;;  %s990_s16 = smov %s992_s27 }
  0xc3   :  { %15 = sbr.rel (!%p13_p8) target bundleno = 3 (0x3), region = 84 }
  0xc8   :  { %513 = vsyncpa [#allocation3], 1 }
  0xc9   :  { %515 = vsyncpa [#allocation3 + $0x1], 1 }
  0xca   :  { %516 = vsyncpa [#allocation5], 1 }

// kernel: forward.47
= control target key start
LH: loop header
LB: loop body
LE: loop exit
PB: predicated region body
PF: predicated region fallthrough
CT: control target
= control target key end

     0   :  { %9 = vsyncpa [#allocation3], 0  ;;  %s820_s0 = inlined_call_operand.vmem [shape: bf16[2,8,128], index: 0, kind: input, shape index: {}]   ;;  %s821_s1 = inlined_call_operand.hbm [shape: bf16[1,128,128], index: 1, kind: input, shape index: {}]   ;;  %s822_s2 = inlined_call_operand.hbm [shape: f32[1,128], index: 2, kind: input, shape index: {}]   ;;  %s823_s3 = inlined_call_operand.hbm [shape: f32[1,128], index: 3, kind: input, shape index: {}]   ;;  %s824_s4 = inlined_call_operand.vmem [shape: bf16[2,8,128], index: 4, kind: output, shape index: {}]  }
   0x1   :  { %10 = vsyncpa [#allocation5], 0  ;;  %s741_s15 = smov 0   ;;  %s743_s16 = smov 0  }
   0x2   :  { %s745_s17 = smov 0  }
   0x3 LB: > { %s194_s20 = sshll.u32 %s822_s2, 4  ;;  %s475_s21 = sadd.s32 4294967295, %s709_s17   ;;  %s709_s17 = sphi %s745_s17, %s16_s17   ;;  %s705_s16 = sphi %s743_s16, %s829_s16   ;;  %s701_s15 = sphi %s741_s15, %s828_s15   ;;  %s195_s20 = int_to_ptr.hbm [resolvable:$true] %s194_s20 }
   0x4   : > { %p477_p0 = scmp.ge.s32.totalorder %s709_s17, 1  ;;  %p165_p1 = scmp.lt.s32.totalorder %s709_s17, 3 }
   0x5   : > { %p762_p2 = scmp.eq.s32.totalorder %s475_s21, 0  ;;  %s711_s24 = smov [#allocation4]  }
   0x6   : > { %p766_p3 = pnand %p477_p0, %p165_p1  ;;  %s196_s25 = sshll.u32 %s711_s24, 4  ;;  %s197_s25 = int_to_ptr.vmem [resolvable:$true] %s196_s25 }
   0x7   : > { %s28_s27 = sadd.s32 1, %s705_s16  ;;  %s178_s30 = sshll.u32 %s821_s1, 4  ;;  %s179_s30 = int_to_ptr.hbm [resolvable:$true] %s178_s30 }
   0x8   : > { %p542_p4 = pneg %p766_p3  ;;  %p30_p6 = scmp.ge.s32.totalorder %s28_s27, 2 }
   0x9   : > { %s712_s5 = smov [#allocation2]   ;;  %s207_s9 = sshll.u32 %s823_s3, 4  ;;  %s208_s9 = int_to_ptr.hbm [resolvable:$true] %s207_s9 }
   0xa   : > { %p774_p5 = pnand %p762_p2, %p542_p4  ;;  %s831_s27 = smov (%p30_p6, %s28_s27), 0 }
   0xb   : > { %s180_s6 = sshll.u32 %s712_s5, 4  ;;  %s713_s10 = smov 64   ;;  %s181_s6 = int_to_ptr.vmem [resolvable:$true] %s180_s6 }
   0xc   : > { %548 = dma.hbm_to_vmem [thread:$0]  (!%p774_p5), %s195_s20, 16, %s197_s25, [#allocation5]  }
   0xd   : > { %s714_s11 = smov 4   ;;  %s715_s12 = smov [#allocation6]  }
   0xe   : > { %545 = dma.hbm_to_vmem [thread:$0]  (!%p774_p5), %s179_s30, 1024, %s181_s6, [#allocation3], %s713_s10, %s713_s10, %s714_s11  }
   0xf   : > { %s209_s13 = sshll.u32 %s715_s12, 4  ;;  %229 = sbr.rel (%p766_p3) target bundleno = 189 (0xbd), region = 36  ;;  %s210_s13 = int_to_ptr.vmem [resolvable:$true] %s209_s13 }
  0x10   : > { %551 = dma.hbm_to_vmem [thread:$0]  (!%p774_p5), %s208_s9, 16, %s210_s13, [#allocation5]  }
  0x14   : > { %692 = dma.done.wait (%p762_p2), [#allocation3], 1024  }
  0x15   : > { %694 = vsyncadd (%p762_p2), [#allocation3], 4294966272 }
  0x16   : > { %696 = dma.done.wait (%p762_p2), [#allocation5], 32  }
  0x17   : > { %698 = vsyncadd (%p762_p2), [#allocation5], 4294967264  ;;  %v529_v0 = vld [vmem:[#allocation2 + $0x38] sm:$0xff]  ;;  %v528_v1 = vld [vmem:[#allocation2 + $0x30] sm:$0xff]  ;;  %p267_p7 = scmp.lt.s32.totalorder %s701_s15, 1 }
  0x18   : > { %343 = vmatpush.bf16.msra.mxu0 %v529_v0  ;;  %v527_v2 = vld [vmem:[#allocation2 + $0x28] sm:$0xff]  ;;  %v526_v3 = vld [vmem:[#allocation2 + $0x20] sm:$0xff]  ;;  %v525_v4 = vld [vmem:[#allocation2 + $0x18] sm:$0xff] }
  0x19   : > { %v524_v5 = vld [vmem:[#allocation2 + $0x10] sm:$0xff]  ;;  %s833_s15 = smov (!%p267_p7, %s701_s15), 1  ;;  %v523_v6 = vld [vmem:[#allocation2 + $0x8] sm:$0xff]  ;;  %v522_v7 = vld [vmem:[#allocation2] sm:$0xff] }
  0x1a   : > { %s486_s14 = sshll.u32 %s833_s15, 2  ;;  %v587_v9 = vld [vmem:[#allocation4] ss:$0 sm:$0xff]  ;;  %v588_v10 = vld [vmem:[#allocation6] ss:$0 sm:$0xff] }
  0x1b   : > { %s270_s20 = scalar_lea.vmem %s820_s0, %s486_s14  ;;  %s277_s23 = scalar_lea.vmem %s824_s4, %s486_s14 }
  0x1c   : > { %344 = vmatpush.bf16.msra.mxu0 %v528_v1  ;;  %v278_v8 = vld [vmem:[%s270_s20] sm:$0xf] }
  0x20   : > { %345 = vmatpush.bf16.msra.mxu0 %v527_v2 }
  0x24   : > { %346 = vmatpush.bf16.msra.mxu0 %v526_v3 }
  0x28   : > { %347 = vmatpush.bf16.msra.mxu0 %v525_v4 }
  0x2c   : > { %348 = vmatpush.bf16.msra.mxu0 %v524_v5 }
  0x30   : > { %349 = vmatpush.bf16.msra.mxu0 %v523_v6 }
  0x34   : > { %350 = vmatpush.bf16.msra.mxu0 %v522_v7 }
  0x37   : > { %351 = vmatmul.bf16.vlgmr.msra.gmra.mxu0 %v278_v8 }
  0xb4   : > { %v352_v11 = vpop.f32.mrf.mxu0 }
  0xb5   : > { %v360_v12 = vmul.f32 %v587_v9, %v352_v11 }
  0xb7   : > { %v365_v13 = vadd.f32 %v588_v10, %v360_v12 }
  0xb9   : > { %v366_v14 = vpack.c.bf16 %v365_v13, %v365_v13 }
  0xbb   : > { %367 = vst [vmem:[%s277_s23] sm:$0xf] %v366_v14 }
  0xbc   : > { %v354_v15 = vpop.f32.mrf.mxu0 }
  0xbd PF: > { %s16_s17 = sadd.s32 1, %s709_s17   ;;  %s828_s15 = smov %s705_s16 }
  0xbe   : > { %p13_p8 = scmp.ge.s32.totalorder %s16_s17, 4   ;;  %s829_s16 = smov %s831_s27 }
  0xc0   :  { %15 = sbr.rel (!%p13_p8) target bundleno = 3 (0x3), region = 82 }
  0xc5   :  { %393 = vsyncpa [#allocation3], 1 }
  0xc6   :  { %395 = vsyncpa [#allocation3 + $0x1], 1 }
  0xc7   :  { %396 = vsyncpa [#allocation5], 1 }

// kernel: forward.46
= control target key start
LH: loop header
LB: loop body
LE: loop exit
PB: predicated region body
PF: predicated region fallthrough
CT: control target
= control target key end

     0   :  { %9 = vsyncpa [#allocation3], 0  ;;  %s967_s0 = inlined_call_operand.vmem [shape: bf16[2,9,128], index: 0, kind: input, shape index: {}]   ;;  %s968_s1 = inlined_call_operand.hbm [shape: bf16[2,128,128], index: 1, kind: input, shape index: {}]   ;;  %s969_s2 = inlined_call_operand.hbm [shape: f32[1,128], index: 2, kind: input, shape index: {}]   ;;  %s970_s3 = inlined_call_operand.hbm [shape: f32[1,128], index: 3, kind: input, shape index: {}]   ;;  %s971_s4 = inlined_call_operand.vmem [shape: bf16[2,8,128], index: 4, kind: output, shape index: {}]  }
   0x1   :  { %10 = vsyncpa [#allocation5], 0  ;;  %s884_s15 = smov 0   ;;  %s886_s16 = smov 0  }
   0x2   :  { %s888_s17 = smov 0  }
   0x3 LB: > { %s194_s20 = sshll.u32 %s969_s2, 4  ;;  %s571_s21 = sadd.s32 4294967295, %s852_s17   ;;  %s852_s17 = sphi %s888_s17, %s16_s17   ;;  %s848_s16 = sphi %s886_s16, %s976_s16   ;;  %s844_s15 = sphi %s884_s15, %s975_s15   ;;  %s195_s20 = int_to_ptr.hbm [resolvable:$true] %s194_s20 }
   0x4   : > { %p573_p0 = scmp.ge.s32.totalorder %s852_s17, 1  ;;  %p165_p1 = scmp.lt.s32.totalorder %s852_s17, 3 }
   0x5   : > { %p905_p2 = scmp.eq.s32.totalorder %s571_s21, 0  ;;  %s854_s24 = smov [#allocation4]  }
   0x6   : > { %p909_p3 = pnand %p573_p0, %p165_p1  ;;  %s196_s25 = sshll.u32 %s854_s24, 4  ;;  %s197_s25 = int_to_ptr.vmem [resolvable:$true] %s196_s25 }
   0x7   : > { %s28_s27 = sadd.s32 1, %s848_s16  ;;  %s178_s30 = sshll.u32 %s968_s1, 4  ;;  %s179_s30 = int_to_ptr.hbm [resolvable:$true] %s178_s30 }
   0x8   : > { %p685_p4 = pneg %p909_p3  ;;  %p30_p6 = scmp.ge.s32.totalorder %s28_s27, 2 }
   0x9   : > { %s855_s5 = smov [#allocation2]   ;;  %s207_s9 = sshll.u32 %s970_s3, 4  ;;  %s208_s9 = int_to_ptr.hbm [resolvable:$true] %s207_s9 }
   0xa   : > { %p917_p5 = pnand %p905_p2, %p685_p4  ;;  %s978_s27 = smov (%p30_p6, %s28_s27), 0 }
   0xb   : > { %s180_s6 = sshll.u32 %s855_s5, 4  ;;  %s856_s10 = smov 64   ;;  %s181_s6 = int_to_ptr.vmem [resolvable:$true] %s180_s6 }
   0xc   : > { %691 = dma.hbm_to_vmem [thread:$0]  (!%p917_p5), %s195_s20, 16, %s197_s25, [#allocation5]  }
   0xd   : > { %s857_s11 = smov 4   ;;  %s858_s12 = smov [#allocation6]  }
   0xe   : > { %688 = dma.hbm_to_vmem [thread:$0]  (!%p917_p5), %s179_s30, 2048, %s181_s6, [#allocation3], %s856_s10, %s856_s10, %s857_s11  }
   0xf   : > { %s209_s13 = sshll.u32 %s858_s12, 4  ;;  %230 = sbr.rel (%p909_p3) target bundleno = 193 (0xc1), region = 36  ;;  %s210_s13 = int_to_ptr.vmem [resolvable:$true] %s209_s13 }
  0x10   : > { %694 = dma.hbm_to_vmem [thread:$0]  (!%p917_p5), %s208_s9, 16, %s210_s13, [#allocation5]  }
  0x14   : > { %835 = dma.done.wait (%p905_p2), [#allocation3], 2048  }
  0x15   : > { %837 = vsyncadd (%p905_p2), [#allocation3], 4294965248 }
  0x16   : > { %839 = dma.done.wait (%p905_p2), [#allocation5], 32  }
  0x17   : > { %841 = vsyncadd (%p905_p2), [#allocation5], 4294967264  ;;  %v672_v0 = vld [vmem:[#allocation2 + $0x78] sm:$0xff]  ;;  %p269_p7 = scmp.lt.s32.totalorder %s844_s15, 1  ;;  %v671_v2 = vld [vmem:[#allocation2 + $0x70] sm:$0xff] }
  0x18   : > { %v663_v1 = vld [vmem:[#allocation2 + $0x38] sm:$0xff]  ;;  %377 = vmatpush.bf16.msra.mxu0 %v672_v0  ;;  %v662_v3 = vld [vmem:[#allocation2 + $0x30] sm:$0xff]  ;;  %v670_v4 = vld [vmem:[#allocation2 + $0x68] sm:$0xff] }
  0x19   : > { %438 = vmatpush.bf16.msra.mxu1 %v663_v1  ;;  %s980_s15 = smov (!%p269_p7, %s844_s15), 1  ;;  %v661_v5 = vld [vmem:[#allocation2 + $0x28] sm:$0xff]  ;;  %v669_v6 = vld [vmem:[#allocation2 + $0x60] sm:$0xff]  ;;  %v668_v8 = vld [vmem:[#allocation2 + $0x58] sm:$0xff] }
  0x1a   : > { %s655_s14 = sshll.u32 %s980_s15, 3  ;;  %v660_v7 = vld [vmem:[#allocation2 + $0x20] sm:$0xff]  ;;  %v659_v9 = vld [vmem:[#allocation2 + $0x18] sm:$0xff]  ;;  %v667_v13 = vld [vmem:[#allocation2 + $0x50] sm:$0xff]  ;;  %s584_s21 = sshll.u32 %s980_s15, 2 }
  0x1b   : > { %s273_s20 = scalar_lea.vmem %s967_s0, %s655_s14  ;;  %v658_v14 = vld [vmem:[#allocation2 + $0x10] sm:$0xff]  ;;  %v666_v16 = vld [vmem:[#allocation2 + $0x48] sm:$0xff]  ;;  %v665_v20 = vld [vmem:[#allocation2 + $0x40] sm:$0xff]  ;;  %s280_s24 = scalar_lea.vmem %s971_s4, %s584_s21 }
  0x1c   : > { %378 = vmatpush.bf16.msra.mxu0 %v671_v2  ;;  %v587_v10 = vld [vmem:[%s273_s20] sm:$0xf]  ;;  %v664_v11 = vld [vmem:[%s273_s20] sm:$0x10]  ;;  %v657_v17 = vld [vmem:[#allocation2 + $0x8] sm:$0xff] }
  0x1d   : > { %439 = vmatpush.bf16.msra.mxu1 %v662_v3  ;;  %v588_v12 = vor.u32 %v664_v11, %v587_v10  ;;  %v656_v21 = vld [vmem:[#allocation2] sm:$0xff] }
  0x1e   : > { %v281_v23 = vld [vmem:[%s273_s20] sm:$0xf] }
  0x1f   : > { %v324_v15 = vshll.u32 %v588_v12, 16  ;;  %v322_v18 = vshrl.u32 %v588_v12, 16  ;;  %v730_v24 = vld [vmem:[#allocation4] ss:$0 sm:$0xff]  ;;  %v731_v28 = vld [vmem:[#allocation6] ss:$0 sm:$0xff] }
  0x20   : > { %379 = vmatpush.bf16.msra.mxu0 %v670_v4 }
  0x21   : > { %440 = vmatpush.bf16.msra.mxu1 %v661_v5  ;;  %v326_v19 = vrot.slane %v324_v15, 1 }
  0x23   : > { %v327_v22 = vor.u32 %v326_v19, %v322_v18 }
  0x24   : > { %380 = vmatpush.bf16.msra.mxu0 %v669_v6 }
  0x25   : > { %441 = vmatpush.bf16.msra.mxu1 %v660_v7 }
  0x28   : > { %381 = vmatpush.bf16.msra.mxu0 %v668_v8 }
  0x29   : > { %442 = vmatpush.bf16.msra.mxu1 %v659_v9 }
  0x2c   : > { %382 = vmatpush.bf16.msra.mxu0 %v667_v13 }
  0x2d   : > { %443 = vmatpush.bf16.msra.mxu1 %v658_v14 }
  0x30   : > { %383 = vmatpush.bf16.msra.mxu0 %v666_v16 }
  0x31   : > { %444 = vmatpush.bf16.msra.mxu1 %v657_v17 }
  0x34   : > { %384 = vmatpush.bf16.msra.mxu0 %v665_v20 }
  0x35   : > { %445 = vmatpush.bf16.msra.mxu1 %v656_v21 }
  0x37   : > { %385 = vmatmul.bf16.vlgmr.msra.gmra.mxu0 %v327_v22 }
  0x38   : > { %446 = vmatmul.bf16.vlgmr.msra.gmra.mxu1 %v281_v23 }
  0xb4   : > { %v386_v25 = vpop.f32.mrf.mxu0 }
  0xb5   : > { %v447_v26 = vpop.f32.mrf.mxu1 }
  0xb6   : > { %v448_v27 = vadd.f32 %v447_v26, %v386_v25 }
  0xb8   : > { %v455_v29 = vmul.f32 %v730_v24, %v448_v27 }
  0xba   : > { %v460_v30 = vadd.f32 %v731_v28, %v455_v29 }
  0xbc   : > { %v461_v31 = vmax.f32 %v460_v30, 0.0  ;;  %v388_v32 = vpop.f32.mrf.mxu0 }
  0xbd   : > { %v449_v33 = vpop.f32.mrf.mxu1 }
  0xbe   : > { %v462_v34 = vpack.c.bf16 %v461_v31, %v461_v31 }
  0xc0   : > { %463 = vst [vmem:[%s280_s24] sm:$0xf] %v462_v34 }
  0xc1 PF: > { %s16_s17 = sadd.s32 1, %s852_s17   ;;  %s975_s15 = smov %s848_s16 }
  0xc2   : > { %p13_p8 = scmp.ge.s32.totalorder %s16_s17, 4   ;;  %s976_s16 = smov %s978_s27 }
  0xc4   :  { %15 = sbr.rel (!%p13_p8) target bundleno = 3 (0x3), region = 83 }
  0xc9   :  { %489 = vsyncpa [#allocation3], 1 }
  0xca   :  { %491 = vsyncpa [#allocation3 + $0x1], 1 }
  0xcb   :  { %492 = vsyncpa [#allocation5], 1 }

// kernel: forward.56
= control target key start
LH: loop header
LB: loop body
LE: loop exit
PB: predicated region body
PF: predicated region fallthrough
CT: control target
= control target key end

     0   :  { %s1185_s0 = inlined_call_operand.vmem [shape: bf16[2,4,256], index: 0, kind: input, shape index: {}]   ;;  %s1186_s1 = inlined_call_operand.hbm [shape: bf16[1,256,256], index: 1, kind: input, shape index: {}]   ;;  %s1187_s2 = inlined_call_operand.hbm [shape: f32[1,256], index: 2, kind: input, shape index: {}]   ;;  %s1188_s3 = inlined_call_operand.hbm [shape: f32[1,256], index: 3, kind: input, shape index: {}]   ;;  %s1189_s4 = inlined_call_operand.vmem [shape: bf16[2,4,256], index: 4, kind: output, shape index: {}]  }
   0x1   :  { %1194 = sst [smem:[#allocation14_spill]] %s1187_s2 }
   0x2   :  { %9 = vsyncpa [#allocation3], 0 }
   0x3   :  { %11 = vsyncpa [#allocation3 + $0x1], 0 }
   0x4   :  { %12 = vsyncpa [#allocation5], 0 }
   0x5   :  { %14 = vsyncpa [#allocation5 + $0x1], 0  ;;  %s1009_s15 = smov 0   ;;  %s1011_s16 = smov 0  }
   0x6   :  { %s1013_s17 = smov 0   ;;  %s1015_s18 = smov 0  }
   0x7   :  { %s1017_s19 = smov 0   ;;  %s1019_s20 = smov 0  }
   0x8   :  { %s1021_s21 = smov 0   ;;  %s1023_s22 = smov 0  }
   0x9 LB: > { %1195 = sst [smem:[#allocation9_spill]] %s959_s17  ;;  %s1190_s23 = sadd.s32 4294967295, %s979_s22   ;;  %s979_s22 = sphi %s1023_s22, %s20_s22   ;;  %s975_s21 = sphi %s1021_s21, %s1209_s21   ;;  %s971_s20 = sphi %s1019_s20, %s1213_s20   ;;  %s967_s19 = sphi %s1017_s19, %s1207_s19   ;;  %s963_s18 = sphi %s1015_s18, %s1212_s18   ;;  %s959_s17 = sphi %s1013_s17, %s1206_s17   ;;  %s955_s16 = sphi %s1011_s16, %s1211_s16   ;;  %s951_s15 = sphi %s1009_s15, %s1210_s15  }
   0xa   : > { %1196 = sst [smem:[#allocation10_spill]] %s975_s21  ;;  %s29_s24 = sadd.s32 1, %s971_s20 }
   0xb   : > { %p30_p0 = scmp.ge.s32.totalorder %s29_s24, 2  ;;  %s32_s25 = sadd.s32 1, %s975_s21 }
   0xc   : > { %s65_s26 = sadd.s32 1, %s959_s17  ;;  %p72_p1 = scmp.ne.s32.totalorder %s959_s17, %s955_s16 }
   0xd   : > { %s1215_s24 = smov (%p30_p0, %s29_s24), 0  ;;  %s1217_s25 = smov (!%p30_p0, %s32_s25), %s975_s21 }
   0xe   : > { %1197 = sst [smem:[#allocation11_spill]] %s1215_s24  ;;  %s62_s27 = ssub.s32 %s971_s20, %s1215_s24 }
   0xf   : > { %p73_p2 = scmp.eq.s32.totalorder %s979_s22, 0  ;;  %p34_p3 = scmp.ge.s32.totalorder %s1217_s25, 2 }
  0x10   : > { %p63_p4 = scmp.eq.s32.totalorder %s62_s27, 0  ;;  %p78_p6 = scmp.ne.s32.totalorder %s955_s16, %s951_s15 }
  0x11   : > { %p74_p5 = por %p73_p2, %p72_p1  ;;  %s1219_s25 = smov (%p34_p3, %s1217_s25), 0 }
  0x12   : > { %1198 = sst [smem:[#allocation12_spill]] %s1219_s25  ;;  %p79_p7 = scmp.eq.s32.totalorder %s1190_s23, 0 }
  0x13   : > { %s1063_s28 = scalar_select %p63_p4, %s959_s17, %s65_s26  }
  0x14   : > { %p749_p8 = scmp.lt.s32.totalorder %s979_s22, 4  ;;  %s1069_s29 = sand.u32 1, %s959_s17  }
  0x15   : > { %1199 = sst [smem:[#allocation13_spill]] %s1063_s28  ;;  %p1071_p9 = por %p79_p7, %p78_p6 }
  0x16   : > { %s642_s5 = sshll.u32 %s1069_s29, 7  ;;  %p1076_p10 = pnand %p749_p8, %p74_p5 }
  0x17   : > { %s211_s7 = sand.u32 1, %s979_s22   ;;  %s1202_s2 = sld [smem:[#allocation14_spill]] }
  0x18   : > { %s214_s12 = scalar_lea.vmem [#allocation4], %s1069_s29  ;;  %s212_s14 = scalar_lea.sflag [#allocation5], %s211_s7 }
  0x19   : > { %s221_s13 = sshll.u32 %s214_s12, 4  ;;  %p644_p11 = scmp.ge.s32.totalorder %s979_s22, 1  ;;  %s222_s13 = int_to_ptr.vmem [resolvable:$true] %s221_s13 }
  0x1a   : > { %p243_p12 = scmp.lt.s32.totalorder %s979_s22, 5  ;;  %s643_s26 = sshll.u32 %s971_s20, 2 }
  0x1b   : > { %s198_s9 = scalar_lea.hbm %s1186_s1, %s643_s26  ;;  %s982_s23 = smov 64  }
  0x1c   : > { %p1090_p13 = pnand %p644_p11, %p243_p12  ;;  %s199_s7 = sshll.u32 %s198_s9, 4  ;;  %s200_s7 = int_to_ptr.hbm [resolvable:$true] %s199_s7 }
  0x1d   : > { %s217_s10 = scalar_lea.hbm %s1202_s2, %s971_s20  ;;  %s983_s2 = smov 4  }
  0x1e   : > { %s219_s11 = sshll.u32 %s217_s10, 4  ;;  %s194_s10 = scalar_lea.vmem [#allocation2], %s642_s5  ;;  %s220_s11 = int_to_ptr.hbm [resolvable:$true] %s219_s11 }
  0x1f   : > { %745 = dma.hbm_to_vmem [thread:$0]  (!%p1076_p10), %s220_s11, 16, %s222_s13, %s212_s14  }
  0x20   : > { %s201_s12 = sshll.u32 %s194_s10, 4  ;;  %s191_s11 = scalar_lea.sflag [#allocation3], %s1069_s29  ;;  %s202_s12 = int_to_ptr.vmem [resolvable:$true] %s201_s12 }
  0x21   : > { %s981_s13 = smov 128   ;;  %s234_s21 = scalar_lea.hbm %s1188_s3, %s971_s20 }
  0x22   : > { %742 = dma.hbm_to_vmem [thread:$0]  (!%p1076_p10), %s200_s7, 2048, %s202_s12, %s191_s11, %s981_s13, %s982_s23, %s983_s2  }
  0x23   : > { %s236_s28 = sshll.u32 %s234_s21, 4  ;;  %s231_s17 = scalar_lea.vmem [#allocation6], %s1069_s29  ;;  %s237_s28 = int_to_ptr.hbm [resolvable:$true] %s236_s28 }
  0x24   : > { %s238_s27 = sshll.u32 %s231_s17, 4  ;;  %247 = sbr.rel (%p1090_p13) target bundleno = 214 (0xd6), region = 36  ;;  %s239_s27 = int_to_ptr.vmem [resolvable:$true] %s238_s27 }
  0x25   : > { %748 = dma.hbm_to_vmem [thread:$0]  (!%p1076_p10), %s237_s28, 16, %s239_s27, %s212_s14  }
  0x26   : > { %s1111_s5 = sand.u32 (!%p1090_p13), 1, %s955_s16  }
  0x27   : > { %s645_s2 = sshll.u32 (!%p1090_p13), %s1111_s5, 7  ;;  %s250_s23 = scalar_lea.sflag (!%p1090_p13), [#allocation3], %s1111_s5 }
  0x28   : > { %s1115_s24 = scalar_lea.vmem (!%p1090_p13), [#allocation2], %s645_s2 }
  0x29   : > { %942 = dma.done.wait (%p1071_p9), %s250_s23, 2048  }
  0x2a   : > { %944 = vsyncadd (%p1071_p9), %s250_s23, 4294965248  ;;  %s1204_s17 = sadd.s32 4294967295, %s979_s22   ;;  %s262_s28 = scalar_lea.vmem [#allocation4], %s1111_s5 }
  0x2b   : > { %s259_s21 = sand.u32 1, %s1204_s17  }
  0x2c   : > { %s260_s25 = scalar_lea.sflag [#allocation5], %s259_s21 }
  0x2d   : > { %946 = dma.done.wait (%p1071_p9), %s260_s25, 32  }
  0x2e   : > { %948 = vsyncadd (%p1071_p9), %s260_s25, 4294967264  ;;  %p313_p0 = scmp.lt.s32.totalorder %s967_s19, 1  ;;  %v724_v0 = vld [vmem:[%s1115_s24 + $0x38] sm:$0xff]  ;;  %v723_v2 = vld [vmem:[%s1115_s24 + $0x30] sm:$0xff]  ;;  %s271_s15 = scalar_lea.vmem [#allocation6], %s1111_s5 }
  0x2f   : > { %v732_v1 = vld [vmem:[%s1115_s24 + $0x78] sm:$0xff]  ;;  %461 = vmatpush.bf16.msra.mxu0 %v724_v0  ;;  %v731_v3 = vld [vmem:[%s1115_s24 + $0x70] sm:$0xff]  ;;  %v722_v5 = vld [vmem:[%s1115_s24 + $0x28] sm:$0xff]  ;;  %p320_p1 = scmp.lt.s32.totalorder %s963_s18, 1 }
  0x30   : > { %s1221_s19 = smov (!%p313_p0, %s967_s19), 1  ;;  %474 = vmatpush.bf16.msra.mxu1 %v732_v1  ;;  %v730_v6 = vld [vmem:[%s1115_s24 + $0x68] sm:$0xff]  ;;  %v721_v7 = vld [vmem:[%s1115_s24 + $0x20] sm:$0xff]  ;;  %v720_v9 = vld [vmem:[%s1115_s24 + $0x18] sm:$0xff] }
  0x31   : > { %s716_s29 = sshll.u32 %s1221_s19, 2  ;;  %v729_v8 = vld [vmem:[%s1115_s24 + $0x60] sm:$0xff]  ;;  %v728_v10 = vld [vmem:[%s1115_s24 + $0x58] sm:$0xff]  ;;  %v719_v11 = vld [vmem:[%s1115_s24 + $0x10] sm:$0xff]  ;;  %s1223_s18 = smov (!%p320_p1, %s963_s18), 1 }
  0x32   : > { %s317_s14 = scalar_lea.vmem %s1185_s0, %s716_s29  ;;  %v727_v12 = vld [vmem:[%s1115_s24 + $0x50] sm:$0xff]  ;;  %v718_v13 = vld [vmem:[%s1115_s24 + $0x8] sm:$0xff]  ;;  %v717_v15 = vld [vmem:[%s1115_s24] sm:$0xff]  ;;  %s648_s26 = sshll.u32 %s1221_s19, 1 }
  0x33   : > { %v326_v4 = vld [vmem:[%s317_s14] sm:$0xf]  ;;  %462 = vmatpush.bf16.msra.mxu0 %v723_v2  ;;  %v726_v14 = vld [vmem:[%s1115_s24 + $0x48] sm:$0xff]  ;;  %v725_v16 = vld [vmem:[%s1115_s24 + $0x40] sm:$0xff]  ;;  %s323_s8 = sadd.s32 %s648_s26, %s1223_s18 }
  0x34   : > { %475 = vmatpush.bf16.msra.mxu1 %v731_v3  ;;  %360 = vst [vmem:[#allocation1] ss:$4 sm:$0xff] %v326_v4  ;;  %v817_v19 = vld [vmem:[%s262_s28] ss:$0 sm:$0xff]  ;;  %s649_s9 = sshll.u32 %s323_s8, 1 }
  0x35   : > { %v818_v23 = vld [vmem:[%s271_s15] ss:$0 sm:$0xff]  ;;  %s325_s7 = scalar_lea.vmem %s1189_s4, %s649_s9 }
  0x37   : > { %463 = vmatpush.bf16.msra.mxu0 %v722_v5 }
  0x38   : > { %476 = vmatpush.bf16.msra.mxu1 %v730_v6 }
  0x3b   : > { %464 = vmatpush.bf16.msra.mxu0 %v721_v7  ;;  %v361_v17 = vld.sshfl [vmem:[#allocation1] sm:$0xff pattern:$0x73625140]  ;;  %v362_v18 = vld.sshfl [vmem:[#allocation1 + $0x8] sm:$0xff pattern:$0x73625140] }
  0x3c   : > { %477 = vmatpush.bf16.msra.mxu1 %v729_v8 }
  0x3f   : > { %465 = vmatpush.bf16.msra.mxu0 %v720_v9 }
  0x40   : > { %478 = vmatpush.bf16.msra.mxu1 %v728_v10 }
  0x43   : > { %466 = vmatpush.bf16.msra.mxu0 %v719_v11 }
  0x44   : > { %479 = vmatpush.bf16.msra.mxu1 %v727_v12 }
  0x47   : > { %467 = vmatpush.bf16.msra.mxu0 %v718_v13 }
  0x48   : > { %480 = vmatpush.bf16.msra.mxu1 %v726_v14 }
  0x4b   : > { %468 = vmatpush.bf16.msra.mxu0 %v717_v15 }
  0x4c   : > { %481 = vmatpush.bf16.msra.mxu1 %v725_v16 }
  0x4e   : > { %469 = vmatmul.bf16.vlgmr.msra.gmra.mxu0 %v361_v17 }
  0x4f   : > { %482 = vmatmul.bf16.vlgmr.msra.gmra.mxu1 %v362_v18 }
  0xcb   : > { %v470_v20 = vpop.f32.mrf.mxu0 }
  0xcc   : > { %v483_v21 = vpop.f32.mrf.mxu1 }
  0xcd   : > { %v484_v22 = vadd.f32 %v483_v21, %v470_v20 }
  0xcf   : > { %v491_v24 = vmul.f32 %v817_v19, %v484_v22 }
  0xd1   : > { %v496_v25 = vadd.f32 %v818_v23, %v491_v24 }
  0xd3   : > { %v497_v26 = vpack.c.bf16 %v496_v25, %v496_v25  ;;  %v472_v27 = vpop.f32.mrf.mxu0 }
  0xd4   : > { %v485_v28 = vpop.f32.mrf.mxu1 }
  0xd5   : > { %498 = vst [vmem:[%s325_s7] sm:$0x3] %v497_v26 }
  0xd6 PF: > { %s20_s22 = sadd.s32 1, %s979_s22   ;;  %s1205_s18 = sld [smem:[#allocation9_spill]] }
  0xd7   : > { %p17_p2 = scmp.ge.s32.totalorder %s20_s22, 6   ;;  %s1206_s17 = sld [smem:[#allocation13_spill]] }
  0xd8   : > { %s1207_s19 = sld [smem:[#allocation10_spill]]  ;;  %s1210_s15 = smov %s955_s16 }
  0xd9   : > { %s1208_s11 = sld [smem:[#allocation11_spill]] }
  0xda   : > { %s1209_s21 = sld [smem:[#allocation12_spill]] }
  0xdb   :  { %19 = sbr.rel (!%p17_p2) target bundleno = 9 (0x9), region = 103 }
  0xdc   : > { %s1211_s16 = smov %s1205_s18  ;;  %s1212_s18 = smov %s971_s20 }
  0xdf   : > { %s1213_s20 = smov %s1208_s11 }
  0xe0   :  { %526 = vsyncpa [#allocation3], 1 }
  0xe1   :  { %528 = vsyncpa [#allocation3 + $0x1], 1 }
  0xe2   :  { %529 = vsyncpa [#allocation5], 1 }
  0xe3   :  { %531 = vsyncpa [#allocation5 + $0x1], 1 }

// kernel: forward.55
= control target key start
LH: loop header
LB: loop body
LE: loop exit
PB: predicated region body
PF: predicated region fallthrough
CT: control target
= control target key end

     0   :  { %s1496_s0 = inlined_call_operand.vmem [shape: bf16[2,5,256], index: 0, kind: input, shape index: {}]   ;;  %s1497_s1 = inlined_call_operand.hbm [shape: bf16[2,256,256], index: 1, kind: input, shape index: {}]   ;;  %s1498_s2 = inlined_call_operand.hbm [shape: f32[1,256], index: 2, kind: input, shape index: {}]   ;;  %s1499_s3 = inlined_call_operand.hbm [shape: f32[1,256], index: 3, kind: input, shape index: {}]   ;;  %s1500_s4 = inlined_call_operand.vmem [shape: bf16[2,4,256], index: 4, kind: output, shape index: {}]  }
   0x1   :  { %1505 = sst [smem:[#allocation14_spill]] %s1498_s2 }
   0x2   :  { %9 = vsyncpa [#allocation3], 0 }
   0x3   :  { %11 = vsyncpa [#allocation3 + $0x1], 0 }
   0x4   :  { %12 = vsyncpa [#allocation5], 0 }
   0x5   :  { %14 = vsyncpa [#allocation5 + $0x1], 0  ;;  %s1300_s15 = smov 0   ;;  %s1302_s16 = smov 0  }
   0x6   :  { %s1304_s17 = smov 0   ;;  %s1306_s18 = smov 0  }
   0x7   :  { %s1308_s19 = smov 0   ;;  %s1310_s20 = smov 0  }
   0x8   :  { %s1312_s21 = smov 0   ;;  %s1314_s22 = smov 0  }
   0x9 LB: > { %1506 = sst [smem:[#allocation9_spill]] %s1250_s17  ;;  %s1501_s23 = sadd.s32 4294967295, %s1270_s22   ;;  %s1270_s22 = sphi %s1314_s22, %s20_s22   ;;  %s1266_s21 = sphi %s1312_s21, %s1520_s21   ;;  %s1262_s20 = sphi %s1310_s20, %s1525_s20   ;;  %s1258_s19 = sphi %s1308_s19, %s1524_s19   ;;  %s1254_s18 = sphi %s1306_s18, %s1523_s18   ;;  %s1250_s17 = sphi %s1304_s17, %s1517_s17   ;;  %s1246_s16 = sphi %s1302_s16, %s1522_s16   ;;  %s1242_s15 = sphi %s1300_s15, %s1521_s15  }
   0xa   : > { %1507 = sst [smem:[#allocation10_spill]] %s1266_s21  ;;  %s29_s24 = sadd.s32 1, %s1262_s20 }
   0xb   : > { %p30_p0 = scmp.ge.s32.totalorder %s29_s24, 2  ;;  %s32_s25 = sadd.s32 1, %s1266_s21 }
   0xc   : > { %s65_s26 = sadd.s32 1, %s1250_s17  ;;  %p72_p1 = scmp.ne.s32.totalorder %s1250_s17, %s1246_s16 }
   0xd   : > { %s1527_s24 = smov (%p30_p0, %s29_s24), 0  ;;  %s1529_s25 = smov (!%p30_p0, %s32_s25), %s1266_s21 }
   0xe   : > { %1508 = sst [smem:[#allocation11_spill]] %s1527_s24  ;;  %s62_s27 = ssub.s32 %s1262_s20, %s1527_s24 }
   0xf   : > { %p73_p2 = scmp.eq.s32.totalorder %s1270_s22, 0  ;;  %p34_p3 = scmp.ge.s32.totalorder %s1529_s25, 2 }
  0x10   : > { %p63_p4 = scmp.eq.s32.totalorder %s62_s27, 0  ;;  %p78_p6 = scmp.ne.s32.totalorder %s1246_s16, %s1242_s15 }
  0x11   : > { %p74_p5 = por %p73_p2, %p72_p1  ;;  %s1531_s25 = smov (%p34_p3, %s1529_s25), 0 }
  0x12   : > { %1509 = sst [smem:[#allocation12_spill]] %s1531_s25  ;;  %p79_p7 = scmp.eq.s32.totalorder %s1501_s23, 0 }
  0x13   : > { %s1354_s28 = scalar_select %p63_p4, %s1250_s17, %s65_s26  }
  0x14   : > { %p1040_p8 = scmp.lt.s32.totalorder %s1270_s22, 4  ;;  %s1360_s29 = sand.u32 1, %s1250_s17  }
  0x15   : > { %1510 = sst [smem:[#allocation13_spill]] %s1354_s28  ;;  %p1362_p9 = por %p79_p7, %p78_p6 }
  0x16   : > { %s821_s5 = sshll.u32 %s1360_s29, 8  ;;  %p1367_p10 = pnand %p1040_p8, %p74_p5 }
  0x17   : > { %s211_s7 = sand.u32 1, %s1270_s22   ;;  %s1513_s2 = sld [smem:[#allocation14_spill]] }
  0x18   : > { %s214_s12 = scalar_lea.vmem [#allocation4], %s1360_s29  ;;  %s212_s14 = scalar_lea.sflag [#allocation5], %s211_s7 }
  0x19   : > { %s221_s13 = sshll.u32 %s214_s12, 4  ;;  %p823_p11 = scmp.ge.s32.totalorder %s1270_s22, 1  ;;  %s222_s13 = int_to_ptr.vmem [resolvable:$true] %s221_s13 }
  0x1a   : > { %p243_p12 = scmp.lt.s32.totalorder %s1270_s22, 5  ;;  %s822_s26 = sshll.u32 %s1262_s20, 2 }
  0x1b   : > { %s198_s9 = scalar_lea.hbm %s1497_s1, %s822_s26  ;;  %s1273_s23 = smov 64  }
  0x1c   : > { %p1381_p13 = pnand %p823_p11, %p243_p12  ;;  %s199_s7 = sshll.u32 %s198_s9, 4  ;;  %s200_s7 = int_to_ptr.hbm [resolvable:$true] %s199_s7 }
  0x1d   : > { %s217_s10 = scalar_lea.hbm %s1513_s2, %s1262_s20  ;;  %s1274_s2 = smov 4  }
  0x1e   : > { %s219_s11 = sshll.u32 %s217_s10, 4  ;;  %s194_s10 = scalar_lea.vmem [#allocation2], %s821_s5  ;;  %s220_s11 = int_to_ptr.hbm [resolvable:$true] %s219_s11 }
  0x1f   : > { %1036 = dma.hbm_to_vmem [thread:$0]  (!%p1367_p10), %s220_s11, 16, %s222_s13, %s212_s14  }
  0x20   : > { %s201_s12 = sshll.u32 %s194_s10, 4  ;;  %s191_s11 = scalar_lea.sflag [#allocation3], %s1360_s29  ;;  %s202_s12 = int_to_ptr.vmem [resolvable:$true] %s201_s12 }
  0x21   : > { %s1272_s13 = smov 128   ;;  %s234_s21 = scalar_lea.hbm %s1499_s3, %s1262_s20 }
  0x22   : > { %1033 = dma.hbm_to_vmem [thread:$0]  (!%p1367_p10), %s200_s7, 4096, %s202_s12, %s191_s11, %s1272_s13, %s1273_s23, %s1274_s2  }
  0x23   : > { %s236_s28 = sshll.u32 %s234_s21, 4  ;;  %s231_s17 = scalar_lea.vmem [#allocation6], %s1360_s29  ;;  %s237_s28 = int_to_ptr.hbm [resolvable:$true] %s236_s28 }
  0x24   : > { %s238_s27 = sshll.u32 %s231_s17, 4  ;;  %247 = sbr.rel (%p1381_p13) target bundleno = 225 (0xe1), region = 36  ;;  %s239_s27 = int_to_ptr.vmem [resolvable:$true] %s238_s27 }
  0x25   : > { %1039 = dma.hbm_to_vmem [thread:$0]  (!%p1367_p10), %s237_s28, 16, %s239_s27, %s212_s14  }
  0x26   : > { %s1402_s5 = sand.u32 (!%p1381_p13), 1, %s1246_s16  }
  0x27   : > { %s824_s2 = sshll.u32 (!%p1381_p13), %s1402_s5, 8  ;;  %s250_s23 = scalar_lea.sflag (!%p1381_p13), [#allocation3], %s1402_s5 }
  0x28   : > { %s1406_s24 = scalar_lea.vmem (!%p1381_p13), [#allocation2], %s824_s2 }
  0x29   : > { %1233 = dma.done.wait (%p1362_p9), %s250_s23, 4096  }
  0x2a   : > { %1235 = vsyncadd (%p1362_p9), %s250_s23, 4294963200  ;;  %s1515_s17 = sadd.s32 4294967295, %s1270_s22   ;;  %s262_s28 = scalar_lea.vmem [#allocation4], %s1402_s5 }
  0x2b   : > { %s259_s21 = sand.u32 1, %s1515_s17  }
  0x2c   : > { %s260_s25 = scalar_lea.sflag [#allocation5], %s259_s21 }
  0x2d   : > { %1237 = dma.done.wait (%p1362_p9), %s260_s25, 32  }
  0x2e   : > { %1239 = vsyncadd (%p1362_p9), %s260_s25, 4294967264  ;;  %p313_p0 = scmp.lt.s32.totalorder %s1258_s19, 1  ;;  %v1015_v0 = vld [vmem:[%s1406_s24 + $0xb8] sm:$0xff]  ;;  %v1014_v4 = vld [vmem:[%s1406_s24 + $0xb0] sm:$0xff]  ;;  %s271_s15 = scalar_lea.vmem [#allocation6], %s1402_s5 }
  0x2f   : > { %v1023_v1 = vld [vmem:[%s1406_s24 + $0xf8] sm:$0xff]  ;;  %510 = vmatpush.bf16.msra.mxu0 %v1015_v0  ;;  %v1022_v5 = vld [vmem:[%s1406_s24 + $0xf0] sm:$0xff]  ;;  %v1013_v8 = vld [vmem:[%s1406_s24 + $0xa8] sm:$0xff]  ;;  %p320_p1 = scmp.lt.s32.totalorder %s1254_s18, 1 }
  0x30   : > { %v999_v2 = vld [vmem:[%s1406_s24 + $0x38] sm:$0xff]  ;;  %s1533_s19 = smov (!%p313_p0, %s1258_s19), 1  ;;  %523 = vmatpush.bf16.msra.mxu1 %v1023_v1  ;;  %v998_v6 = vld [vmem:[%s1406_s24 + $0x30] sm:$0xff]  ;;  %v1021_v9 = vld [vmem:[%s1406_s24 + $0xe8] sm:$0xff] }
  0x31   : > { %v1007_v3 = vld [vmem:[%s1406_s24 + $0x78] sm:$0xff]  ;;  %639 = vmatpush.bf16.msra.mxu2 %v999_v2  ;;  %v1006_v7 = vld [vmem:[%s1406_s24 + $0x70] sm:$0xff]  ;;  %s991_s29 = sshll.u32 %s1533_s19, 3  ;;  %v997_v10 = vld [vmem:[%s1406_s24 + $0x28] sm:$0xff]  ;;  %s1535_s18 = smov (!%p320_p1, %s1254_s18), 1 }
  0x32   : > { %652 = vmatpush.bf16.msra.mxu3 %v1007_v3  ;;  %v1005_v11 = vld [vmem:[%s1406_s24 + $0x68] sm:$0xff]  ;;  %s1439_s14 = scalar_lea.vmem %s1496_s0, %s991_s29  ;;  %v1012_v12 = vld [vmem:[%s1406_s24 + $0xa0] sm:$0xff]  ;;  %v1011_v19 = vld [vmem:[%s1406_s24 + $0x98] sm:$0xff]  ;;  %s827_s26 = sshll.u32 %s1533_s19, 1 }
  0x33   : > { %511 = vmatpush.bf16.msra.mxu0 %v1014_v4  ;;  %v1020_v13 = vld [vmem:[%s1406_s24 + $0xe0] sm:$0xff]  ;;  %v1019_v20 = vld [vmem:[%s1406_s24 + $0xd8] sm:$0xff]  ;;  %v1010_v25 = vld [vmem:[%s1406_s24 + $0x90] sm:$0xff]  ;;  %s323_s8 = sadd.s32 %s827_s26, %s1535_s18 }
  0x34   : > { %524 = vmatpush.bf16.msra.mxu1 %v1022_v5  ;;  %v359_v14 = vld [vmem:[%s1439_s14] sm:$0x77]  ;;  %v995_v21 = vld [vmem:[%s1406_s24 + $0x18] sm:$0xff]  ;;  %v1018_v26 = vld [vmem:[%s1406_s24 + $0xd0] sm:$0xff]  ;;  %s828_s9 = sshll.u32 %s323_s8, 1 }
  0x35   : > { %640 = vmatpush.bf16.msra.mxu2 %v998_v6  ;;  %v996_v15 = vld [vmem:[%s1406_s24 + $0x20] sm:$0xff]  ;;  %v394_v17 = vunpack.c.l.b16 %v359_v14  ;;  %v395_v18 = vunpack.c.h.b16 %v359_v14  ;;  %v1003_v22 = vld [vmem:[%s1406_s24 + $0x58] sm:$0xff]  ;;  %v994_v27 = vld [vmem:[%s1406_s24 + $0x10] sm:$0xff]  ;;  %s325_s7 = scalar_lea.vmem %s1500_s4, %s828_s9 }
  0x36   : > { %653 = vmatpush.bf16.msra.mxu3 %v1006_v7  ;;  %v1004_v16 = vld [vmem:[%s1406_s24 + $0x60] sm:$0xff]  ;;  %v1002_v28 = vld [vmem:[%s1406_s24 + $0x50] sm:$0xff]  ;;  %v1009_v31 = vld [vmem:[%s1406_s24 + $0x88] sm:$0xff] }
  0x37   : > { %512 = vmatpush.bf16.msra.mxu0 %v1013_v8  ;;  %v396_v23 = vpack.c.b16 %v394_v17, %v394_v17  ;;  %v397_v24 = vpack.c.b16 %v395_v18, %v395_v18  ;;  %v1017_v32 = vld [vmem:[%s1406_s24 + $0xc8] sm:$0xff]  ;;  %v326_v35 = vld [vmem:[%s1439_s14] sm:$0x33] }
  0x38   : > { %525 = vmatpush.bf16.msra.mxu1 %v1021_v9  ;;  %v993_v33 = vld [vmem:[%s1406_s24 + $0x8] sm:$0xff]  ;;  %v1008_v40 = vld [vmem:[%s1406_s24 + $0x80] sm:$0xff]  ;;  %v537_v42 = vunpack.c.l.b16 %v326_v35  ;;  %v538_v43 = vunpack.c.h.b16 %v326_v35 }
  0x39   : > { %641 = vmatpush.bf16.msra.mxu2 %v997_v10  ;;  %v401_v29 = vshll.u32 %v396_v23, 16  ;;  %v408_v30 = vshll.u32 %v397_v24, 16  ;;  %v1001_v34 = vld [vmem:[%s1406_s24 + $0x48] sm:$0xff]  ;;  %v399_v36 = vshrl.u32 %v396_v23, 16  ;;  %v406_v38 = vshrl.u32 %v397_v24, 16  ;;  %v1016_v41 = vld [vmem:[%s1406_s24 + $0xc0] sm:$0xff] }
  0x3a   : > { %654 = vmatpush.bf16.msra.mxu3 %v1005_v11  ;;  %v992_v44 = vld [vmem:[%s1406_s24] sm:$0xff]  ;;  %v539_v48 = vpack.c.b16 %v537_v42, %v537_v42  ;;  %v540_v49 = vpack.c.b16 %v538_v43, %v538_v43 }
  0x3b   : > { %513 = vmatpush.bf16.msra.mxu0 %v1012_v12  ;;  %v403_v37 = vrot.slane %v401_v29, 1  ;;  %v410_v39 = vrot.slane %v408_v30, 1  ;;  %v1000_v45 = vld [vmem:[%s1406_s24 + $0x40] sm:$0xff] }
  0x3c   : > { %526 = vmatpush.bf16.msra.mxu1 %v1020_v13  ;;  %v1108_v56 = vld [vmem:[%s262_s28] ss:$0 sm:$0xff] }
  0x3d   : > { %642 = vmatpush.bf16.msra.mxu2 %v996_v15  ;;  %v404_v46 = vor.u32 %v403_v37, %v399_v36  ;;  %v411_v47 = vor.u32 %v410_v39, %v406_v38  ;;  %v1109_v60 = vld [vmem:[%s271_s15] ss:$0 sm:$0xff] }
  0x3e   : > { %655 = vmatpush.bf16.msra.mxu3 %v1004_v16 }
  0x3f   : > { %514 = vmatpush.bf16.msra.mxu0 %v1011_v19 }
  0x40   : > { %527 = vmatpush.bf16.msra.mxu1 %v1019_v20 }
  0x41   : > { %643 = vmatpush.bf16.msra.mxu2 %v995_v21 }
  0x42   : > { %656 = vmatpush.bf16.msra.mxu3 %v1003_v22 }
  0x43   : > { %515 = vmatpush.bf16.msra.mxu0 %v1010_v25 }
  0x44   : > { %528 = vmatpush.bf16.msra.mxu1 %v1018_v26 }
  0x45   : > { %644 = vmatpush.bf16.msra.mxu2 %v994_v27 }
  0x46   : > { %657 = vmatpush.bf16.msra.mxu3 %v1002_v28 }
  0x47   : > { %516 = vmatpush.bf16.msra.mxu0 %v1009_v31 }
  0x48   : > { %529 = vmatpush.bf16.msra.mxu1 %v1017_v32 }
  0x49   : > { %645 = vmatpush.bf16.msra.mxu2 %v993_v33 }
  0x4a   : > { %658 = vmatpush.bf16.msra.mxu3 %v1001_v34 }
  0x4b   : > { %517 = vmatpush.bf16.msra.mxu0 %v1008_v40 }
  0x4c   : > { %530 = vmatpush.bf16.msra.mxu1 %v1016_v41 }
  0x4d   : > { %646 = vmatpush.bf16.msra.mxu2 %v992_v44 }
  0x4e   : > { %659 = vmatpush.bf16.msra.mxu3 %v1000_v45  ;;  %518 = vmatmul.bf16.vlgmr.msra.gmra.mxu0 %v404_v46 }
  0x4f   : > { %531 = vmatmul.bf16.vlgmr.msra.gmra.mxu1 %v411_v47 }
  0x50   : > { %647 = vmatmul.bf16.vlgmr.msra.gmra.mxu2 %v539_v48 }
  0x51   : > { %660 = vmatmul.bf16.vlgmr.msra.gmra.mxu3 %v540_v49 }
  0xcb   : > { %v519_v50 = vpop.f32.mrf.mxu0 }
  0xcc   : > { %v532_v51 = vpop.f32.mrf.mxu1 }
  0xcd   : > { %v533_v52 = vadd.f32 %v532_v51, %v519_v50 }
  0xd3   : > { %v648_v53 = vpop.f32.mrf.mxu2  ;;  %v521_v57 = vpop.f32.mrf.mxu0 }
  0xd4   : > { %v661_v54 = vpop.f32.mrf.mxu3  ;;  %v649_v55 = vadd.f32 %v648_v53, %v533_v52  ;;  %v534_v58 = vpop.f32.mrf.mxu1 }
  0xd6   : > { %v662_v59 = vadd.f32 %v661_v54, %v649_v55 }
  0xd8   : > { %v669_v61 = vmul.f32 %v1108_v56, %v662_v59 }
  0xda   : > { %v674_v62 = vadd.f32 %v1109_v60, %v669_v61 }
  0xdb   : > { %v650_v63 = vpop.f32.mrf.mxu2 }
  0xdc   : > { %v663_v0 = vpop.f32.mrf.mxu3  ;;  %v675_v1 = vmax.f32 %v674_v62, 0.0 }
  0xde   : > { %v676_v2 = vpack.c.bf16 %v675_v1, %v675_v1 }
  0xe0   : > { %677 = vst [vmem:[%s325_s7] sm:$0x3] %v676_v2 }
  0xe1 PF: > { %s20_s22 = sadd.s32 1, %s1270_s22   ;;  %s1516_s19 = sld [smem:[#allocation9_spill]] }
  0xe2   : > { %p17_p2 = scmp.ge.s32.totalorder %s20_s22, 6   ;;  %s1517_s17 = sld [smem:[#allocation13_spill]] }
  0xe3   : > { %s1518_s11 = sld [smem:[#allocation10_spill]]  ;;  %s1521_s15 = smov %s1246_s16 }
  0xe4   : > { %s1519_s13 = sld [smem:[#allocation11_spill]]  ;;  %s1523_s18 = smov %s1262_s20 }
  0xe5   : > { %s1520_s21 = sld [smem:[#allocation12_spill]] }
  0xe6   :  { %19 = sbr.rel (!%p17_p2) target bundleno = 9 (0x9), region = 104 }
  0xe7   : > { %s1522_s16 = smov %s1516_s19 }
  0xe9   : > { %s1524_s19 = smov %s1518_s11 }
  0xea   : > { %s1525_s20 = smov %s1519_s13 }
  0xeb   :  { %705 = vsyncpa [#allocation3], 1 }
  0xec   :  { %707 = vsyncpa [#allocation3 + $0x1], 1 }
  0xed   :  { %708 = vsyncpa [#allocation5], 1 }
  0xee   :  { %710 = vsyncpa [#allocation5 + $0x1], 1 }

// kernel: forward.49
= control target key start
LH: loop header
LB: loop body
LE: loop exit
PB: predicated region body
PF: predicated region fallthrough
CT: control target
= control target key end

     0   :  { %9 = vsyncpa [#allocation3], 0  ;;  %s1087_s0 = inlined_call_operand.vmem [shape: bf16[2,10,128], index: 0, kind: input, shape index: {}]   ;;  %s1088_s1 = inlined_call_operand.hbm [shape: bf16[3,128,128], index: 1, kind: input, shape index: {}]   ;;  %s1089_s2 = inlined_call_operand.hbm [shape: f32[1,128], index: 2, kind: input, shape index: {}]   ;;  %s1090_s3 = inlined_call_operand.hbm [shape: f32[1,128], index: 3, kind: input, shape index: {}]   ;;  %s1091_s4 = inlined_call_operand.vmem [shape: bf16[2,8,128], index: 4, kind: output, shape index: {}]  }
   0x1   :  { %10 = vsyncpa [#allocation5], 0  ;;  %s1004_s15 = smov 0   ;;  %s1006_s16 = smov 0  }
   0x2   :  { %s1008_s17 = smov 0  }
   0x3 LB: > { %s194_s20 = sshll.u32 %s1089_s2, 4  ;;  %s656_s21 = sadd.s32 4294967295, %s972_s17   ;;  %s972_s17 = sphi %s1008_s17, %s16_s17   ;;  %s968_s16 = sphi %s1006_s16, %s1096_s16   ;;  %s964_s15 = sphi %s1004_s15, %s1095_s15   ;;  %s195_s20 = int_to_ptr.hbm [resolvable:$true] %s194_s20 }
   0x4   : > { %p658_p0 = scmp.ge.s32.totalorder %s972_s17, 1  ;;  %p165_p1 = scmp.lt.s32.totalorder %s972_s17, 3 }
   0x5   : > { %p1025_p2 = scmp.eq.s32.totalorder %s656_s21, 0  ;;  %s974_s24 = smov [#allocation4]  }
   0x6   : > { %p1029_p3 = pnand %p658_p0, %p165_p1  ;;  %s196_s25 = sshll.u32 %s974_s24, 4  ;;  %s197_s25 = int_to_ptr.vmem [resolvable:$true] %s196_s25 }
   0x7   : > { %s28_s27 = sadd.s32 1, %s968_s16  ;;  %s178_s30 = sshll.u32 %s1088_s1, 4  ;;  %s179_s30 = int_to_ptr.hbm [resolvable:$true] %s178_s30 }
   0x8   : > { %p805_p4 = pneg %p1029_p3  ;;  %p30_p6 = scmp.ge.s32.totalorder %s28_s27, 2 }
   0x9   : > { %s975_s5 = smov [#allocation2]   ;;  %s207_s9 = sshll.u32 %s1090_s3, 4  ;;  %s208_s9 = int_to_ptr.hbm [resolvable:$true] %s207_s9 }
   0xa   : > { %p1037_p5 = pnand %p1025_p2, %p805_p4  ;;  %s1098_s27 = smov (%p30_p6, %s28_s27), 0 }
   0xb   : > { %s180_s6 = sshll.u32 %s975_s5, 4  ;;  %s976_s10 = smov 64   ;;  %s181_s6 = int_to_ptr.vmem [resolvable:$true] %s180_s6 }
   0xc   : > { %811 = dma.hbm_to_vmem [thread:$0]  (!%p1037_p5), %s195_s20, 16, %s197_s25, [#allocation5]  }
   0xd   : > { %s977_s11 = smov 4   ;;  %s978_s12 = smov [#allocation6]  }
   0xe   : > { %808 = dma.hbm_to_vmem [thread:$0]  (!%p1037_p5), %s179_s30, 3072, %s181_s6, [#allocation3], %s976_s10, %s976_s10, %s977_s11  }
   0xf   : > { %s209_s13 = sshll.u32 %s978_s12, 4  ;;  %230 = sbr.rel (%p1029_p3) target bundleno = 200 (0xc8), region = 36  ;;  %s210_s13 = int_to_ptr.vmem [resolvable:$true] %s209_s13 }
  0x10   : > { %814 = dma.hbm_to_vmem [thread:$0]  (!%p1037_p5), %s208_s9, 16, %s210_s13, [#allocation5]  }
  0x14   : > { %955 = dma.done.wait (%p1025_p2), [#allocation3], 3072  }
  0x15   : > { %957 = vsyncadd (%p1025_p2), [#allocation3], 4294964224 }
  0x16   : > { %959 = dma.done.wait (%p1025_p2), [#allocation5], 32  }
  0x17   : > { %961 = vsyncadd (%p1025_p2), [#allocation5], 4294967264  ;;  %p269_p7 = scmp.lt.s32.totalorder %s964_s15, 1  ;;  %v784_v0 = vld [vmem:[#allocation2 + $0x78] sm:$0xff]  ;;  %v783_v3 = vld [vmem:[#allocation2 + $0x70] sm:$0xff] }
  0x18   : > { %v776_v1 = vld [vmem:[#allocation2 + $0x38] sm:$0xff]  ;;  %377 = vmatpush.bf16.msra.mxu0 %v784_v0  ;;  %v775_v4 = vld [vmem:[#allocation2 + $0x30] sm:$0xff]  ;;  %v782_v6 = vld [vmem:[#allocation2 + $0x68] sm:$0xff] }
  0x19   : > { %v792_v2 = vld [vmem:[#allocation2 + $0xb8] sm:$0xff]  ;;  %s1100_s15 = smov (!%p269_p7, %s964_s15), 1  ;;  %438 = vmatpush.bf16.msra.mxu1 %v776_v1  ;;  %v791_v5 = vld [vmem:[#allocation2 + $0xb0] sm:$0xff]  ;;  %v774_v7 = vld [vmem:[#allocation2 + $0x28] sm:$0xff] }
  0x1a   : > { %522 = vmatpush.bf16.msra.mxu2 %v792_v2  ;;  %s768_s14 = sshll.u32 %s1100_s15, 3  ;;  %v790_v8 = vld [vmem:[#allocation2 + $0xa8] sm:$0xff]  ;;  %v781_v9 = vld [vmem:[#allocation2 + $0x60] sm:$0xff]  ;;  %v780_v16 = vld [vmem:[#allocation2 + $0x58] sm:$0xff]  ;;  %s669_s21 = sshll.u32 %s1100_s15, 2 }
  0x1b   : > { %s273_s20 = scalar_lea.vmem %s1087_s0, %s768_s14  ;;  %v773_v10 = vld [vmem:[#allocation2 + $0x20] sm:$0xff]  ;;  %v772_v17 = vld [vmem:[#allocation2 + $0x18] sm:$0xff]  ;;  %v779_v20 = vld [vmem:[#allocation2 + $0x50] sm:$0xff]  ;;  %s280_s24 = scalar_lea.vmem %s1091_s4, %s669_s21 }
  0x1c   : > { %378 = vmatpush.bf16.msra.mxu0 %v783_v3  ;;  %v281_v11 = vld [vmem:[%s273_s20] sm:$0xf]  ;;  %v298_v12 = vld [vmem:[%s273_s20 + $0x4] sm:$0x1]  ;;  %v788_v18 = vld [vmem:[#allocation2 + $0x98] sm:$0xff] }
  0x1d   : > { %439 = vmatpush.bf16.msra.mxu1 %v775_v4  ;;  %v789_v13 = vld [vmem:[#allocation2 + $0xa0] sm:$0xff]  ;;  %v318_v14 = vunpack.c.l.b16 %v281_v11  ;;  %v319_v15 = vunpack.c.l.b16 %v298_v12  ;;  %v771_v21 = vld [vmem:[#allocation2 + $0x10] sm:$0xff]  ;;  %v778_v25 = vld [vmem:[#allocation2 + $0x48] sm:$0xff] }
  0x1e   : > { %523 = vmatpush.bf16.msra.mxu2 %v791_v5  ;;  %v787_v22 = vld [vmem:[#allocation2 + $0x90] sm:$0xff]  ;;  %v451_v23 = vld [vmem:[%s273_s20] sm:$0xe]  ;;  %v770_v26 = vld [vmem:[#allocation2 + $0x8] sm:$0xff] }
  0x1f   : > { %v320_v19 = vpack.c.b16 %v319_v15, %v318_v14  ;;  %v470_v27 = vunpack.c.l.b16 %v451_v23  ;;  %v786_v28 = vld [vmem:[#allocation2 + $0x88] sm:$0xff]  ;;  %v777_v31 = vld [vmem:[#allocation2 + $0x40] sm:$0xff] }
  0x20   : > { %379 = vmatpush.bf16.msra.mxu0 %v782_v6  ;;  %v769_v32 = vld [vmem:[#allocation2] sm:$0xff] }
  0x21   : > { %440 = vmatpush.bf16.msra.mxu1 %v774_v7  ;;  %v324_v24 = vshll.u32 %v320_v19, 16  ;;  %v322_v29 = vshrl.u32 %v320_v19, 16  ;;  %v471_v33 = vpack.c.b16 %v319_v15, %v470_v27  ;;  %v785_v34 = vld [vmem:[#allocation2 + $0x80] sm:$0xff] }
  0x22   : > { %524 = vmatpush.bf16.msra.mxu2 %v790_v8  ;;  %v850_v40 = vld [vmem:[#allocation4] ss:$0 sm:$0xff]  ;;  %v851_v43 = vld [vmem:[#allocation6] ss:$0 sm:$0xff] }
  0x23   : > { %v326_v30 = vrot.slane %v324_v24, 1  ;;  %v472_v36 = vrot.slane %v471_v33, 1 }
  0x24   : > { %380 = vmatpush.bf16.msra.mxu0 %v781_v9 }
  0x25   : > { %441 = vmatpush.bf16.msra.mxu1 %v773_v10  ;;  %v327_v35 = vor.u32 %v326_v30, %v322_v29 }
  0x26   : > { %525 = vmatpush.bf16.msra.mxu2 %v789_v13 }
  0x28   : > { %381 = vmatpush.bf16.msra.mxu0 %v780_v16 }
  0x29   : > { %442 = vmatpush.bf16.msra.mxu1 %v772_v17 }
  0x2a   : > { %526 = vmatpush.bf16.msra.mxu2 %v788_v18 }
  0x2c   : > { %382 = vmatpush.bf16.msra.mxu0 %v779_v20 }
  0x2d   : > { %443 = vmatpush.bf16.msra.mxu1 %v771_v21 }
  0x2e   : > { %527 = vmatpush.bf16.msra.mxu2 %v787_v22 }
  0x30   : > { %383 = vmatpush.bf16.msra.mxu0 %v778_v25 }
  0x31   : > { %444 = vmatpush.bf16.msra.mxu1 %v770_v26 }
  0x32   : > { %528 = vmatpush.bf16.msra.mxu2 %v786_v28 }
  0x34   : > { %384 = vmatpush.bf16.msra.mxu0 %v777_v31 }
  0x35   : > { %445 = vmatpush.bf16.msra.mxu1 %v769_v32 }
  0x36   : > { %529 = vmatpush.bf16.msra.mxu2 %v785_v34 }
  0x37   : > { %385 = vmatmul.bf16.vlgmr.msra.gmra.mxu0 %v327_v35 }
  0x38   : > { %446 = vmatmul.bf16.vlgmr.msra.gmra.mxu1 %v281_v11 }
  0x39   : > { %530 = vmatmul.bf16.vlgmr.msra.gmra.mxu2 %v472_v36 }
  0xb4   : > { %v386_v37 = vpop.f32.mrf.mxu0 }
  0xb5   : > { %v447_v38 = vpop.f32.mrf.mxu1 }
  0xb6   : > { %v448_v39 = vadd.f32 %v447_v38, %v386_v37 }
  0xbc   : > { %v531_v41 = vpop.f32.mrf.mxu2  ;;  %v388_v44 = vpop.f32.mrf.mxu0 }
  0xbd   : > { %v535_v42 = vadd.f32 %v531_v41, %v448_v39  ;;  %v449_v45 = vpop.f32.mrf.mxu1 }
  0xbf   : > { %v540_v46 = vmul.f32 %v850_v40, %v535_v42 }
  0xc1   : > { %v545_v47 = vadd.f32 %v851_v43, %v540_v46 }
  0xc3   : > { %v546_v48 = vmax.f32 %v545_v47, 0.0 }
  0xc4   : > { %v533_v49 = vpop.f32.mrf.mxu2 }
  0xc5   : > { %v547_v50 = vpack.c.bf16 %v546_v48, %v546_v48 }
  0xc7   : > { %548 = vst [vmem:[%s280_s24] sm:$0xf] %v547_v50 }
  0xc8 PF: > { %s16_s17 = sadd.s32 1, %s972_s17   ;;  %s1095_s15 = smov %s968_s16 }
  0xc9   : > { %p13_p8 = scmp.ge.s32.totalorder %s16_s17, 4   ;;  %s1096_s16 = smov %s1098_s27 }
  0xcb   :  { %15 = sbr.rel (!%p13_p8) target bundleno = 3 (0x3), region = 84 }
  0xd0   :  { %574 = vsyncpa [#allocation3], 1 }
  0xd1   :  { %576 = vsyncpa [#allocation3 + $0x1], 1 }
  0xd2   :  { %577 = vsyncpa [#allocation5], 1 }

// kernel: forward.48
= control target key start
LH: loop header
LB: loop body
LE: loop exit
PB: predicated region body
PF: predicated region fallthrough
CT: control target
= control target key end

     0   :  { %10 = vsyncpa [#allocation3], 0  ;;  %s1168_s0 = inlined_call_operand.vmem [shape: bf16[2,10,128], index: 0, kind: input, shape index: {}]   ;;  %s1169_s1 = inlined_call_operand.hbm [shape: bf16[3,128,128], index: 1, kind: input, shape index: {}]   ;;  %s1170_s2 = inlined_call_operand.hbm [shape: f32[1,128], index: 2, kind: input, shape index: {}]   ;;  %s1171_s3 = inlined_call_operand.hbm [shape: f32[1,128], index: 3, kind: input, shape index: {}]   ;;  %s1172_s4 = inlined_call_operand.vmem [shape: bf16[2,8,128], index: 4, kind: input, shape index: {}]   ;;  %s1173_s5 = inlined_call_operand.vmem [shape: bf16[2,8,128], index: 5, kind: output, shape index: {}]  }
   0x1   :  { %11 = vsyncpa [#allocation5], 0  ;;  %s1082_s18 = smov 0   ;;  %s1084_s19 = smov 0  }
   0x2   :  { %s1086_s20 = smov 0  }
   0x3 LB: > { %s223_s23 = sshll.u32 %s1170_s2, 4  ;;  %s728_s24 = sadd.s32 4294967295, %s1045_s20   ;;  %s1045_s20 = sphi %s1086_s20, %s17_s20   ;;  %s1041_s19 = sphi %s1084_s19, %s1178_s19   ;;  %s1037_s18 = sphi %s1082_s18, %s1177_s18   ;;  %s224_s23 = int_to_ptr.hbm [resolvable:$true] %s223_s23 }
   0x4   : > { %p730_p0 = scmp.ge.s32.totalorder %s1045_s20, 1  ;;  %p194_p1 = scmp.lt.s32.totalorder %s1045_s20, 3 }
   0x5   : > { %p1103_p2 = scmp.eq.s32.totalorder %s728_s24, 0  ;;  %s1047_s27 = smov [#allocation4]  }
   0x6   : > { %p1107_p3 = pnand %p730_p0, %p194_p1  ;;  %s225_s28 = sshll.u32 %s1047_s27, 4  ;;  %s226_s28 = int_to_ptr.vmem [resolvable:$true] %s225_s28 }
   0x7   : > { %s29_s30 = sadd.s32 1, %s1041_s19  ;;  %s207_s8 = sshll.u32 %s1169_s1, 4  ;;  %s208_s8 = int_to_ptr.hbm [resolvable:$true] %s207_s8 }
   0x8   : > { %p878_p4 = pneg %p1107_p3  ;;  %p31_p6 = scmp.ge.s32.totalorder %s29_s30, 2 }
   0x9   : > { %s1048_s9 = smov [#allocation2]   ;;  %s236_s13 = sshll.u32 %s1171_s3, 4  ;;  %s237_s13 = int_to_ptr.hbm [resolvable:$true] %s236_s13 }
   0xa   : > { %p1115_p5 = pnand %p1103_p2, %p878_p4  ;;  %s1180_s30 = smov (%p31_p6, %s29_s30), 0 }
   0xb   : > { %s209_s10 = sshll.u32 %s1048_s9, 4  ;;  %s1049_s14 = smov 64   ;;  %s210_s10 = int_to_ptr.vmem [resolvable:$true] %s209_s10 }
   0xc   : > { %884 = dma.hbm_to_vmem [thread:$0]  (!%p1115_p5), %s224_s23, 16, %s226_s28, [#allocation5]  }
   0xd   : > { %s1050_s15 = smov 4   ;;  %s1051_s16 = smov [#allocation6]  }
   0xe   : > { %881 = dma.hbm_to_vmem [thread:$0]  (!%p1115_p5), %s208_s8, 3072, %s210_s10, [#allocation3], %s1049_s14, %s1049_s14, %s1050_s15  }
   0xf   : > { %s238_s17 = sshll.u32 %s1051_s16, 4  ;;  %269 = sbr.rel (%p1107_p3) target bundleno = 200 (0xc8), region = 40  ;;  %s239_s17 = int_to_ptr.vmem [resolvable:$true] %s238_s17 }
  0x10   : > { %887 = dma.hbm_to_vmem [thread:$0]  (!%p1115_p5), %s237_s13, 16, %s239_s17, [#allocation5]  }
  0x14   : > { %1028 = dma.done.wait (%p1103_p2), [#allocation3], 3072  }
  0x15   : > { %1030 = vsyncadd (%p1103_p2), [#allocation3], 4294964224 }
  0x16   : > { %1032 = dma.done.wait (%p1103_p2), [#allocation5], 32  }
  0x17   : > { %1034 = vsyncadd (%p1103_p2), [#allocation5], 4294967264  ;;  %p317_p7 = scmp.lt.s32.totalorder %s1037_s18, 1  ;;  %v857_v0 = vld [vmem:[#allocation2 + $0x78] sm:$0xff]  ;;  %v856_v3 = vld [vmem:[#allocation2 + $0x70] sm:$0xff] }
  0x18   : > { %v849_v1 = vld [vmem:[#allocation2 + $0x38] sm:$0xff]  ;;  %432 = vmatpush.bf16.msra.mxu0 %v857_v0  ;;  %v848_v4 = vld [vmem:[#allocation2 + $0x30] sm:$0xff]  ;;  %v855_v6 = vld [vmem:[#allocation2 + $0x68] sm:$0xff] }
  0x19   : > { %v865_v2 = vld [vmem:[#allocation2 + $0xb8] sm:$0xff]  ;;  %s1182_s18 = smov (!%p317_p7, %s1037_s18), 1  ;;  %493 = vmatpush.bf16.msra.mxu1 %v849_v1  ;;  %v864_v5 = vld [vmem:[#allocation2 + $0xb0] sm:$0xff]  ;;  %v847_v7 = vld [vmem:[#allocation2 + $0x28] sm:$0xff] }
  0x1a   : > { %577 = vmatpush.bf16.msra.mxu2 %v865_v2  ;;  %s841_s21 = sshll.u32 %s1182_s18, 3  ;;  %v863_v8 = vld [vmem:[#allocation2 + $0xa8] sm:$0xff]  ;;  %v854_v9 = vld [vmem:[#allocation2 + $0x60] sm:$0xff]  ;;  %v853_v16 = vld [vmem:[#allocation2 + $0x58] sm:$0xff]  ;;  %s741_s25 = sshll.u32 %s1182_s18, 2 }
  0x1b   : > { %s321_s24 = scalar_lea.vmem %s1168_s0, %s841_s21  ;;  %v846_v10 = vld [vmem:[#allocation2 + $0x20] sm:$0xff]  ;;  %v845_v17 = vld [vmem:[#allocation2 + $0x18] sm:$0xff]  ;;  %v852_v20 = vld [vmem:[#allocation2 + $0x50] sm:$0xff]  ;;  %s328_s28 = scalar_lea.vmem %s1172_s4, %s741_s25 }
  0x1c   : > { %433 = vmatpush.bf16.msra.mxu0 %v856_v3  ;;  %v336_v11 = vld [vmem:[%s321_s24] sm:$0xf]  ;;  %v353_v12 = vld [vmem:[%s321_s24 + $0x4] sm:$0x1]  ;;  %v861_v18 = vld [vmem:[#allocation2 + $0x98] sm:$0xff]  ;;  %s335_s18 = scalar_lea.vmem %s1173_s5, %s741_s25 }
  0x1d   : > { %494 = vmatpush.bf16.msra.mxu1 %v848_v4  ;;  %v862_v13 = vld [vmem:[#allocation2 + $0xa0] sm:$0xff]  ;;  %v373_v14 = vunpack.c.l.b16 %v336_v11  ;;  %v374_v15 = vunpack.c.l.b16 %v353_v12  ;;  %v844_v21 = vld [vmem:[#allocation2 + $0x10] sm:$0xff]  ;;  %v851_v25 = vld [vmem:[#allocation2 + $0x48] sm:$0xff] }
  0x1e   : > { %578 = vmatpush.bf16.msra.mxu2 %v864_v5  ;;  %v860_v22 = vld [vmem:[#allocation2 + $0x90] sm:$0xff]  ;;  %v506_v23 = vld [vmem:[%s321_s24] sm:$0xe]  ;;  %v843_v26 = vld [vmem:[#allocation2 + $0x8] sm:$0xff] }
  0x1f   : > { %v375_v19 = vpack.c.b16 %v374_v15, %v373_v14  ;;  %v525_v27 = vunpack.c.l.b16 %v506_v23  ;;  %v859_v28 = vld [vmem:[#allocation2 + $0x88] sm:$0xff]  ;;  %v850_v31 = vld [vmem:[#allocation2 + $0x40] sm:$0xff] }
  0x20   : > { %434 = vmatpush.bf16.msra.mxu0 %v855_v6  ;;  %v842_v32 = vld [vmem:[#allocation2] sm:$0xff] }
  0x21   : > { %495 = vmatpush.bf16.msra.mxu1 %v847_v7  ;;  %v379_v24 = vshll.u32 %v375_v19, 16  ;;  %v377_v29 = vshrl.u32 %v375_v19, 16  ;;  %v526_v33 = vpack.c.b16 %v374_v15, %v525_v27  ;;  %v858_v34 = vld [vmem:[#allocation2 + $0x80] sm:$0xff] }
  0x22   : > { %579 = vmatpush.bf16.msra.mxu2 %v863_v8  ;;  %v923_v40 = vld [vmem:[#allocation4] ss:$0 sm:$0xff]  ;;  %v924_v44 = vld [vmem:[#allocation6] ss:$0 sm:$0xff] }
  0x23   : > { %v381_v30 = vrot.slane %v379_v24, 1  ;;  %v527_v36 = vrot.slane %v526_v33, 1  ;;  %v601_v42 = vld [vmem:[%s328_s28] sm:$0xf] }
  0x24   : > { %435 = vmatpush.bf16.msra.mxu0 %v854_v9  ;;  %v602_v48 = vunpack.c.l.bf16 %v601_v42 }
  0x25   : > { %496 = vmatpush.bf16.msra.mxu1 %v846_v10  ;;  %v382_v35 = vor.u32 %v381_v30, %v377_v29 }
  0x26   : > { %580 = vmatpush.bf16.msra.mxu2 %v862_v13 }
  0x28   : > { %436 = vmatpush.bf16.msra.mxu0 %v853_v16 }
  0x29   : > { %497 = vmatpush.bf16.msra.mxu1 %v845_v17 }
  0x2a   : > { %581 = vmatpush.bf16.msra.mxu2 %v861_v18 }
  0x2c   : > { %437 = vmatpush.bf16.msra.mxu0 %v852_v20 }
  0x2d   : > { %498 = vmatpush.bf16.msra.mxu1 %v844_v21 }
  0x2e   : > { %582 = vmatpush.bf16.msra.mxu2 %v860_v22 }
  0x30   : > { %438 = vmatpush.bf16.msra.mxu0 %v851_v25 }
  0x31   : > { %499 = vmatpush.bf16.msra.mxu1 %v843_v26 }
  0x32   : > { %583 = vmatpush.bf16.msra.mxu2 %v859_v28 }
  0x34   : > { %439 = vmatpush.bf16.msra.mxu0 %v850_v31 }
  0x35   : > { %500 = vmatpush.bf16.msra.mxu1 %v842_v32 }
  0x36   : > { %584 = vmatpush.bf16.msra.mxu2 %v858_v34 }
  0x37   : > { %440 = vmatmul.bf16.vlgmr.msra.gmra.mxu0 %v382_v35 }
  0x38   : > { %501 = vmatmul.bf16.vlgmr.msra.gmra.mxu1 %v336_v11 }
  0x39   : > { %585 = vmatmul.bf16.vlgmr.msra.gmra.mxu2 %v527_v36 }
  0xb4   : > { %v441_v37 = vpop.f32.mrf.mxu0 }
  0xb5   : > { %v502_v38 = vpop.f32.mrf.mxu1 }
  0xb6   : > { %v503_v39 = vadd.f32 %v502_v38, %v441_v37 }
  0xbc   : > { %v586_v41 = vpop.f32.mrf.mxu2  ;;  %v443_v45 = vpop.f32.mrf.mxu0 }
  0xbd   : > { %v590_v43 = vadd.f32 %v586_v41, %v503_v39  ;;  %v504_v46 = vpop.f32.mrf.mxu1 }
  0xbf   : > { %v595_v47 = vmul.f32 %v923_v40, %v590_v43 }
  0xc1   : > { %v600_v49 = vadd.f32 %v924_v44, %v595_v47 }
  0xc3   : > { %v603_v50 = vadd.f32 %v602_v48, %v600_v49 }
  0xc4   : > { %v588_v51 = vpop.f32.mrf.mxu2 }
  0xc5   : > { %v604_v52 = vpack.c.bf16 %v603_v50, %v603_v50 }
  0xc7   : > { %605 = vst [vmem:[%s335_s18] sm:$0xf] %v604_v52 }
  0xc8 PF: > { %s17_s20 = sadd.s32 1, %s1045_s20   ;;  %s1177_s18 = smov %s1041_s19 }
  0xc9   : > { %p14_p8 = scmp.ge.s32.totalorder %s17_s20, 4   ;;  %s1178_s19 = smov %s1180_s30 }
  0xcb   :  { %16 = sbr.rel (!%p14_p8) target bundleno = 3 (0x3), region = 91 }
  0xd0   :  { %631 = vsyncpa [#allocation3], 1 }
  0xd1   :  { %633 = vsyncpa [#allocation3 + $0x1], 1 }
  0xd2   :  { %634 = vsyncpa [#allocation5], 1 }

// kernel: forward.57
= control target key start
LH: loop header
LB: loop body
LE: loop exit
PB: predicated region body
PF: predicated region fallthrough
CT: control target
= control target key end

     0   :  { %s1879_s0 = inlined_call_operand.vmem [shape: bf16[2,6,256], index: 0, kind: input, shape index: {}]   ;;  %s1880_s1 = inlined_call_operand.hbm [shape: bf16[3,256,256], index: 1, kind: input, shape index: {}]   ;;  %s1881_s2 = inlined_call_operand.hbm [shape: f32[1,256], index: 2, kind: input, shape index: {}]   ;;  %s1882_s3 = inlined_call_operand.hbm [shape: f32[1,256], index: 3, kind: input, shape index: {}]   ;;  %s1883_s4 = inlined_call_operand.vmem [shape: bf16[2,4,256], index: 4, kind: input, shape index: {}]   ;;  %s1884_s5 = inlined_call_operand.vmem [shape: bf16[2,4,256], index: 5, kind: output, shape index: {}]  }
   0x1   :  { %1889 = sst [smem:[#allocation14_spill]] %s1881_s2 }
   0x2   :  { %1890 = sst [smem:[#allocation15_spill]] %s1884_s5 }
   0x3   :  { %10 = vsyncpa [#allocation3], 0 }
   0x4   :  { %12 = vsyncpa [#allocation3 + $0x1], 0 }
   0x5   :  { %13 = vsyncpa [#allocation5], 0 }
   0x6   :  { %15 = vsyncpa [#allocation5 + $0x1], 0  ;;  %s1663_s18 = smov 0   ;;  %s1665_s19 = smov 0  }
   0x7   :  { %s1667_s20 = smov 0   ;;  %s1669_s21 = smov 0  }
   0x8   :  { %s1671_s22 = smov 0   ;;  %s1673_s23 = smov 0  }
   0x9   :  { %s1675_s24 = smov 0   ;;  %s1677_s25 = smov 0  }
   0xa LB: > { %1891 = sst [smem:[#allocation9_spill]] %s1608_s20  ;;  %s1885_s26 = sadd.s32 4294967295, %s1628_s25   ;;  %s1628_s25 = sphi %s1677_s25, %s21_s25   ;;  %s1624_s24 = sphi %s1675_s24, %s1906_s24   ;;  %s1620_s23 = sphi %s1673_s23, %s1910_s23   ;;  %s1616_s22 = sphi %s1671_s22, %s1904_s22   ;;  %s1612_s21 = sphi %s1669_s21, %s1909_s21   ;;  %s1608_s20 = sphi %s1667_s20, %s1903_s20   ;;  %s1604_s19 = sphi %s1665_s19, %s1908_s19   ;;  %s1600_s18 = sphi %s1663_s18, %s1907_s18  }
   0xb   : > { %1892 = sst [smem:[#allocation10_spill]] %s1624_s24  ;;  %s30_s27 = sadd.s32 1, %s1620_s23 }
   0xc   : > { %p31_p0 = scmp.ge.s32.totalorder %s30_s27, 2  ;;  %s33_s28 = sadd.s32 1, %s1624_s24 }
   0xd   : > { %s66_s29 = sadd.s32 1, %s1608_s20  ;;  %p73_p1 = scmp.ne.s32.totalorder %s1608_s20, %s1604_s19 }
   0xe   : > { %s1912_s27 = smov (%p31_p0, %s30_s27), 0  ;;  %s1914_s28 = smov (!%p31_p0, %s33_s28), %s1624_s24 }
   0xf   : > { %1893 = sst [smem:[#allocation11_spill]] %s1912_s27  ;;  %s63_s30 = ssub.s32 %s1620_s23, %s1912_s27 }
  0x10   : > { %p74_p2 = scmp.eq.s32.totalorder %s1628_s25, 0  ;;  %p35_p3 = scmp.ge.s32.totalorder %s1914_s28, 2 }
  0x11   : > { %p64_p4 = scmp.eq.s32.totalorder %s63_s30, 0  ;;  %p79_p6 = scmp.ne.s32.totalorder %s1604_s19, %s1600_s18 }
  0x12   : > { %p75_p5 = por %p74_p2, %p73_p1  ;;  %s1916_s28 = smov (%p35_p3, %s1914_s28), 0 }
  0x13   : > { %1894 = sst [smem:[#allocation12_spill]] %s1916_s28  ;;  %p80_p7 = scmp.eq.s32.totalorder %s1885_s26, 0 }
  0x14   : > { %s1717_s6 = scalar_select %p64_p4, %s1608_s20, %s66_s29  }
  0x15   : > { %p1398_p8 = scmp.lt.s32.totalorder %s1628_s25, 4  ;;  %s1723_s7 = sand.u32 1, %s1608_s20  }
  0x16   : > { %1895 = sst [smem:[#allocation13_spill]] %s1717_s6  ;;  %p1725_p9 = por %p80_p7, %p79_p6 }
  0x17   : > { %s1380_s9 = smul.u32 384, %s1723_s7  ;;  %p1730_p10 = pnand %p1398_p8, %p75_p5 }
  0x18   : > { %s240_s11 = sand.u32 1, %s1628_s25   ;;  %s1898_s2 = sld [smem:[#allocation14_spill]] }
  0x19   : > { %s243_s16 = scalar_lea.vmem [#allocation4], %s1723_s7  ;;  %s241_s18 = scalar_lea.sflag [#allocation5], %s240_s11 }
  0x1a   : > { %s250_s17 = sshll.u32 %s243_s16, 4  ;;  %p1066_p11 = scmp.ge.s32.totalorder %s1628_s25, 1  ;;  %s251_s17 = int_to_ptr.vmem [resolvable:$true] %s250_s17 }
  0x1b   : > { %p283_p12 = scmp.lt.s32.totalorder %s1628_s25, 5  ;;  %s1065_s30 = sshll.u32 %s1620_s23, 2 }
  0x1c   : > { %s223_s16 = scalar_lea.vmem [#allocation2], %s1380_s9  ;;  %s1632_s28 = smov 4  }
  0x1d   : > { %p1744_p13 = pnand %p1066_p11, %p283_p12  ;;  %s230_s26 = sshll.u32 %s223_s16, 4  ;;  %s231_s26 = int_to_ptr.vmem [resolvable:$true] %s230_s26 }
  0x1e   : > { %s246_s14 = scalar_lea.hbm %s1898_s2, %s1620_s23  ;;  %s1631_s2 = smov 64  }
  0x1f   : > { %s248_s15 = sshll.u32 %s246_s14, 4  ;;  %s227_s14 = scalar_lea.hbm %s1880_s1, %s1065_s30  ;;  %s249_s15 = int_to_ptr.hbm [resolvable:$true] %s248_s15 }
  0x20   : > { %1394 = dma.hbm_to_vmem [thread:$0]  (!%p1730_p10), %s249_s15, 16, %s251_s17, %s241_s18  }
  0x21   : > { %s228_s11 = sshll.u32 %s227_s14, 4  ;;  %s220_s15 = scalar_lea.sflag [#allocation3], %s1723_s7  ;;  %s229_s11 = int_to_ptr.hbm [resolvable:$true] %s228_s11 }
  0x22   : > { %s1630_s17 = smov 128   ;;  %s263_s6 = scalar_lea.hbm %s1882_s3, %s1620_s23 }
  0x23   : > { %1391 = dma.hbm_to_vmem [thread:$0]  (!%p1730_p10), %s229_s11, 6144, %s231_s26, %s220_s15, %s1630_s17, %s1631_s2, %s1632_s28  }
  0x24   : > { %s265_s20 = sshll.u32 %s263_s6, 4  ;;  %s260_s5 = scalar_lea.vmem [#allocation6], %s1723_s7  ;;  %s266_s20 = int_to_ptr.hbm [resolvable:$true] %s265_s20 }
  0x25   : > { %s267_s12 = sshll.u32 %s260_s5, 4  ;;  %287 = sbr.rel (%p1744_p13) target bundleno = 252 (0xfc), region = 40  ;;  %s268_s12 = int_to_ptr.vmem [resolvable:$true] %s267_s12 }
  0x26   : > { %1397 = dma.hbm_to_vmem [thread:$0]  (!%p1730_p10), %s266_s20, 16, %s268_s12, %s241_s18  }
  0x27   : > { %s1765_s9 = sand.u32 (!%p1744_p13), 1, %s1604_s19  }
  0x28   : > { %s1381_s2 = smul.u32 (!%p1744_p13), 384, %s1765_s9  ;;  %s290_s26 = scalar_lea.sflag (!%p1744_p13), [#allocation3], %s1765_s9 }
  0x2a   : > { %s1769_s24 = scalar_lea.vmem [#allocation2], %s1381_s2 }
  0x2b   : > { %1591 = dma.done.wait (%p1725_p9), %s290_s26, 6144  }
  0x2c   : > { %1593 = vsyncadd (%p1725_p9), %s290_s26, 4294961152  ;;  %s1900_s5 = sadd.s32 4294967295, %s1628_s25   ;;  %s302_s28 = scalar_lea.vmem [#allocation4], %s1765_s9 }
  0x2d   : > { %s299_s20 = sand.u32 1, %s1900_s5  }
  0x2e   : > { %s300_s27 = scalar_lea.sflag [#allocation5], %s299_s20 }
  0x2f   : > { %1595 = dma.done.wait (%p1725_p9), %s300_s27, 32  }
  0x30   : > { %1597 = vsyncadd (%p1725_p9), %s300_s27, 4294967264  ;;  %p363_p0 = scmp.lt.s32.totalorder %s1616_s22, 1  ;;  %v1355_v0 = vld [vmem:[%s1769_s24 + $0xb8] sm:$0xff]  ;;  %v1354_v2 = vld [vmem:[%s1769_s24 + $0xb0] sm:$0xff]  ;;  %s311_s18 = scalar_lea.vmem [#allocation6], %s1765_s9 }
  0x31   : > { %v1363_v1 = vld [vmem:[%s1769_s24 + $0xf8] sm:$0xff]  ;;  %568 = vmatpush.bf16.msra.mxu0 %v1355_v0  ;;  %v1362_v3 = vld [vmem:[%s1769_s24 + $0xf0] sm:$0xff]  ;;  %v1353_v8 = vld [vmem:[%s1769_s24 + $0xa8] sm:$0xff]  ;;  %p370_p1 = scmp.lt.s32.totalorder %s1612_s21, 1  ;;  %s1901_s15 = sld [smem:[#allocation15_spill]] }
  0x32   : > { %s1918_s22 = smov (!%p363_p0, %s1616_s22), 1  ;;  %581 = vmatpush.bf16.msra.mxu1 %v1363_v1  ;;  %v1339_v4 = vld [vmem:[%s1769_s24 + $0x38] sm:$0xff]  ;;  %v1338_v6 = vld [vmem:[%s1769_s24 + $0x30] sm:$0xff]  ;;  %v1361_v9 = vld [vmem:[%s1769_s24 + $0xe8] sm:$0xff] }
  0x33   : > { %v1347_v5 = vld [vmem:[%s1769_s24 + $0x78] sm:$0xff]  ;;  %697 = vmatpush.bf16.msra.mxu2 %v1339_v4  ;;  %v1346_v7 = vld [vmem:[%s1769_s24 + $0x70] sm:$0xff]  ;;  %s1331_s6 = sshll.u32 %s1918_s22, 3  ;;  %v1337_v10 = vld [vmem:[%s1769_s24 + $0x28] sm:$0xff]  ;;  %s1920_s21 = smov (!%p370_p1, %s1612_s21), 1 }
  0x34   : > { %710 = vmatpush.bf16.msra.mxu3 %v1347_v5  ;;  %v1345_v11 = vld [vmem:[%s1769_s24 + $0x68] sm:$0xff]  ;;  %s1802_s10 = scalar_lea.vmem %s1879_s0, %s1331_s6  ;;  %v1352_v12 = vld [vmem:[%s1769_s24 + $0xa0] sm:$0xff]  ;;  %v1351_v19 = vld [vmem:[%s1769_s24 + $0x98] sm:$0xff]  ;;  %s1069_s29 = sshll.u32 %s1918_s22, 1 }
  0x35   : > { %569 = vmatpush.bf16.msra.mxu0 %v1354_v2  ;;  %v1360_v13 = vld [vmem:[%s1769_s24 + $0xe0] sm:$0xff]  ;;  %v1359_v20 = vld [vmem:[%s1769_s24 + $0xd8] sm:$0xff]  ;;  %v1350_v25 = vld [vmem:[%s1769_s24 + $0x90] sm:$0xff]  ;;  %s373_s30 = sadd.s32 %s1069_s29, %s1920_s21 }
  0x36   : > { %582 = vmatpush.bf16.msra.mxu1 %v1362_v3  ;;  %v417_v14 = vld [vmem:[%s1802_s10] sm:$0x77]  ;;  %v1335_v21 = vld [vmem:[%s1769_s24 + $0x18] sm:$0xff]  ;;  %v1358_v26 = vld [vmem:[%s1769_s24 + $0xd0] sm:$0xff]  ;;  %s1070_s13 = sshll.u32 %s373_s30, 1 }
  0x37   : > { %698 = vmatpush.bf16.msra.mxu2 %v1338_v6  ;;  %v1336_v15 = vld [vmem:[%s1769_s24 + $0x20] sm:$0xff]  ;;  %v452_v17 = vunpack.c.l.b16 %v417_v14  ;;  %v453_v18 = vunpack.c.h.b16 %v417_v14  ;;  %v1343_v22 = vld [vmem:[%s1769_s24 + $0x58] sm:$0xff]  ;;  %v1334_v27 = vld [vmem:[%s1769_s24 + $0x10] sm:$0xff]  ;;  %s375_s11 = scalar_lea.vmem %s1883_s4, %s1070_s13  ;;  %s383_s17 = scalar_lea.vmem %s1901_s15, %s1070_s13 }
  0x38   : > { %711 = vmatpush.bf16.msra.mxu3 %v1346_v7  ;;  %v1344_v16 = vld [vmem:[%s1769_s24 + $0x60] sm:$0xff]  ;;  %v1342_v28 = vld [vmem:[%s1769_s24 + $0x50] sm:$0xff]  ;;  %v1349_v31 = vld [vmem:[%s1769_s24 + $0x88] sm:$0xff] }
  0x39   : > { %570 = vmatpush.bf16.msra.mxu0 %v1353_v8  ;;  %v454_v23 = vpack.c.b16 %v452_v17, %v452_v17  ;;  %v455_v24 = vpack.c.b16 %v453_v18, %v453_v18  ;;  %v1357_v32 = vld [vmem:[%s1769_s24 + $0xc8] sm:$0xff]  ;;  %v384_v39 = vld [vmem:[%s1802_s10] sm:$0x33]  ;;  %v1371_v42 = vld [vmem:[%s1769_s24 + $0x138] sm:$0xff] }
  0x3a   : > { %583 = vmatpush.bf16.msra.mxu1 %v1361_v9  ;;  %v1333_v33 = vld [vmem:[%s1769_s24 + $0x8] sm:$0xff]  ;;  %v1348_v40 = vld [vmem:[%s1769_s24 + $0x80] sm:$0xff]  ;;  %v1379_v43 = vld [vmem:[%s1769_s24 + $0x178] sm:$0xff]  ;;  %v595_v46 = vunpack.c.l.b16 %v384_v39  ;;  %v596_v47 = vunpack.c.h.b16 %v384_v39 }
  0x3b   : > { %699 = vmatpush.bf16.msra.mxu2 %v1337_v10  ;;  %v459_v29 = vshll.u32 %v454_v23, 16  ;;  %v466_v30 = vshll.u32 %v455_v24, 16  ;;  %v1341_v34 = vld [vmem:[%s1769_s24 + $0x48] sm:$0xff]  ;;  %v457_v35 = vshrl.u32 %v454_v23, 16  ;;  %v464_v37 = vshrl.u32 %v455_v24, 16  ;;  %v1356_v41 = vld [vmem:[%s1769_s24 + $0xc0] sm:$0xff] }
  0x3c   : > { %712 = vmatpush.bf16.msra.mxu3 %v1345_v11  ;;  %v1332_v44 = vld [vmem:[%s1769_s24] sm:$0xff]  ;;  %v1370_v50 = vld [vmem:[%s1769_s24 + $0x130] sm:$0xff]  ;;  %v597_v52 = vpack.c.b16 %v595_v46, %v595_v46  ;;  %v598_v53 = vpack.c.b16 %v596_v47, %v596_v47  ;;  %v1369_v54 = vld [vmem:[%s1769_s24 + $0x128] sm:$0xff] }
  0x3d   : > { %571 = vmatpush.bf16.msra.mxu0 %v1352_v12  ;;  %v461_v36 = vrot.slane %v459_v29, 1  ;;  %v468_v38 = vrot.slane %v466_v30, 1  ;;  %v1340_v45 = vld [vmem:[%s1769_s24 + $0x40] sm:$0xff]  ;;  %v1378_v51 = vld [vmem:[%s1769_s24 + $0x170] sm:$0xff]  ;;  %v1377_v55 = vld [vmem:[%s1769_s24 + $0x168] sm:$0xff] }
  0x3e   : > { %584 = vmatpush.bf16.msra.mxu1 %v1360_v13  ;;  %v1368_v56 = vld [vmem:[%s1769_s24 + $0x120] sm:$0xff]  ;;  %v1367_v58 = vld [vmem:[%s1769_s24 + $0x118] sm:$0xff]  ;;  %v1366_v60 = vld [vmem:[%s1769_s24 + $0x110] sm:$0xff] }
  0x3f   : > { %700 = vmatpush.bf16.msra.mxu2 %v1336_v15  ;;  %v462_v48 = vor.u32 %v461_v36, %v457_v35  ;;  %v469_v49 = vor.u32 %v468_v38, %v464_v37  ;;  %v1376_v57 = vld [vmem:[%s1769_s24 + $0x160] sm:$0xff]  ;;  %v1375_v59 = vld [vmem:[%s1769_s24 + $0x158] sm:$0xff]  ;;  %v1374_v61 = vld [vmem:[%s1769_s24 + $0x150] sm:$0xff] }
  0x40   : > { %713 = vmatpush.bf16.msra.mxu3 %v1344_v16  ;;  %v723_v62 = vld [vmem:[%s1802_s10] sm:$0x66]  ;;  %v1365_v1 = vld [vmem:[%s1769_s24 + $0x108] sm:$0xff]  ;;  %v1466_v23 = vld [vmem:[%s302_s28] ss:$0 sm:$0xff] }
  0x41   : > { %572 = vmatpush.bf16.msra.mxu0 %v1351_v19  ;;  %v758_v63 = vunpack.c.l.b16 %v723_v62  ;;  %v759_v0 = vunpack.c.h.b16 %v723_v62  ;;  %v1373_v2 = vld [vmem:[%s1769_s24 + $0x148] sm:$0xff]  ;;  %v1364_v5 = vld [vmem:[%s1769_s24 + $0x100] sm:$0xff] }
  0x42   : > { %585 = vmatpush.bf16.msra.mxu1 %v1359_v20  ;;  %v1372_v6 = vld [vmem:[%s1769_s24 + $0x140] sm:$0xff] }
  0x43   : > { %701 = vmatpush.bf16.msra.mxu2 %v1335_v21  ;;  %v760_v3 = vpack.c.b16 %v758_v63, %v758_v63  ;;  %v761_v4 = vpack.c.b16 %v759_v0, %v759_v0  ;;  %v899_v24 = vld [vmem:[%s375_s11] sm:$0x3] }
  0x44   : > { %714 = vmatpush.bf16.msra.mxu3 %v1343_v22 }
  0x45   : > { %573 = vmatpush.bf16.msra.mxu0 %v1350_v25  ;;  %v762_v7 = vrot.slane %v760_v3, 1  ;;  %v763_v8 = vrot.slane %v761_v4, 1 }
  0x46   : > { %586 = vmatpush.bf16.msra.mxu1 %v1358_v26  ;;  %v1467_v26 = vld [vmem:[%s311_s18] ss:$0 sm:$0xff] }
  0x47   : > { %702 = vmatpush.bf16.msra.mxu2 %v1334_v27 }
  0x48   : > { %715 = vmatpush.bf16.msra.mxu3 %v1342_v28  ;;  %v900_v28 = vunpack.c.l.bf16 %v899_v24 }
  0x49   : > { %574 = vmatpush.bf16.msra.mxu0 %v1349_v31 }
  0x4a   : > { %587 = vmatpush.bf16.msra.mxu1 %v1357_v32 }
  0x4b   : > { %703 = vmatpush.bf16.msra.mxu2 %v1333_v33 }
  0x4c   : > { %716 = vmatpush.bf16.msra.mxu3 %v1341_v34 }
  0x4d   : > { %575 = vmatpush.bf16.msra.mxu0 %v1348_v40 }
  0x4e   : > { %588 = vmatpush.bf16.msra.mxu1 %v1356_v41 }
  0x4f   : > { %704 = vmatpush.bf16.msra.mxu2 %v1332_v44 }
  0x50   : > { %717 = vmatpush.bf16.msra.mxu3 %v1340_v45  ;;  %576 = vmatmul.bf16.vlgmr.msra.gmra.mxu0 %v462_v48 }
  0x51   : > { %862 = vmatpush.bf16.msrb.mxu0 %v1371_v42  ;;  %589 = vmatmul.bf16.vlgmr.msra.gmra.mxu1 %v469_v49 }
  0x52   : > { %875 = vmatpush.bf16.msrb.mxu1 %v1379_v43  ;;  %705 = vmatmul.bf16.vlgmr.msra.gmra.mxu2 %v597_v52 }
  0x53   : > { %718 = vmatmul.bf16.vlgmr.msra.gmra.mxu3 %v598_v53 }
  0x55   : > { %863 = vmatpush.bf16.msrb.mxu0 %v1370_v50 }
  0x56   : > { %876 = vmatpush.bf16.msrb.mxu1 %v1378_v51 }
  0x59   : > { %864 = vmatpush.bf16.msrb.mxu0 %v1369_v54 }
  0x5a   : > { %877 = vmatpush.bf16.msrb.mxu1 %v1377_v55 }
  0x5d   : > { %865 = vmatpush.bf16.msrb.mxu0 %v1368_v56 }
  0x5e   : > { %878 = vmatpush.bf16.msrb.mxu1 %v1376_v57 }
  0x61   : > { %866 = vmatpush.bf16.msrb.mxu0 %v1367_v58 }
  0x62   : > { %879 = vmatpush.bf16.msrb.mxu1 %v1375_v59 }
  0x65   : > { %867 = vmatpush.bf16.msrb.mxu0 %v1366_v60 }
  0x66   : > { %880 = vmatpush.bf16.msrb.mxu1 %v1374_v61 }
  0x69   : > { %868 = vmatpush.bf16.msrb.mxu0 %v1365_v1 }
  0x6a   : > { %881 = vmatpush.bf16.msrb.mxu1 %v1373_v2 }
  0x6d   : > { %869 = vmatpush.bf16.msrb.mxu0 %v1364_v5 }
  0x6e   : > { %882 = vmatpush.bf16.msrb.mxu1 %v1372_v6 }
  0x70   : > { %870 = vmatmul.bf16.vlgmr.msrb.gmra.mxu0 %v762_v7 }
  0x71   : > { %883 = vmatmul.bf16.vlgmr.msrb.gmra.mxu1 %v763_v8 }
  0xcd   : > { %v577_v9 = vpop.f32.mrf.mxu0 }
  0xce   : > { %v590_v10 = vpop.f32.mrf.mxu1 }
  0xcf   : > { %v591_v17 = vadd.f32 %v590_v10, %v577_v9 }
  0xd5   : > { %v579_v11 = vpop.f32.mrf.mxu0  ;;  %v706_v13 = vpop.f32.mrf.mxu2 }
  0xd6   : > { %v592_v12 = vpop.f32.mrf.mxu1  ;;  %v719_v14 = vpop.f32.mrf.mxu3  ;;  %v707_v18 = vadd.f32 %v706_v13, %v591_v17 }
  0xd8   : > { %v720_v21 = vadd.f32 %v719_v14, %v707_v18 }
  0xdd   : > { %v708_v15 = vpop.f32.mrf.mxu2 }
  0xde   : > { %v721_v16 = vpop.f32.mrf.mxu3 }
  0xed   : > { %v871_v19 = vpop.f32.mrf.mxu0 }
  0xee   : > { %v884_v20 = vpop.f32.mrf.mxu1 }
  0xef   : > { %v885_v22 = vadd.f32 %v884_v20, %v871_v19 }
  0xf1   : > { %v888_v25 = vadd.f32 %v885_v22, %v720_v21 }
  0xf3   : > { %v893_v27 = vmul.f32 %v1466_v23, %v888_v25 }
  0xf5   : > { %v898_v29 = vadd.f32 %v1467_v26, %v893_v27  ;;  %v873_v30 = vpop.f32.mrf.mxu0 }
  0xf6   : > { %v886_v31 = vpop.f32.mrf.mxu1 }
  0xf7   : > { %v901_v32 = vadd.f32 %v900_v28, %v898_v29 }
  0xf9   : > { %v902_v33 = vpack.c.bf16 %v901_v32, %v901_v32 }
  0xfb   : > { %903 = vst [vmem:[%s383_s17] sm:$0x3] %v902_v33 }
  0xfc PF: > { %s21_s25 = sadd.s32 1, %s1628_s25   ;;  %s1902_s12 = sld [smem:[#allocation9_spill]] }
  0xfd   : > { %p18_p2 = scmp.ge.s32.totalorder %s21_s25, 6   ;;  %s1903_s20 = sld [smem:[#allocation13_spill]] }
  0xfe   : > { %s1904_s22 = sld [smem:[#allocation10_spill]]  ;;  %s1907_s18 = smov %s1604_s19 }
  0xff   : > { %s1905_s9 = sld [smem:[#allocation11_spill]]  ;;  %s1909_s21 = smov %s1620_s23 }
 0x100   : > { %s1906_s24 = sld [smem:[#allocation12_spill]] }
 0x101   :  { %20 = sbr.rel (!%p18_p2) target bundleno = 10 (0xa), region = 112 }
 0x102   : > { %s1908_s19 = smov %s1902_s12 }
 0x105   : > { %s1910_s23 = smov %s1905_s9 }
 0x106   :  { %931 = vsyncpa [#allocation3], 1 }
 0x107   :  { %933 = vsyncpa [#allocation3 + $0x1], 1 }
 0x108   :  { %934 = vsyncpa [#allocation5], 1 }
 0x109   :  { %936 = vsyncpa [#allocation5 + $0x1], 1 }

// kernel: forward.69
= control target key start
LH: loop header
LB: loop body
LE: loop exit
PB: predicated region body
PF: predicated region fallthrough
CT: control target
= control target key end

     0   :  { %s1428_s0 = inlined_call_operand.vmem [shape: bf16[2,2,512], index: 0, kind: input, shape index: {}]   ;;  %s1429_s1 = inlined_call_operand.hbm [shape: bf16[1,512,512], index: 1, kind: input, shape index: {}]   ;;  %s1430_s2 = inlined_call_operand.hbm [shape: f32[1,512], index: 2, kind: input, shape index: {}]   ;;  %s1431_s3 = inlined_call_operand.hbm [shape: f32[1,512], index: 3, kind: input, shape index: {}]   ;;  %s1432_s4 = inlined_call_operand.vmem [shape: bf16[2,2,512], index: 4, kind: output, shape index: {}]  }
   0x1   :  { %1437 = sst [smem:[#allocation14_spill]] %s1430_s2 }
   0x2   :  { %9 = vsyncpa [#allocation3], 0 }
   0x3   :  { %11 = vsyncpa [#allocation3 + $0x1], 0 }
   0x4   :  { %12 = vsyncpa [#allocation5], 0 }
   0x5   :  { %14 = vsyncpa [#allocation5 + $0x1], 0  ;;  %s1233_s15 = smov 0   ;;  %s1235_s16 = smov 0  }
   0x6   :  { %s1237_s17 = smov 0   ;;  %s1239_s18 = smov 0  }
   0x7   :  { %s1241_s19 = smov 0   ;;  %s1243_s20 = smov 0  }
   0x8   :  { %s1245_s21 = smov 0   ;;  %s1247_s22 = smov 0  }
   0x9 LB: > { %1438 = sst [smem:[#allocation9_spill]] %s1183_s17  ;;  %s1433_s23 = sadd.s32 4294967295, %s1203_s22   ;;  %s1203_s22 = sphi %s1247_s22, %s20_s22   ;;  %s1199_s21 = sphi %s1245_s21, %s1452_s21   ;;  %s1195_s20 = sphi %s1243_s20, %s1456_s20   ;;  %s1191_s19 = sphi %s1241_s19, %s1450_s19   ;;  %s1187_s18 = sphi %s1239_s18, %s1455_s18   ;;  %s1183_s17 = sphi %s1237_s17, %s1449_s17   ;;  %s1179_s16 = sphi %s1235_s16, %s1454_s16   ;;  %s1175_s15 = sphi %s1233_s15, %s1453_s15  }
   0xa   : > { %1439 = sst [smem:[#allocation10_spill]] %s1199_s21  ;;  %s29_s24 = sadd.s32 1, %s1195_s20 }
   0xb   : > { %p30_p0 = scmp.ge.s32.totalorder %s29_s24, 4  ;;  %s32_s25 = sadd.s32 1, %s1199_s21 }
   0xc   : > { %s65_s26 = sadd.s32 1, %s1183_s17  ;;  %p72_p1 = scmp.ne.s32.totalorder %s1183_s17, %s1179_s16 }
   0xd   : > { %s1458_s24 = smov (%p30_p0, %s29_s24), 0  ;;  %s1460_s25 = smov (!%p30_p0, %s32_s25), %s1199_s21 }
   0xe   : > { %1440 = sst [smem:[#allocation11_spill]] %s1458_s24  ;;  %s62_s27 = ssub.s32 %s1195_s20, %s1458_s24 }
   0xf   : > { %p73_p2 = scmp.eq.s32.totalorder %s1203_s22, 0  ;;  %p34_p3 = scmp.ge.s32.totalorder %s1460_s25, 2 }
  0x10   : > { %p63_p4 = scmp.eq.s32.totalorder %s62_s27, 0  ;;  %p78_p6 = scmp.ne.s32.totalorder %s1179_s16, %s1175_s15 }
  0x11   : > { %p74_p5 = por %p73_p2, %p72_p1  ;;  %s1462_s25 = smov (%p34_p3, %s1460_s25), 0 }
  0x12   : > { %1441 = sst [smem:[#allocation12_spill]] %s1462_s25  ;;  %p79_p7 = scmp.eq.s32.totalorder %s1433_s23, 0 }
  0x13   : > { %s1287_s28 = scalar_select %p63_p4, %s1183_s17, %s65_s26  }
  0x14   : > { %p973_p8 = scmp.lt.s32.totalorder %s1203_s22, 8  ;;  %s1293_s29 = sand.u32 1, %s1183_s17  }
  0x15   : > { %1442 = sst [smem:[#allocation13_spill]] %s1287_s28  ;;  %p1295_p9 = por %p79_p7, %p78_p6 }
  0x16   : > { %s789_s5 = sshll.u32 %s1293_s29, 8  ;;  %p1300_p10 = pnand %p973_p8, %p74_p5 }
  0x17   : > { %s210_s7 = sand.u32 1, %s1203_s22   ;;  %s1445_s2 = sld [smem:[#allocation14_spill]] }
  0x18   : > { %s213_s12 = scalar_lea.vmem [#allocation4], %s1293_s29  ;;  %s211_s14 = scalar_lea.sflag [#allocation5], %s210_s7 }
  0x19   : > { %s220_s13 = sshll.u32 %s213_s12, 4  ;;  %p791_p11 = scmp.ge.s32.totalorder %s1203_s22, 1  ;;  %s221_s13 = int_to_ptr.vmem [resolvable:$true] %s220_s13 }
  0x1a   : > { %p242_p12 = scmp.lt.s32.totalorder %s1203_s22, 9  ;;  %s790_s26 = sshll.u32 %s1195_s20, 2 }
  0x1b   : > { %s197_s9 = scalar_lea.hbm %s1429_s1, %s790_s26  ;;  %s1206_s23 = smov 64  }
  0x1c   : > { %p1314_p13 = pnand %p791_p11, %p242_p12  ;;  %s198_s7 = sshll.u32 %s197_s9, 4  ;;  %s199_s7 = int_to_ptr.hbm [resolvable:$true] %s198_s7 }
  0x1d   : > { %s216_s10 = scalar_lea.hbm %s1445_s2, %s1195_s20  ;;  %s1207_s2 = smov 4  }
  0x1e   : > { %s218_s11 = sshll.u32 %s216_s10, 4  ;;  %s193_s10 = scalar_lea.vmem [#allocation2], %s789_s5  ;;  %s219_s11 = int_to_ptr.hbm [resolvable:$true] %s218_s11 }
  0x1f   : > { %969 = dma.hbm_to_vmem [thread:$0]  (!%p1300_p10), %s219_s11, 16, %s221_s13, %s211_s14  }
  0x20   : > { %s200_s12 = sshll.u32 %s193_s10, 4  ;;  %s190_s11 = scalar_lea.sflag [#allocation3], %s1293_s29  ;;  %s201_s12 = int_to_ptr.vmem [resolvable:$true] %s200_s12 }
  0x21   : > { %s1205_s13 = smov 256   ;;  %s233_s21 = scalar_lea.hbm %s1431_s3, %s1195_s20 }
  0x22   : > { %966 = dma.hbm_to_vmem [thread:$0]  (!%p1300_p10), %s199_s7, 4096, %s201_s12, %s190_s11, %s1205_s13, %s1206_s23, %s1207_s2  }
  0x23   : > { %s235_s28 = sshll.u32 %s233_s21, 4  ;;  %s230_s17 = scalar_lea.vmem [#allocation6], %s1293_s29  ;;  %s236_s28 = int_to_ptr.hbm [resolvable:$true] %s235_s28 }
  0x24   : > { %s237_s27 = sshll.u32 %s230_s17, 4  ;;  %246 = sbr.rel (%p1314_p13) target bundleno = 223 (0xdf), region = 36  ;;  %s238_s27 = int_to_ptr.vmem [resolvable:$true] %s237_s27 }
  0x25   : > { %972 = dma.hbm_to_vmem [thread:$0]  (!%p1300_p10), %s236_s28, 16, %s238_s27, %s211_s14  }
  0x26   : > { %s1335_s5 = sand.u32 (!%p1314_p13), 1, %s1179_s16  }
  0x27   : > { %s792_s2 = sshll.u32 (!%p1314_p13), %s1335_s5, 8  ;;  %s249_s23 = scalar_lea.sflag (!%p1314_p13), [#allocation3], %s1335_s5 }
  0x28   : > { %s1339_s24 = scalar_lea.vmem (!%p1314_p13), [#allocation2], %s792_s2 }
  0x29   : > { %1166 = dma.done.wait (%p1295_p9), %s249_s23, 4096  }
  0x2a   : > { %1168 = vsyncadd (%p1295_p9), %s249_s23, 4294963200  ;;  %s1447_s17 = sadd.s32 4294967295, %s1203_s22   ;;  %s261_s28 = scalar_lea.vmem [#allocation4], %s1335_s5 }
  0x2b   : > { %s258_s21 = sand.u32 1, %s1447_s17  }
  0x2c   : > { %s259_s25 = scalar_lea.sflag [#allocation5], %s258_s21 }
  0x2d   : > { %1170 = dma.done.wait (%p1295_p9), %s259_s25, 32  }
  0x2e   : > { %1172 = vsyncadd (%p1295_p9), %s259_s25, 4294967264  ;;  %p310_p0 = scmp.lt.s32.totalorder %s1191_s19, 1  ;;  %v932_v0 = vld [vmem:[%s1339_s24 + $0x38] sm:$0xff]  ;;  %v931_v4 = vld [vmem:[%s1339_s24 + $0x30] sm:$0xff]  ;;  %s270_s15 = scalar_lea.vmem [#allocation6], %s1335_s5 }
  0x2f   : > { %v940_v1 = vld [vmem:[%s1339_s24 + $0x78] sm:$0xff]  ;;  %588 = vmatpush.bf16.msra.mxu0 %v932_v0  ;;  %v939_v5 = vld [vmem:[%s1339_s24 + $0x70] sm:$0xff]  ;;  %v930_v8 = vld [vmem:[%s1339_s24 + $0x28] sm:$0xff]  ;;  %p316_p1 = scmp.lt.s32.totalorder %s1187_s18, 3 }
  0x30   : > { %v948_v2 = vld [vmem:[%s1339_s24 + $0xb8] sm:$0xff]  ;;  %s1464_s19 = smov (!%p310_p0, %s1191_s19), 1  ;;  %601 = vmatpush.bf16.msra.mxu1 %v940_v1  ;;  %v947_v6 = vld [vmem:[%s1339_s24 + $0xb0] sm:$0xff]  ;;  %v938_v9 = vld [vmem:[%s1339_s24 + $0x68] sm:$0xff] }
  0x31   : > { %v956_v3 = vld [vmem:[%s1339_s24 + $0xf8] sm:$0xff]  ;;  %614 = vmatpush.bf16.msra.mxu2 %v948_v2  ;;  %v955_v7 = vld [vmem:[%s1339_s24 + $0xf0] sm:$0xff]  ;;  %s793_s29 = sshll.u32 %s1464_s19, 2  ;;  %v946_v10 = vld [vmem:[%s1339_s24 + $0xa8] sm:$0xff]  ;;  %s1466_s18 = smov (!%p316_p1, %s1187_s18), 3 }
  0x32   : > { %627 = vmatpush.bf16.msra.mxu3 %v956_v3  ;;  %v954_v11 = vld [vmem:[%s1339_s24 + $0xe8] sm:$0xff]  ;;  %s313_s14 = scalar_lea.vmem %s1428_s0, %s793_s29  ;;  %v929_v12 = vld [vmem:[%s1339_s24 + $0x20] sm:$0xff]  ;;  %v928_v17 = vld [vmem:[%s1339_s24 + $0x18] sm:$0xff]  ;;  %s319_s26 = sadd.s32 %s793_s29, %s1466_s18 }
  0x33   : > { %589 = vmatpush.bf16.msra.mxu0 %v931_v4  ;;  %v937_v13 = vld [vmem:[%s1339_s24 + $0x60] sm:$0xff]  ;;  %v321_v14 = vld [vmem:[%s313_s14] sm:$0xf]  ;;  %v927_v21 = vld [vmem:[%s1339_s24 + $0x10] sm:$0xff]  ;;  %s320_s10 = scalar_lea.vmem %s1432_s4, %s319_s26 }
  0x34   : > { %602 = vmatpush.bf16.msra.mxu1 %v939_v5  ;;  %v945_v15 = vld [vmem:[%s1339_s24 + $0xa0] sm:$0xff]  ;;  %387 = vst [vmem:[#allocation1] ss:$9 sm:$0xff] %v321_v14  ;;  %v936_v18 = vld [vmem:[%s1339_s24 + $0x58] sm:$0xff]  ;;  %v935_v22 = vld [vmem:[%s1339_s24 + $0x50] sm:$0xff] }
  0x35   : > { %615 = vmatpush.bf16.msra.mxu2 %v947_v6  ;;  %v953_v16 = vld [vmem:[%s1339_s24 + $0xe0] sm:$0xff]  ;;  %v944_v19 = vld [vmem:[%s1339_s24 + $0x98] sm:$0xff]  ;;  %v943_v23 = vld [vmem:[%s1339_s24 + $0x90] sm:$0xff] }
  0x36   : > { %628 = vmatpush.bf16.msra.mxu3 %v955_v7  ;;  %v952_v20 = vld [vmem:[%s1339_s24 + $0xd8] sm:$0xff]  ;;  %v951_v24 = vld [vmem:[%s1339_s24 + $0xd0] sm:$0xff]  ;;  %v926_v25 = vld [vmem:[%s1339_s24 + $0x8] sm:$0xff] }
  0x37   : > { %590 = vmatpush.bf16.msra.mxu0 %v930_v8  ;;  %v934_v26 = vld [vmem:[%s1339_s24 + $0x48] sm:$0xff]  ;;  %v925_v29 = vld [vmem:[%s1339_s24] sm:$0xff]  ;;  %v1041_v43 = vld [vmem:[%s261_s28] ss:$0 sm:$0xff] }
  0x38   : > { %603 = vmatpush.bf16.msra.mxu1 %v938_v9  ;;  %v942_v27 = vld [vmem:[%s1339_s24 + $0x88] sm:$0xff]  ;;  %v933_v30 = vld [vmem:[%s1339_s24 + $0x40] sm:$0xff]  ;;  %v1042_v47 = vld [vmem:[%s270_s15] ss:$0 sm:$0xff] }
  0x39   : > { %616 = vmatpush.bf16.msra.mxu2 %v946_v10  ;;  %v950_v28 = vld [vmem:[%s1339_s24 + $0xc8] sm:$0xff]  ;;  %v941_v31 = vld [vmem:[%s1339_s24 + $0x80] sm:$0xff] }
  0x3a   : > { %629 = vmatpush.bf16.msra.mxu3 %v954_v11  ;;  %v949_v32 = vld [vmem:[%s1339_s24 + $0xc0] sm:$0xff] }
  0x3b   : > { %591 = vmatpush.bf16.msra.mxu0 %v929_v12  ;;  %v388_v33 = vld [vmem:[#allocation1] sm:$0xff]  ;;  %v389_v34 = vld [vmem:[#allocation1 + $0x9] sm:$0xff]  ;;  %v390_v35 = vld [vmem:[#allocation1 + $0x12] sm:$0xff] }
  0x3c   : > { %604 = vmatpush.bf16.msra.mxu1 %v937_v13  ;;  %v391_v36 = vld [vmem:[#allocation1 + $0x1b] sm:$0xff] }
  0x3d   : > { %617 = vmatpush.bf16.msra.mxu2 %v945_v15 }
  0x3e   : > { %630 = vmatpush.bf16.msra.mxu3 %v953_v16 }
  0x3f   : > { %592 = vmatpush.bf16.msra.mxu0 %v928_v17 }
  0x40   : > { %605 = vmatpush.bf16.msra.mxu1 %v936_v18 }
  0x41   : > { %618 = vmatpush.bf16.msra.mxu2 %v944_v19 }
  0x42   : > { %631 = vmatpush.bf16.msra.mxu3 %v952_v20 }
  0x43   : > { %593 = vmatpush.bf16.msra.mxu0 %v927_v21 }
  0x44   : > { %606 = vmatpush.bf16.msra.mxu1 %v935_v22 }
  0x45   : > { %619 = vmatpush.bf16.msra.mxu2 %v943_v23 }
  0x46   : > { %632 = vmatpush.bf16.msra.mxu3 %v951_v24 }
  0x47   : > { %594 = vmatpush.bf16.msra.mxu0 %v926_v25 }
  0x48   : > { %607 = vmatpush.bf16.msra.mxu1 %v934_v26 }
  0x49   : > { %620 = vmatpush.bf16.msra.mxu2 %v942_v27 }
  0x4a   : > { %633 = vmatpush.bf16.msra.mxu3 %v950_v28 }
  0x4b   : > { %595 = vmatpush.bf16.msra.mxu0 %v925_v29 }
  0x4c   : > { %608 = vmatpush.bf16.msra.mxu1 %v933_v30 }
  0x4d   : > { %621 = vmatpush.bf16.msra.mxu2 %v941_v31 }
  0x4e   : > { %634 = vmatpush.bf16.msra.mxu3 %v949_v32  ;;  %596 = vmatmul.bf16.vlgmr.msra.gmra.mxu0 %v388_v33 }
  0x4f   : > { %609 = vmatmul.bf16.vlgmr.msra.gmra.mxu1 %v389_v34 }
  0x50   : > { %622 = vmatmul.bf16.vlgmr.msra.gmra.mxu2 %v390_v35 }
  0x51   : > { %635 = vmatmul.bf16.vlgmr.msra.gmra.mxu3 %v391_v36 }
  0xcb   : > { %v597_v37 = vpop.f32.mrf.mxu0 }
  0xcc   : > { %v610_v38 = vpop.f32.mrf.mxu1 }
  0xcd   : > { %v611_v39 = vadd.f32 %v610_v38, %v597_v37 }
  0xd3   : > { %v623_v40 = vpop.f32.mrf.mxu2  ;;  %v599_v44 = vpop.f32.mrf.mxu0 }
  0xd4   : > { %v636_v41 = vpop.f32.mrf.mxu3  ;;  %v624_v42 = vadd.f32 %v623_v40, %v611_v39  ;;  %v612_v45 = vpop.f32.mrf.mxu1 }
  0xd6   : > { %v637_v46 = vadd.f32 %v636_v41, %v624_v42 }
  0xd8   : > { %v644_v48 = vmul.f32 %v1041_v43, %v637_v46 }
  0xda   : > { %v649_v49 = vadd.f32 %v1042_v47, %v644_v48 }
  0xdb   : > { %v625_v50 = vpop.f32.mrf.mxu2 }
  0xdc   : > { %v638_v51 = vpop.f32.mrf.mxu3  ;;  %v650_v52 = vpack.c.bf16 %v649_v49, %v649_v49 }
  0xde   : > { %651 = vst [vmem:[%s320_s10] sm:$0x1] %v650_v52 }
  0xdf PF: > { %s20_s22 = sadd.s32 1, %s1203_s22   ;;  %s1448_s12 = sld [smem:[#allocation9_spill]] }
  0xe0   : > { %p17_p2 = scmp.ge.s32.totalorder %s20_s22, 10   ;;  %s1449_s17 = sld [smem:[#allocation13_spill]] }
  0xe1   : > { %s1450_s19 = sld [smem:[#allocation10_spill]]  ;;  %s1453_s15 = smov %s1179_s16 }
  0xe2   : > { %s1451_s7 = sld [smem:[#allocation11_spill]]  ;;  %s1455_s18 = smov %s1195_s20 }
  0xe3   : > { %s1452_s21 = sld [smem:[#allocation12_spill]] }
  0xe4   :  { %19 = sbr.rel (!%p17_p2) target bundleno = 9 (0x9), region = 103 }
  0xe5   : > { %s1454_s16 = smov %s1448_s12 }
  0xe8   : > { %s1456_s20 = smov %s1451_s7 }
  0xe9   :  { %677 = vsyncpa [#allocation3], 1 }
  0xea   :  { %679 = vsyncpa [#allocation3 + $0x1], 1 }
  0xeb   :  { %680 = vsyncpa [#allocation5], 1 }
  0xec   :  { %682 = vsyncpa [#allocation5 + $0x1], 1 }

// kernel: forward.58
= control target key start
LH: loop header
LB: loop body
LE: loop exit
PB: predicated region body
PF: predicated region fallthrough
CT: control target
= control target key end

     0   :  { %s1791_s0 = inlined_call_operand.vmem [shape: bf16[2,6,256], index: 0, kind: input, shape index: {}]   ;;  %s1792_s1 = inlined_call_operand.hbm [shape: bf16[3,256,256], index: 1, kind: input, shape index: {}]   ;;  %s1793_s2 = inlined_call_operand.hbm [shape: f32[1,256], index: 2, kind: input, shape index: {}]   ;;  %s1794_s3 = inlined_call_operand.hbm [shape: f32[1,256], index: 3, kind: input, shape index: {}]   ;;  %s1795_s4 = inlined_call_operand.vmem [shape: bf16[2,4,256], index: 4, kind: output, shape index: {}]  }
   0x1   :  { %1800 = sst [smem:[#allocation14_spill]] %s1793_s2 }
   0x2   :  { %9 = vsyncpa [#allocation3], 0 }
   0x3   :  { %11 = vsyncpa [#allocation3 + $0x1], 0 }
   0x4   :  { %12 = vsyncpa [#allocation5], 0 }
   0x5   :  { %14 = vsyncpa [#allocation5 + $0x1], 0  ;;  %s1578_s15 = smov 0   ;;  %s1580_s16 = smov 0  }
   0x6   :  { %s1582_s17 = smov 0   ;;  %s1584_s18 = smov 0  }
   0x7   :  { %s1586_s19 = smov 0   ;;  %s1588_s20 = smov 0  }
   0x8   :  { %s1590_s21 = smov 0   ;;  %s1592_s22 = smov 0  }
   0x9 LB: > { %1801 = sst [smem:[#allocation9_spill]] %s1528_s17  ;;  %s1796_s23 = sadd.s32 4294967295, %s1548_s22   ;;  %s1548_s22 = sphi %s1592_s22, %s20_s22   ;;  %s1544_s21 = sphi %s1590_s21, %s1815_s21   ;;  %s1540_s20 = sphi %s1588_s20, %s1820_s20   ;;  %s1536_s19 = sphi %s1586_s19, %s1819_s19   ;;  %s1532_s18 = sphi %s1584_s18, %s1818_s18   ;;  %s1528_s17 = sphi %s1582_s17, %s1812_s17   ;;  %s1524_s16 = sphi %s1580_s16, %s1817_s16   ;;  %s1520_s15 = sphi %s1578_s15, %s1816_s15  }
   0xa   : > { %1802 = sst [smem:[#allocation10_spill]] %s1544_s21  ;;  %s29_s24 = sadd.s32 1, %s1540_s20 }
   0xb   : > { %p30_p0 = scmp.ge.s32.totalorder %s29_s24, 2  ;;  %s32_s25 = sadd.s32 1, %s1544_s21 }
   0xc   : > { %s65_s26 = sadd.s32 1, %s1528_s17  ;;  %p72_p1 = scmp.ne.s32.totalorder %s1528_s17, %s1524_s16 }
   0xd   : > { %s1822_s24 = smov (%p30_p0, %s29_s24), 0  ;;  %s1824_s25 = smov (!%p30_p0, %s32_s25), %s1544_s21 }
   0xe   : > { %1803 = sst [smem:[#allocation11_spill]] %s1822_s24  ;;  %s62_s27 = ssub.s32 %s1540_s20, %s1822_s24 }
   0xf   : > { %p73_p2 = scmp.eq.s32.totalorder %s1548_s22, 0  ;;  %p34_p3 = scmp.ge.s32.totalorder %s1824_s25, 2 }
  0x10   : > { %p63_p4 = scmp.eq.s32.totalorder %s62_s27, 0  ;;  %p78_p6 = scmp.ne.s32.totalorder %s1524_s16, %s1520_s15 }
  0x11   : > { %p74_p5 = por %p73_p2, %p72_p1  ;;  %s1826_s25 = smov (%p34_p3, %s1824_s25), 0 }
  0x12   : > { %1804 = sst [smem:[#allocation12_spill]] %s1826_s25  ;;  %p79_p7 = scmp.eq.s32.totalorder %s1796_s23, 0 }
  0x13   : > { %s1632_s28 = scalar_select %p63_p4, %s1528_s17, %s65_s26  }
  0x14   : > { %p1318_p8 = scmp.lt.s32.totalorder %s1548_s22, 4  ;;  %s1638_s29 = sand.u32 1, %s1528_s17  }
  0x15   : > { %1805 = sst [smem:[#allocation13_spill]] %s1632_s28  ;;  %p1640_p9 = por %p79_p7, %p78_p6 }
  0x16   : > { %s1300_s5 = smul.u32 384, %s1638_s29  ;;  %p1645_p10 = pnand %p1318_p8, %p74_p5 }
  0x17   : > { %s211_s7 = sand.u32 1, %s1548_s22   ;;  %s1808_s2 = sld [smem:[#allocation14_spill]] }
  0x18   : > { %s214_s12 = scalar_lea.vmem [#allocation4], %s1638_s29  ;;  %s212_s14 = scalar_lea.sflag [#allocation5], %s211_s7 }
  0x19   : > { %s221_s13 = sshll.u32 %s214_s12, 4  ;;  %p988_p11 = scmp.ge.s32.totalorder %s1548_s22, 1  ;;  %s222_s13 = int_to_ptr.vmem [resolvable:$true] %s221_s13 }
  0x1a   : > { %p243_p12 = scmp.lt.s32.totalorder %s1548_s22, 5  ;;  %s987_s26 = sshll.u32 %s1540_s20, 2 }
  0x1b   : > { %s198_s9 = scalar_lea.hbm %s1792_s1, %s987_s26  ;;  %s1551_s23 = smov 64  }
  0x1c   : > { %p1659_p13 = pnand %p988_p11, %p243_p12  ;;  %s199_s7 = sshll.u32 %s198_s9, 4  ;;  %s200_s7 = int_to_ptr.hbm [resolvable:$true] %s199_s7 }
  0x1d   : > { %s217_s10 = scalar_lea.hbm %s1808_s2, %s1540_s20  ;;  %s1552_s2 = smov 4  }
  0x1e   : > { %s219_s11 = sshll.u32 %s217_s10, 4  ;;  %s194_s10 = scalar_lea.vmem [#allocation2], %s1300_s5  ;;  %s220_s11 = int_to_ptr.hbm [resolvable:$true] %s219_s11 }
  0x1f   : > { %1314 = dma.hbm_to_vmem [thread:$0]  (!%p1645_p10), %s220_s11, 16, %s222_s13, %s212_s14  }
  0x20   : > { %s201_s12 = sshll.u32 %s194_s10, 4  ;;  %s191_s11 = scalar_lea.sflag [#allocation3], %s1638_s29  ;;  %s202_s12 = int_to_ptr.vmem [resolvable:$true] %s201_s12 }
  0x21   : > { %s1550_s13 = smov 128   ;;  %s234_s21 = scalar_lea.hbm %s1794_s3, %s1540_s20 }
  0x22   : > { %1311 = dma.hbm_to_vmem [thread:$0]  (!%p1645_p10), %s200_s7, 6144, %s202_s12, %s191_s11, %s1550_s13, %s1551_s23, %s1552_s2  }
  0x23   : > { %s236_s28 = sshll.u32 %s234_s21, 4  ;;  %s231_s17 = scalar_lea.vmem [#allocation6], %s1638_s29  ;;  %s237_s28 = int_to_ptr.hbm [resolvable:$true] %s236_s28 }
  0x24   : > { %s238_s27 = sshll.u32 %s231_s17, 4  ;;  %247 = sbr.rel (%p1659_p13) target bundleno = 251 (0xfb), region = 36  ;;  %s239_s27 = int_to_ptr.vmem [resolvable:$true] %s238_s27 }
  0x25   : > { %1317 = dma.hbm_to_vmem [thread:$0]  (!%p1645_p10), %s237_s28, 16, %s239_s27, %s212_s14  }
  0x26   : > { %s1680_s5 = sand.u32 (!%p1659_p13), 1, %s1524_s16  }
  0x27   : > { %s1301_s2 = smul.u32 (!%p1659_p13), 384, %s1680_s5  ;;  %s250_s23 = scalar_lea.sflag (!%p1659_p13), [#allocation3], %s1680_s5 }
  0x29   : > { %s1684_s24 = scalar_lea.vmem [#allocation2], %s1301_s2 }
  0x2a   : > { %1511 = dma.done.wait (%p1640_p9), %s250_s23, 6144  }
  0x2b   : > { %1513 = vsyncadd (%p1640_p9), %s250_s23, 4294961152  ;;  %s1810_s17 = sadd.s32 4294967295, %s1548_s22   ;;  %s262_s28 = scalar_lea.vmem [#allocation4], %s1680_s5 }
  0x2c   : > { %s259_s21 = sand.u32 1, %s1810_s17  }
  0x2d   : > { %s260_s25 = scalar_lea.sflag [#allocation5], %s259_s21 }
  0x2e   : > { %1515 = dma.done.wait (%p1640_p9), %s260_s25, 32  }
  0x2f   : > { %1517 = vsyncadd (%p1640_p9), %s260_s25, 4294967264  ;;  %p313_p0 = scmp.lt.s32.totalorder %s1536_s19, 1  ;;  %v1275_v0 = vld [vmem:[%s1684_s24 + $0xb8] sm:$0xff]  ;;  %v1274_v2 = vld [vmem:[%s1684_s24 + $0xb0] sm:$0xff]  ;;  %s271_s15 = scalar_lea.vmem [#allocation6], %s1680_s5 }
  0x30   : > { %v1283_v1 = vld [vmem:[%s1684_s24 + $0xf8] sm:$0xff]  ;;  %510 = vmatpush.bf16.msra.mxu0 %v1275_v0  ;;  %v1282_v3 = vld [vmem:[%s1684_s24 + $0xf0] sm:$0xff]  ;;  %v1273_v8 = vld [vmem:[%s1684_s24 + $0xa8] sm:$0xff]  ;;  %p320_p1 = scmp.lt.s32.totalorder %s1532_s18, 1 }
  0x31   : > { %s1828_s19 = smov (!%p313_p0, %s1536_s19), 1  ;;  %523 = vmatpush.bf16.msra.mxu1 %v1283_v1  ;;  %v1259_v4 = vld [vmem:[%s1684_s24 + $0x38] sm:$0xff]  ;;  %v1258_v6 = vld [vmem:[%s1684_s24 + $0x30] sm:$0xff]  ;;  %v1281_v9 = vld [vmem:[%s1684_s24 + $0xe8] sm:$0xff] }
  0x32   : > { %v1267_v5 = vld [vmem:[%s1684_s24 + $0x78] sm:$0xff]  ;;  %639 = vmatpush.bf16.msra.mxu2 %v1259_v4  ;;  %v1266_v7 = vld [vmem:[%s1684_s24 + $0x70] sm:$0xff]  ;;  %s1251_s29 = sshll.u32 %s1828_s19, 3  ;;  %v1257_v10 = vld [vmem:[%s1684_s24 + $0x28] sm:$0xff]  ;;  %s1830_s18 = smov (!%p320_p1, %s1532_s18), 1 }
  0x33   : > { %652 = vmatpush.bf16.msra.mxu3 %v1267_v5  ;;  %v1265_v11 = vld [vmem:[%s1684_s24 + $0x68] sm:$0xff]  ;;  %s1717_s14 = scalar_lea.vmem %s1791_s0, %s1251_s29  ;;  %v1272_v12 = vld [vmem:[%s1684_s24 + $0xa0] sm:$0xff]  ;;  %v1271_v19 = vld [vmem:[%s1684_s24 + $0x98] sm:$0xff]  ;;  %s991_s26 = sshll.u32 %s1828_s19, 1 }
  0x34   : > { %511 = vmatpush.bf16.msra.mxu0 %v1274_v2  ;;  %v1280_v13 = vld [vmem:[%s1684_s24 + $0xe0] sm:$0xff]  ;;  %v1279_v20 = vld [vmem:[%s1684_s24 + $0xd8] sm:$0xff]  ;;  %v1270_v25 = vld [vmem:[%s1684_s24 + $0x90] sm:$0xff]  ;;  %s323_s8 = sadd.s32 %s991_s26, %s1830_s18 }
  0x35   : > { %524 = vmatpush.bf16.msra.mxu1 %v1282_v3  ;;  %v359_v14 = vld [vmem:[%s1717_s14] sm:$0x77]  ;;  %v1255_v21 = vld [vmem:[%s1684_s24 + $0x18] sm:$0xff]  ;;  %v1278_v26 = vld [vmem:[%s1684_s24 + $0xd0] sm:$0xff]  ;;  %s992_s9 = sshll.u32 %s323_s8, 1 }
  0x36   : > { %640 = vmatpush.bf16.msra.mxu2 %v1258_v6  ;;  %v1256_v15 = vld [vmem:[%s1684_s24 + $0x20] sm:$0xff]  ;;  %v394_v17 = vunpack.c.l.b16 %v359_v14  ;;  %v395_v18 = vunpack.c.h.b16 %v359_v14  ;;  %v1263_v22 = vld [vmem:[%s1684_s24 + $0x58] sm:$0xff]  ;;  %v1254_v27 = vld [vmem:[%s1684_s24 + $0x10] sm:$0xff]  ;;  %s325_s7 = scalar_lea.vmem %s1795_s4, %s992_s9 }
  0x37   : > { %653 = vmatpush.bf16.msra.mxu3 %v1266_v7  ;;  %v1264_v16 = vld [vmem:[%s1684_s24 + $0x60] sm:$0xff]  ;;  %v1262_v28 = vld [vmem:[%s1684_s24 + $0x50] sm:$0xff]  ;;  %v1269_v31 = vld [vmem:[%s1684_s24 + $0x88] sm:$0xff] }
  0x38   : > { %512 = vmatpush.bf16.msra.mxu0 %v1273_v8  ;;  %v396_v23 = vpack.c.b16 %v394_v17, %v394_v17  ;;  %v397_v24 = vpack.c.b16 %v395_v18, %v395_v18  ;;  %v1277_v32 = vld [vmem:[%s1684_s24 + $0xc8] sm:$0xff]  ;;  %v326_v39 = vld [vmem:[%s1717_s14] sm:$0x33]  ;;  %v1291_v42 = vld [vmem:[%s1684_s24 + $0x138] sm:$0xff] }
  0x39   : > { %525 = vmatpush.bf16.msra.mxu1 %v1281_v9  ;;  %v1253_v33 = vld [vmem:[%s1684_s24 + $0x8] sm:$0xff]  ;;  %v1268_v40 = vld [vmem:[%s1684_s24 + $0x80] sm:$0xff]  ;;  %v1299_v43 = vld [vmem:[%s1684_s24 + $0x178] sm:$0xff]  ;;  %v537_v46 = vunpack.c.l.b16 %v326_v39  ;;  %v538_v47 = vunpack.c.h.b16 %v326_v39 }
  0x3a   : > { %641 = vmatpush.bf16.msra.mxu2 %v1257_v10  ;;  %v401_v29 = vshll.u32 %v396_v23, 16  ;;  %v408_v30 = vshll.u32 %v397_v24, 16  ;;  %v1261_v34 = vld [vmem:[%s1684_s24 + $0x48] sm:$0xff]  ;;  %v399_v35 = vshrl.u32 %v396_v23, 16  ;;  %v406_v37 = vshrl.u32 %v397_v24, 16  ;;  %v1276_v41 = vld [vmem:[%s1684_s24 + $0xc0] sm:$0xff] }
  0x3b   : > { %654 = vmatpush.bf16.msra.mxu3 %v1265_v11  ;;  %v1252_v44 = vld [vmem:[%s1684_s24] sm:$0xff]  ;;  %v1290_v50 = vld [vmem:[%s1684_s24 + $0x130] sm:$0xff]  ;;  %v539_v52 = vpack.c.b16 %v537_v46, %v537_v46  ;;  %v540_v53 = vpack.c.b16 %v538_v47, %v538_v47  ;;  %v1289_v54 = vld [vmem:[%s1684_s24 + $0x128] sm:$0xff] }
  0x3c   : > { %513 = vmatpush.bf16.msra.mxu0 %v1272_v12  ;;  %v403_v36 = vrot.slane %v401_v29, 1  ;;  %v410_v38 = vrot.slane %v408_v30, 1  ;;  %v1260_v45 = vld [vmem:[%s1684_s24 + $0x40] sm:$0xff]  ;;  %v1298_v51 = vld [vmem:[%s1684_s24 + $0x170] sm:$0xff]  ;;  %v1297_v55 = vld [vmem:[%s1684_s24 + $0x168] sm:$0xff] }
  0x3d   : > { %526 = vmatpush.bf16.msra.mxu1 %v1280_v13  ;;  %v1288_v56 = vld [vmem:[%s1684_s24 + $0x120] sm:$0xff]  ;;  %v1287_v58 = vld [vmem:[%s1684_s24 + $0x118] sm:$0xff]  ;;  %v1286_v60 = vld [vmem:[%s1684_s24 + $0x110] sm:$0xff] }
  0x3e   : > { %642 = vmatpush.bf16.msra.mxu2 %v1256_v15  ;;  %v404_v48 = vor.u32 %v403_v36, %v399_v35  ;;  %v411_v49 = vor.u32 %v410_v38, %v406_v37  ;;  %v1296_v57 = vld [vmem:[%s1684_s24 + $0x160] sm:$0xff]  ;;  %v1295_v59 = vld [vmem:[%s1684_s24 + $0x158] sm:$0xff]  ;;  %v1294_v61 = vld [vmem:[%s1684_s24 + $0x150] sm:$0xff] }
  0x3f   : > { %655 = vmatpush.bf16.msra.mxu3 %v1264_v16  ;;  %v665_v62 = vld [vmem:[%s1717_s14] sm:$0x66]  ;;  %v1285_v1 = vld [vmem:[%s1684_s24 + $0x108] sm:$0xff]  ;;  %v1386_v23 = vld [vmem:[%s262_s28] ss:$0 sm:$0xff] }
  0x40   : > { %514 = vmatpush.bf16.msra.mxu0 %v1271_v19  ;;  %v700_v63 = vunpack.c.l.b16 %v665_v62  ;;  %v701_v0 = vunpack.c.h.b16 %v665_v62  ;;  %v1293_v2 = vld [vmem:[%s1684_s24 + $0x148] sm:$0xff]  ;;  %v1284_v5 = vld [vmem:[%s1684_s24 + $0x100] sm:$0xff] }
  0x41   : > { %527 = vmatpush.bf16.msra.mxu1 %v1279_v20  ;;  %v1292_v6 = vld [vmem:[%s1684_s24 + $0x140] sm:$0xff] }
  0x42   : > { %643 = vmatpush.bf16.msra.mxu2 %v1255_v21  ;;  %v702_v3 = vpack.c.b16 %v700_v63, %v700_v63  ;;  %v703_v4 = vpack.c.b16 %v701_v0, %v701_v0 }
  0x43   : > { %656 = vmatpush.bf16.msra.mxu3 %v1263_v22 }
  0x44   : > { %515 = vmatpush.bf16.msra.mxu0 %v1270_v25  ;;  %v704_v7 = vrot.slane %v702_v3, 1  ;;  %v705_v8 = vrot.slane %v703_v4, 1  ;;  %v1387_v25 = vld [vmem:[%s271_s15] ss:$0 sm:$0xff] }
  0x45   : > { %528 = vmatpush.bf16.msra.mxu1 %v1278_v26 }
  0x46   : > { %644 = vmatpush.bf16.msra.mxu2 %v1254_v27 }
  0x47   : > { %657 = vmatpush.bf16.msra.mxu3 %v1262_v28 }
  0x48   : > { %516 = vmatpush.bf16.msra.mxu0 %v1269_v31 }
  0x49   : > { %529 = vmatpush.bf16.msra.mxu1 %v1277_v32 }
  0x4a   : > { %645 = vmatpush.bf16.msra.mxu2 %v1253_v33 }
  0x4b   : > { %658 = vmatpush.bf16.msra.mxu3 %v1261_v34 }
  0x4c   : > { %517 = vmatpush.bf16.msra.mxu0 %v1268_v40 }
  0x4d   : > { %530 = vmatpush.bf16.msra.mxu1 %v1276_v41 }
  0x4e   : > { %646 = vmatpush.bf16.msra.mxu2 %v1252_v44 }
  0x4f   : > { %659 = vmatpush.bf16.msra.mxu3 %v1260_v45  ;;  %518 = vmatmul.bf16.vlgmr.msra.gmra.mxu0 %v404_v48 }
  0x50   : > { %804 = vmatpush.bf16.msrb.mxu0 %v1291_v42  ;;  %531 = vmatmul.bf16.vlgmr.msra.gmra.mxu1 %v411_v49 }
  0x51   : > { %817 = vmatpush.bf16.msrb.mxu1 %v1299_v43  ;;  %647 = vmatmul.bf16.vlgmr.msra.gmra.mxu2 %v539_v52 }
  0x52   : > { %660 = vmatmul.bf16.vlgmr.msra.gmra.mxu3 %v540_v53 }
  0x54   : > { %805 = vmatpush.bf16.msrb.mxu0 %v1290_v50 }
  0x55   : > { %818 = vmatpush.bf16.msrb.mxu1 %v1298_v51 }
  0x58   : > { %806 = vmatpush.bf16.msrb.mxu0 %v1289_v54 }
  0x59   : > { %819 = vmatpush.bf16.msrb.mxu1 %v1297_v55 }
  0x5c   : > { %807 = vmatpush.bf16.msrb.mxu0 %v1288_v56 }
  0x5d   : > { %820 = vmatpush.bf16.msrb.mxu1 %v1296_v57 }
  0x60   : > { %808 = vmatpush.bf16.msrb.mxu0 %v1287_v58 }
  0x61   : > { %821 = vmatpush.bf16.msrb.mxu1 %v1295_v59 }
  0x64   : > { %809 = vmatpush.bf16.msrb.mxu0 %v1286_v60 }
  0x65   : > { %822 = vmatpush.bf16.msrb.mxu1 %v1294_v61 }
  0x68   : > { %810 = vmatpush.bf16.msrb.mxu0 %v1285_v1 }
  0x69   : > { %823 = vmatpush.bf16.msrb.mxu1 %v1293_v2 }
  0x6c   : > { %811 = vmatpush.bf16.msrb.mxu0 %v1284_v5 }
  0x6d   : > { %824 = vmatpush.bf16.msrb.mxu1 %v1292_v6 }
  0x6f   : > { %812 = vmatmul.bf16.vlgmr.msrb.gmra.mxu0 %v704_v7 }
  0x70   : > { %825 = vmatmul.bf16.vlgmr.msrb.gmra.mxu1 %v705_v8 }
  0xcc   : > { %v519_v9 = vpop.f32.mrf.mxu0 }
  0xcd   : > { %v532_v10 = vpop.f32.mrf.mxu1 }
  0xce   : > { %v533_v17 = vadd.f32 %v532_v10, %v519_v9 }
  0xd4   : > { %v521_v11 = vpop.f32.mrf.mxu0  ;;  %v648_v13 = vpop.f32.mrf.mxu2 }
  0xd5   : > { %v534_v12 = vpop.f32.mrf.mxu1  ;;  %v661_v14 = vpop.f32.mrf.mxu3  ;;  %v649_v18 = vadd.f32 %v648_v13, %v533_v17 }
  0xd7   : > { %v662_v21 = vadd.f32 %v661_v14, %v649_v18 }
  0xdc   : > { %v650_v15 = vpop.f32.mrf.mxu2 }
  0xdd   : > { %v663_v16 = vpop.f32.mrf.mxu3 }
  0xec   : > { %v813_v19 = vpop.f32.mrf.mxu0 }
  0xed   : > { %v826_v20 = vpop.f32.mrf.mxu1 }
  0xee   : > { %v827_v22 = vadd.f32 %v826_v20, %v813_v19 }
  0xf0   : > { %v830_v24 = vadd.f32 %v827_v22, %v662_v21 }
  0xf2   : > { %v835_v26 = vmul.f32 %v1386_v23, %v830_v24 }
  0xf4   : > { %v840_v27 = vadd.f32 %v1387_v25, %v835_v26  ;;  %v815_v28 = vpop.f32.mrf.mxu0 }
  0xf5   : > { %v828_v29 = vpop.f32.mrf.mxu1 }
  0xf6   : > { %v841_v30 = vmax.f32 %v840_v27, 0.0 }
  0xf8   : > { %v842_v31 = vpack.c.bf16 %v841_v30, %v841_v30 }
  0xfa   : > { %843 = vst [vmem:[%s325_s7] sm:$0x3] %v842_v31 }
  0xfb PF: > { %s20_s22 = sadd.s32 1, %s1548_s22   ;;  %s1811_s19 = sld [smem:[#allocation9_spill]] }
  0xfc   : > { %p17_p2 = scmp.ge.s32.totalorder %s20_s22, 6   ;;  %s1812_s17 = sld [smem:[#allocation13_spill]] }
  0xfd   : > { %s1813_s11 = sld [smem:[#allocation10_spill]]  ;;  %s1816_s15 = smov %s1524_s16 }
  0xfe   : > { %s1814_s13 = sld [smem:[#allocation11_spill]]  ;;  %s1818_s18 = smov %s1540_s20 }
  0xff   : > { %s1815_s21 = sld [smem:[#allocation12_spill]] }
 0x100   :  { %19 = sbr.rel (!%p17_p2) target bundleno = 9 (0x9), region = 105 }
 0x101   : > { %s1817_s16 = smov %s1811_s19 }
 0x103   : > { %s1819_s19 = smov %s1813_s11 }
 0x104   : > { %s1820_s20 = smov %s1814_s13 }
 0x105   :  { %871 = vsyncpa [#allocation3], 1 }
 0x106   :  { %873 = vsyncpa [#allocation3 + $0x1], 1 }
 0x107   :  { %874 = vsyncpa [#allocation5], 1 }
 0x108   :  { %876 = vsyncpa [#allocation5 + $0x1], 1 }

// kernel: forward.68
= control target key start
LH: loop header
LB: loop body
LE: loop exit
PB: predicated region body
PF: predicated region fallthrough
CT: control target
= control target key end

     0   :  { %s2031_s0 = inlined_call_operand.vmem [shape: bf16[2,3,512], index: 0, kind: input, shape index: {}]   ;;  %s2032_s1 = inlined_call_operand.hbm [shape: bf16[2,512,512], index: 1, kind: input, shape index: {}]   ;;  %s2033_s2 = inlined_call_operand.hbm [shape: f32[1,512], index: 2, kind: input, shape index: {}]   ;;  %s2034_s3 = inlined_call_operand.hbm [shape: f32[1,512], index: 3, kind: input, shape index: {}]   ;;  %s2035_s4 = inlined_call_operand.vmem [shape: bf16[2,2,512], index: 4, kind: output, shape index: {}]  }
   0x1   :  { %2040 = sst [smem:[#allocation14_spill]] %s2033_s2 }
   0x2   :  { %9 = vsyncpa [#allocation3], 0 }
   0x3   :  { %11 = vsyncpa [#allocation3 + $0x1], 0 }
   0x4   :  { %12 = vsyncpa [#allocation5], 0 }
   0x5   :  { %14 = vsyncpa [#allocation5 + $0x1], 0  ;;  %s1807_s15 = smov 0   ;;  %s1809_s16 = smov 0  }
   0x6   :  { %s1811_s17 = smov 0   ;;  %s1813_s18 = smov 0  }
   0x7   :  { %s1815_s19 = smov 0   ;;  %s1817_s20 = smov 0  }
   0x8   :  { %s1819_s21 = smov 0   ;;  %s1821_s22 = smov 0  }
   0x9 LB: > { %2041 = sst [smem:[#allocation9_spill]] %s1757_s17  ;;  %s2036_s23 = sadd.s32 4294967295, %s1777_s22   ;;  %s1777_s22 = sphi %s1821_s22, %s20_s22   ;;  %s1773_s21 = sphi %s1819_s21, %s2055_s21   ;;  %s1769_s20 = sphi %s1817_s20, %s2059_s20   ;;  %s1765_s19 = sphi %s1815_s19, %s2053_s19   ;;  %s1761_s18 = sphi %s1813_s18, %s2058_s18   ;;  %s1757_s17 = sphi %s1811_s17, %s2052_s17   ;;  %s1753_s16 = sphi %s1809_s16, %s2057_s16   ;;  %s1749_s15 = sphi %s1807_s15, %s2056_s15  }
   0xa   : > { %2042 = sst [smem:[#allocation10_spill]] %s1773_s21  ;;  %s29_s24 = sadd.s32 1, %s1769_s20 }
   0xb   : > { %p30_p0 = scmp.ge.s32.totalorder %s29_s24, 4  ;;  %s32_s25 = sadd.s32 1, %s1773_s21 }
   0xc   : > { %s65_s26 = sadd.s32 1, %s1757_s17  ;;  %p72_p1 = scmp.ne.s32.totalorder %s1757_s17, %s1753_s16 }
   0xd   : > { %s2061_s24 = smov (%p30_p0, %s29_s24), 0  ;;  %s2063_s25 = smov (!%p30_p0, %s32_s25), %s1773_s21 }
   0xe   : > { %2043 = sst [smem:[#allocation11_spill]] %s2061_s24  ;;  %s62_s27 = ssub.s32 %s1769_s20, %s2061_s24 }
   0xf   : > { %p73_p2 = scmp.eq.s32.totalorder %s1777_s22, 0  ;;  %p34_p3 = scmp.ge.s32.totalorder %s2063_s25, 2 }
  0x10   : > { %p63_p4 = scmp.eq.s32.totalorder %s62_s27, 0  ;;  %p78_p6 = scmp.ne.s32.totalorder %s1753_s16, %s1749_s15 }
  0x11   : > { %p74_p5 = por %p73_p2, %p72_p1  ;;  %s2065_s25 = smov (%p34_p3, %s2063_s25), 0 }
  0x12   : > { %2044 = sst [smem:[#allocation12_spill]] %s2065_s25  ;;  %p79_p7 = scmp.eq.s32.totalorder %s2036_s23, 0 }
  0x13   : > { %s1861_s28 = scalar_select %p63_p4, %s1757_s17, %s65_s26  }
  0x14   : > { %p1547_p8 = scmp.lt.s32.totalorder %s1777_s22, 8  ;;  %s1867_s29 = sand.u32 1, %s1757_s17  }
  0x15   : > { %2045 = sst [smem:[#allocation13_spill]] %s1861_s28  ;;  %p1869_p9 = por %p79_p7, %p78_p6 }
  0x16   : > { %s1137_s5 = sshll.u32 %s1867_s29, 9  ;;  %p1874_p10 = pnand %p1547_p8, %p74_p5 }
  0x17   : > { %s211_s7 = sand.u32 1, %s1777_s22   ;;  %s2048_s2 = sld [smem:[#allocation14_spill]] }
  0x18   : > { %s214_s12 = scalar_lea.vmem [#allocation4], %s1867_s29  ;;  %s212_s14 = scalar_lea.sflag [#allocation5], %s211_s7 }
  0x19   : > { %s221_s13 = sshll.u32 %s214_s12, 4  ;;  %p1139_p11 = scmp.ge.s32.totalorder %s1777_s22, 1  ;;  %s222_s13 = int_to_ptr.vmem [resolvable:$true] %s221_s13 }
  0x1a   : > { %p243_p12 = scmp.lt.s32.totalorder %s1777_s22, 9  ;;  %s1138_s26 = sshll.u32 %s1769_s20, 2 }
  0x1b   : > { %s198_s9 = scalar_lea.hbm %s2032_s1, %s1138_s26  ;;  %s1780_s23 = smov 64  }
  0x1c   : > { %p1888_p13 = pnand %p1139_p11, %p243_p12  ;;  %s199_s7 = sshll.u32 %s198_s9, 4  ;;  %s200_s7 = int_to_ptr.hbm [resolvable:$true] %s199_s7 }
  0x1d   : > { %s217_s10 = scalar_lea.hbm %s2048_s2, %s1769_s20  ;;  %s1781_s2 = smov 4  }
  0x1e   : > { %s219_s11 = sshll.u32 %s217_s10, 4  ;;  %s194_s10 = scalar_lea.vmem [#allocation2], %s1137_s5  ;;  %s220_s11 = int_to_ptr.hbm [resolvable:$true] %s219_s11 }
  0x1f   : > { %1543 = dma.hbm_to_vmem [thread:$0]  (!%p1874_p10), %s220_s11, 16, %s222_s13, %s212_s14  }
  0x20   : > { %s201_s12 = sshll.u32 %s194_s10, 4  ;;  %s191_s11 = scalar_lea.sflag [#allocation3], %s1867_s29  ;;  %s202_s12 = int_to_ptr.vmem [resolvable:$true] %s201_s12 }
  0x21   : > { %s1779_s13 = smov 256   ;;  %s234_s21 = scalar_lea.hbm %s2034_s3, %s1769_s20 }
  0x22   : > { %1540 = dma.hbm_to_vmem [thread:$0]  (!%p1874_p10), %s200_s7, 8192, %s202_s12, %s191_s11, %s1779_s13, %s1780_s23, %s1781_s2  }
  0x23   : > { %s236_s28 = sshll.u32 %s234_s21, 4  ;;  %s231_s17 = scalar_lea.vmem [#allocation6], %s1867_s29  ;;  %s237_s28 = int_to_ptr.hbm [resolvable:$true] %s236_s28 }
  0x24   : > { %s238_s27 = sshll.u32 %s231_s17, 4  ;;  %247 = sbr.rel (%p1888_p13) target bundleno = 257 (0x101), region = 36  ;;  %s239_s27 = int_to_ptr.vmem [resolvable:$true] %s238_s27 }
  0x25   : > { %1546 = dma.hbm_to_vmem [thread:$0]  (!%p1874_p10), %s237_s28, 16, %s239_s27, %s212_s14  }
  0x26   : > { %s1909_s5 = sand.u32 (!%p1888_p13), 1, %s1753_s16  }
  0x27   : > { %s1140_s2 = sshll.u32 (!%p1888_p13), %s1909_s5, 9  ;;  %s250_s23 = scalar_lea.sflag (!%p1888_p13), [#allocation3], %s1909_s5 }
  0x28   : > { %s1913_s24 = scalar_lea.vmem (!%p1888_p13), [#allocation2], %s1140_s2 }
  0x29   : > { %1740 = dma.done.wait (%p1869_p9), %s250_s23, 8192  }
  0x2a   : > { %1742 = vsyncadd (%p1869_p9), %s250_s23, 4294959104  ;;  %s2050_s17 = sadd.s32 4294967295, %s1777_s22   ;;  %s262_s28 = scalar_lea.vmem [#allocation4], %s1909_s5 }
  0x2b   : > { %s259_s21 = sand.u32 1, %s2050_s17  }
  0x2c   : > { %s260_s25 = scalar_lea.sflag [#allocation5], %s259_s21 }
  0x2d   : > { %1744 = dma.done.wait (%p1869_p9), %s260_s25, 32  }
  0x2e   : > { %1746 = vsyncadd (%p1869_p9), %s260_s25, 4294967264  ;;  %p312_p0 = scmp.lt.s32.totalorder %s1765_s19, 1  ;;  %v1506_v0 = vld [vmem:[%s1913_s24 + $0x138] sm:$0xff]  ;;  %v1505_v4 = vld [vmem:[%s1913_s24 + $0x130] sm:$0xff]  ;;  %s271_s15 = scalar_lea.vmem [#allocation6], %s1909_s5 }
  0x2f   : > { %v1514_v1 = vld [vmem:[%s1913_s24 + $0x178] sm:$0xff]  ;;  %681 = vmatpush.bf16.msra.mxu0 %v1506_v0  ;;  %v1513_v5 = vld [vmem:[%s1913_s24 + $0x170] sm:$0xff]  ;;  %v1504_v8 = vld [vmem:[%s1913_s24 + $0x128] sm:$0xff]  ;;  %p319_p1 = scmp.lt.s32.totalorder %s1761_s18, 3 }
  0x30   : > { %v1522_v2 = vld [vmem:[%s1913_s24 + $0x1b8] sm:$0xff]  ;;  %694 = vmatpush.bf16.msra.mxu1 %v1514_v1  ;;  %v1521_v6 = vld [vmem:[%s1913_s24 + $0x1b0] sm:$0xff]  ;;  %s2067_s19 = smov (!%p312_p0, %s1765_s19), 1  ;;  %v1512_v9 = vld [vmem:[%s1913_s24 + $0x168] sm:$0xff] }
  0x31   : > { %v1530_v3 = vld [vmem:[%s1913_s24 + $0x1f8] sm:$0xff]  ;;  %707 = vmatpush.bf16.msra.mxu2 %v1522_v2  ;;  %v1529_v7 = vld [vmem:[%s1913_s24 + $0x1f0] sm:$0xff]  ;;  %v1520_v10 = vld [vmem:[%s1913_s24 + $0x1a8] sm:$0xff]  ;;  %s1466_s29 = sshll.u32 %s2067_s19, 3  ;;  %s2069_s18 = smov (!%p319_p1, %s1761_s18), 3 }
  0x32   : > { %720 = vmatpush.bf16.msra.mxu3 %v1530_v3  ;;  %v1528_v11 = vld [vmem:[%s1913_s24 + $0x1e8] sm:$0xff]  ;;  %v1503_v12 = vld [vmem:[%s1913_s24 + $0x120] sm:$0xff]  ;;  %s316_s14 = scalar_lea.vmem %s2031_s0, %s1466_s29  ;;  %v1502_v17 = vld [vmem:[%s1913_s24 + $0x118] sm:$0xff]  ;;  %s1143_s26 = sshll.u32 %s2067_s19, 2 }
  0x33   : > { %682 = vmatpush.bf16.msra.mxu0 %v1505_v4  ;;  %v1511_v13 = vld [vmem:[%s1913_s24 + $0x160] sm:$0xff]  ;;  %v389_v16 = vld [vmem:[%s316_s14] sm:$0xff]  ;;  %v1501_v21 = vld [vmem:[%s1913_s24 + $0x110] sm:$0xff]  ;;  %s322_s8 = sadd.s32 %s1143_s26, %s2069_s18 }
  0x34   : > { %695 = vmatpush.bf16.msra.mxu1 %v1513_v5  ;;  %v1519_v14 = vld [vmem:[%s1913_s24 + $0x1a0] sm:$0xff]  ;;  %v1510_v18 = vld [vmem:[%s1913_s24 + $0x158] sm:$0xff]  ;;  %456 = vst [vmem:[#allocation1] ss:$4 sm:$0xff] %v389_v16  ;;  %v1509_v22 = vld [vmem:[%s1913_s24 + $0x150] sm:$0xff]  ;;  %s323_s12 = scalar_lea.vmem %s2035_s4, %s322_s8 }
  0x35   : > { %708 = vmatpush.bf16.msra.mxu2 %v1521_v6  ;;  %v1527_v15 = vld [vmem:[%s1913_s24 + $0x1e0] sm:$0xff]  ;;  %v1518_v19 = vld [vmem:[%s1913_s24 + $0x198] sm:$0xff]  ;;  %v1517_v23 = vld [vmem:[%s1913_s24 + $0x190] sm:$0xff] }
  0x36   : > { %721 = vmatpush.bf16.msra.mxu3 %v1529_v7  ;;  %v1526_v20 = vld [vmem:[%s1913_s24 + $0x1d8] sm:$0xff]  ;;  %v1525_v24 = vld [vmem:[%s1913_s24 + $0x1d0] sm:$0xff]  ;;  %v1500_v25 = vld [vmem:[%s1913_s24 + $0x108] sm:$0xff] }
  0x37   : > { %683 = vmatpush.bf16.msra.mxu0 %v1504_v8  ;;  %v324_v26 = vld [vmem:[%s316_s14] sm:$0x55]  ;;  %v1508_v29 = vld [vmem:[%s1913_s24 + $0x148] sm:$0xff]  ;;  %v1499_v38 = vld [vmem:[%s1913_s24 + $0x100] sm:$0xff] }
  0x38   : > { %696 = vmatpush.bf16.msra.mxu1 %v1512_v9  ;;  %v1516_v30 = vld [vmem:[%s1913_s24 + $0x188] sm:$0xff]  ;;  %v1507_v39 = vld [vmem:[%s1913_s24 + $0x140] sm:$0xff]  ;;  %v1474_v50 = vld [vmem:[%s1913_s24 + $0x38] sm:$0xff] }
  0x39   : > { %709 = vmatpush.bf16.msra.mxu2 %v1520_v10  ;;  %v1524_v31 = vld [vmem:[%s1913_s24 + $0x1c8] sm:$0xff]  ;;  %v1515_v44 = vld [vmem:[%s1913_s24 + $0x180] sm:$0xff]  ;;  %v1482_v51 = vld [vmem:[%s1913_s24 + $0x78] sm:$0xff] }
  0x3a   : > { %722 = vmatpush.bf16.msra.mxu3 %v1528_v11  ;;  %v1523_v45 = vld [vmem:[%s1913_s24 + $0x1c0] sm:$0xff]  ;;  %v1490_v52 = vld [vmem:[%s1913_s24 + $0xb8] sm:$0xff]  ;;  %v1473_v58 = vld [vmem:[%s1913_s24 + $0x30] sm:$0xff] }
  0x3b   : > { %684 = vmatpush.bf16.msra.mxu0 %v1503_v12  ;;  %v459_v27 = vld.sshfl [vmem:[#allocation1 + $0x10] sm:$0xff pattern:$0x73625140]  ;;  %v457_v28 = vld.sshfl [vmem:[#allocation1] sm:$0xff pattern:$0x73625140] }
  0x3c   : > { %697 = vmatpush.bf16.msra.mxu1 %v1511_v13  ;;  %v475_v32 = vshll.u32 %v459_v27, 16  ;;  %v463_v33 = vshll.u32 %v457_v28, 16  ;;  %v460_v34 = vld.sshfl [vmem:[#allocation1 + $0x18] sm:$0xff pattern:$0x73625140]  ;;  %v473_v40 = vshrl.u32 %v459_v27, 16 }
  0x3d   : > { %710 = vmatpush.bf16.msra.mxu2 %v1519_v14  ;;  %v458_v35 = vld.sshfl [vmem:[#allocation1 + $0x8] sm:$0xff pattern:$0x73625140]  ;;  %v481_v36 = vshll.u32 %v460_v34, 16  ;;  %v461_v42 = vshrl.u32 %v457_v28, 16  ;;  %v479_v46 = vshrl.u32 %v460_v34, 16 }
  0x3e   : > { %723 = vmatpush.bf16.msra.mxu3 %v1527_v15  ;;  %734 = vst [vmem:[#allocation1] ss:$4 sm:$0xff] %v324_v26  ;;  %v469_v37 = vshll.u32 %v458_v35, 16  ;;  %v477_v41 = vrot.slane %v475_v32, 1  ;;  %v465_v43 = vrot.slane %v463_v33, 1  ;;  %v467_v48 = vshrl.u32 %v458_v35, 16 }
  0x3f   : > { %685 = vmatpush.bf16.msra.mxu0 %v1502_v17  ;;  %v483_v47 = vrot.slane %v481_v36, 1  ;;  %v1498_v53 = vld [vmem:[%s1913_s24 + $0xf8] sm:$0xff]  ;;  %v1481_v59 = vld [vmem:[%s1913_s24 + $0x70] sm:$0xff]  ;;  %v1472_v62 = vld [vmem:[%s1913_s24 + $0x28] sm:$0xff] }
  0x40   : > { %698 = vmatpush.bf16.msra.mxu1 %v1510_v18  ;;  %v471_v49 = vrot.slane %v469_v37, 1  ;;  %v478_v54 = vor.u32 %v477_v41, %v473_v40  ;;  %v466_v55 = vor.u32 %v465_v43, %v461_v42  ;;  %v1489_v60 = vld [vmem:[%s1913_s24 + $0xb0] sm:$0xff]  ;;  %v1480_v63 = vld [vmem:[%s1913_s24 + $0x68] sm:$0xff]  ;;  %v1471_v2 = vld [vmem:[%s1913_s24 + $0x20] sm:$0xff] }
  0x41   : > { %711 = vmatpush.bf16.msra.mxu2 %v1518_v19  ;;  %v484_v56 = vor.u32 %v483_v47, %v479_v46  ;;  %v1497_v61 = vld [vmem:[%s1913_s24 + $0xf0] sm:$0xff]  ;;  %v1488_v0 = vld [vmem:[%s1913_s24 + $0xa8] sm:$0xff]  ;;  %v1479_v3 = vld [vmem:[%s1913_s24 + $0x60] sm:$0xff] }
  0x42   : > { %724 = vmatpush.bf16.msra.mxu3 %v1526_v20  ;;  %v472_v57 = vor.u32 %v471_v49, %v467_v48  ;;  %v1496_v1 = vld [vmem:[%s1913_s24 + $0xe8] sm:$0xff]  ;;  %v1487_v4 = vld [vmem:[%s1913_s24 + $0xa0] sm:$0xff]  ;;  %v1470_v6 = vld [vmem:[%s1913_s24 + $0x18] sm:$0xff] }
  0x43   : > { %686 = vmatpush.bf16.msra.mxu0 %v1501_v21  ;;  %v1495_v5 = vld [vmem:[%s1913_s24 + $0xe0] sm:$0xff]  ;;  %v1478_v7 = vld [vmem:[%s1913_s24 + $0x58] sm:$0xff]  ;;  %v1469_v10 = vld [vmem:[%s1913_s24 + $0x10] sm:$0xff] }
  0x44   : > { %699 = vmatpush.bf16.msra.mxu1 %v1509_v22  ;;  %v1486_v8 = vld [vmem:[%s1913_s24 + $0x98] sm:$0xff]  ;;  %v1477_v11 = vld [vmem:[%s1913_s24 + $0x50] sm:$0xff]  ;;  %v1468_v14 = vld [vmem:[%s1913_s24 + $0x8] sm:$0xff] }
  0x45   : > { %712 = vmatpush.bf16.msra.mxu2 %v1517_v23  ;;  %v1494_v9 = vld [vmem:[%s1913_s24 + $0xd8] sm:$0xff]  ;;  %v1485_v12 = vld [vmem:[%s1913_s24 + $0x90] sm:$0xff]  ;;  %v1476_v15 = vld [vmem:[%s1913_s24 + $0x48] sm:$0xff] }
  0x46   : > { %725 = vmatpush.bf16.msra.mxu3 %v1525_v24  ;;  %v1493_v13 = vld [vmem:[%s1913_s24 + $0xd0] sm:$0xff]  ;;  %v1484_v16 = vld [vmem:[%s1913_s24 + $0x88] sm:$0xff]  ;;  %v1467_v18 = vld [vmem:[%s1913_s24] sm:$0xff] }
  0x47   : > { %687 = vmatpush.bf16.msra.mxu0 %v1500_v25  ;;  %v1492_v17 = vld [vmem:[%s1913_s24 + $0xc8] sm:$0xff]  ;;  %v1475_v19 = vld [vmem:[%s1913_s24 + $0x40] sm:$0xff]  ;;  %v735_v22 = vld.sshfl [vmem:[#allocation1] sm:$0xff pattern:$0x73625140] }
  0x48   : > { %700 = vmatpush.bf16.msra.mxu1 %v1508_v29  ;;  %v1483_v20 = vld [vmem:[%s1913_s24 + $0x80] sm:$0xff]  ;;  %v737_v24 = vld.sshfl [vmem:[#allocation1 + $0x10] sm:$0xff pattern:$0x73625140]  ;;  %v1616_v48 = vld [vmem:[%s271_s15] ss:$0 sm:$0xff] }
  0x49   : > { %713 = vmatpush.bf16.msra.mxu2 %v1516_v30  ;;  %v1491_v21 = vld [vmem:[%s1913_s24 + $0xc0] sm:$0xff]  ;;  %v738_v25 = vld.sshfl [vmem:[#allocation1 + $0x18] sm:$0xff pattern:$0x73625140] }
  0x4a   : > { %726 = vmatpush.bf16.msra.mxu3 %v1524_v31  ;;  %v736_v23 = vld.sshfl [vmem:[#allocation1 + $0x8] sm:$0xff pattern:$0x73625140] }
  0x4b   : > { %688 = vmatpush.bf16.msra.mxu0 %v1499_v38 }
  0x4c   : > { %701 = vmatpush.bf16.msra.mxu1 %v1507_v39 }
  0x4d   : > { %714 = vmatpush.bf16.msra.mxu2 %v1515_v44  ;;  %v1615_v44 = vld [vmem:[%s262_s28] ss:$0 sm:$0xff] }
  0x4e   : > { %727 = vmatpush.bf16.msra.mxu3 %v1523_v45  ;;  %689 = vmatmul.bf16.vlgmr.msra.gmra.mxu0 %v466_v55 }
  0x4f   : > { %935 = vmatpush.bf16.msrb.mxu0 %v1474_v50  ;;  %702 = vmatmul.bf16.vlgmr.msra.gmra.mxu1 %v472_v57 }
  0x50   : > { %948 = vmatpush.bf16.msrb.mxu1 %v1482_v51  ;;  %715 = vmatmul.bf16.vlgmr.msra.gmra.mxu2 %v478_v54 }
  0x51   : > { %961 = vmatpush.bf16.msrb.mxu2 %v1490_v52  ;;  %728 = vmatmul.bf16.vlgmr.msra.gmra.mxu3 %v484_v56 }
  0x52   : > { %974 = vmatpush.bf16.msrb.mxu3 %v1498_v53 }
  0x53   : > { %936 = vmatpush.bf16.msrb.mxu0 %v1473_v58 }
  0x54   : > { %949 = vmatpush.bf16.msrb.mxu1 %v1481_v59 }
  0x55   : > { %962 = vmatpush.bf16.msrb.mxu2 %v1489_v60 }
  0x56   : > { %975 = vmatpush.bf16.msrb.mxu3 %v1497_v61 }
  0x57   : > { %937 = vmatpush.bf16.msrb.mxu0 %v1472_v62 }
  0x58   : > { %950 = vmatpush.bf16.msrb.mxu1 %v1480_v63 }
  0x59   : > { %963 = vmatpush.bf16.msrb.mxu2 %v1488_v0 }
  0x5a   : > { %976 = vmatpush.bf16.msrb.mxu3 %v1496_v1 }
  0x5b   : > { %938 = vmatpush.bf16.msrb.mxu0 %v1471_v2 }
  0x5c   : > { %951 = vmatpush.bf16.msrb.mxu1 %v1479_v3 }
  0x5d   : > { %964 = vmatpush.bf16.msrb.mxu2 %v1487_v4 }
  0x5e   : > { %977 = vmatpush.bf16.msrb.mxu3 %v1495_v5 }
  0x5f   : > { %939 = vmatpush.bf16.msrb.mxu0 %v1470_v6 }
  0x60   : > { %952 = vmatpush.bf16.msrb.mxu1 %v1478_v7 }
  0x61   : > { %965 = vmatpush.bf16.msrb.mxu2 %v1486_v8 }
  0x62   : > { %978 = vmatpush.bf16.msrb.mxu3 %v1494_v9 }
  0x63   : > { %940 = vmatpush.bf16.msrb.mxu0 %v1469_v10 }
  0x64   : > { %953 = vmatpush.bf16.msrb.mxu1 %v1477_v11 }
  0x65   : > { %966 = vmatpush.bf16.msrb.mxu2 %v1485_v12 }
  0x66   : > { %979 = vmatpush.bf16.msrb.mxu3 %v1493_v13 }
  0x67   : > { %941 = vmatpush.bf16.msrb.mxu0 %v1468_v14 }
  0x68   : > { %954 = vmatpush.bf16.msrb.mxu1 %v1476_v15 }
  0x69   : > { %967 = vmatpush.bf16.msrb.mxu2 %v1484_v16 }
  0x6a   : > { %980 = vmatpush.bf16.msrb.mxu3 %v1492_v17 }
  0x6b   : > { %942 = vmatpush.bf16.msrb.mxu0 %v1467_v18 }
  0x6c   : > { %955 = vmatpush.bf16.msrb.mxu1 %v1475_v19 }
  0x6d   : > { %968 = vmatpush.bf16.msrb.mxu2 %v1483_v20 }
  0x6e   : > { %981 = vmatpush.bf16.msrb.mxu3 %v1491_v21  ;;  %943 = vmatmul.bf16.vlgmr.msrb.gmra.mxu0 %v735_v22 }
  0x6f   : > { %956 = vmatmul.bf16.vlgmr.msrb.gmra.mxu1 %v736_v23 }
  0x70   : > { %969 = vmatmul.bf16.vlgmr.msrb.gmra.mxu2 %v737_v24 }
  0x71   : > { %982 = vmatmul.bf16.vlgmr.msrb.gmra.mxu3 %v738_v25 }
  0xcb   : > { %v690_v26 = vpop.f32.mrf.mxu0 }
  0xcc   : > { %v703_v27 = vpop.f32.mrf.mxu1 }
  0xcd   : > { %v704_v34 = vadd.f32 %v703_v27, %v690_v26 }
  0xd3   : > { %v716_v28 = vpop.f32.mrf.mxu2  ;;  %v692_v30 = vpop.f32.mrf.mxu0 }
  0xd4   : > { %v729_v29 = vpop.f32.mrf.mxu3  ;;  %v705_v31 = vpop.f32.mrf.mxu1  ;;  %v717_v35 = vadd.f32 %v716_v28, %v704_v34 }
  0xd6   : > { %v730_v36 = vadd.f32 %v729_v29, %v717_v35 }
  0xdb   : > { %v718_v32 = vpop.f32.mrf.mxu2 }
  0xdc   : > { %v731_v33 = vpop.f32.mrf.mxu3 }
  0xeb   : > { %v944_v37 = vpop.f32.mrf.mxu0 }
  0xec   : > { %v957_v38 = vpop.f32.mrf.mxu1  ;;  %v945_v39 = vadd.f32 %v944_v37, %v730_v36 }
  0xee   : > { %v958_v40 = vadd.f32 %v957_v38, %v945_v39 }
  0xf3   : > { %v970_v41 = vpop.f32.mrf.mxu2  ;;  %v946_v45 = vpop.f32.mrf.mxu0 }
  0xf4   : > { %v983_v42 = vpop.f32.mrf.mxu3  ;;  %v971_v43 = vadd.f32 %v970_v41, %v958_v40  ;;  %v959_v46 = vpop.f32.mrf.mxu1 }
  0xf6   : > { %v984_v47 = vadd.f32 %v983_v42, %v971_v43 }
  0xf8   : > { %v991_v49 = vmul.f32 %v1615_v44, %v984_v47 }
  0xfa   : > { %v996_v50 = vadd.f32 %v1616_v48, %v991_v49 }
  0xfb   : > { %v972_v51 = vpop.f32.mrf.mxu2 }
  0xfc   : > { %v985_v52 = vpop.f32.mrf.mxu3  ;;  %v997_v53 = vmax.f32 %v996_v50, 0.0 }
  0xfe   : > { %v998_v54 = vpack.c.bf16 %v997_v53, %v997_v53 }
 0x100   : > { %999 = vst [vmem:[%s323_s12] sm:$0x1] %v998_v54 }
 0x101 PF: > { %s20_s22 = sadd.s32 1, %s1777_s22   ;;  %s2051_s7 = sld [smem:[#allocation9_spill]] }
 0x102   : > { %p17_p2 = scmp.ge.s32.totalorder %s20_s22, 10   ;;  %s2052_s17 = sld [smem:[#allocation13_spill]] }
 0x103   : > { %s2053_s19 = sld [smem:[#allocation10_spill]]  ;;  %s2056_s15 = smov %s1753_s16 }
 0x104   : > { %s2054_s11 = sld [smem:[#allocation11_spill]]  ;;  %s2058_s18 = smov %s1769_s20 }
 0x105   : > { %s2055_s21 = sld [smem:[#allocation12_spill]] }
 0x106   :  { %19 = sbr.rel (!%p17_p2) target bundleno = 9 (0x9), region = 104 }
 0x107   : > { %s2057_s16 = smov %s2051_s7 }
 0x10a   : > { %s2059_s20 = smov %s2054_s11 }
 0x10b   :  { %1025 = vsyncpa [#allocation3], 1 }
 0x10c   :  { %1027 = vsyncpa [#allocation3 + $0x1], 1 }
 0x10d   :  { %1028 = vsyncpa [#allocation5], 1 }
 0x10e   :  { %1030 = vsyncpa [#allocation5 + $0x1], 1 }

// kernel: forward.75
= control target key start
LH: loop header
LB: loop body
LE: loop exit
PB: predicated region body
PF: predicated region fallthrough
CT: control target
= control target key end

     0   :  { %10 = vsyncpa [#allocation3], 0  ;;  %s542_s0 = inlined_call_operand.vmem [shape: bf16[2,2,512], index: 0, kind: input, shape index: {}]   ;;  %s543_s1 = inlined_call_operand.hbm [shape: f32[512,128], index: 1, kind: input, shape index: {}]   ;;  %s544_s2 = inlined_call_operand.hbm [shape: f32[1,128], index: 2, kind: input, shape index: {}]   ;;  %s545_s3 = inlined_call_operand.hbm [shape: f32[2,128], index: 3, kind: output, shape index: {0}]   ;;  %s546_s4 = inlined_call_operand.hbm [shape: f32[2,512], index: 4, kind: output, shape index: {1}]  }
   0x1   :  { %11 = vsyncpa [#allocation6], 0 }
   0x2   :  { %12 = vsyncpa [#allocation4], 0 }
   0x3   :  { %13 = vsyncpa [#allocation9], 0  ;;  %s20_s17 = sshll.u32 %s543_s1, 4  ;;  %s481_s18 = smov [#allocation2]   ;;  %s21_s17 = int_to_ptr.hbm [resolvable:$true] %s20_s17 }
   0x4   :  { %s22_s19 = sshll.u32 %s481_s18, 4  ;;  %s34_s22 = sshll.u32 %s544_s2, 4  ;;  %s23_s19 = int_to_ptr.vmem [resolvable:$true] %s22_s19  ;;  %s35_s22 = int_to_ptr.hbm [resolvable:$true] %s34_s22 }
   0x5   :  { %s482_s23 = smov 128   ;;  %s483_s24 = smov 8  }
   0x6   :  { %28 = dma.hbm_to_vmem [thread:$0]  %s21_s17, 8192, %s23_s19, [#allocation3], %s482_s23, %s482_s23, %s483_s24  }
   0x7   :  { %s484_s25 = smov [#allocation5]  }
   0x8   :  { %s36_s26 = sshll.u32 %s484_s25, 4  ;;  %s37_s26 = int_to_ptr.vmem [resolvable:$true] %s36_s26 }
   0x9   :  { %39 = dma.hbm_to_vmem [thread:$0]  %s35_s22, 16, %s37_s26, [#allocation6]  }
   0xa   :  { %473 = dma.done.wait [#allocation3], 8192  }
   0xb   :  { %474 = vsyncadd [#allocation3], 4294959104 }
   0xc   :  { %475 = dma.done.wait [#allocation6], 16  }
   0xd   :  { %476 = vsyncadd [#allocation6], 4294967280  ;;  %v222_v0 = vld [vmem:[#allocation2 + $0x178] sm:$0xff]  ;;  %v221_v2 = vld [vmem:[#allocation2 + $0x170] sm:$0xff]  ;;  %vm73_vm0 = vcmask 1041408   ;;  %vm165_vm1 = vcmask 1041409  }
   0xe   :  { %v190_v1 = vld [vmem:[#allocation2 + $0x78] sm:$0xff]  ;;  %291 = vmatpush.msra.mxu2 %v222_v0  ;;  %v189_v4 = vld [vmem:[#allocation2 + $0x70] sm:$0xff]  ;;  %v220_v6 = vld [vmem:[#allocation2 + $0x168] sm:$0xff]  ;;  %vm153_vm2 = vcmask 1045508   ;;  %vm155_vm3 = vcmask 1043456   ;;  %s350_s30 = sshll.u32 %s546_s4, 4  ;;  %s351_s30 = int_to_ptr.hbm [resolvable:$true] %s350_s30 }
   0xf   :  { %251 = vmatpush.msra.mxu0 %v190_v1  ;;  %v238_v3 = vld [vmem:[#allocation2 + $0x1f8] sm:$0xff]  ;;  %v237_v7 = vld [vmem:[#allocation2 + $0x1f0] sm:$0xff]  ;;  %v188_v8 = vld [vmem:[#allocation2 + $0x68] sm:$0xff]  ;;  %vm167_vm4 = vcmask 1043459   ;;  %vm169_vm5 = vcmask 1045509   ;;  %vm171_vm6 = vcmask 1047559  }
  0x10   :  { %v206_v5 = vld [vmem:[#allocation2 + $0xf8] sm:$0xff]  ;;  %311 = vmatpush.msra.mxu3 %v238_v3  ;;  %292 = vmatpush.msra.mxu2 %v221_v2  ;;  %v205_v9 = vld [vmem:[#allocation2 + $0xf0] sm:$0xff]  ;;  %v236_v10 = vld [vmem:[#allocation2 + $0x1e8] sm:$0xff]  ;;  %s486_s4 = smov [#allocation7]   ;;  %s339_s8 = sshll.u32 %s545_s3, 4  ;;  %s340_s8 = int_to_ptr.hbm [resolvable:$true] %s339_s8 }
  0x11   :  { %271 = vmatpush.msra.mxu1 %v206_v5  ;;  %252 = vmatpush.msra.mxu0 %v189_v4  ;;  %v219_v11 = vld [vmem:[#allocation2 + $0x160] sm:$0xff]  ;;  %v204_v13 = vld [vmem:[#allocation2 + $0xe8] sm:$0xff]  ;;  %v218_v16 = vld [vmem:[#allocation2 + $0x158] sm:$0xff]  ;;  %s337_s5 = sshll.u32 %s486_s4, 4  ;;  %s338_s5 = int_to_ptr.vmem [resolvable:$true] %s337_s5 }
  0x12   :  { %312 = vmatpush.msra.mxu3 %v237_v7  ;;  %v187_v12 = vld [vmem:[#allocation2 + $0x60] sm:$0xff]  ;;  %293 = vmatpush.msra.mxu2 %v220_v6  ;;  %v186_v17 = vld [vmem:[#allocation2 + $0x58] sm:$0xff]  ;;  %v217_v20 = vld [vmem:[#allocation2 + $0x150] sm:$0xff] }
  0x13   :  { %272 = vmatpush.msra.mxu1 %v205_v9  ;;  %253 = vmatpush.msra.mxu0 %v188_v8  ;;  %v235_v14 = vld [vmem:[#allocation2 + $0x1e0] sm:$0xff]  ;;  %v234_v18 = vld [vmem:[#allocation2 + $0x1d8] sm:$0xff]  ;;  %v185_v21 = vld [vmem:[#allocation2 + $0x50] sm:$0xff] }
  0x14   :  { %v203_v15 = vld [vmem:[#allocation2 + $0xe0] sm:$0xff]  ;;  %313 = vmatpush.msra.mxu3 %v236_v10  ;;  %294 = vmatpush.msra.mxu2 %v219_v11  ;;  %v202_v19 = vld [vmem:[#allocation2 + $0xd8] sm:$0xff]  ;;  %v233_v22 = vld [vmem:[#allocation2 + $0x1d0] sm:$0xff] }
  0x15   :  { %273 = vmatpush.msra.mxu1 %v204_v13  ;;  %254 = vmatpush.msra.mxu0 %v187_v12  ;;  %v201_v23 = vld [vmem:[#allocation2 + $0xd0] sm:$0xff]  ;;  %v216_v24 = vld [vmem:[#allocation2 + $0x148] sm:$0xff]  ;;  %v215_v28 = vld [vmem:[#allocation2 + $0x140] sm:$0xff] }
  0x16   :  { %314 = vmatpush.msra.mxu3 %v235_v14  ;;  %295 = vmatpush.msra.mxu2 %v218_v16  ;;  %v184_v25 = vld [vmem:[#allocation2 + $0x48] sm:$0xff]  ;;  %v183_v29 = vld [vmem:[#allocation2 + $0x40] sm:$0xff]  ;;  %v214_v32 = vld [vmem:[#allocation2 + $0x138] sm:$0xff] }
  0x17   :  { %274 = vmatpush.msra.mxu1 %v203_v15  ;;  %255 = vmatpush.msra.mxu0 %v186_v17  ;;  %v232_v26 = vld [vmem:[#allocation2 + $0x1c8] sm:$0xff]  ;;  %v231_v30 = vld [vmem:[#allocation2 + $0x1c0] sm:$0xff]  ;;  %v182_v33 = vld [vmem:[#allocation2 + $0x38] sm:$0xff] }
  0x18   :  { %315 = vmatpush.msra.mxu3 %v234_v18  ;;  %296 = vmatpush.msra.mxu2 %v217_v20  ;;  %v200_v27 = vld [vmem:[#allocation2 + $0xc8] sm:$0xff]  ;;  %v199_v31 = vld [vmem:[#allocation2 + $0xc0] sm:$0xff]  ;;  %v230_v34 = vld [vmem:[#allocation2 + $0x1b8] sm:$0xff] }
  0x19   :  { %275 = vmatpush.msra.mxu1 %v202_v19  ;;  %256 = vmatpush.msra.mxu0 %v185_v21  ;;  %v198_v35 = vld [vmem:[#allocation2 + $0xb8] sm:$0xff]  ;;  %v213_v36 = vld [vmem:[#allocation2 + $0x130] sm:$0xff]  ;;  %v212_v40 = vld [vmem:[#allocation2 + $0x128] sm:$0xff] }
  0x1a   :  { %316 = vmatpush.msra.mxu3 %v233_v22  ;;  %297 = vmatpush.msra.mxu2 %v216_v24  ;;  %v181_v37 = vld [vmem:[#allocation2 + $0x30] sm:$0xff]  ;;  %v180_v41 = vld [vmem:[#allocation2 + $0x28] sm:$0xff]  ;;  %v211_v44 = vld [vmem:[#allocation2 + $0x120] sm:$0xff] }
  0x1b   :  { %276 = vmatpush.msra.mxu1 %v201_v23  ;;  %257 = vmatpush.msra.mxu0 %v184_v25  ;;  %v229_v38 = vld [vmem:[#allocation2 + $0x1b0] sm:$0xff]  ;;  %v228_v42 = vld [vmem:[#allocation2 + $0x1a8] sm:$0xff]  ;;  %v179_v45 = vld [vmem:[#allocation2 + $0x20] sm:$0xff] }
  0x1c   :  { %317 = vmatpush.msra.mxu3 %v232_v26  ;;  %298 = vmatpush.msra.mxu2 %v215_v28  ;;  %v197_v39 = vld [vmem:[#allocation2 + $0xb0] sm:$0xff]  ;;  %v196_v43 = vld [vmem:[#allocation2 + $0xa8] sm:$0xff]  ;;  %v367_v46 = vld [vmem:[%s542_s0] sm:$0xff]   ;;  %s485_s0 = smov [#allocation8]  }
  0x1d   :  { %277 = vmatpush.msra.mxu1 %v200_v27  ;;  %258 = vmatpush.msra.mxu0 %v183_v29  ;;  %v227_v47 = vld [vmem:[#allocation2 + $0x1a0] sm:$0xff]  ;;  %v368_v49 = vunpack.c.l.bf16 %v367_v46  ;;  %v369_v50 = vunpack.c.h.bf16 %v367_v46  ;;  %v210_v51 = vld [vmem:[#allocation2 + $0x118] sm:$0xff]  ;;  %v209_v55 = vld [vmem:[#allocation2 + $0x110] sm:$0xff]  ;;  %s348_s27 = sshll.u32 %s485_s0, 4  ;;  %s349_s27 = int_to_ptr.vmem [resolvable:$true] %s348_s27 }
  0x1e   :  { %318 = vmatpush.msra.mxu3 %v231_v30  ;;  %299 = vmatpush.msra.mxu2 %v214_v32  ;;  %v195_v48 = vld [vmem:[#allocation2 + $0xa0] sm:$0xff]  ;;  %v178_v52 = vld [vmem:[#allocation2 + $0x18] sm:$0xff]  ;;  %v177_v56 = vld [vmem:[#allocation2 + $0x10] sm:$0xff] }
  0x1f   :  { %278 = vmatpush.msra.mxu1 %v199_v31  ;;  %259 = vmatpush.msra.mxu0 %v182_v33  ;;  %v226_v53 = vld [vmem:[#allocation2 + $0x198] sm:$0xff]  ;;  %54 = vst [vmem:[#allocation1] ss:$4 sm:$0xff] %v368_v49  ;;  %v225_v57 = vld [vmem:[#allocation2 + $0x190] sm:$0xff]  ;;  %v208_v59 = vld [vmem:[#allocation2 + $0x108] sm:$0xff] }
  0x20   :  { %319 = vmatpush.msra.mxu3 %v230_v34  ;;  %300 = vmatpush.msra.mxu2 %v213_v36  ;;  %v194_v54 = vld [vmem:[#allocation2 + $0x98] sm:$0xff]  ;;  %60 = vst [vmem:[#allocation1 + $0x20] ss:$4 sm:$0xff] %v369_v50  ;;  %v193_v58 = vld [vmem:[#allocation2 + $0x90] sm:$0xff]  ;;  %v176_v60 = vld [vmem:[#allocation2 + $0x8] sm:$0xff] }
  0x21   :  { %279 = vmatpush.msra.mxu1 %v198_v35  ;;  %260 = vmatpush.msra.mxu0 %v181_v37  ;;  %v224_v61 = vld [vmem:[#allocation2 + $0x188] sm:$0xff]  ;;  %v207_v63 = vld [vmem:[#allocation2 + $0x100] sm:$0xff] }
  0x22   :  { %320 = vmatpush.msra.mxu3 %v229_v38  ;;  %301 = vmatpush.msra.mxu2 %v212_v40  ;;  %v192_v62 = vld [vmem:[#allocation2 + $0x88] sm:$0xff]  ;;  %v175_v0 = vld [vmem:[#allocation2] sm:$0xff] }
  0x23   :  { %280 = vmatpush.msra.mxu1 %v197_v39  ;;  %261 = vmatpush.msra.mxu0 %v180_v41  ;;  %v223_v1 = vld [vmem:[#allocation2 + $0x180] sm:$0xff] }
  0x24   :  { %321 = vmatpush.msra.mxu3 %v228_v42  ;;  %302 = vmatpush.msra.mxu2 %v211_v44  ;;  %v191_v2 = vld [vmem:[#allocation2 + $0x80] sm:$0xff] }
  0x25   :  { %281 = vmatpush.msra.mxu1 %v196_v43  ;;  %262 = vmatpush.msra.mxu0 %v179_v45 }
  0x26   :  { %322 = vmatpush.msra.mxu3 %v227_v47  ;;  %303 = vmatpush.msra.mxu2 %v210_v51  ;;  %v57_v3 = vld.sshfl [vmem:[#allocation1 + $0x10] sm:$0xff pattern:$0x73625140]  ;;  %v55_v4 = vld.sshfl [vmem:[#allocation1] sm:$0xff pattern:$0x73625140] }
  0x27   :  { %282 = vmatpush.msra.mxu1 %v195_v48  ;;  %263 = vmatpush.msra.mxu0 %v178_v52  ;;  %v63_v5 = vld.sshfl [vmem:[#allocation1 + $0x30] sm:$0xff pattern:$0x73625140]  ;;  %v88_v6 = vsel %vm73_vm0, %v57_v3, 0.0  ;;  %v74_v7 = vsel %vm73_vm0, %v55_v4, 0.0 }
  0x28   :  { %323 = vmatpush.msra.mxu3 %v226_v53  ;;  %304 = vmatpush.msra.mxu2 %v209_v55  ;;  %v89_v8 = vrot.slane %v88_v6, 4  ;;  %v116_v9 = vsel %vm73_vm0, %v63_v5, 0.0  ;;  %v61_v10 = vld.sshfl [vmem:[#allocation1 + $0x20] sm:$0xff pattern:$0x73625140]  ;;  %v75_v11 = vrot.slane %v74_v7, 4 }
  0x29   :  { %283 = vmatpush.msra.mxu1 %v194_v54  ;;  %264 = vmatpush.msra.mxu0 %v177_v56  ;;  %v117_v12 = vrot.slane %v116_v9, 4  ;;  %v102_v13 = vsel %vm73_vm0, %v61_v10, 0.0  ;;  %v58_v14 = vld.sshfl [vmem:[#allocation1 + $0x18] sm:$0xff pattern:$0x73625140] }
  0x2a   :  { %324 = vmatpush.msra.mxu3 %v225_v57  ;;  %305 = vmatpush.msra.mxu2 %v208_v59  ;;  %v90_v15 = vadd.f32 %v89_v8, %v88_v6  ;;  %v76_v16 = vadd.f32 %v75_v11, %v74_v7  ;;  %v103_v17 = vrot.slane %v102_v13, 4  ;;  %v64_v18 = vld.sshfl [vmem:[#allocation1 + $0x38] sm:$0xff pattern:$0x73625140]  ;;  %v95_v19 = vsel %vm73_vm0, %v58_v14, 0.0 }
  0x2b   :  { %284 = vmatpush.msra.mxu1 %v193_v58  ;;  %265 = vmatpush.msra.mxu0 %v176_v60  ;;  %v118_v20 = vadd.f32 %v117_v12, %v116_v9  ;;  %v96_v21 = vrot.slane %v95_v19, 4  ;;  %v123_v22 = vsel %vm73_vm0, %v64_v18, 0.0  ;;  %v56_v23 = vld.sshfl [vmem:[#allocation1 + $0x8] sm:$0xff pattern:$0x73625140] }
  0x2c   :  { %325 = vmatpush.msra.mxu3 %v224_v61  ;;  %306 = vmatpush.msra.mxu2 %v207_v63  ;;  %v91_v24 = vrot.slane %v90_v15, 2  ;;  %v77_v25 = vrot.slane %v76_v16, 2  ;;  %v104_v26 = vadd.f32 %v103_v17, %v102_v13  ;;  %v124_v27 = vrot.slane %v123_v22, 4  ;;  %v62_v28 = vld.sshfl [vmem:[#allocation1 + $0x28] sm:$0xff pattern:$0x73625140] }
  0x2d   :  { %285 = vmatpush.msra.mxu1 %v192_v62  ;;  %266 = vmatpush.msra.mxu0 %v175_v0  ;;  %v119_v29 = vrot.slane %v118_v20, 2  ;;  %v97_v30 = vadd.f32 %v96_v21, %v95_v19  ;;  %v81_v31 = vsel %vm73_vm0, %v56_v23, 0.0  ;;  %v109_v32 = vsel %vm73_vm0, %v62_v28, 0.0 }
  0x2e   :  { %326 = vmatpush.msra.mxu3 %v223_v1  ;;  %v92_v33 = vadd.f32 %v91_v24, %v90_v15  ;;  %v78_v34 = vadd.f32 %v77_v25, %v76_v16  ;;  %v105_v35 = vrot.slane %v104_v26, 2  ;;  %v125_v36 = vadd.f32 %v124_v27, %v123_v22 }
  0x2f   :  { %286 = vmatpush.msra.mxu1 %v191_v2  ;;  %v120_v37 = vadd.f32 %v119_v29, %v118_v20  ;;  %v98_v38 = vrot.slane %v97_v30, 2  ;;  %v82_v39 = vrot.slane %v81_v31, 4  ;;  %v110_v40 = vrot.slane %v109_v32, 4 }
  0x30   :  { %v93_v41 = vrot.slane %v92_v33, 1  ;;  %v79_v42 = vrot.slane %v78_v34, 1  ;;  %v106_v43 = vadd.f32 %v105_v35, %v104_v26  ;;  %v126_v44 = vrot.slane %v125_v36, 2 }
  0x31   :  { %v121_v45 = vrot.slane %v120_v37, 1  ;;  %v99_v46 = vadd.f32 %v98_v38, %v97_v30  ;;  %v83_v47 = vadd.f32 %v82_v39, %v81_v31  ;;  %v111_v48 = vadd.f32 %v110_v40, %v109_v32  ;;  %v376_v32 = vld [vmem:[#allocation5] ss:$0 sm:$0xff] }
  0x32   :  { %v94_v49 = vadd.f32 %v93_v41, %v92_v33  ;;  %v80_v50 = vadd.f32 %v79_v42, %v78_v34  ;;  %v107_v51 = vrot.slane %v106_v43, 1  ;;  %v127_v52 = vadd.f32 %v126_v44, %v125_v36 }
  0x33   :  { %v122_v53 = vadd.f32 %v121_v45, %v120_v37  ;;  %v100_v54 = vrot.slane %v99_v46, 1  ;;  %v84_v55 = vrot.slane %v83_v47, 2  ;;  %v112_v56 = vrot.slane %v111_v48, 2 }
  0x34   :  { %v132_v57 = vmul.f32 0.5, %v94_v49  ;;  %v108_v58 = vadd.f32 %v107_v51, %v106_v43  ;;  %v130_v59 = vmul.f32 0.5, %v80_v50  ;;  %v128_v60 = vrot.slane %v127_v52, 1 }
  0x35   :  { %v136_v61 = vmul.f32 0.5, %v122_v53  ;;  %v101_v62 = vadd.f32 %v100_v54, %v99_v46  ;;  %v85_v63 = vadd.f32 %v84_v55, %v83_v47  ;;  %v113_v0 = vadd.f32 %v112_v56, %v111_v48 }
  0x36   :  { %v134_v1 = vmul.f32 0.5, %v108_v58  ;;  %v129_v2 = vadd.f32 %v128_v60, %v127_v52  ;;  %v147_v3 = vrot.slane %v132_v57, 4 }
  0x37   :  { %v245_v4 = vsel %vm165_vm1, %v136_v61, %v132_v57  ;;  %v133_v5 = vmul.f32 0.5, %v101_v62  ;;  %v86_v6 = vrot.slane %v85_v63, 1  ;;  %v150_v7 = vrot.slane %v136_v61, 4 }
  0x38   :  { %307 = vmatmul.f32.vlgmr.msra.gmra.mxu2 %v245_v4  ;;  %v243_v8 = vsel %vm165_vm1, %v134_v1, %v130_v59  ;;  %v137_v9 = vmul.f32 0.5, %v129_v2  ;;  %v114_v10 = vrot.slane %v113_v0, 1 }
  0x39   :  { %267 = vmatmul.f32.vlgmr.msra.gmra.mxu0 %v243_v8  ;;  %v148_v11 = vrot.slane %v133_v5, 2  ;;  %v87_v12 = vadd.f32 %v86_v6, %v85_v63 }
  0x3a   :  { %v151_v13 = vrot.slane %v137_v9, 2  ;;  %v246_v14 = vsel %vm165_vm1, %v137_v9, %v133_v5  ;;  %v115_v15 = vadd.f32 %v114_v10, %v113_v0 }
  0x3b   :  { %v154_v16 = vsel %vm153_vm2, %v147_v3, %v148_v11  ;;  %327 = vmatmul.f32.vlgmr.msra.gmra.mxu3 %v246_v14  ;;  %v131_v17 = vmul.f32 0.5, %v87_v12 }
  0x3c   :  { %v158_v18 = vsel %vm153_vm2, %v150_v7, %v151_v13  ;;  %v135_v19 = vmul.f32 0.5, %v115_v15 }
  0x3d   :  { %v146_v20 = vrot.slane %v131_v17, 6 }
  0x3e   :  { %v149_v21 = vrot.slane %v135_v19, 6  ;;  %v244_v22 = vsel %vm165_vm1, %v135_v19, %v131_v17 }
  0x3f   :  { %v152_v23 = vsel %vm73_vm0, %v130_v59, %v146_v20  ;;  %287 = vmatmul.f32.vlgmr.msra.gmra.mxu1 %v244_v22 }
  0x40   :  { %v157_v24 = vsel %vm73_vm0, %v134_v1, %v149_v21  ;;  %v156_v27 = vsel %vm155_vm3, %v152_v23, %v154_v16 }
  0x41   :  { %v159_v25 = vsel %vm155_vm3, %v157_v24, %v158_v18 }
  0x42   :  { %v164_v26 = vrot.slane %v159_v25, 7 }
  0x44   :  { %v166_v28 = vsel %vm165_vm1, %v164_v26, %v156_v27 }
  0x45   :  { %v168_v29 = vsel %vm167_vm4, %v164_v26, %v166_v28 }
  0x46   :  { %v170_v30 = vsel %vm169_vm5, %v164_v26, %v168_v29 }
  0x47   :  { %v172_v31 = vsel %vm171_vm6, %v164_v26, %v170_v30 }
  0x48   :  { %174 = vst [vmem:[#allocation8] sm:$0xff] %v172_v31 }
  0x49   :  { %353 = dma.vmem_to_hbm [thread:$0]  %s349_s27, 128, %s351_s30, [#allocation9]  }
  0xb6   :  { %v268_v33 = vpop.f32.mrf.mxu0 }
  0xb7   :  { %v269_v34 = vadd.f32 %v376_v32, %v268_v33 }
  0xbb   :  { %v308_v36 = vpop.f32.mrf.mxu2 }
  0xbc   :  { %v288_v35 = vpop.f32.mrf.mxu1 }
  0xbd   :  { %v289_v37 = vadd.f32 %v288_v35, %v269_v34 }
  0xbe   :  { %v328_v38 = vpop.f32.mrf.mxu3 }
  0xbf   :  { %v309_v39 = vadd.f32 %v308_v36, %v289_v37 }
  0xc1   :  { %v329_v40 = vadd.f32 %v328_v38, %v309_v39 }
  0xc3   :  { %331 = vst [vmem:[#allocation7] sm:$0x3] %v329_v40 }
  0xc4   :  { %342 = dma.vmem_to_hbm [thread:$0]  %s338_s5, 32, %s340_s8, [#allocation4]  }
  0xc5   :  { %477 = dma.done.wait [#allocation4], 32  }
  0xc6   :  { %478 = vsyncadd [#allocation4], 4294967264 }
  0xc7   :  { %479 = dma.done.wait [#allocation9], 128  }
  0xc8   :  { %480 = vsyncadd [#allocation9], 4294967168 }
  0xc9   :  { %362 = vsyncpa [#allocation3], 1 }
  0xca   :  { %363 = vsyncpa [#allocation6], 1 }
  0xcb   :  { %364 = vsyncpa [#allocation4], 1 }
  0xcc   :  { %365 = vsyncpa [#allocation9], 1 }

// kernel: forward.70
= control target key start
LH: loop header
LB: loop body
LE: loop exit
PB: predicated region body
PF: predicated region fallthrough
CT: control target
= control target key end

     0   :  { %s2704_s0 = inlined_call_operand.vmem [shape: bf16[2,4,512], index: 0, kind: input, shape index: {}]   ;;  %s2705_s1 = inlined_call_operand.hbm [shape: bf16[3,512,512], index: 1, kind: input, shape index: {}]   ;;  %s2706_s2 = inlined_call_operand.hbm [shape: f32[1,512], index: 2, kind: input, shape index: {}]   ;;  %s2707_s3 = inlined_call_operand.hbm [shape: f32[1,512], index: 3, kind: input, shape index: {}]   ;;  %s2708_s4 = inlined_call_operand.vmem [shape: bf16[2,2,512], index: 4, kind: input, shape index: {}]   ;;  %s2709_s5 = inlined_call_operand.vmem [shape: bf16[2,2,512], index: 5, kind: output, shape index: {}]  }
   0x1   :  { %2714 = sst [smem:[#allocation14_spill]] %s2706_s2 }
   0x2   :  { %2715 = sst [smem:[#allocation15_spill]] %s2709_s5 }
   0x3   :  { %10 = vsyncpa [#allocation3], 0 }
   0x4   :  { %12 = vsyncpa [#allocation3 + $0x1], 0 }
   0x5   :  { %13 = vsyncpa [#allocation5], 0 }
   0x6   :  { %15 = vsyncpa [#allocation5 + $0x1], 0  ;;  %s2438_s18 = smov 0   ;;  %s2440_s19 = smov 0  }
   0x7   :  { %s2442_s20 = smov 0   ;;  %s2444_s21 = smov 0  }
   0x8   :  { %s2446_s22 = smov 0   ;;  %s2448_s23 = smov 0  }
   0x9   :  { %s2450_s24 = smov 0   ;;  %s2452_s25 = smov 0  }
   0xa LB: > { %2716 = sst [smem:[#allocation9_spill]] %s2383_s20  ;;  %s2710_s26 = sadd.s32 4294967295, %s2403_s25   ;;  %s2403_s25 = sphi %s2452_s25, %s21_s25   ;;  %s2399_s24 = sphi %s2450_s24, %s2731_s24   ;;  %s2395_s23 = sphi %s2448_s23, %s2735_s23   ;;  %s2391_s22 = sphi %s2446_s22, %s2729_s22   ;;  %s2387_s21 = sphi %s2444_s21, %s2734_s21   ;;  %s2383_s20 = sphi %s2442_s20, %s2728_s20   ;;  %s2379_s19 = sphi %s2440_s19, %s2733_s19   ;;  %s2375_s18 = sphi %s2438_s18, %s2732_s18  }
   0xb   : > { %2717 = sst [smem:[#allocation10_spill]] %s2399_s24  ;;  %s30_s27 = sadd.s32 1, %s2395_s23 }
   0xc   : > { %p31_p0 = scmp.ge.s32.totalorder %s30_s27, 4  ;;  %s33_s28 = sadd.s32 1, %s2399_s24 }
   0xd   : > { %s66_s29 = sadd.s32 1, %s2383_s20  ;;  %p73_p1 = scmp.ne.s32.totalorder %s2383_s20, %s2379_s19 }
   0xe   : > { %s2737_s27 = smov (%p31_p0, %s30_s27), 0  ;;  %s2739_s28 = smov (!%p31_p0, %s33_s28), %s2399_s24 }
   0xf   : > { %2718 = sst [smem:[#allocation11_spill]] %s2737_s27  ;;  %s63_s30 = ssub.s32 %s2395_s23, %s2737_s27 }
  0x10   : > { %p74_p2 = scmp.eq.s32.totalorder %s2403_s25, 0  ;;  %p35_p3 = scmp.ge.s32.totalorder %s2739_s28, 2 }
  0x11   : > { %p64_p4 = scmp.eq.s32.totalorder %s63_s30, 0  ;;  %p79_p6 = scmp.ne.s32.totalorder %s2379_s19, %s2375_s18 }
  0x12   : > { %p75_p5 = por %p74_p2, %p73_p1  ;;  %s2741_s28 = smov (%p35_p3, %s2739_s28), 0 }
  0x13   : > { %2719 = sst [smem:[#allocation12_spill]] %s2741_s28  ;;  %p80_p7 = scmp.eq.s32.totalorder %s2710_s26, 0 }
  0x14   : > { %s2492_s6 = scalar_select %p64_p4, %s2383_s20, %s66_s29  }
  0x15   : > { %p2173_p8 = scmp.lt.s32.totalorder %s2403_s25, 8  ;;  %s2498_s7 = sand.u32 1, %s2383_s20  }
  0x16   : > { %2720 = sst [smem:[#allocation13_spill]] %s2492_s6  ;;  %p2500_p9 = por %p80_p7, %p79_p6 }
  0x17   : > { %s2155_s9 = smul.u32 768, %s2498_s7  ;;  %p2505_p10 = pnand %p2173_p8, %p75_p5 }
  0x18   : > { %s240_s11 = sand.u32 1, %s2403_s25   ;;  %s2723_s2 = sld [smem:[#allocation14_spill]] }
  0x19   : > { %s243_s16 = scalar_lea.vmem [#allocation4], %s2498_s7  ;;  %s241_s18 = scalar_lea.sflag [#allocation5], %s240_s11 }
  0x1a   : > { %s250_s17 = sshll.u32 %s243_s16, 4  ;;  %p1539_p11 = scmp.ge.s32.totalorder %s2403_s25, 1  ;;  %s251_s17 = int_to_ptr.vmem [resolvable:$true] %s250_s17 }
  0x1b   : > { %p282_p12 = scmp.lt.s32.totalorder %s2403_s25, 9  ;;  %s1538_s30 = sshll.u32 %s2395_s23, 2 }
  0x1c   : > { %s223_s16 = scalar_lea.vmem [#allocation2], %s2155_s9  ;;  %s2407_s28 = smov 4  }
  0x1d   : > { %p2519_p13 = pnand %p1539_p11, %p282_p12  ;;  %s230_s26 = sshll.u32 %s223_s16, 4  ;;  %s231_s26 = int_to_ptr.vmem [resolvable:$true] %s230_s26 }
  0x1e   : > { %s246_s14 = scalar_lea.hbm %s2723_s2, %s2395_s23  ;;  %s2406_s2 = smov 64  }
  0x1f   : > { %s248_s15 = sshll.u32 %s246_s14, 4  ;;  %s227_s14 = scalar_lea.hbm %s2705_s1, %s1538_s30  ;;  %s249_s15 = int_to_ptr.hbm [resolvable:$true] %s248_s15 }
  0x20   : > { %2169 = dma.hbm_to_vmem [thread:$0]  (!%p2505_p10), %s249_s15, 16, %s251_s17, %s241_s18  }
  0x21   : > { %s228_s11 = sshll.u32 %s227_s14, 4  ;;  %s220_s15 = scalar_lea.sflag [#allocation3], %s2498_s7  ;;  %s229_s11 = int_to_ptr.hbm [resolvable:$true] %s228_s11 }
  0x22   : > { %s2405_s17 = smov 256   ;;  %s263_s6 = scalar_lea.hbm %s2707_s3, %s2395_s23 }
  0x23   : > { %2166 = dma.hbm_to_vmem [thread:$0]  (!%p2505_p10), %s229_s11, 12288, %s231_s26, %s220_s15, %s2405_s17, %s2406_s2, %s2407_s28  }
  0x24   : > { %s265_s20 = sshll.u32 %s263_s6, 4  ;;  %s260_s5 = scalar_lea.vmem [#allocation6], %s2498_s7  ;;  %s266_s20 = int_to_ptr.hbm [resolvable:$true] %s265_s20 }
  0x25   : > { %s267_s12 = sshll.u32 %s260_s5, 4  ;;  %286 = sbr.rel (%p2519_p13) target bundleno = 293 (0x125), region = 40  ;;  %s268_s12 = int_to_ptr.vmem [resolvable:$true] %s267_s12 }
  0x26   : > { %2172 = dma.hbm_to_vmem [thread:$0]  (!%p2505_p10), %s266_s20, 16, %s268_s12, %s241_s18  }
  0x27   : > { %s2540_s9 = sand.u32 (!%p2519_p13), 1, %s2379_s19  }
  0x28   : > { %s2156_s2 = smul.u32 (!%p2519_p13), 768, %s2540_s9  ;;  %s289_s26 = scalar_lea.sflag (!%p2519_p13), [#allocation3], %s2540_s9 }
  0x2a   : > { %s2544_s24 = scalar_lea.vmem [#allocation2], %s2156_s2 }
  0x2b   : > { %2366 = dma.done.wait (%p2500_p9), %s289_s26, 12288  }
  0x2c   : > { %2368 = vsyncadd (%p2500_p9), %s289_s26, 4294955008  ;;  %s2725_s5 = sadd.s32 4294967295, %s2403_s25   ;;  %s301_s28 = scalar_lea.vmem [#allocation4], %s2540_s9 }
  0x2d   : > { %s298_s20 = sand.u32 1, %s2725_s5  }
  0x2e   : > { %s299_s27 = scalar_lea.sflag [#allocation5], %s298_s20 }
  0x2f   : > { %2370 = dma.done.wait (%p2500_p9), %s299_s27, 32  }
  0x30   : > { %2372 = vsyncadd (%p2500_p9), %s299_s27, 4294967264  ;;  %v2098_v0 = vld [vmem:[%s2544_s24 + $0x138] sm:$0xff]  ;;  %v2097_v4 = vld [vmem:[%s2544_s24 + $0x130] sm:$0xff]  ;;  %p360_p0 = scmp.lt.s32.totalorder %s2391_s22, 1  ;;  %s310_s18 = scalar_lea.vmem [#allocation6], %s2540_s9 }
  0x31   : > { %v2106_v1 = vld [vmem:[%s2544_s24 + $0x178] sm:$0xff]  ;;  %736 = vmatpush.bf16.msra.mxu0 %v2098_v0  ;;  %v2105_v5 = vld [vmem:[%s2544_s24 + $0x170] sm:$0xff]  ;;  %v2096_v8 = vld [vmem:[%s2544_s24 + $0x128] sm:$0xff]  ;;  %p367_p1 = scmp.lt.s32.totalorder %s2387_s21, 3  ;;  %s2726_s11 = sld [smem:[#allocation15_spill]] }
  0x32   : > { %v2114_v2 = vld [vmem:[%s2544_s24 + $0x1b8] sm:$0xff]  ;;  %749 = vmatpush.bf16.msra.mxu1 %v2106_v1  ;;  %v2113_v6 = vld [vmem:[%s2544_s24 + $0x1b0] sm:$0xff]  ;;  %v2104_v9 = vld [vmem:[%s2544_s24 + $0x168] sm:$0xff]  ;;  %s2743_s22 = smov (!%p360_p0, %s2391_s22), 1 }
  0x33   : > { %v2122_v3 = vld [vmem:[%s2544_s24 + $0x1f8] sm:$0xff]  ;;  %762 = vmatpush.bf16.msra.mxu2 %v2114_v2  ;;  %v2121_v7 = vld [vmem:[%s2544_s24 + $0x1f0] sm:$0xff]  ;;  %v2112_v10 = vld [vmem:[%s2544_s24 + $0x1a8] sm:$0xff]  ;;  %s2058_s6 = sshll.u32 %s2743_s22, 3  ;;  %s2745_s21 = smov (!%p367_p1, %s2387_s21), 3 }
  0x34   : > { %775 = vmatpush.bf16.msra.mxu3 %v2122_v3  ;;  %v2120_v11 = vld [vmem:[%s2544_s24 + $0x1e8] sm:$0xff]  ;;  %v2095_v12 = vld [vmem:[%s2544_s24 + $0x120] sm:$0xff]  ;;  %v2094_v16 = vld [vmem:[%s2544_s24 + $0x118] sm:$0xff]  ;;  %s2583_s10 = scalar_lea.vmem %s2704_s0, %s2058_s6  ;;  %s1542_s29 = sshll.u32 %s2743_s22, 2 }
  0x35   : > { %737 = vmatpush.bf16.msra.mxu0 %v2097_v4  ;;  %v2103_v13 = vld [vmem:[%s2544_s24 + $0x160] sm:$0xff]  ;;  %v2102_v17 = vld [vmem:[%s2544_s24 + $0x158] sm:$0xff]  ;;  %v2093_v21 = vld [vmem:[%s2544_s24 + $0x110] sm:$0xff]  ;;  %s370_s30 = sadd.s32 %s1542_s29, %s2745_s21 }
  0x36   : > { %750 = vmatpush.bf16.msra.mxu1 %v2105_v5  ;;  %v2111_v14 = vld [vmem:[%s2544_s24 + $0x1a0] sm:$0xff]  ;;  %v2110_v18 = vld [vmem:[%s2544_s24 + $0x198] sm:$0xff]  ;;  %v2101_v22 = vld [vmem:[%s2544_s24 + $0x150] sm:$0xff]  ;;  %s371_s16 = scalar_lea.vmem %s2708_s4, %s370_s30 }
  0x37   : > { %763 = vmatpush.bf16.msra.mxu2 %v2113_v6  ;;  %v2119_v15 = vld [vmem:[%s2544_s24 + $0x1e0] sm:$0xff]  ;;  %v2118_v19 = vld [vmem:[%s2544_s24 + $0x1d8] sm:$0xff]  ;;  %v2109_v23 = vld [vmem:[%s2544_s24 + $0x190] sm:$0xff]  ;;  %s378_s15 = scalar_lea.vmem %s2726_s11, %s370_s30 }
  0x38   : > { %776 = vmatpush.bf16.msra.mxu3 %v2121_v7  ;;  %v444_v20 = vld [vmem:[%s2583_s10] sm:$0xff]  ;;  %v2117_v24 = vld [vmem:[%s2544_s24 + $0x1d0] sm:$0xff]  ;;  %v2092_v25 = vld [vmem:[%s2544_s24 + $0x108] sm:$0xff] }
  0x39   : > { %738 = vmatpush.bf16.msra.mxu0 %v2096_v8  ;;  %511 = vst [vmem:[#allocation1] ss:$4 sm:$0xff] %v444_v20  ;;  %v2100_v26 = vld [vmem:[%s2544_s24 + $0x148] sm:$0xff]  ;;  %v2091_v29 = vld [vmem:[%s2544_s24 + $0x100] sm:$0xff]  ;;  %v379_v31 = vld [vmem:[%s2583_s10] sm:$0x55] }
  0x3a   : > { %751 = vmatpush.bf16.msra.mxu1 %v2104_v9  ;;  %v2108_v27 = vld [vmem:[%s2544_s24 + $0x188] sm:$0xff]  ;;  %v2099_v30 = vld [vmem:[%s2544_s24 + $0x140] sm:$0xff]  ;;  %v2066_v36 = vld [vmem:[%s2544_s24 + $0x38] sm:$0xff] }
  0x3b   : > { %764 = vmatpush.bf16.msra.mxu2 %v2112_v10  ;;  %v2116_v28 = vld [vmem:[%s2544_s24 + $0x1c8] sm:$0xff]  ;;  %v2107_v32 = vld [vmem:[%s2544_s24 + $0x180] sm:$0xff]  ;;  %v2074_v37 = vld [vmem:[%s2544_s24 + $0x78] sm:$0xff] }
  0x3c   : > { %777 = vmatpush.bf16.msra.mxu3 %v2120_v11  ;;  %v2115_v33 = vld [vmem:[%s2544_s24 + $0x1c0] sm:$0xff]  ;;  %v2082_v48 = vld [vmem:[%s2544_s24 + $0xb8] sm:$0xff]  ;;  %v2065_v56 = vld [vmem:[%s2544_s24 + $0x30] sm:$0xff] }
  0x3d   : > { %739 = vmatpush.bf16.msra.mxu0 %v2095_v12  ;;  %v2090_v49 = vld [vmem:[%s2544_s24 + $0xf8] sm:$0xff]  ;;  %v2073_v57 = vld [vmem:[%s2544_s24 + $0x70] sm:$0xff]  ;;  %v2064_v62 = vld [vmem:[%s2544_s24 + $0x28] sm:$0xff] }
  0x3e   : > { %752 = vmatpush.bf16.msra.mxu1 %v2103_v13  ;;  %v2081_v59 = vld [vmem:[%s2544_s24 + $0xb0] sm:$0xff]  ;;  %v2072_v63 = vld [vmem:[%s2544_s24 + $0x68] sm:$0xff]  ;;  %v2063_v2 = vld [vmem:[%s2544_s24 + $0x20] sm:$0xff] }
  0x3f   : > { %765 = vmatpush.bf16.msra.mxu2 %v2111_v14  ;;  %v2089_v60 = vld [vmem:[%s2544_s24 + $0xf0] sm:$0xff]  ;;  %v2080_v0 = vld [vmem:[%s2544_s24 + $0xa8] sm:$0xff]  ;;  %v2071_v3 = vld [vmem:[%s2544_s24 + $0x60] sm:$0xff] }
  0x40   : > { %778 = vmatpush.bf16.msra.mxu3 %v2119_v15  ;;  %v514_v34 = vld.sshfl [vmem:[#allocation1 + $0x10] sm:$0xff pattern:$0x73625140]  ;;  %v512_v35 = vld.sshfl [vmem:[#allocation1] sm:$0xff pattern:$0x73625140] }
  0x41   : > { %740 = vmatpush.bf16.msra.mxu0 %v2094_v16  ;;  %v528_v38 = vshrl.u32 %v514_v34, 16  ;;  %v530_v39 = vshll.u32 %v514_v34, 16  ;;  %v516_v40 = vshrl.u32 %v512_v35, 16  ;;  %v518_v41 = vshll.u32 %v512_v35, 16  ;;  %v2088_v1 = vld [vmem:[%s2544_s24 + $0xe8] sm:$0xff]  ;;  %v2079_v9 = vld [vmem:[%s2544_s24 + $0xa0] sm:$0xff] }
  0x42   : > { %753 = vmatpush.bf16.msra.mxu1 %v2102_v17  ;;  %v515_v42 = vld.sshfl [vmem:[#allocation1 + $0x18] sm:$0xff pattern:$0x73625140]  ;;  %v513_v43 = vld.sshfl [vmem:[#allocation1 + $0x8] sm:$0xff pattern:$0x73625140] }
  0x43   : > { %766 = vmatpush.bf16.msra.mxu2 %v2110_v18  ;;  %v532_v44 = vrot.slane %v530_v39, 1  ;;  %v520_v45 = vrot.slane %v518_v41, 1  ;;  %v534_v46 = vshrl.u32 %v515_v42, 16  ;;  %v536_v47 = vshll.u32 %v515_v42, 16  ;;  %789 = vst [vmem:[#allocation1] ss:$4 sm:$0xff] %v379_v31 }
  0x44   : > { %779 = vmatpush.bf16.msra.mxu3 %v2118_v19  ;;  %v522_v50 = vshrl.u32 %v513_v43, 16  ;;  %v524_v51 = vshll.u32 %v513_v43, 16  ;;  %v1042_v4 = vld [vmem:[%s2583_s10] sm:$0xaa]  ;;  %v2087_v10 = vld [vmem:[%s2544_s24 + $0xe0] sm:$0xff]  ;;  %v2061_v15 = vld [vmem:[%s2544_s24 + $0x10] sm:$0xff] }
  0x45   : > { %741 = vmatpush.bf16.msra.mxu0 %v2093_v21  ;;  %v533_v52 = vor.u32 %v532_v44, %v528_v38  ;;  %v521_v53 = vor.u32 %v520_v45, %v516_v40  ;;  %v538_v54 = vrot.slane %v536_v47, 1  ;;  %v2062_v11 = vld [vmem:[%s2544_s24 + $0x18] sm:$0xff]  ;;  %v2069_v16 = vld [vmem:[%s2544_s24 + $0x50] sm:$0xff]  ;;  %v2060_v19 = vld [vmem:[%s2544_s24 + $0x8] sm:$0xff] }
  0x46   : > { %754 = vmatpush.bf16.msra.mxu1 %v2101_v22  ;;  %v526_v55 = vrot.slane %v524_v51, 1  ;;  %v2070_v12 = vld [vmem:[%s2544_s24 + $0x58] sm:$0xff]  ;;  %v2077_v17 = vld [vmem:[%s2544_s24 + $0x90] sm:$0xff]  ;;  %v2068_v20 = vld [vmem:[%s2544_s24 + $0x48] sm:$0xff] }
  0x47   : > { %767 = vmatpush.bf16.msra.mxu2 %v2109_v23  ;;  %v539_v58 = vor.u32 %v538_v54, %v534_v46  ;;  %v2078_v13 = vld [vmem:[%s2544_s24 + $0x98] sm:$0xff]  ;;  %v2085_v18 = vld [vmem:[%s2544_s24 + $0xd0] sm:$0xff]  ;;  %v2076_v21 = vld [vmem:[%s2544_s24 + $0x88] sm:$0xff] }
  0x48   : > { %780 = vmatpush.bf16.msra.mxu3 %v2117_v24  ;;  %v527_v61 = vor.u32 %v526_v55, %v522_v50  ;;  %v2086_v14 = vld [vmem:[%s2544_s24 + $0xd8] sm:$0xff]  ;;  %v2084_v22 = vld [vmem:[%s2544_s24 + $0xc8] sm:$0xff]  ;;  %v2059_v23 = vld [vmem:[%s2544_s24] sm:$0xff] }
  0x49   : > { %742 = vmatpush.bf16.msra.mxu0 %v2092_v25  ;;  %v2067_v24 = vld [vmem:[%s2544_s24 + $0x40] sm:$0xff]  ;;  %v2129_v31 = vld [vmem:[%s2544_s24 + $0x230] sm:$0xff]  ;;  %v2128_v35 = vld [vmem:[%s2544_s24 + $0x228] sm:$0xff] }
  0x4a   : > { %755 = vmatpush.bf16.msra.mxu1 %v2100_v26  ;;  %v792_v5 = vld.sshfl [vmem:[#allocation1 + $0x10] sm:$0xff pattern:$0x73625140]  ;;  %v790_v6 = vld.sshfl [vmem:[#allocation1] sm:$0xff pattern:$0x73625140] }
  0x4b   : > { %768 = vmatpush.bf16.msra.mxu2 %v2108_v27  ;;  %v793_v7 = vld.sshfl [vmem:[#allocation1 + $0x18] sm:$0xff pattern:$0x73625140]  ;;  %v791_v8 = vld.sshfl [vmem:[#allocation1 + $0x8] sm:$0xff pattern:$0x73625140] }
  0x4c   : > { %781 = vmatpush.bf16.msra.mxu3 %v2116_v28  ;;  %1109 = vst [vmem:[#allocation1] ss:$4 sm:$0xff] %v1042_v4  ;;  %v2075_v25 = vld [vmem:[%s2544_s24 + $0x80] sm:$0xff]  ;;  %v2130_v27 = vld [vmem:[%s2544_s24 + $0x238] sm:$0xff]  ;;  %v2153_v34 = vld [vmem:[%s2544_s24 + $0x2f0] sm:$0xff] }
  0x4d   : > { %743 = vmatpush.bf16.msra.mxu0 %v2091_v29  ;;  %v2083_v26 = vld [vmem:[%s2544_s24 + $0xc0] sm:$0xff]  ;;  %v2138_v28 = vld [vmem:[%s2544_s24 + $0x278] sm:$0xff]  ;;  %v2152_v38 = vld [vmem:[%s2544_s24 + $0x2e8] sm:$0xff] }
  0x4e   : > { %756 = vmatpush.bf16.msra.mxu1 %v2099_v30  ;;  %v2146_v29 = vld [vmem:[%s2544_s24 + $0x2b8] sm:$0xff]  ;;  %v2127_v39 = vld [vmem:[%s2544_s24 + $0x220] sm:$0xff]  ;;  %v2125_v47 = vld [vmem:[%s2544_s24 + $0x210] sm:$0xff] }
  0x4f   : > { %769 = vmatpush.bf16.msra.mxu2 %v2107_v32  ;;  %v2154_v30 = vld [vmem:[%s2544_s24 + $0x2f8] sm:$0xff]  ;;  %v2137_v32 = vld [vmem:[%s2544_s24 + $0x270] sm:$0xff]  ;;  %v2135_v40 = vld [vmem:[%s2544_s24 + $0x260] sm:$0xff] }
  0x50   : > { %782 = vmatpush.bf16.msra.mxu3 %v2115_v33  ;;  %744 = vmatmul.bf16.vlgmr.msra.gmra.mxu0 %v521_v53  ;;  %v2145_v33 = vld [vmem:[%s2544_s24 + $0x2b0] sm:$0xff]  ;;  %v2143_v41 = vld [vmem:[%s2544_s24 + $0x2a0] sm:$0xff]  ;;  %v2126_v43 = vld [vmem:[%s2544_s24 + $0x218] sm:$0xff] }
  0x51   : > { %990 = vmatpush.bf16.msrb.mxu0 %v2066_v36  ;;  %757 = vmatmul.bf16.vlgmr.msra.gmra.mxu1 %v527_v61  ;;  %v2136_v36 = vld [vmem:[%s2544_s24 + $0x268] sm:$0xff]  ;;  %v2151_v42 = vld [vmem:[%s2544_s24 + $0x2e0] sm:$0xff]  ;;  %v2134_v44 = vld [vmem:[%s2544_s24 + $0x258] sm:$0xff] }
  0x52   : > { %1003 = vmatpush.bf16.msrb.mxu1 %v2074_v37  ;;  %770 = vmatmul.bf16.vlgmr.msra.gmra.mxu2 %v533_v52  ;;  %v2144_v37 = vld [vmem:[%s2544_s24 + $0x2a8] sm:$0xff]  ;;  %v2142_v45 = vld [vmem:[%s2544_s24 + $0x298] sm:$0xff]  ;;  %v2149_v50 = vld [vmem:[%s2544_s24 + $0x2d0] sm:$0xff] }
  0x53   : > { %1016 = vmatpush.bf16.msrb.mxu2 %v2082_v48  ;;  %783 = vmatmul.bf16.vlgmr.msra.gmra.mxu3 %v539_v58  ;;  %v2150_v46 = vld [vmem:[%s2544_s24 + $0x2d8] sm:$0xff]  ;;  %v2133_v48 = vld [vmem:[%s2544_s24 + $0x250] sm:$0xff]  ;;  %v2124_v51 = vld [vmem:[%s2544_s24 + $0x208] sm:$0xff] }
  0x54   : > { %1029 = vmatpush.bf16.msrb.mxu3 %v2090_v49  ;;  %v2141_v49 = vld [vmem:[%s2544_s24 + $0x290] sm:$0xff]  ;;  %v2132_v52 = vld [vmem:[%s2544_s24 + $0x248] sm:$0xff]  ;;  %v2123_v55 = vld [vmem:[%s2544_s24 + $0x200] sm:$0xff] }
  0x55   : > { %991 = vmatpush.bf16.msrb.mxu0 %v2065_v56  ;;  %v2140_v53 = vld [vmem:[%s2544_s24 + $0x288] sm:$0xff]  ;;  %v2131_v56 = vld [vmem:[%s2544_s24 + $0x240] sm:$0xff] }
  0x56   : > { %1004 = vmatpush.bf16.msrb.mxu1 %v2073_v57  ;;  %v2148_v54 = vld [vmem:[%s2544_s24 + $0x2c8] sm:$0xff]  ;;  %v2139_v57 = vld [vmem:[%s2544_s24 + $0x280] sm:$0xff] }
  0x57   : > { %1017 = vmatpush.bf16.msrb.mxu2 %v2081_v59  ;;  %v2147_v58 = vld [vmem:[%s2544_s24 + $0x2c0] sm:$0xff]  ;;  %v1110_v59 = vld.sshfl [vmem:[#allocation1] sm:$0xff pattern:$0x73625140] }
  0x58   : > { %1030 = vmatpush.bf16.msrb.mxu3 %v2089_v60  ;;  %v1112_v60 = vld.sshfl [vmem:[#allocation1 + $0x8] sm:$0xff pattern:$0x73625140]  ;;  %v1114_v61 = vld.sshfl [vmem:[#allocation1 + $0x10] sm:$0xff pattern:$0x73625140] }
  0x59   : > { %992 = vmatpush.bf16.msrb.mxu0 %v2064_v62  ;;  %v1116_v62 = vld.sshfl [vmem:[#allocation1 + $0x18] sm:$0xff pattern:$0x73625140] }
  0x5a   : > { %1005 = vmatpush.bf16.msrb.mxu1 %v2072_v63  ;;  %v1118_v63 = vrot.slane %v1110_v59, 1 }
  0x5b   : > { %1018 = vmatpush.bf16.msrb.mxu2 %v2080_v0  ;;  %v1119_v0 = vrot.slane %v1112_v60, 1 }
  0x5c   : > { %1031 = vmatpush.bf16.msrb.mxu3 %v2088_v1  ;;  %v1120_v1 = vrot.slane %v1114_v61, 1 }
  0x5d   : > { %993 = vmatpush.bf16.msrb.mxu0 %v2063_v2  ;;  %v1121_v2 = vrot.slane %v1116_v62, 1 }
  0x5e   : > { %1006 = vmatpush.bf16.msrb.mxu1 %v2071_v3 }
  0x5f   : > { %1019 = vmatpush.bf16.msrb.mxu2 %v2079_v9 }
  0x60   : > { %1032 = vmatpush.bf16.msrb.mxu3 %v2087_v10 }
  0x61   : > { %994 = vmatpush.bf16.msrb.mxu0 %v2062_v11 }
  0x62   : > { %1007 = vmatpush.bf16.msrb.mxu1 %v2070_v12 }
  0x63   : > { %1020 = vmatpush.bf16.msrb.mxu2 %v2078_v13 }
  0x64   : > { %1033 = vmatpush.bf16.msrb.mxu3 %v2086_v14 }
  0x65   : > { %995 = vmatpush.bf16.msrb.mxu0 %v2061_v15 }
  0x66   : > { %1008 = vmatpush.bf16.msrb.mxu1 %v2069_v16 }
  0x67   : > { %1021 = vmatpush.bf16.msrb.mxu2 %v2077_v17 }
  0x68   : > { %1034 = vmatpush.bf16.msrb.mxu3 %v2085_v18 }
  0x69   : > { %996 = vmatpush.bf16.msrb.mxu0 %v2060_v19 }
  0x6a   : > { %1009 = vmatpush.bf16.msrb.mxu1 %v2068_v20 }
  0x6b   : > { %1022 = vmatpush.bf16.msrb.mxu2 %v2076_v21 }
  0x6c   : > { %1035 = vmatpush.bf16.msrb.mxu3 %v2084_v22 }
  0x6d   : > { %997 = vmatpush.bf16.msrb.mxu0 %v2059_v23 }
  0x6e   : > { %1010 = vmatpush.bf16.msrb.mxu1 %v2067_v24 }
  0x6f   : > { %1023 = vmatpush.bf16.msrb.mxu2 %v2075_v25 }
  0x70   : > { %1036 = vmatpush.bf16.msrb.mxu3 %v2083_v26  ;;  %998 = vmatmul.bf16.vlgmr.msrb.gmra.mxu0 %v790_v6 }
  0x71   : > { %1318 = vmatpush.bf16.msra.mxu0 %v2130_v27  ;;  %1011 = vmatmul.bf16.vlgmr.msrb.gmra.mxu1 %v791_v8 }
  0x72   : > { %1331 = vmatpush.bf16.msra.mxu1 %v2138_v28  ;;  %1024 = vmatmul.bf16.vlgmr.msrb.gmra.mxu2 %v792_v5 }
  0x73   : > { %1344 = vmatpush.bf16.msra.mxu2 %v2146_v29  ;;  %1037 = vmatmul.bf16.vlgmr.msrb.gmra.mxu3 %v793_v7 }
  0x74   : > { %1357 = vmatpush.bf16.msra.mxu3 %v2154_v30 }
  0x75   : > { %1319 = vmatpush.bf16.msra.mxu0 %v2129_v31 }
  0x76   : > { %1332 = vmatpush.bf16.msra.mxu1 %v2137_v32 }
  0x77   : > { %1345 = vmatpush.bf16.msra.mxu2 %v2145_v33 }
  0x78   : > { %1358 = vmatpush.bf16.msra.mxu3 %v2153_v34 }
  0x79   : > { %1320 = vmatpush.bf16.msra.mxu0 %v2128_v35  ;;  %v2241_v35 = vld [vmem:[%s301_s28] ss:$0 sm:$0xff] }
  0x7a   : > { %1333 = vmatpush.bf16.msra.mxu1 %v2136_v36  ;;  %v1381_v36 = vld [vmem:[%s371_s16] sm:$0x1] }
  0x7b   : > { %1346 = vmatpush.bf16.msra.mxu2 %v2144_v37 }
  0x7c   : > { %1359 = vmatpush.bf16.msra.mxu3 %v2152_v38  ;;  %v2242_v38 = vld [vmem:[%s310_s18] ss:$0 sm:$0xff] }
  0x7d   : > { %1321 = vmatpush.bf16.msra.mxu0 %v2127_v39 }
  0x7e   : > { %1334 = vmatpush.bf16.msra.mxu1 %v2135_v40  ;;  %v1382_v40 = vunpack.c.l.bf16 %v1381_v36 }
  0x7f   : > { %1347 = vmatpush.bf16.msra.mxu2 %v2143_v41 }
  0x80   : > { %1360 = vmatpush.bf16.msra.mxu3 %v2151_v42 }
  0x81   : > { %1322 = vmatpush.bf16.msra.mxu0 %v2126_v43 }
  0x82   : > { %1335 = vmatpush.bf16.msra.mxu1 %v2134_v44 }
  0x83   : > { %1348 = vmatpush.bf16.msra.mxu2 %v2142_v45 }
  0x84   : > { %1361 = vmatpush.bf16.msra.mxu3 %v2150_v46 }
  0x85   : > { %1323 = vmatpush.bf16.msra.mxu0 %v2125_v47 }
  0x86   : > { %1336 = vmatpush.bf16.msra.mxu1 %v2133_v48 }
  0x87   : > { %1349 = vmatpush.bf16.msra.mxu2 %v2141_v49 }
  0x88   : > { %1362 = vmatpush.bf16.msra.mxu3 %v2149_v50 }
  0x89   : > { %1324 = vmatpush.bf16.msra.mxu0 %v2124_v51 }
  0x8a   : > { %1337 = vmatpush.bf16.msra.mxu1 %v2132_v52 }
  0x8b   : > { %1350 = vmatpush.bf16.msra.mxu2 %v2140_v53 }
  0x8c   : > { %1363 = vmatpush.bf16.msra.mxu3 %v2148_v54 }
  0x8d   : > { %1325 = vmatpush.bf16.msra.mxu0 %v2123_v55 }
  0x8e   : > { %1338 = vmatpush.bf16.msra.mxu1 %v2131_v56 }
  0x8f   : > { %1351 = vmatpush.bf16.msra.mxu2 %v2139_v57 }
  0x90   : > { %1364 = vmatpush.bf16.msra.mxu3 %v2147_v58  ;;  %1326 = vmatmul.bf16.vlgmr.msra.gmra.mxu0 %v1118_v63 }
  0x91   : > { %1339 = vmatmul.bf16.vlgmr.msra.gmra.mxu1 %v1119_v0 }
  0x92   : > { %1352 = vmatmul.bf16.vlgmr.msra.gmra.mxu2 %v1120_v1 }
  0x93   : > { %1365 = vmatmul.bf16.vlgmr.msra.gmra.mxu3 %v1121_v2 }
  0xcd   : > { %v745_v3 = vpop.f32.mrf.mxu0 }
  0xce   : > { %v758_v4 = vpop.f32.mrf.mxu1 }
  0xcf   : > { %v759_v18 = vadd.f32 %v758_v4, %v745_v3 }
  0xd5   : > { %v771_v5 = vpop.f32.mrf.mxu2  ;;  %v747_v7 = vpop.f32.mrf.mxu0 }
  0xd6   : > { %v784_v6 = vpop.f32.mrf.mxu3  ;;  %v760_v8 = vpop.f32.mrf.mxu1  ;;  %v772_v20 = vadd.f32 %v771_v5, %v759_v18 }
  0xd8   : > { %v785_v21 = vadd.f32 %v784_v6, %v772_v20 }
  0xdd   : > { %v773_v9 = vpop.f32.mrf.mxu2 }
  0xde   : > { %v786_v10 = vpop.f32.mrf.mxu3 }
  0xed   : > { %v999_v11 = vpop.f32.mrf.mxu0 }
  0xee   : > { %v1012_v12 = vpop.f32.mrf.mxu1  ;;  %v1000_v22 = vadd.f32 %v999_v11, %v785_v21 }
  0xf0   : > { %v1013_v25 = vadd.f32 %v1012_v12, %v1000_v22 }
  0xf5   : > { %v1025_v13 = vpop.f32.mrf.mxu2  ;;  %v1001_v15 = vpop.f32.mrf.mxu0 }
  0xf6   : > { %v1038_v14 = vpop.f32.mrf.mxu3  ;;  %v1014_v16 = vpop.f32.mrf.mxu1  ;;  %v1026_v27 = vadd.f32 %v1025_v13, %v1013_v25 }
  0xf8   : > { %v1039_v33 = vadd.f32 %v1038_v14, %v1026_v27 }
  0xfd   : > { %v1027_v17 = vpop.f32.mrf.mxu2 }
  0xfe   : > { %v1040_v19 = vpop.f32.mrf.mxu3 }
 0x10d   : > { %v1327_v23 = vpop.f32.mrf.mxu0 }
 0x10e   : > { %v1340_v24 = vpop.f32.mrf.mxu1 }
 0x10f   : > { %v1341_v26 = vadd.f32 %v1340_v24, %v1327_v23 }
 0x115   : > { %v1353_v28 = vpop.f32.mrf.mxu2  ;;  %v1329_v31 = vpop.f32.mrf.mxu0 }
 0x116   : > { %v1366_v29 = vpop.f32.mrf.mxu3  ;;  %v1354_v30 = vadd.f32 %v1353_v28, %v1341_v26  ;;  %v1342_v32 = vpop.f32.mrf.mxu1 }
 0x118   : > { %v1367_v34 = vadd.f32 %v1366_v29, %v1354_v30 }
 0x11a   : > { %v1370_v37 = vadd.f32 %v1367_v34, %v1039_v33 }
 0x11c   : > { %v1375_v39 = vmul.f32 %v2241_v35, %v1370_v37 }
 0x11d   : > { %v1355_v41 = vpop.f32.mrf.mxu2 }
 0x11e   : > { %v1368_v42 = vpop.f32.mrf.mxu3  ;;  %v1380_v43 = vadd.f32 %v2242_v38, %v1375_v39 }
 0x120   : > { %v1383_v44 = vadd.f32 %v1382_v40, %v1380_v43 }
 0x122   : > { %v1384_v45 = vpack.c.bf16 %v1383_v44, %v1383_v44 }
 0x124   : > { %1385 = vst [vmem:[%s378_s15] sm:$0x1] %v1384_v45 }
 0x125 PF: > { %s21_s25 = sadd.s32 1, %s2403_s25   ;;  %s2727_s17 = sld [smem:[#allocation9_spill]] }
 0x126   : > { %p18_p2 = scmp.ge.s32.totalorder %s21_s25, 10   ;;  %s2728_s20 = sld [smem:[#allocation13_spill]] }
 0x127   : > { %s2729_s22 = sld [smem:[#allocation10_spill]]  ;;  %s2732_s18 = smov %s2379_s19 }
 0x128   : > { %s2730_s12 = sld [smem:[#allocation11_spill]]  ;;  %s2734_s21 = smov %s2395_s23 }
 0x129   : > { %s2731_s24 = sld [smem:[#allocation12_spill]] }
 0x12a   :  { %20 = sbr.rel (!%p18_p2) target bundleno = 10 (0xa), region = 112 }
 0x12b   : > { %s2733_s19 = smov %s2727_s17 }
 0x12e   : > { %s2735_s23 = smov %s2730_s12 }
 0x12f   :  { %1411 = vsyncpa [#allocation3], 1 }
 0x130   :  { %1413 = vsyncpa [#allocation3 + $0x1], 1 }
 0x131   :  { %1414 = vsyncpa [#allocation5], 1 }
 0x132   :  { %1416 = vsyncpa [#allocation5 + $0x1], 1 }

// kernel: forward.71
= control target key start
LH: loop header
LB: loop body
LE: loop exit
PB: predicated region body
PF: predicated region fallthrough
CT: control target
= control target key end

     0   :  { %s2623_s0 = inlined_call_operand.vmem [shape: bf16[2,4,512], index: 0, kind: input, shape index: {}]   ;;  %s2624_s1 = inlined_call_operand.hbm [shape: bf16[3,512,512], index: 1, kind: input, shape index: {}]   ;;  %s2625_s2 = inlined_call_operand.hbm [shape: f32[1,512], index: 2, kind: input, shape index: {}]   ;;  %s2626_s3 = inlined_call_operand.hbm [shape: f32[1,512], index: 3, kind: input, shape index: {}]   ;;  %s2627_s4 = inlined_call_operand.vmem [shape: bf16[2,2,512], index: 4, kind: output, shape index: {}]  }
   0x1   :  { %2632 = sst [smem:[#allocation14_spill]] %s2625_s2 }
   0x2   :  { %9 = vsyncpa [#allocation3], 0 }
   0x3   :  { %11 = vsyncpa [#allocation3 + $0x1], 0 }
   0x4   :  { %12 = vsyncpa [#allocation5], 0 }
   0x5   :  { %14 = vsyncpa [#allocation5 + $0x1], 0  ;;  %s2360_s15 = smov 0   ;;  %s2362_s16 = smov 0  }
   0x6   :  { %s2364_s17 = smov 0   ;;  %s2366_s18 = smov 0  }
   0x7   :  { %s2368_s19 = smov 0   ;;  %s2370_s20 = smov 0  }
   0x8   :  { %s2372_s21 = smov 0   ;;  %s2374_s22 = smov 0  }
   0x9 LB: > { %2633 = sst [smem:[#allocation9_spill]] %s2310_s17  ;;  %s2628_s23 = sadd.s32 4294967295, %s2330_s22   ;;  %s2330_s22 = sphi %s2374_s22, %s20_s22   ;;  %s2326_s21 = sphi %s2372_s21, %s2647_s21   ;;  %s2322_s20 = sphi %s2370_s20, %s2651_s20   ;;  %s2318_s19 = sphi %s2368_s19, %s2645_s19   ;;  %s2314_s18 = sphi %s2366_s18, %s2650_s18   ;;  %s2310_s17 = sphi %s2364_s17, %s2644_s17   ;;  %s2306_s16 = sphi %s2362_s16, %s2649_s16   ;;  %s2302_s15 = sphi %s2360_s15, %s2648_s15  }
   0xa   : > { %2634 = sst [smem:[#allocation10_spill]] %s2326_s21  ;;  %s29_s24 = sadd.s32 1, %s2322_s20 }
   0xb   : > { %p30_p0 = scmp.ge.s32.totalorder %s29_s24, 4  ;;  %s32_s25 = sadd.s32 1, %s2326_s21 }
   0xc   : > { %s65_s26 = sadd.s32 1, %s2310_s17  ;;  %p72_p1 = scmp.ne.s32.totalorder %s2310_s17, %s2306_s16 }
   0xd   : > { %s2653_s24 = smov (%p30_p0, %s29_s24), 0  ;;  %s2655_s25 = smov (!%p30_p0, %s32_s25), %s2326_s21 }
   0xe   : > { %2635 = sst [smem:[#allocation11_spill]] %s2653_s24  ;;  %s62_s27 = ssub.s32 %s2322_s20, %s2653_s24 }
   0xf   : > { %p73_p2 = scmp.eq.s32.totalorder %s2330_s22, 0  ;;  %p34_p3 = scmp.ge.s32.totalorder %s2655_s25, 2 }
  0x10   : > { %p63_p4 = scmp.eq.s32.totalorder %s62_s27, 0  ;;  %p78_p6 = scmp.ne.s32.totalorder %s2306_s16, %s2302_s15 }
  0x11   : > { %p74_p5 = por %p73_p2, %p72_p1  ;;  %s2657_s25 = smov (%p34_p3, %s2655_s25), 0 }
  0x12   : > { %2636 = sst [smem:[#allocation12_spill]] %s2657_s25  ;;  %p79_p7 = scmp.eq.s32.totalorder %s2628_s23, 0 }
  0x13   : > { %s2414_s28 = scalar_select %p63_p4, %s2310_s17, %s65_s26  }
  0x14   : > { %p2100_p8 = scmp.lt.s32.totalorder %s2330_s22, 8  ;;  %s2420_s29 = sand.u32 1, %s2310_s17  }
  0x15   : > { %2637 = sst [smem:[#allocation13_spill]] %s2414_s28  ;;  %p2422_p9 = por %p79_p7, %p78_p6 }
  0x16   : > { %s2082_s5 = smul.u32 768, %s2420_s29  ;;  %p2427_p10 = pnand %p2100_p8, %p74_p5 }
  0x17   : > { %s211_s7 = sand.u32 1, %s2330_s22   ;;  %s2640_s2 = sld [smem:[#allocation14_spill]] }
  0x18   : > { %s214_s12 = scalar_lea.vmem [#allocation4], %s2420_s29  ;;  %s212_s14 = scalar_lea.sflag [#allocation5], %s211_s7 }
  0x19   : > { %s221_s13 = sshll.u32 %s214_s12, 4  ;;  %p1467_p11 = scmp.ge.s32.totalorder %s2330_s22, 1  ;;  %s222_s13 = int_to_ptr.vmem [resolvable:$true] %s221_s13 }
  0x1a   : > { %p243_p12 = scmp.lt.s32.totalorder %s2330_s22, 9  ;;  %s1466_s26 = sshll.u32 %s2322_s20, 2 }
  0x1b   : > { %s198_s9 = scalar_lea.hbm %s2624_s1, %s1466_s26  ;;  %s2333_s23 = smov 64  }
  0x1c   : > { %p2441_p13 = pnand %p1467_p11, %p243_p12  ;;  %s199_s7 = sshll.u32 %s198_s9, 4  ;;  %s200_s7 = int_to_ptr.hbm [resolvable:$true] %s199_s7 }
  0x1d   : > { %s217_s10 = scalar_lea.hbm %s2640_s2, %s2322_s20  ;;  %s2334_s2 = smov 4  }
  0x1e   : > { %s219_s11 = sshll.u32 %s217_s10, 4  ;;  %s194_s10 = scalar_lea.vmem [#allocation2], %s2082_s5  ;;  %s220_s11 = int_to_ptr.hbm [resolvable:$true] %s219_s11 }
  0x1f   : > { %2096 = dma.hbm_to_vmem [thread:$0]  (!%p2427_p10), %s220_s11, 16, %s222_s13, %s212_s14  }
  0x20   : > { %s201_s12 = sshll.u32 %s194_s10, 4  ;;  %s191_s11 = scalar_lea.sflag [#allocation3], %s2420_s29  ;;  %s202_s12 = int_to_ptr.vmem [resolvable:$true] %s201_s12 }
  0x21   : > { %s2332_s13 = smov 256   ;;  %s234_s21 = scalar_lea.hbm %s2626_s3, %s2322_s20 }
  0x22   : > { %2093 = dma.hbm_to_vmem [thread:$0]  (!%p2427_p10), %s200_s7, 12288, %s202_s12, %s191_s11, %s2332_s13, %s2333_s23, %s2334_s2  }
  0x23   : > { %s236_s28 = sshll.u32 %s234_s21, 4  ;;  %s231_s17 = scalar_lea.vmem [#allocation6], %s2420_s29  ;;  %s237_s28 = int_to_ptr.hbm [resolvable:$true] %s236_s28 }
  0x24   : > { %s238_s27 = sshll.u32 %s231_s17, 4  ;;  %247 = sbr.rel (%p2441_p13) target bundleno = 292 (0x124), region = 36  ;;  %s239_s27 = int_to_ptr.vmem [resolvable:$true] %s238_s27 }
  0x25   : > { %2099 = dma.hbm_to_vmem [thread:$0]  (!%p2427_p10), %s237_s28, 16, %s239_s27, %s212_s14  }
  0x26   : > { %s2462_s5 = sand.u32 (!%p2441_p13), 1, %s2306_s16  }
  0x27   : > { %s2083_s2 = smul.u32 (!%p2441_p13), 768, %s2462_s5  ;;  %s250_s23 = scalar_lea.sflag (!%p2441_p13), [#allocation3], %s2462_s5 }
  0x29   : > { %s2466_s24 = scalar_lea.vmem [#allocation2], %s2083_s2 }
  0x2a   : > { %2293 = dma.done.wait (%p2422_p9), %s250_s23, 12288  }
  0x2b   : > { %2295 = vsyncadd (%p2422_p9), %s250_s23, 4294955008  ;;  %s2642_s17 = sadd.s32 4294967295, %s2330_s22   ;;  %s262_s28 = scalar_lea.vmem [#allocation4], %s2462_s5 }
  0x2c   : > { %s259_s21 = sand.u32 1, %s2642_s17  }
  0x2d   : > { %s260_s25 = scalar_lea.sflag [#allocation5], %s259_s21 }
  0x2e   : > { %2297 = dma.done.wait (%p2422_p9), %s260_s25, 32  }
  0x2f   : > { %2299 = vsyncadd (%p2422_p9), %s260_s25, 4294967264  ;;  %v2025_v0 = vld [vmem:[%s2466_s24 + $0x138] sm:$0xff]  ;;  %v2024_v4 = vld [vmem:[%s2466_s24 + $0x130] sm:$0xff]  ;;  %p312_p0 = scmp.lt.s32.totalorder %s2318_s19, 1  ;;  %s271_s15 = scalar_lea.vmem [#allocation6], %s2462_s5 }
  0x30   : > { %v2033_v1 = vld [vmem:[%s2466_s24 + $0x178] sm:$0xff]  ;;  %681 = vmatpush.bf16.msra.mxu0 %v2025_v0  ;;  %v2032_v5 = vld [vmem:[%s2466_s24 + $0x170] sm:$0xff]  ;;  %v2023_v8 = vld [vmem:[%s2466_s24 + $0x128] sm:$0xff]  ;;  %p319_p1 = scmp.lt.s32.totalorder %s2314_s18, 3 }
  0x31   : > { %v2041_v2 = vld [vmem:[%s2466_s24 + $0x1b8] sm:$0xff]  ;;  %694 = vmatpush.bf16.msra.mxu1 %v2033_v1  ;;  %v2040_v6 = vld [vmem:[%s2466_s24 + $0x1b0] sm:$0xff]  ;;  %v2031_v9 = vld [vmem:[%s2466_s24 + $0x168] sm:$0xff]  ;;  %s2659_s19 = smov (!%p312_p0, %s2318_s19), 1 }
  0x32   : > { %v2049_v3 = vld [vmem:[%s2466_s24 + $0x1f8] sm:$0xff]  ;;  %707 = vmatpush.bf16.msra.mxu2 %v2041_v2  ;;  %v2048_v7 = vld [vmem:[%s2466_s24 + $0x1f0] sm:$0xff]  ;;  %v2039_v10 = vld [vmem:[%s2466_s24 + $0x1a8] sm:$0xff]  ;;  %s1985_s29 = sshll.u32 %s2659_s19, 3  ;;  %s2661_s18 = smov (!%p319_p1, %s2314_s18), 3 }
  0x33   : > { %720 = vmatpush.bf16.msra.mxu3 %v2049_v3  ;;  %v2047_v11 = vld [vmem:[%s2466_s24 + $0x1e8] sm:$0xff]  ;;  %v2022_v12 = vld [vmem:[%s2466_s24 + $0x120] sm:$0xff]  ;;  %v2021_v16 = vld [vmem:[%s2466_s24 + $0x118] sm:$0xff]  ;;  %s2505_s14 = scalar_lea.vmem %s2623_s0, %s1985_s29  ;;  %s1470_s26 = sshll.u32 %s2659_s19, 2 }
  0x34   : > { %682 = vmatpush.bf16.msra.mxu0 %v2024_v4  ;;  %v2030_v13 = vld [vmem:[%s2466_s24 + $0x160] sm:$0xff]  ;;  %v2029_v17 = vld [vmem:[%s2466_s24 + $0x158] sm:$0xff]  ;;  %v2020_v21 = vld [vmem:[%s2466_s24 + $0x110] sm:$0xff]  ;;  %s322_s8 = sadd.s32 %s1470_s26, %s2661_s18 }
  0x35   : > { %695 = vmatpush.bf16.msra.mxu1 %v2032_v5  ;;  %v2038_v14 = vld [vmem:[%s2466_s24 + $0x1a0] sm:$0xff]  ;;  %v2037_v18 = vld [vmem:[%s2466_s24 + $0x198] sm:$0xff]  ;;  %v2028_v22 = vld [vmem:[%s2466_s24 + $0x150] sm:$0xff]  ;;  %s323_s12 = scalar_lea.vmem %s2627_s4, %s322_s8 }
  0x36   : > { %708 = vmatpush.bf16.msra.mxu2 %v2040_v6  ;;  %v2046_v15 = vld [vmem:[%s2466_s24 + $0x1e0] sm:$0xff]  ;;  %v2045_v19 = vld [vmem:[%s2466_s24 + $0x1d8] sm:$0xff]  ;;  %v2036_v23 = vld [vmem:[%s2466_s24 + $0x190] sm:$0xff] }
  0x37   : > { %721 = vmatpush.bf16.msra.mxu3 %v2048_v7  ;;  %v389_v20 = vld [vmem:[%s2505_s14] sm:$0xff]  ;;  %v2044_v24 = vld [vmem:[%s2466_s24 + $0x1d0] sm:$0xff]  ;;  %v2019_v25 = vld [vmem:[%s2466_s24 + $0x108] sm:$0xff] }
  0x38   : > { %683 = vmatpush.bf16.msra.mxu0 %v2023_v8  ;;  %456 = vst [vmem:[#allocation1] ss:$4 sm:$0xff] %v389_v20  ;;  %v2027_v26 = vld [vmem:[%s2466_s24 + $0x148] sm:$0xff]  ;;  %v2018_v29 = vld [vmem:[%s2466_s24 + $0x100] sm:$0xff]  ;;  %v324_v31 = vld [vmem:[%s2505_s14] sm:$0x55] }
  0x39   : > { %696 = vmatpush.bf16.msra.mxu1 %v2031_v9  ;;  %v2035_v27 = vld [vmem:[%s2466_s24 + $0x188] sm:$0xff]  ;;  %v2026_v30 = vld [vmem:[%s2466_s24 + $0x140] sm:$0xff]  ;;  %v1993_v36 = vld [vmem:[%s2466_s24 + $0x38] sm:$0xff] }
  0x3a   : > { %709 = vmatpush.bf16.msra.mxu2 %v2039_v10  ;;  %v2043_v28 = vld [vmem:[%s2466_s24 + $0x1c8] sm:$0xff]  ;;  %v2034_v32 = vld [vmem:[%s2466_s24 + $0x180] sm:$0xff]  ;;  %v2001_v37 = vld [vmem:[%s2466_s24 + $0x78] sm:$0xff] }
  0x3b   : > { %722 = vmatpush.bf16.msra.mxu3 %v2047_v11  ;;  %v2042_v33 = vld [vmem:[%s2466_s24 + $0x1c0] sm:$0xff]  ;;  %v2009_v48 = vld [vmem:[%s2466_s24 + $0xb8] sm:$0xff]  ;;  %v1992_v56 = vld [vmem:[%s2466_s24 + $0x30] sm:$0xff] }
  0x3c   : > { %684 = vmatpush.bf16.msra.mxu0 %v2022_v12  ;;  %v2017_v49 = vld [vmem:[%s2466_s24 + $0xf8] sm:$0xff]  ;;  %v2000_v57 = vld [vmem:[%s2466_s24 + $0x70] sm:$0xff]  ;;  %v1991_v62 = vld [vmem:[%s2466_s24 + $0x28] sm:$0xff] }
  0x3d   : > { %697 = vmatpush.bf16.msra.mxu1 %v2030_v13  ;;  %v2008_v59 = vld [vmem:[%s2466_s24 + $0xb0] sm:$0xff]  ;;  %v1999_v63 = vld [vmem:[%s2466_s24 + $0x68] sm:$0xff]  ;;  %v1990_v2 = vld [vmem:[%s2466_s24 + $0x20] sm:$0xff] }
  0x3e   : > { %710 = vmatpush.bf16.msra.mxu2 %v2038_v14  ;;  %v2016_v60 = vld [vmem:[%s2466_s24 + $0xf0] sm:$0xff]  ;;  %v2007_v0 = vld [vmem:[%s2466_s24 + $0xa8] sm:$0xff]  ;;  %v1998_v3 = vld [vmem:[%s2466_s24 + $0x60] sm:$0xff] }
  0x3f   : > { %723 = vmatpush.bf16.msra.mxu3 %v2046_v15  ;;  %v459_v34 = vld.sshfl [vmem:[#allocation1 + $0x10] sm:$0xff pattern:$0x73625140]  ;;  %v457_v35 = vld.sshfl [vmem:[#allocation1] sm:$0xff pattern:$0x73625140] }
  0x40   : > { %685 = vmatpush.bf16.msra.mxu0 %v2021_v16  ;;  %v473_v38 = vshrl.u32 %v459_v34, 16  ;;  %v475_v39 = vshll.u32 %v459_v34, 16  ;;  %v461_v40 = vshrl.u32 %v457_v35, 16  ;;  %v463_v41 = vshll.u32 %v457_v35, 16  ;;  %v2015_v1 = vld [vmem:[%s2466_s24 + $0xe8] sm:$0xff]  ;;  %v2006_v9 = vld [vmem:[%s2466_s24 + $0xa0] sm:$0xff] }
  0x41   : > { %698 = vmatpush.bf16.msra.mxu1 %v2029_v17  ;;  %v460_v42 = vld.sshfl [vmem:[#allocation1 + $0x18] sm:$0xff pattern:$0x73625140]  ;;  %v458_v43 = vld.sshfl [vmem:[#allocation1 + $0x8] sm:$0xff pattern:$0x73625140] }
  0x42   : > { %711 = vmatpush.bf16.msra.mxu2 %v2037_v18  ;;  %v477_v44 = vrot.slane %v475_v39, 1  ;;  %v465_v45 = vrot.slane %v463_v41, 1  ;;  %v479_v46 = vshrl.u32 %v460_v42, 16  ;;  %v481_v47 = vshll.u32 %v460_v42, 16  ;;  %734 = vst [vmem:[#allocation1] ss:$4 sm:$0xff] %v324_v31 }
  0x43   : > { %724 = vmatpush.bf16.msra.mxu3 %v2045_v19  ;;  %v467_v50 = vshrl.u32 %v458_v43, 16  ;;  %v469_v51 = vshll.u32 %v458_v43, 16  ;;  %v987_v4 = vld [vmem:[%s2505_s14] sm:$0xaa]  ;;  %v2014_v10 = vld [vmem:[%s2466_s24 + $0xe0] sm:$0xff]  ;;  %v1988_v15 = vld [vmem:[%s2466_s24 + $0x10] sm:$0xff] }
  0x44   : > { %686 = vmatpush.bf16.msra.mxu0 %v2020_v21  ;;  %v478_v52 = vor.u32 %v477_v44, %v473_v38  ;;  %v466_v53 = vor.u32 %v465_v45, %v461_v40  ;;  %v483_v54 = vrot.slane %v481_v47, 1  ;;  %v1989_v11 = vld [vmem:[%s2466_s24 + $0x18] sm:$0xff]  ;;  %v1996_v16 = vld [vmem:[%s2466_s24 + $0x50] sm:$0xff]  ;;  %v1987_v19 = vld [vmem:[%s2466_s24 + $0x8] sm:$0xff] }
  0x45   : > { %699 = vmatpush.bf16.msra.mxu1 %v2028_v22  ;;  %v471_v55 = vrot.slane %v469_v51, 1  ;;  %v1997_v12 = vld [vmem:[%s2466_s24 + $0x58] sm:$0xff]  ;;  %v2004_v17 = vld [vmem:[%s2466_s24 + $0x90] sm:$0xff]  ;;  %v1995_v20 = vld [vmem:[%s2466_s24 + $0x48] sm:$0xff] }
  0x46   : > { %712 = vmatpush.bf16.msra.mxu2 %v2036_v23  ;;  %v484_v58 = vor.u32 %v483_v54, %v479_v46  ;;  %v2005_v13 = vld [vmem:[%s2466_s24 + $0x98] sm:$0xff]  ;;  %v2012_v18 = vld [vmem:[%s2466_s24 + $0xd0] sm:$0xff]  ;;  %v2003_v21 = vld [vmem:[%s2466_s24 + $0x88] sm:$0xff] }
  0x47   : > { %725 = vmatpush.bf16.msra.mxu3 %v2044_v24  ;;  %v472_v61 = vor.u32 %v471_v55, %v467_v50  ;;  %v2013_v14 = vld [vmem:[%s2466_s24 + $0xd8] sm:$0xff]  ;;  %v2011_v22 = vld [vmem:[%s2466_s24 + $0xc8] sm:$0xff]  ;;  %v1986_v23 = vld [vmem:[%s2466_s24] sm:$0xff] }
  0x48   : > { %687 = vmatpush.bf16.msra.mxu0 %v2019_v25  ;;  %v1994_v24 = vld [vmem:[%s2466_s24 + $0x40] sm:$0xff]  ;;  %v2056_v31 = vld [vmem:[%s2466_s24 + $0x230] sm:$0xff]  ;;  %v2055_v35 = vld [vmem:[%s2466_s24 + $0x228] sm:$0xff] }
  0x49   : > { %700 = vmatpush.bf16.msra.mxu1 %v2027_v26  ;;  %v737_v5 = vld.sshfl [vmem:[#allocation1 + $0x10] sm:$0xff pattern:$0x73625140]  ;;  %v735_v6 = vld.sshfl [vmem:[#allocation1] sm:$0xff pattern:$0x73625140] }
  0x4a   : > { %713 = vmatpush.bf16.msra.mxu2 %v2035_v27  ;;  %v738_v7 = vld.sshfl [vmem:[#allocation1 + $0x18] sm:$0xff pattern:$0x73625140]  ;;  %v736_v8 = vld.sshfl [vmem:[#allocation1 + $0x8] sm:$0xff pattern:$0x73625140] }
  0x4b   : > { %726 = vmatpush.bf16.msra.mxu3 %v2043_v28  ;;  %1054 = vst [vmem:[#allocation1] ss:$4 sm:$0xff] %v987_v4  ;;  %v2002_v25 = vld [vmem:[%s2466_s24 + $0x80] sm:$0xff]  ;;  %v2057_v27 = vld [vmem:[%s2466_s24 + $0x238] sm:$0xff]  ;;  %v2080_v34 = vld [vmem:[%s2466_s24 + $0x2f0] sm:$0xff] }
  0x4c   : > { %688 = vmatpush.bf16.msra.mxu0 %v2018_v29  ;;  %v2010_v26 = vld [vmem:[%s2466_s24 + $0xc0] sm:$0xff]  ;;  %v2065_v28 = vld [vmem:[%s2466_s24 + $0x278] sm:$0xff]  ;;  %v2079_v38 = vld [vmem:[%s2466_s24 + $0x2e8] sm:$0xff] }
  0x4d   : > { %701 = vmatpush.bf16.msra.mxu1 %v2026_v30  ;;  %v2073_v29 = vld [vmem:[%s2466_s24 + $0x2b8] sm:$0xff]  ;;  %v2054_v39 = vld [vmem:[%s2466_s24 + $0x220] sm:$0xff]  ;;  %v2052_v47 = vld [vmem:[%s2466_s24 + $0x210] sm:$0xff] }
  0x4e   : > { %714 = vmatpush.bf16.msra.mxu2 %v2034_v32  ;;  %v2081_v30 = vld [vmem:[%s2466_s24 + $0x2f8] sm:$0xff]  ;;  %v2064_v32 = vld [vmem:[%s2466_s24 + $0x270] sm:$0xff]  ;;  %v2062_v40 = vld [vmem:[%s2466_s24 + $0x260] sm:$0xff] }
  0x4f   : > { %727 = vmatpush.bf16.msra.mxu3 %v2042_v33  ;;  %689 = vmatmul.bf16.vlgmr.msra.gmra.mxu0 %v466_v53  ;;  %v2072_v33 = vld [vmem:[%s2466_s24 + $0x2b0] sm:$0xff]  ;;  %v2070_v41 = vld [vmem:[%s2466_s24 + $0x2a0] sm:$0xff]  ;;  %v2053_v43 = vld [vmem:[%s2466_s24 + $0x218] sm:$0xff] }
  0x50   : > { %935 = vmatpush.bf16.msrb.mxu0 %v1993_v36  ;;  %702 = vmatmul.bf16.vlgmr.msra.gmra.mxu1 %v472_v61  ;;  %v2063_v36 = vld [vmem:[%s2466_s24 + $0x268] sm:$0xff]  ;;  %v2078_v42 = vld [vmem:[%s2466_s24 + $0x2e0] sm:$0xff]  ;;  %v2061_v44 = vld [vmem:[%s2466_s24 + $0x258] sm:$0xff] }
  0x51   : > { %948 = vmatpush.bf16.msrb.mxu1 %v2001_v37  ;;  %715 = vmatmul.bf16.vlgmr.msra.gmra.mxu2 %v478_v52  ;;  %v2071_v37 = vld [vmem:[%s2466_s24 + $0x2a8] sm:$0xff]  ;;  %v2069_v45 = vld [vmem:[%s2466_s24 + $0x298] sm:$0xff]  ;;  %v2076_v50 = vld [vmem:[%s2466_s24 + $0x2d0] sm:$0xff] }
  0x52   : > { %961 = vmatpush.bf16.msrb.mxu2 %v2009_v48  ;;  %728 = vmatmul.bf16.vlgmr.msra.gmra.mxu3 %v484_v58  ;;  %v2077_v46 = vld [vmem:[%s2466_s24 + $0x2d8] sm:$0xff]  ;;  %v2060_v48 = vld [vmem:[%s2466_s24 + $0x250] sm:$0xff]  ;;  %v2051_v51 = vld [vmem:[%s2466_s24 + $0x208] sm:$0xff] }
  0x53   : > { %974 = vmatpush.bf16.msrb.mxu3 %v2017_v49  ;;  %v2068_v49 = vld [vmem:[%s2466_s24 + $0x290] sm:$0xff]  ;;  %v2059_v52 = vld [vmem:[%s2466_s24 + $0x248] sm:$0xff]  ;;  %v2050_v55 = vld [vmem:[%s2466_s24 + $0x200] sm:$0xff] }
  0x54   : > { %936 = vmatpush.bf16.msrb.mxu0 %v1992_v56  ;;  %v2067_v53 = vld [vmem:[%s2466_s24 + $0x288] sm:$0xff]  ;;  %v2058_v56 = vld [vmem:[%s2466_s24 + $0x240] sm:$0xff] }
  0x55   : > { %949 = vmatpush.bf16.msrb.mxu1 %v2000_v57  ;;  %v2075_v54 = vld [vmem:[%s2466_s24 + $0x2c8] sm:$0xff]  ;;  %v2066_v57 = vld [vmem:[%s2466_s24 + $0x280] sm:$0xff] }
  0x56   : > { %962 = vmatpush.bf16.msrb.mxu2 %v2008_v59  ;;  %v2074_v58 = vld [vmem:[%s2466_s24 + $0x2c0] sm:$0xff]  ;;  %v1055_v59 = vld.sshfl [vmem:[#allocation1] sm:$0xff pattern:$0x73625140] }
  0x57   : > { %975 = vmatpush.bf16.msrb.mxu3 %v2016_v60  ;;  %v1057_v60 = vld.sshfl [vmem:[#allocation1 + $0x8] sm:$0xff pattern:$0x73625140]  ;;  %v1059_v61 = vld.sshfl [vmem:[#allocation1 + $0x10] sm:$0xff pattern:$0x73625140] }
  0x58   : > { %937 = vmatpush.bf16.msrb.mxu0 %v1991_v62  ;;  %v1061_v62 = vld.sshfl [vmem:[#allocation1 + $0x18] sm:$0xff pattern:$0x73625140] }
  0x59   : > { %950 = vmatpush.bf16.msrb.mxu1 %v1999_v63  ;;  %v1063_v63 = vrot.slane %v1055_v59, 1 }
  0x5a   : > { %963 = vmatpush.bf16.msrb.mxu2 %v2007_v0  ;;  %v1064_v0 = vrot.slane %v1057_v60, 1 }
  0x5b   : > { %976 = vmatpush.bf16.msrb.mxu3 %v2015_v1  ;;  %v1065_v1 = vrot.slane %v1059_v61, 1 }
  0x5c   : > { %938 = vmatpush.bf16.msrb.mxu0 %v1990_v2  ;;  %v1066_v2 = vrot.slane %v1061_v62, 1 }
  0x5d   : > { %951 = vmatpush.bf16.msrb.mxu1 %v1998_v3 }
  0x5e   : > { %964 = vmatpush.bf16.msrb.mxu2 %v2006_v9 }
  0x5f   : > { %977 = vmatpush.bf16.msrb.mxu3 %v2014_v10 }
  0x60   : > { %939 = vmatpush.bf16.msrb.mxu0 %v1989_v11 }
  0x61   : > { %952 = vmatpush.bf16.msrb.mxu1 %v1997_v12 }
  0x62   : > { %965 = vmatpush.bf16.msrb.mxu2 %v2005_v13 }
  0x63   : > { %978 = vmatpush.bf16.msrb.mxu3 %v2013_v14 }
  0x64   : > { %940 = vmatpush.bf16.msrb.mxu0 %v1988_v15 }
  0x65   : > { %953 = vmatpush.bf16.msrb.mxu1 %v1996_v16 }
  0x66   : > { %966 = vmatpush.bf16.msrb.mxu2 %v2004_v17 }
  0x67   : > { %979 = vmatpush.bf16.msrb.mxu3 %v2012_v18 }
  0x68   : > { %941 = vmatpush.bf16.msrb.mxu0 %v1987_v19 }
  0x69   : > { %954 = vmatpush.bf16.msrb.mxu1 %v1995_v20 }
  0x6a   : > { %967 = vmatpush.bf16.msrb.mxu2 %v2003_v21 }
  0x6b   : > { %980 = vmatpush.bf16.msrb.mxu3 %v2011_v22 }
  0x6c   : > { %942 = vmatpush.bf16.msrb.mxu0 %v1986_v23 }
  0x6d   : > { %955 = vmatpush.bf16.msrb.mxu1 %v1994_v24 }
  0x6e   : > { %968 = vmatpush.bf16.msrb.mxu2 %v2002_v25 }
  0x6f   : > { %981 = vmatpush.bf16.msrb.mxu3 %v2010_v26  ;;  %943 = vmatmul.bf16.vlgmr.msrb.gmra.mxu0 %v735_v6 }
  0x70   : > { %1263 = vmatpush.bf16.msra.mxu0 %v2057_v27  ;;  %956 = vmatmul.bf16.vlgmr.msrb.gmra.mxu1 %v736_v8 }
  0x71   : > { %1276 = vmatpush.bf16.msra.mxu1 %v2065_v28  ;;  %969 = vmatmul.bf16.vlgmr.msrb.gmra.mxu2 %v737_v5 }
  0x72   : > { %1289 = vmatpush.bf16.msra.mxu2 %v2073_v29  ;;  %982 = vmatmul.bf16.vlgmr.msrb.gmra.mxu3 %v738_v7 }
  0x73   : > { %1302 = vmatpush.bf16.msra.mxu3 %v2081_v30 }
  0x74   : > { %1264 = vmatpush.bf16.msra.mxu0 %v2056_v31 }
  0x75   : > { %1277 = vmatpush.bf16.msra.mxu1 %v2064_v32 }
  0x76   : > { %1290 = vmatpush.bf16.msra.mxu2 %v2072_v33 }
  0x77   : > { %1303 = vmatpush.bf16.msra.mxu3 %v2080_v34 }
  0x78   : > { %1265 = vmatpush.bf16.msra.mxu0 %v2055_v35  ;;  %v2168_v35 = vld [vmem:[%s262_s28] ss:$0 sm:$0xff] }
  0x79   : > { %1278 = vmatpush.bf16.msra.mxu1 %v2063_v36 }
  0x7a   : > { %1291 = vmatpush.bf16.msra.mxu2 %v2071_v37  ;;  %v2169_v37 = vld [vmem:[%s271_s15] ss:$0 sm:$0xff] }
  0x7b   : > { %1304 = vmatpush.bf16.msra.mxu3 %v2079_v38 }
  0x7c   : > { %1266 = vmatpush.bf16.msra.mxu0 %v2054_v39 }
  0x7d   : > { %1279 = vmatpush.bf16.msra.mxu1 %v2062_v40 }
  0x7e   : > { %1292 = vmatpush.bf16.msra.mxu2 %v2070_v41 }
  0x7f   : > { %1305 = vmatpush.bf16.msra.mxu3 %v2078_v42 }
  0x80   : > { %1267 = vmatpush.bf16.msra.mxu0 %v2053_v43 }
  0x81   : > { %1280 = vmatpush.bf16.msra.mxu1 %v2061_v44 }
  0x82   : > { %1293 = vmatpush.bf16.msra.mxu2 %v2069_v45 }
  0x83   : > { %1306 = vmatpush.bf16.msra.mxu3 %v2077_v46 }
  0x84   : > { %1268 = vmatpush.bf16.msra.mxu0 %v2052_v47 }
  0x85   : > { %1281 = vmatpush.bf16.msra.mxu1 %v2060_v48 }
  0x86   : > { %1294 = vmatpush.bf16.msra.mxu2 %v2068_v49 }
  0x87   : > { %1307 = vmatpush.bf16.msra.mxu3 %v2076_v50 }
  0x88   : > { %1269 = vmatpush.bf16.msra.mxu0 %v2051_v51 }
  0x89   : > { %1282 = vmatpush.bf16.msra.mxu1 %v2059_v52 }
  0x8a   : > { %1295 = vmatpush.bf16.msra.mxu2 %v2067_v53 }
  0x8b   : > { %1308 = vmatpush.bf16.msra.mxu3 %v2075_v54 }
  0x8c   : > { %1270 = vmatpush.bf16.msra.mxu0 %v2050_v55 }
  0x8d   : > { %1283 = vmatpush.bf16.msra.mxu1 %v2058_v56 }
  0x8e   : > { %1296 = vmatpush.bf16.msra.mxu2 %v2066_v57 }
  0x8f   : > { %1309 = vmatpush.bf16.msra.mxu3 %v2074_v58  ;;  %1271 = vmatmul.bf16.vlgmr.msra.gmra.mxu0 %v1063_v63 }
  0x90   : > { %1284 = vmatmul.bf16.vlgmr.msra.gmra.mxu1 %v1064_v0 }
  0x91   : > { %1297 = vmatmul.bf16.vlgmr.msra.gmra.mxu2 %v1065_v1 }
  0x92   : > { %1310 = vmatmul.bf16.vlgmr.msra.gmra.mxu3 %v1066_v2 }
  0xcc   : > { %v690_v3 = vpop.f32.mrf.mxu0 }
  0xcd   : > { %v703_v4 = vpop.f32.mrf.mxu1 }
  0xce   : > { %v704_v18 = vadd.f32 %v703_v4, %v690_v3 }
  0xd4   : > { %v716_v5 = vpop.f32.mrf.mxu2  ;;  %v692_v7 = vpop.f32.mrf.mxu0 }
  0xd5   : > { %v729_v6 = vpop.f32.mrf.mxu3  ;;  %v705_v8 = vpop.f32.mrf.mxu1  ;;  %v717_v20 = vadd.f32 %v716_v5, %v704_v18 }
  0xd7   : > { %v730_v21 = vadd.f32 %v729_v6, %v717_v20 }
  0xdc   : > { %v718_v9 = vpop.f32.mrf.mxu2 }
  0xdd   : > { %v731_v10 = vpop.f32.mrf.mxu3 }
  0xec   : > { %v944_v11 = vpop.f32.mrf.mxu0 }
  0xed   : > { %v957_v12 = vpop.f32.mrf.mxu1  ;;  %v945_v22 = vadd.f32 %v944_v11, %v730_v21 }
  0xef   : > { %v958_v25 = vadd.f32 %v957_v12, %v945_v22 }
  0xf4   : > { %v970_v13 = vpop.f32.mrf.mxu2  ;;  %v946_v15 = vpop.f32.mrf.mxu0 }
  0xf5   : > { %v983_v14 = vpop.f32.mrf.mxu3  ;;  %v959_v16 = vpop.f32.mrf.mxu1  ;;  %v971_v27 = vadd.f32 %v970_v13, %v958_v25 }
  0xf7   : > { %v984_v33 = vadd.f32 %v983_v14, %v971_v27 }
  0xfc   : > { %v972_v17 = vpop.f32.mrf.mxu2 }
  0xfd   : > { %v985_v19 = vpop.f32.mrf.mxu3 }
 0x10c   : > { %v1272_v23 = vpop.f32.mrf.mxu0 }
 0x10d   : > { %v1285_v24 = vpop.f32.mrf.mxu1 }
 0x10e   : > { %v1286_v26 = vadd.f32 %v1285_v24, %v1272_v23 }
 0x114   : > { %v1298_v28 = vpop.f32.mrf.mxu2  ;;  %v1274_v31 = vpop.f32.mrf.mxu0 }
 0x115   : > { %v1311_v29 = vpop.f32.mrf.mxu3  ;;  %v1299_v30 = vadd.f32 %v1298_v28, %v1286_v26  ;;  %v1287_v32 = vpop.f32.mrf.mxu1 }
 0x117   : > { %v1312_v34 = vadd.f32 %v1311_v29, %v1299_v30 }
 0x119   : > { %v1315_v36 = vadd.f32 %v1312_v34, %v984_v33 }
 0x11b   : > { %v1320_v38 = vmul.f32 %v2168_v35, %v1315_v36 }
 0x11c   : > { %v1300_v39 = vpop.f32.mrf.mxu2 }
 0x11d   : > { %v1313_v40 = vpop.f32.mrf.mxu3  ;;  %v1325_v41 = vadd.f32 %v2169_v37, %v1320_v38 }
 0x11f   : > { %v1326_v42 = vmax.f32 %v1325_v41, 0.0 }
 0x121   : > { %v1327_v43 = vpack.c.bf16 %v1326_v42, %v1326_v42 }
 0x123   : > { %1328 = vst [vmem:[%s323_s12] sm:$0x1] %v1327_v43 }
 0x124 PF: > { %s20_s22 = sadd.s32 1, %s2330_s22   ;;  %s2643_s7 = sld [smem:[#allocation9_spill]] }
 0x125   : > { %p17_p2 = scmp.ge.s32.totalorder %s20_s22, 10   ;;  %s2644_s17 = sld [smem:[#allocation13_spill]] }
 0x126   : > { %s2645_s19 = sld [smem:[#allocation10_spill]]  ;;  %s2648_s15 = smov %s2306_s16 }
 0x127   : > { %s2646_s11 = sld [smem:[#allocation11_spill]]  ;;  %s2650_s18 = smov %s2322_s20 }
 0x128   : > { %s2647_s21 = sld [smem:[#allocation12_spill]] }
 0x129   :  { %19 = sbr.rel (!%p17_p2) target bundleno = 9 (0x9), region = 105 }
 0x12a   : > { %s2649_s16 = smov %s2643_s7 }
 0x12d   : > { %s2651_s20 = smov %s2646_s11 }
 0x12e   :  { %1354 = vsyncpa [#allocation3], 1 }
 0x12f   :  { %1356 = vsyncpa [#allocation3 + $0x1], 1 }
 0x130   :  { %1357 = vsyncpa [#allocation5], 1 }
 0x131   :  { %1359 = vsyncpa [#allocation5 + $0x1], 1 }

</bundles_post_ra>
